<compile_context>
chip_gen: v7x
topology: tpu7x:2x2x1
jax: 0.10.0
libtpu: 0.0.40
codegen_flags: <defaults>
</compile_context>

<pallas_src>
import jax
import jax.numpy as jnp
import numpy as np
from jax.experimental import pallas as pl
from jax.experimental.pallas import tpu as pltpu

# Geometry fixed by the PyTorch module (lin1 expects 9*9*64 inputs).
H = W = 9              # spatial size of every activation
SP = 16                # padded row stride (12 padded cols -> 16 for alignment)
GRID_R = H * SP        # 144 output rows computed per layer (only cols < 9 valid)
NROW = 12 * SP         # 192 buffer rows (12 padded image rows * stride 16)
PAD_BASE = SP          # activation (padded row 1, col 0) lands at flat row 16
KSIZE = 4
NUM_CLASSES = 2
LIN2_PAD = 128         # lane-pad lin2's tiny output to a full 128-lane block


# ----------------------------------------------------------------------------
# Kernel 1: fused conv stack (one batch element per grid step)
# ----------------------------------------------------------------------------
def _conv_stack_kernel(x_ref, w1_ref, b1_ref, w2_ref, b2_ref, w3_ref, b3_ref,
                       w4_ref, b4_ref, out_ref,
                       stage_ref, buf2_ref, buf3_ref, buf4_ref):
    rows = jax.lax.broadcasted_iota(jnp.int32, (GRID_R, 1), 0)
    colmask = (rows % SP) < W          # valid 9 output columns of each 16-row block

    def handoff(y, dst_ref):
        """Write relu'd activation y (144, c) as the next layer's zero-padded,
        kw-concatenated bf16 input: dst[r, kw*c:(kw+1)*c] = padded_act[r + kw]."""
        c = y.shape[-1]
        ym = jnp.where(colmask, y, 0.0)
        # Stage the padded activation once (f32, aligned rows), then read back
        # the 4 kw-shifted views (3 of them sublane-misaligned f32 reads).
        stage_ref[pl.ds(0, 16), :c] = jnp.zeros((16, c), jnp.float32)
        stage_ref[pl.ds(PAD_BASE, GRID_R), :c] = ym
        stage_ref[pl.ds(160, 32), :c] = jnp.zeros((32, c), jnp.float32)
        # Only the untouched edge rows of dst need zeroing (rest is overwritten).
        dst_ref[pl.ds(0, 16), :] = jnp.zeros((16, dst_ref.shape[1]), dst_ref.dtype)
        dst_ref[pl.ds(160, 32), :] = jnp.zeros((32, dst_ref.shape[1]), dst_ref.dtype)
        for kw in range(KSIZE):
            v = stage_ref[pl.ds(PAD_BASE - 1 + kw, GRID_R), :c]
            dst_ref[pl.ds(PAD_BASE, GRID_R), kw * c:(kw + 1) * c] = v.astype(dst_ref.dtype)

    def conv_relu(src_ref, w_ref, b_ref):
        # src: (192, 4*c_in) bf16 kw-concat buffer; w: (4, 4*c_in, c_out).
        # One aligned read + one matmul per kh -> 4 matmuls with K = 4*c_in.
        c_out = w_ref.shape[-1]
        acc = jnp.zeros((GRID_R, c_out), jnp.float32)
        for kh in range(KSIZE):
            acc += jnp.dot(src_ref[pl.ds(kh * SP, GRID_R), :], w_ref[kh],
                           preferred_element_type=jnp.float32)
        return jnp.maximum(acc + b_ref[...], 0.0)

    # conv1: 16-tap im2col pre-built by the wrapper -> a single K=64 matmul.
    y1 = jnp.maximum(
        jnp.dot(x_ref[...], w1_ref[...], preferred_element_type=jnp.float32)
        + b1_ref[...], 0.0)
    handoff(y1, buf2_ref)
    handoff(conv_relu(buf2_ref, w2_ref, b2_ref), buf3_ref)
    handoff(conv_relu(buf3_ref, w3_ref, b3_ref), buf4_ref)
    # Single full-block bf16 store; wrapper discards the invalid 63 rows.
    out_ref[...] = conv_relu(buf4_ref, w4_ref, b4_ref).astype(out_ref.dtype)


def conv_stack(im1, kp):
    batch = im1.shape[0]
    cw = [kp[f"cw{l}"] for l in range(1, 5)]
    cb = [kp[f"cb{l}"] for l in range(1, 5)]
    c_final = cw[3].shape[-1]

    def const_spec(arr):
        return pl.BlockSpec(arr.shape, lambda i, _nd=arr.ndim: (0,) * _nd)

    in_specs = [pl.BlockSpec((None, GRID_R, im1.shape[-1]), lambda i: (i, 0, 0))]
    for w, b in zip(cw, cb):
        in_specs.append(const_spec(w))
        in_specs.append(const_spec(b))

    return pl.pallas_call(
        _conv_stack_kernel,
        out_shape=jax.ShapeDtypeStruct((batch, GRID_R, c_final), jnp.bfloat16),
        grid_spec=pltpu.PrefetchScalarGridSpec(
            num_scalar_prefetch=0,
            grid=(batch,),
            in_specs=in_specs,
            out_specs=pl.BlockSpec((None, GRID_R, c_final), lambda i: (i, 0, 0)),
            scratch_shapes=[
                pltpu.VMEM((NROW, 256), jnp.float32),        # f32 staging for handoff
                pltpu.VMEM((NROW, 4 * 64), jnp.bfloat16),    # conv2 input (kw-concat)
                pltpu.VMEM((NROW, 4 * 128), jnp.bfloat16),   # conv3 input
                pltpu.VMEM((NROW, 4 * 256), jnp.bfloat16),   # conv4 input
            ],
        ),
        compiler_params=pltpu.CompilerParams(
            dimension_semantics=("parallel",),
            vmem_limit_bytes=16 * 1024 * 1024,
        ),
    )(im1, cw[0], cb[0], cw[1], cb[1], cw[2], cb[2], cw[3], cb[3])


# ----------------------------------------------------------------------------
# Kernel 2: fused lin1 + lin2 (lin2 folded into the epilogue)
# Grid = (2 parallel halves of the 1024 lin1 columns, column tiles)  ->
# each half produces a partial (B, 128) result; wrapper sums the two halves.
# ----------------------------------------------------------------------------
def _lin_stack_kernel(x_ref, w1_ref, b1_ref, w2_ref, b2_ref, out_ref):
    p = pl.program_id(0)
    j = pl.program_id(1)
    h = jnp.dot(x_ref[...], w1_ref[...], preferred_element_type=jnp.float32)
    h = h + b1_ref[...]                                    # (B, tn) lin1 tile
    part = jnp.dot(h.astype(jnp.bfloat16), w2_ref[...],    # lin2 fold, bf16 MXU path
                   preferred_element_type=jnp.float32)

    @pl.when(j == 0)
    def _():
        out_ref[...] = jnp.broadcast_to(
            b2_ref[...] * (p == 0).astype(jnp.float32), out_ref.shape)

    out_ref[...] += part


def lin_stack(x_flat, kp, *, tn=256, n_par=2):
    B, K = x_flat.shape
    N1 = kp["w1"].shape[1]
    NP = kp["w2"].shape[1]
    assert N1 % (n_par * tn) == 0
    nj = N1 // (n_par * tn)
    return pl.pallas_call(
        _lin_stack_kernel,
        out_shape=jax.ShapeDtypeStruct((n_par, B, NP), jnp.float32),
        grid_spec=pltpu.PrefetchScalarGridSpec(
            num_scalar_prefetch=0,
            grid=(n_par, nj),
            in_specs=[
                pl.BlockSpec((B, K), lambda p, j: (0, 0)),
                pl.BlockSpec((K, tn), lambda p, j, _nj=nj: (0, p * _nj + j)),
                pl.BlockSpec((1, tn), lambda p, j, _nj=nj: (0, p * _nj + j)),
                pl.BlockSpec((tn, NP), lambda p, j, _nj=nj: (p * _nj + j, 0)),
                pl.BlockSpec((1, NP), lambda p, j: (0, 0)),
            ],
            out_specs=pl.BlockSpec((None, B, NP), lambda p, j: (p, 0, 0)),
        ),
        compiler_params=pltpu.CompilerParams(
            dimension_semantics=("parallel", "arbitrary"),
            vmem_limit_bytes=24 * 1024 * 1024,
        ),
    )(x_flat, kp["w1"], kp["b1"], kp["w2"], kp["b2"])


# ----------------------------------------------------------------------------
# Forward pass (wrapper glue is tiny: 12 KB im2col prep, one slice/reshape,
# one (2,B,128) add, final class slice)
# ----------------------------------------------------------------------------
def _prep_conv1_im2col(x_nchw):
    """Build conv1's full 16-tap im2col in (h, w-slot<16, kh*kw*ci) layout, bf16."""
    B, C = x_nchw.shape[0], x_nchw.shape[1]
    x = jnp.transpose(x_nchw, (0, 2, 3, 1))                       # NCHW -> NHWC (B,9,9,C)
    xp = jnp.pad(x, ((0, 0), (1, 2), (1, 2), (0, 0)))             # ZeroPad2d((1,2,1,2))
    taps = [xp[:, kh:kh + H, kw:kw + W, :]
            for kh in range(KSIZE) for kw in range(KSIZE)]
    im = jnp.concatenate(taps, axis=-1)                           # (B,9,9,16*C)
    im = jnp.pad(im, ((0, 0), (0, 0), (0, SP - W), (0, 0)))       # pad cols to stride 16
    return im.reshape(B, GRID_R, KSIZE * KSIZE * C).astype(jnp.bfloat16)


def classifier_forward(x_nchw, kp):
    B = x_nchw.shape[0]
    im1 = _prep_conv1_im2col(x_nchw)
    act = conv_stack(im1, kp)                                   # (B, 144, 64) bf16
    c4 = act.shape[-1]
    act = act.reshape(B, H, SP, c4)[:, :, :W, :]                # keep the 9 valid cols
    x_flat = act.reshape(B, H * W * c4)                         # (B, 5184) bf16, (h,w,c)
    parts = lin_stack(x_flat, kp)                               # (2, B, 128) f32
    return (parts[0] + parts[1])[:, :NUM_CLASSES]


# ----------------------------------------------------------------------------
# Params (torch layout, bf16 weights) + one-time kernel-layout preparation
# ----------------------------------------------------------------------------
def init_params(key, in_channels=4, num_classes=NUM_CLASSES):
    chans = [in_channels, 64, 128, 256, 64]
    keys = jax.random.split(key, 6)
    convs = []
    for i in range(4):
        c_in, c_out = chans[i], chans[i + 1]
        fan_in = c_in * KSIZE * KSIZE
        w = (jax.random.normal(jax.random.fold_in(keys[i], 0),
                               (c_out, c_in, KSIZE, KSIZE), jnp.float32)
             / np.sqrt(fan_in)).astype(jnp.bfloat16)
        b = jax.random.normal(jax.random.fold_in(keys[i], 1), (c_out,), jnp.float32) * 0.01
        convs.append((w, b))
    lin1_w = (jax.random.normal(keys[4], (1024, H * W * chans[4]), jnp.float32)
              / np.sqrt(H * W * chans[4])).astype(jnp.bfloat16)
    lin1_b = jax.random.normal(jax.random.fold_in(keys[4], 1), (1024,), jnp.float32) * 0.01
    lin2_w = (jax.random.normal(keys[5], (num_classes, 1024), jnp.float32)
              / np.sqrt(1024)).astype(jnp.bfloat16)
    lin2_b = jax.random.normal(jax.random.fold_in(keys[5], 1), (num_classes,), jnp.float32) * 0.01
    return {"convs": convs, "lin1_w": lin1_w, "lin1_b": lin1_b,
            "lin2_w": lin2_w, "lin2_b": lin2_b}


def prepare_params(p):
    """One-time re-layout of weights into the forms the Pallas kernels consume."""
    kp = {}
    # conv1: full 16-tap im2col weight, K ordered (kh, kw, ci) to match the wrapper prep.
    w, b = p["convs"][0]
    c_out, c_in = w.shape[0], w.shape[1]
    kp["cw1"] = jnp.transpose(w, (2, 3, 1, 0)).reshape(KSIZE * KSIZE * c_in, c_out)
    kp["cb1"] = b.reshape(1, c_out).astype(jnp.float32)
    # conv2..4: per-kh weights (4, 4*c_in, c_out), K ordered (kw, ci) to match buffers.
    for l, (w, b) in enumerate(p["convs"][1:], start=2):
        c_out, c_in = w.shape[0], w.shape[1]
        kp[f"cw{l}"] = jnp.transpose(w, (2, 3, 1, 0)).reshape(KSIZE, KSIZE * c_in, c_out)
        kp[f"cb{l}"] = b.reshape(1, c_out).astype(jnp.float32)
    # lin1: permute columns from PyTorch's (c, h, w) flatten to our (h, w, c) flatten.
    c4 = p["convs"][-1][0].shape[0]
    l1 = p["lin1_w"].reshape(1024, c4, H, W)
    kp["w1"] = jnp.transpose(l1, (2, 3, 1, 0)).reshape(H * W * c4, 1024)        # bf16
    kp["b1"] = p["lin1_b"].reshape(1, 1024).astype(jnp.float32)
    # lin2: transpose + lane-pad to 128 outputs (sliced back to NUM_CLASSES outside).
    w2 = jnp.transpose(p["lin2_w"], (1, 0))                                     # (1024, nc) bf16
    nc = w2.shape[1]
    kp["w2"] = jnp.pad(w2, ((0, 0), (0, LIN2_PAD - nc)))
    kp["b2"] = jnp.pad(p["lin2_b"], (0, LIN2_PAD - nc)).reshape(1, LIN2_PAD).astype(jnp.float32)
    return kp


# ----------------------------------------------------------------------------
# Pure-JAX reference (f32 math on the same bf16-stored weights)
# ----------------------------------------------------------------------------
def classifier_reference(x, p):
    for w, b in p["convs"]:
        x = jnp.pad(x, ((0, 0), (0, 0), (1, 2), (1, 2)))
        x = jax.lax.conv_general_dilated(
            x, w.astype(jnp.float32), window_strides=(1, 1), padding="VALID",
            dimension_numbers=("NCHW", "OIHW", "NCHW"))
        x = jnp.maximum(x + b[None, :, None, None], 0.0)
    x = x.reshape(x.shape[0], -1)
    x = x @ p["lin1_w"].astype(jnp.float32).T + p["lin1_b"]
    x = x @ p["lin2_w"].astype(jnp.float32).T + p["lin2_b"]
    return x


if __name__ == "__main__":
    key = jax.random.PRNGKey(0)
    k_x, k_p = jax.random.split(key)
    # Spatial size must be 9x9 so the flatten matches lin1's 9*9*64 input.
    x = jax.random.normal(k_x, (2, 4, 9, 9), jnp.float32)     # NCHW, like PyTorch
    params = init_params(k_p)
    kparams = prepare_params(params)                          # one-time weight re-layout

    fwd = jax.jit(classifier_forward)
    out = jax.block_until_ready(fwd(x, kparams))
    ref = jax.block_until_ready(classifier_reference(x, params))

    assert out.shape == (2, NUM_CLASSES), out.shape
    np.testing.assert_allclose(np.asarray(out, np.float32), np.asarray(ref, np.float32),
                               rtol=5e-2, atol=2e-2)
    print("KERNEL_OK")
</pallas_src>

<mosaic_0001>
module attributes {stable_mosaic.version = 11 : i64} {
  func.func @_conv_stack_kernel(%arg0: i32, %arg1: memref<1x144x64xbf16, #tpu.memory_space<vmem>>, %arg2: memref<64x64xbf16, #tpu.memory_space<vmem>>, %arg3: memref<1x64xf32, #tpu.memory_space<vmem>>, %arg4: memref<4x256x128xbf16, #tpu.memory_space<vmem>>, %arg5: memref<1x128xf32, #tpu.memory_space<vmem>>, %arg6: memref<4x512x256xbf16, #tpu.memory_space<vmem>>, %arg7: memref<1x256xf32, #tpu.memory_space<vmem>>, %arg8: memref<4x1024x64xbf16, #tpu.memory_space<vmem>>, %arg9: memref<1x64xf32, #tpu.memory_space<vmem>>, %arg10: memref<1x144x64xbf16, #tpu.memory_space<vmem>>, %arg11: memref<192x256xf32, #tpu.memory_space<vmem>>, %arg12: memref<192x256xbf16, #tpu.memory_space<vmem>>, %arg13: memref<192x512xbf16, #tpu.memory_space<vmem>>, %arg14: memref<192x1024xbf16, #tpu.memory_space<vmem>>) attributes {dimension_semantics = [#tpu.dimension_semantics<parallel>], iteration_bounds = array<i64: 2>, scalar_prefetch = 0 : i64, scratch_operands = 4 : i64, tpu.core_type = #tpu.core_type<tc>, window_params = [{transform_indices = @transform_0, window_bounds = array<i64: 1, 144, 64>}, {pipeline_mode = #tpu.pipeline_mode<synchronous>, transform_indices = @transform_1, window_bounds = array<i64: 64, 64>}, {pipeline_mode = #tpu.pipeline_mode<synchronous>, transform_indices = @transform_2, window_bounds = array<i64: 1, 64>}, {pipeline_mode = #tpu.pipeline_mode<synchronous>, transform_indices = @transform_3, window_bounds = array<i64: 4, 256, 128>}, {pipeline_mode = #tpu.pipeline_mode<synchronous>, transform_indices = @transform_4, window_bounds = array<i64: 1, 128>}, {pipeline_mode = #tpu.pipeline_mode<synchronous>, transform_indices = @transform_5, window_bounds = array<i64: 4, 512, 256>}, {pipeline_mode = #tpu.pipeline_mode<synchronous>, transform_indices = @transform_6, window_bounds = array<i64: 1, 256>}, {pipeline_mode = #tpu.pipeline_mode<synchronous>, transform_indices = @transform_7, window_bounds = array<i64: 4, 1024, 64>}, {pipeline_mode = #tpu.pipeline_mode<synchronous>, transform_indices = @transform_8, window_bounds = array<i64: 1, 64>}, {transform_indices = @transform_9, window_bounds = array<i64: 1, 144, 64>}]} {
    %0 = tpu.iota {dimensions = array<i32: 0>} : vector<144x1xi32>
    %c16_i32 = arith.constant 16 : i32
    %c0_i32 = arith.constant 0 : i32
    %1 = arith.cmpi eq, %c16_i32, %c0_i32 : i32
    %c1_i32 = arith.constant 1 : i32
    %2 = arith.select %1, %c1_i32, %c16_i32 : i32
    %3 = vector.broadcast %2 : i32 to vector<144x1xi32>
    %4 = arith.remsi %0, %3 : vector<144x1xi32>
    %c0_i32_0 = arith.constant 0 : i32
    %5 = vector.broadcast %c0_i32_0 : i32 to vector<144x1xi32>
    %6 = arith.cmpi ne, %4, %5 : vector<144x1xi32>
    %c0_i32_1 = arith.constant 0 : i32
    %7 = vector.broadcast %c0_i32_1 : i32 to vector<144x1xi32>
    %8 = arith.cmpi slt, %4, %7 : vector<144x1xi32>
    %c0_i32_2 = arith.constant 0 : i32
    %9 = arith.cmpi slt, %2, %c0_i32_2 : i32
    %10 = vector.broadcast %9 : i1 to vector<144x1xi1>
    %11 = vector.broadcast %10 : vector<144x1xi1> to vector<144x1xi1>
    %12 = arith.xori %8, %11 : vector<144x1xi1>
    %13 = arith.andi %12, %6 : vector<144x1xi1>
    %14 = vector.broadcast %2 : i32 to vector<144x1xi32>
    %15 = arith.addi %4, %14 : vector<144x1xi32>
    %16 = arith.select %13, %15, %4 : vector<144x1xi1>, vector<144x1xi32>
    %c9_i32 = arith.constant 9 : i32
    %17 = vector.broadcast %c9_i32 : i32 to vector<144x1xi32>
    %18 = arith.cmpi slt, %16, %17 : vector<144x1xi32>
    %c0 = arith.constant 0 : index
    %c0_3 = arith.constant 0 : index
    %c0_4 = arith.constant 0 : index
    %19 = vector.load %arg1[%c0, %c0_3, %c0_4] : memref<1x144x64xbf16, #tpu.memory_space<vmem>>, vector<1x144x64xbf16>
    %20 = vector.shape_cast %19 : vector<1x144x64xbf16> to vector<144x64xbf16>
    %c0_5 = arith.constant 0 : index
    %c0_6 = arith.constant 0 : index
    %21 = vector.load %arg2[%c0_5, %c0_6] : memref<64x64xbf16, #tpu.memory_space<vmem>>, vector<64x64xbf16>
    %cst = arith.constant dense<0.000000e+00> : vector<144x64xf32>
    %22 = tpu.matmul %20, %21, %cst {dimension_numbers = #tpu.dot_dimension_numbers<[1], [0], [0], [1], [0, 0, 1, 1], [], []>} : vector<144x64xbf16>, vector<64x64xbf16>, vector<144x64xf32> -> vector<144x64xf32>
    %c0_7 = arith.constant 0 : index
    %c0_8 = arith.constant 0 : index
    %23 = vector.load %arg3[%c0_7, %c0_8] : memref<1x64xf32, #tpu.memory_space<vmem>>, vector<1x64xf32>
    %24 = vector.broadcast %23 : vector<1x64xf32> to vector<144x64xf32>
    %25 = arith.addf %22, %24 : vector<144x64xf32>
    %cst_9 = arith.constant 0.000000e+00 : f32
    %26 = vector.broadcast %cst_9 : f32 to vector<144x64xf32>
    %27 = arith.maximumf %25, %26 : vector<144x64xf32>
    %cst_10 = arith.constant 0.000000e+00 : f32
    %28 = vector.shape_cast %18 : vector<144x1xi1> to vector<144x1xi1>
    %29 = vector.broadcast %28 : vector<144x1xi1> to vector<144x64xi1>
    %30 = vector.broadcast %cst_10 : f32 to vector<144x64xf32>
    %31 = arith.select %29, %27, %30 : vector<144x64xi1>, vector<144x64xf32>
    %cst_11 = arith.constant 0.000000e+00 : f32
    %32 = vector.broadcast %cst_11 : f32 to vector<16x64xf32>
    %c0_12 = arith.constant 0 : index
    %c0_13 = arith.constant 0 : index
    %33 = vector.load %arg11[%c0_12, %c0_13] : memref<192x256xf32, #tpu.memory_space<vmem>>, vector<16x64xf32>
    tpu.vector_store %arg11[%c0_12, %c0_13], %32 {strides = array<i32>} : memref<192x256xf32, #tpu.memory_space<vmem>>, vector<16x64xf32>,
    %c16 = arith.constant 16 : index
    %c0_14 = arith.constant 0 : index
    %34 = vector.load %arg11[%c16, %c0_14] : memref<192x256xf32, #tpu.memory_space<vmem>>, vector<144x64xf32>
    tpu.vector_store %arg11[%c16, %c0_14], %31 {strides = array<i32>} : memref<192x256xf32, #tpu.memory_space<vmem>>, vector<144x64xf32>,
    %cst_15 = arith.constant 0.000000e+00 : f32
    %35 = vector.broadcast %cst_15 : f32 to vector<32x64xf32>
    %c160 = arith.constant 160 : index
    %c0_16 = arith.constant 0 : index
    %36 = vector.load %arg11[%c160, %c0_16] : memref<192x256xf32, #tpu.memory_space<vmem>>, vector<32x64xf32>
    tpu.vector_store %arg11[%c160, %c0_16], %35 {strides = array<i32>} : memref<192x256xf32, #tpu.memory_space<vmem>>, vector<32x64xf32>,
    %cst_17 = arith.constant 0.000000e+00 : bf16
    %37 = vector.broadcast %cst_17 : bf16 to vector<16x256xbf16>
    %c0_18 = arith.constant 0 : index
    %c0_19 = arith.constant 0 : index
    %38 = vector.load %arg12[%c0_18, %c0_19] : memref<192x256xbf16, #tpu.memory_space<vmem>>, vector<16x256xbf16>
    tpu.vector_store %arg12[%c0_18, %c0_19], %37 {strides = array<i32>} : memref<192x256xbf16, #tpu.memory_space<vmem>>, vector<16x256xbf16>,
    %cst_20 = arith.constant 0.000000e+00 : bf16
    %39 = vector.broadcast %cst_20 : bf16 to vector<32x256xbf16>
    %c160_21 = arith.constant 160 : index
    %c0_22 = arith.constant 0 : index
    %40 = vector.load %arg12[%c160_21, %c0_22] : memref<192x256xbf16, #tpu.memory_space<vmem>>, vector<32x256xbf16>
    tpu.vector_store %arg12[%c160_21, %c0_22], %39 {strides = array<i32>} : memref<192x256xbf16, #tpu.memory_space<vmem>>, vector<32x256xbf16>,
    %c15 = arith.constant 15 : index
    %c0_23 = arith.constant 0 : index
    %41 = vector.load %arg11[%c15, %c0_23] : memref<192x256xf32, #tpu.memory_space<vmem>>, vector<144x64xf32>
    %42 = arith.truncf %41 : vector<144x64xf32> to vector<144x64xbf16>
    %c16_24 = arith.constant 16 : index
    %c0_25 = arith.constant 0 : index
    %43 = vector.load %arg12[%c16_24, %c0_25] : memref<192x256xbf16, #tpu.memory_space<vmem>>, vector<144x64xbf16>
    tpu.vector_store %arg12[%c16_24, %c0_25], %42 {strides = array<i32>} : memref<192x256xbf16, #tpu.memory_space<vmem>>, vector<144x64xbf16>,
    %c16_26 = arith.constant 16 : index
    %c0_27 = arith.constant 0 : index
    %44 = vector.load %arg11[%c16_26, %c0_27] : memref<192x256xf32, #tpu.memory_space<vmem>>, vector<144x64xf32>
    %45 = arith.truncf %44 : vector<144x64xf32> to vector<144x64xbf16>
    %c16_28 = arith.constant 16 : index
    %c64 = arith.constant 64 : index
    %46 = vector.load %arg12[%c16_28, %c64] : memref<192x256xbf16, #tpu.memory_space<vmem>>, vector<144x64xbf16>
    tpu.vector_store %arg12[%c16_28, %c64], %45 {strides = array<i32>} : memref<192x256xbf16, #tpu.memory_space<vmem>>, vector<144x64xbf16>,
    %c17 = arith.constant 17 : index
    %c0_29 = arith.constant 0 : index
    %47 = vector.load %arg11[%c17, %c0_29] : memref<192x256xf32, #tpu.memory_space<vmem>>, vector<144x64xf32>
    %48 = arith.truncf %47 : vector<144x64xf32> to vector<144x64xbf16>
    %c16_30 = arith.constant 16 : index
    %c128 = arith.constant 128 : index
    %49 = vector.load %arg12[%c16_30, %c128] : memref<192x256xbf16, #tpu.memory_space<vmem>>, vector<144x64xbf16>
    tpu.vector_store %arg12[%c16_30, %c128], %48 {strides = array<i32>} : memref<192x256xbf16, #tpu.memory_space<vmem>>, vector<144x64xbf16>,
    %c18 = arith.constant 18 : index
    %c0_31 = arith.constant 0 : index
    %50 = vector.load %arg11[%c18, %c0_31] : memref<192x256xf32, #tpu.memory_space<vmem>>, vector<144x64xf32>
    %51 = arith.truncf %50 : vector<144x64xf32> to vector<144x64xbf16>
    %c16_32 = arith.constant 16 : index
    %c192 = arith.constant 192 : index
    %52 = vector.load %arg12[%c16_32, %c192] : memref<192x256xbf16, #tpu.memory_space<vmem>>, vector<144x64xbf16>
    tpu.vector_store %arg12[%c16_32, %c192], %51 {strides = array<i32>} : memref<192x256xbf16, #tpu.memory_space<vmem>>, vector<144x64xbf16>,
    %cst_33 = arith.constant 0.000000e+00 : f32
    %53 = vector.broadcast %cst_33 : f32 to vector<144x128xf32>
    %c0_34 = arith.constant 0 : index
    %c0_35 = arith.constant 0 : index
    %54 = vector.load %arg12[%c0_34, %c0_35] : memref<192x256xbf16, #tpu.memory_space<vmem>>, vector<144x256xbf16>
    %c0_36 = arith.constant 0 : index
    %c0_37 = arith.constant 0 : index
    %c0_38 = arith.constant 0 : index
    %55 = vector.load %arg4[%c0_36, %c0_37, %c0_38] : memref<4x256x128xbf16, #tpu.memory_space<vmem>>, vector<1x256x128xbf16>
    %56 = vector.shape_cast %55 : vector<1x256x128xbf16> to vector<256x128xbf16>
    %cst_39 = arith.constant dense<0.000000e+00> : vector<144x128xf32>
    %57 = tpu.matmul %54, %56, %cst_39 {dimension_numbers = #tpu.dot_dimension_numbers<[1], [0], [0], [1], [0, 0, 1, 1], [], []>} : vector<144x256xbf16>, vector<256x128xbf16>, vector<144x128xf32> -> vector<144x128xf32>
    %58 = arith.addf %53, %57 : vector<144x128xf32>
    %c16_40 = arith.constant 16 : index
    %c0_41 = arith.constant 0 : index
    %59 = vector.load %arg12[%c16_40, %c0_41] : memref<192x256xbf16, #tpu.memory_space<vmem>>, vector<144x256xbf16>
    %c1 = arith.constant 1 : index
    %c0_42 = arith.constant 0 : index
    %c0_43 = arith.constant 0 : index
    %60 = vector.load %arg4[%c1, %c0_42, %c0_43] : memref<4x256x128xbf16, #tpu.memory_space<vmem>>, vector<1x256x128xbf16>
    %61 = vector.shape_cast %60 : vector<1x256x128xbf16> to vector<256x128xbf16>
    %cst_44 = arith.constant dense<0.000000e+00> : vector<144x128xf32>
    %62 = tpu.matmul %59, %61, %cst_44 {dimension_numbers = #tpu.dot_dimension_numbers<[1], [0], [0], [1], [0, 0, 1, 1], [], []>} : vector<144x256xbf16>, vector<256x128xbf16>, vector<144x128xf32> -> vector<144x128xf32>
    %63 = arith.addf %58, %62 : vector<144x128xf32>
    %c32 = arith.constant 32 : index
    %c0_45 = arith.constant 0 : index
    %64 = vector.load %arg12[%c32, %c0_45] : memref<192x256xbf16, #tpu.memory_space<vmem>>, vector<144x256xbf16>
    %c2 = arith.constant 2 : index
    %c0_46 = arith.constant 0 : index
    %c0_47 = arith.constant 0 : index
    %65 = vector.load %arg4[%c2, %c0_46, %c0_47] : memref<4x256x128xbf16, #tpu.memory_space<vmem>>, vector<1x256x128xbf16>
    %66 = vector.shape_cast %65 : vector<1x256x128xbf16> to vector<256x128xbf16>
    %cst_48 = arith.constant dense<0.000000e+00> : vector<144x128xf32>
    %67 = tpu.matmul %64, %66, %cst_48 {dimension_numbers = #tpu.dot_dimension_numbers<[1], [0], [0], [1], [0, 0, 1, 1], [], []>} : vector<144x256xbf16>, vector<256x128xbf16>, vector<144x128xf32> -> vector<144x128xf32>
    %68 = arith.addf %63, %67 : vector<144x128xf32>
    %c48 = arith.constant 48 : index
    %c0_49 = arith.constant 0 : index
    %69 = vector.load %arg12[%c48, %c0_49] : memref<192x256xbf16, #tpu.memory_space<vmem>>, vector<144x256xbf16>
    %c3 = arith.constant 3 : index
    %c0_50 = arith.constant 0 : index
    %c0_51 = arith.constant 0 : index
    %70 = vector.load %arg4[%c3, %c0_50, %c0_51] : memref<4x256x128xbf16, #tpu.memory_space<vmem>>, vector<1x256x128xbf16>
    %71 = vector.shape_cast %70 : vector<1x256x128xbf16> to vector<256x128xbf16>
    %cst_52 = arith.constant dense<0.000000e+00> : vector<144x128xf32>
    %72 = tpu.matmul %69, %71, %cst_52 {dimension_numbers = #tpu.dot_dimension_numbers<[1], [0], [0], [1], [0, 0, 1, 1], [], []>} : vector<144x256xbf16>, vector<256x128xbf16>, vector<144x128xf32> -> vector<144x128xf32>
    %73 = arith.addf %68, %72 : vector<144x128xf32>
    %c0_53 = arith.constant 0 : index
    %c0_54 = arith.constant 0 : index
    %74 = vector.load %arg5[%c0_53, %c0_54] : memref<1x128xf32, #tpu.memory_space<vmem>>, vector<1x128xf32>
    %75 = vector.broadcast %74 : vector<1x128xf32> to vector<144x128xf32>
    %76 = arith.addf %73, %75 : vector<144x128xf32>
    %cst_55 = arith.constant 0.000000e+00 : f32
    %77 = vector.broadcast %cst_55 : f32 to vector<144x128xf32>
    %78 = arith.maximumf %76, %77 : vector<144x128xf32>
    %cst_56 = arith.constant 0.000000e+00 : f32
    %79 = vector.shape_cast %18 : vector<144x1xi1> to vector<144x1xi1>
    %80 = vector.broadcast %79 : vector<144x1xi1> to vector<144x128xi1>
    %81 = vector.broadcast %cst_56 : f32 to vector<144x128xf32>
    %82 = arith.select %80, %78, %81 : vector<144x128xi1>, vector<144x128xf32>
    %cst_57 = arith.constant 0.000000e+00 : f32
    %83 = vector.broadcast %cst_57 : f32 to vector<16x128xf32>
    %c0_58 = arith.constant 0 : index
    %c0_59 = arith.constant 0 : index
    %84 = vector.load %arg11[%c0_58, %c0_59] : memref<192x256xf32, #tpu.memory_space<vmem>>, vector<16x128xf32>
    tpu.vector_store %arg11[%c0_58, %c0_59], %83 {strides = array<i32>} : memref<192x256xf32, #tpu.memory_space<vmem>>, vector<16x128xf32>,
    %c16_60 = arith.constant 16 : index
    %c0_61 = arith.constant 0 : index
    %85 = vector.load %arg11[%c16_60, %c0_61] : memref<192x256xf32, #tpu.memory_space<vmem>>, vector<144x128xf32>
    tpu.vector_store %arg11[%c16_60, %c0_61], %82 {strides = array<i32>} : memref<192x256xf32, #tpu.memory_space<vmem>>, vector<144x128xf32>,
    %cst_62 = arith.constant 0.000000e+00 : f32
    %86 = vector.broadcast %cst_62 : f32 to vector<32x128xf32>
    %c160_63 = arith.constant 160 : index
    %c0_64 = arith.constant 0 : index
    %87 = vector.load %arg11[%c160_63, %c0_64] : memref<192x256xf32, #tpu.memory_space<vmem>>, vector<32x128xf32>
    tpu.vector_store %arg11[%c160_63, %c0_64], %86 {strides = array<i32>} : memref<192x256xf32, #tpu.memory_space<vmem>>, vector<32x128xf32>,
    %cst_65 = arith.constant 0.000000e+00 : bf16
    %88 = vector.broadcast %cst_65 : bf16 to vector<16x512xbf16>
    %c0_66 = arith.constant 0 : index
    %c0_67 = arith.constant 0 : index
    %89 = vector.load %arg13[%c0_66, %c0_67] : memref<192x512xbf16, #tpu.memory_space<vmem>>, vector<16x512xbf16>
    tpu.vector_store %arg13[%c0_66, %c0_67], %88 {strides = array<i32>} : memref<192x512xbf16, #tpu.memory_space<vmem>>, vector<16x512xbf16>,
    %cst_68 = arith.constant 0.000000e+00 : bf16
    %90 = vector.broadcast %cst_68 : bf16 to vector<32x512xbf16>
    %c160_69 = arith.constant 160 : index
    %c0_70 = arith.constant 0 : index
    %91 = vector.load %arg13[%c160_69, %c0_70] : memref<192x512xbf16, #tpu.memory_space<vmem>>, vector<32x512xbf16>
    tpu.vector_store %arg13[%c160_69, %c0_70], %90 {strides = array<i32>} : memref<192x512xbf16, #tpu.memory_space<vmem>>, vector<32x512xbf16>,
    %c15_71 = arith.constant 15 : index
    %c0_72 = arith.constant 0 : index
    %92 = vector.load %arg11[%c15_71, %c0_72] : memref<192x256xf32, #tpu.memory_space<vmem>>, vector<144x128xf32>
    %93 = arith.truncf %92 : vector<144x128xf32> to vector<144x128xbf16>
    %c16_73 = arith.constant 16 : index
    %c0_74 = arith.constant 0 : index
    %94 = vector.load %arg13[%c16_73, %c0_74] : memref<192x512xbf16, #tpu.memory_space<vmem>>, vector<144x128xbf16>
    tpu.vector_store %arg13[%c16_73, %c0_74], %93 {strides = array<i32>} : memref<192x512xbf16, #tpu.memory_space<vmem>>, vector<144x128xbf16>,
    %c16_75 = arith.constant 16 : index
    %c0_76 = arith.constant 0 : index
    %95 = vector.load %arg11[%c16_75, %c0_76] : memref<192x256xf32, #tpu.memory_space<vmem>>, vector<144x128xf32>
    %96 = arith.truncf %95 : vector<144x128xf32> to vector<144x128xbf16>
    %c16_77 = arith.constant 16 : index
    %c128_78 = arith.constant 128 : index
    %97 = vector.load %arg13[%c16_77, %c128_78] : memref<192x512xbf16, #tpu.memory_space<vmem>>, vector<144x128xbf16>
    tpu.vector_store %arg13[%c16_77, %c128_78], %96 {strides = array<i32>} : memref<192x512xbf16, #tpu.memory_space<vmem>>, vector<144x128xbf16>,
    %c17_79 = arith.constant 17 : index
    %c0_80 = arith.constant 0 : index
    %98 = vector.load %arg11[%c17_79, %c0_80] : memref<192x256xf32, #tpu.memory_space<vmem>>, vector<144x128xf32>
    %99 = arith.truncf %98 : vector<144x128xf32> to vector<144x128xbf16>
    %c16_81 = arith.constant 16 : index
    %c256 = arith.constant 256 : index
    %100 = vector.load %arg13[%c16_81, %c256] : memref<192x512xbf16, #tpu.memory_space<vmem>>, vector<144x128xbf16>
    tpu.vector_store %arg13[%c16_81, %c256], %99 {strides = array<i32>} : memref<192x512xbf16, #tpu.memory_space<vmem>>, vector<144x128xbf16>,
    %c18_82 = arith.constant 18 : index
    %c0_83 = arith.constant 0 : index
    %101 = vector.load %arg11[%c18_82, %c0_83] : memref<192x256xf32, #tpu.memory_space<vmem>>, vector<144x128xf32>
    %102 = arith.truncf %101 : vector<144x128xf32> to vector<144x128xbf16>
    %c16_84 = arith.constant 16 : index
    %c384 = arith.constant 384 : index
    %103 = vector.load %arg13[%c16_84, %c384] : memref<192x512xbf16, #tpu.memory_space<vmem>>, vector<144x128xbf16>
    tpu.vector_store %arg13[%c16_84, %c384], %102 {strides = array<i32>} : memref<192x512xbf16, #tpu.memory_space<vmem>>, vector<144x128xbf16>,
    %cst_85 = arith.constant 0.000000e+00 : f32
    %104 = vector.broadcast %cst_85 : f32 to vector<144x256xf32>
    %c0_86 = arith.constant 0 : index
    %c0_87 = arith.constant 0 : index
    %105 = vector.load %arg13[%c0_86, %c0_87] : memref<192x512xbf16, #tpu.memory_space<vmem>>, vector<144x512xbf16>
    %c0_88 = arith.constant 0 : index
    %c0_89 = arith.constant 0 : index
    %c0_90 = arith.constant 0 : index
    %106 = vector.load %arg6[%c0_88, %c0_89, %c0_90] : memref<4x512x256xbf16, #tpu.memory_space<vmem>>, vector<1x512x256xbf16>
    %107 = vector.shape_cast %106 : vector<1x512x256xbf16> to vector<512x256xbf16>
    %cst_91 = arith.constant dense<0.000000e+00> : vector<144x256xf32>
    %108 = tpu.matmul %105, %107, %cst_91 {dimension_numbers = #tpu.dot_dimension_numbers<[1], [0], [0], [1], [0, 0, 1, 1], [], []>} : vector<144x512xbf16>, vector<512x256xbf16>, vector<144x256xf32> -> vector<144x256xf32>
    %109 = arith.addf %104, %108 : vector<144x256xf32>
    %c16_92 = arith.constant 16 : index
    %c0_93 = arith.constant 0 : index
    %110 = vector.load %arg13[%c16_92, %c0_93] : memref<192x512xbf16, #tpu.memory_space<vmem>>, vector<144x512xbf16>
    %c1_94 = arith.constant 1 : index
    %c0_95 = arith.constant 0 : index
    %c0_96 = arith.constant 0 : index
    %111 = vector.load %arg6[%c1_94, %c0_95, %c0_96] : memref<4x512x256xbf16, #tpu.memory_space<vmem>>, vector<1x512x256xbf16>
    %112 = vector.shape_cast %111 : vector<1x512x256xbf16> to vector<512x256xbf16>
    %cst_97 = arith.constant dense<0.000000e+00> : vector<144x256xf32>
    %113 = tpu.matmul %110, %112, %cst_97 {dimension_numbers = #tpu.dot_dimension_numbers<[1], [0], [0], [1], [0, 0, 1, 1], [], []>} : vector<144x512xbf16>, vector<512x256xbf16>, vector<144x256xf32> -> vector<144x256xf32>
    %114 = arith.addf %109, %113 : vector<144x256xf32>
    %c32_98 = arith.constant 32 : index
    %c0_99 = arith.constant 0 : index
    %115 = vector.load %arg13[%c32_98, %c0_99] : memref<192x512xbf16, #tpu.memory_space<vmem>>, vector<144x512xbf16>
    %c2_100 = arith.constant 2 : index
    %c0_101 = arith.constant 0 : index
    %c0_102 = arith.constant 0 : index
    %116 = vector.load %arg6[%c2_100, %c0_101, %c0_102] : memref<4x512x256xbf16, #tpu.memory_space<vmem>>, vector<1x512x256xbf16>
    %117 = vector.shape_cast %116 : vector<1x512x256xbf16> to vector<512x256xbf16>
    %cst_103 = arith.constant dense<0.000000e+00> : vector<144x256xf32>
    %118 = tpu.matmul %115, %117, %cst_103 {dimension_numbers = #tpu.dot_dimension_numbers<[1], [0], [0], [1], [0, 0, 1, 1], [], []>} : vector<144x512xbf16>, vector<512x256xbf16>, vector<144x256xf32> -> vector<144x256xf32>
    %119 = arith.addf %114, %118 : vector<144x256xf32>
    %c48_104 = arith.constant 48 : index
    %c0_105 = arith.constant 0 : index
    %120 = vector.load %arg13[%c48_104, %c0_105] : memref<192x512xbf16, #tpu.memory_space<vmem>>, vector<144x512xbf16>
    %c3_106 = arith.constant 3 : index
    %c0_107 = arith.constant 0 : index
    %c0_108 = arith.constant 0 : index
    %121 = vector.load %arg6[%c3_106, %c0_107, %c0_108] : memref<4x512x256xbf16, #tpu.memory_space<vmem>>, vector<1x512x256xbf16>
    %122 = vector.shape_cast %121 : vector<1x512x256xbf16> to vector<512x256xbf16>
    %cst_109 = arith.constant dense<0.000000e+00> : vector<144x256xf32>
    %123 = tpu.matmul %120, %122, %cst_109 {dimension_numbers = #tpu.dot_dimension_numbers<[1], [0], [0], [1], [0, 0, 1, 1], [], []>} : vector<144x512xbf16>, vector<512x256xbf16>, vector<144x256xf32> -> vector<144x256xf32>
    %124 = arith.addf %119, %123 : vector<144x256xf32>
    %c0_110 = arith.constant 0 : index
    %c0_111 = arith.constant 0 : index
    %125 = vector.load %arg7[%c0_110, %c0_111] : memref<1x256xf32, #tpu.memory_space<vmem>>, vector<1x256xf32>
    %126 = vector.broadcast %125 : vector<1x256xf32> to vector<144x256xf32>
    %127 = arith.addf %124, %126 : vector<144x256xf32>
    %cst_112 = arith.constant 0.000000e+00 : f32
    %128 = vector.broadcast %cst_112 : f32 to vector<144x256xf32>
    %129 = arith.maximumf %127, %128 : vector<144x256xf32>
    %cst_113 = arith.constant 0.000000e+00 : f32
    %130 = vector.shape_cast %18 : vector<144x1xi1> to vector<144x1xi1>
    %131 = vector.broadcast %130 : vector<144x1xi1> to vector<144x256xi1>
    %132 = vector.broadcast %cst_113 : f32 to vector<144x256xf32>
    %133 = arith.select %131, %129, %132 : vector<144x256xi1>, vector<144x256xf32>
    %cst_114 = arith.constant 0.000000e+00 : f32
    %134 = vector.broadcast %cst_114 : f32 to vector<16x256xf32>
    %c0_115 = arith.constant 0 : index
    %c0_116 = arith.constant 0 : index
    %135 = vector.load %arg11[%c0_115, %c0_116] : memref<192x256xf32, #tpu.memory_space<vmem>>, vector<16x256xf32>
    tpu.vector_store %arg11[%c0_115, %c0_116], %134 {strides = array<i32>} : memref<192x256xf32, #tpu.memory_space<vmem>>, vector<16x256xf32>,
    %c16_117 = arith.constant 16 : index
    %c0_118 = arith.constant 0 : index
    %136 = vector.load %arg11[%c16_117, %c0_118] : memref<192x256xf32, #tpu.memory_space<vmem>>, vector<144x256xf32>
    tpu.vector_store %arg11[%c16_117, %c0_118], %133 {strides = array<i32>} : memref<192x256xf32, #tpu.memory_space<vmem>>, vector<144x256xf32>,
    %cst_119 = arith.constant 0.000000e+00 : f32
    %137 = vector.broadcast %cst_119 : f32 to vector<32x256xf32>
    %c160_120 = arith.constant 160 : index
    %c0_121 = arith.constant 0 : index
    %138 = vector.load %arg11[%c160_120, %c0_121] : memref<192x256xf32, #tpu.memory_space<vmem>>, vector<32x256xf32>
    tpu.vector_store %arg11[%c160_120, %c0_121], %137 {strides = array<i32>} : memref<192x256xf32, #tpu.memory_space<vmem>>, vector<32x256xf32>,
    %cst_122 = arith.constant 0.000000e+00 : bf16
    %139 = vector.broadcast %cst_122 : bf16 to vector<16x1024xbf16>
    %c0_123 = arith.constant 0 : index
    %c0_124 = arith.constant 0 : index
    %140 = vector.load %arg14[%c0_123, %c0_124] : memref<192x1024xbf16, #tpu.memory_space<vmem>>, vector<16x1024xbf16>
    tpu.vector_store %arg14[%c0_123, %c0_124], %139 {strides = array<i32>} : memref<192x1024xbf16, #tpu.memory_space<vmem>>, vector<16x1024xbf16>,
    %cst_125 = arith.constant 0.000000e+00 : bf16
    %141 = vector.broadcast %cst_125 : bf16 to vector<32x1024xbf16>
    %c160_126 = arith.constant 160 : index
    %c0_127 = arith.constant 0 : index
    %142 = vector.load %arg14[%c160_126, %c0_127] : memref<192x1024xbf16, #tpu.memory_space<vmem>>, vector<32x1024xbf16>
    tpu.vector_store %arg14[%c160_126, %c0_127], %141 {strides = array<i32>} : memref<192x1024xbf16, #tpu.memory_space<vmem>>, vector<32x1024xbf16>,
    %c15_128 = arith.constant 15 : index
    %c0_129 = arith.constant 0 : index
    %143 = vector.load %arg11[%c15_128, %c0_129] : memref<192x256xf32, #tpu.memory_space<vmem>>, vector<144x256xf32>
    %144 = arith.truncf %143 : vector<144x256xf32> to vector<144x256xbf16>
    %c16_130 = arith.constant 16 : index
    %c0_131 = arith.constant 0 : index
    %145 = vector.load %arg14[%c16_130, %c0_131] : memref<192x1024xbf16, #tpu.memory_space<vmem>>, vector<144x256xbf16>
    tpu.vector_store %arg14[%c16_130, %c0_131], %144 {strides = array<i32>} : memref<192x1024xbf16, #tpu.memory_space<vmem>>, vector<144x256xbf16>,
    %c16_132 = arith.constant 16 : index
    %c0_133 = arith.constant 0 : index
    %146 = vector.load %arg11[%c16_132, %c0_133] : memref<192x256xf32, #tpu.memory_space<vmem>>, vector<144x256xf32>
    %147 = arith.truncf %146 : vector<144x256xf32> to vector<144x256xbf16>
    %c16_134 = arith.constant 16 : index
    %c256_135 = arith.constant 256 : index
    %148 = vector.load %arg14[%c16_134, %c256_135] : memref<192x1024xbf16, #tpu.memory_space<vmem>>, vector<144x256xbf16>
    tpu.vector_store %arg14[%c16_134, %c256_135], %147 {strides = array<i32>} : memref<192x1024xbf16, #tpu.memory_space<vmem>>, vector<144x256xbf16>,
    %c17_136 = arith.constant 17 : index
    %c0_137 = arith.constant 0 : index
    %149 = vector.load %arg11[%c17_136, %c0_137] : memref<192x256xf32, #tpu.memory_space<vmem>>, vector<144x256xf32>
    %150 = arith.truncf %149 : vector<144x256xf32> to vector<144x256xbf16>
    %c16_138 = arith.constant 16 : index
    %c512 = arith.constant 512 : index
    %151 = vector.load %arg14[%c16_138, %c512] : memref<192x1024xbf16, #tpu.memory_space<vmem>>, vector<144x256xbf16>
    tpu.vector_store %arg14[%c16_138, %c512], %150 {strides = array<i32>} : memref<192x1024xbf16, #tpu.memory_space<vmem>>, vector<144x256xbf16>,
    %c18_139 = arith.constant 18 : index
    %c0_140 = arith.constant 0 : index
    %152 = vector.load %arg11[%c18_139, %c0_140] : memref<192x256xf32, #tpu.memory_space<vmem>>, vector<144x256xf32>
    %153 = arith.truncf %152 : vector<144x256xf32> to vector<144x256xbf16>
    %c16_141 = arith.constant 16 : index
    %c768 = arith.constant 768 : index
    %154 = vector.load %arg14[%c16_141, %c768] : memref<192x1024xbf16, #tpu.memory_space<vmem>>, vector<144x256xbf16>
    tpu.vector_store %arg14[%c16_141, %c768], %153 {strides = array<i32>} : memref<192x1024xbf16, #tpu.memory_space<vmem>>, vector<144x256xbf16>,
    %cst_142 = arith.constant 0.000000e+00 : f32
    %155 = vector.broadcast %cst_142 : f32 to vector<144x64xf32>
    %c0_143 = arith.constant 0 : index
    %c0_144 = arith.constant 0 : index
    %156 = vector.load %arg14[%c0_143, %c0_144] : memref<192x1024xbf16, #tpu.memory_space<vmem>>, vector<144x1024xbf16>
    %c0_145 = arith.constant 0 : index
    %c0_146 = arith.constant 0 : index
    %c0_147 = arith.constant 0 : index
    %157 = vector.load %arg8[%c0_145, %c0_146, %c0_147] : memref<4x1024x64xbf16, #tpu.memory_space<vmem>>, vector<1x1024x64xbf16>
    %158 = vector.shape_cast %157 : vector<1x1024x64xbf16> to vector<1024x64xbf16>
    %cst_148 = arith.constant dense<0.000000e+00> : vector<144x64xf32>
    %159 = tpu.matmul %156, %158, %cst_148 {dimension_numbers = #tpu.dot_dimension_numbers<[1], [0], [0], [1], [0, 0, 1, 1], [], []>} : vector<144x1024xbf16>, vector<1024x64xbf16>, vector<144x64xf32> -> vector<144x64xf32>
    %160 = arith.addf %155, %159 : vector<144x64xf32>
    %c16_149 = arith.constant 16 : index
    %c0_150 = arith.constant 0 : index
    %161 = vector.load %arg14[%c16_149, %c0_150] : memref<192x1024xbf16, #tpu.memory_space<vmem>>, vector<144x1024xbf16>
    %c1_151 = arith.constant 1 : index
    %c0_152 = arith.constant 0 : index
    %c0_153 = arith.constant 0 : index
    %162 = vector.load %arg8[%c1_151, %c0_152, %c0_153] : memref<4x1024x64xbf16, #tpu.memory_space<vmem>>, vector<1x1024x64xbf16>
    %163 = vector.shape_cast %162 : vector<1x1024x64xbf16> to vector<1024x64xbf16>
    %cst_154 = arith.constant dense<0.000000e+00> : vector<144x64xf32>
    %164 = tpu.matmul %161, %163, %cst_154 {dimension_numbers = #tpu.dot_dimension_numbers<[1], [0], [0], [1], [0, 0, 1, 1], [], []>} : vector<144x1024xbf16>, vector<1024x64xbf16>, vector<144x64xf32> -> vector<144x64xf32>
    %165 = arith.addf %160, %164 : vector<144x64xf32>
    %c32_155 = arith.constant 32 : index
    %c0_156 = arith.constant 0 : index
    %166 = vector.load %arg14[%c32_155, %c0_156] : memref<192x1024xbf16, #tpu.memory_space<vmem>>, vector<144x1024xbf16>
    %c2_157 = arith.constant 2 : index
    %c0_158 = arith.constant 0 : index
    %c0_159 = arith.constant 0 : index
    %167 = vector.load %arg8[%c2_157, %c0_158, %c0_159] : memref<4x1024x64xbf16, #tpu.memory_space<vmem>>, vector<1x1024x64xbf16>
    %168 = vector.shape_cast %167 : vector<1x1024x64xbf16> to vector<1024x64xbf16>
    %cst_160 = arith.constant dense<0.000000e+00> : vector<144x64xf32>
    %169 = tpu.matmul %166, %168, %cst_160 {dimension_numbers = #tpu.dot_dimension_numbers<[1], [0], [0], [1], [0, 0, 1, 1], [], []>} : vector<144x1024xbf16>, vector<1024x64xbf16>, vector<144x64xf32> -> vector<144x64xf32>
    %170 = arith.addf %165, %169 : vector<144x64xf32>
    %c48_161 = arith.constant 48 : index
    %c0_162 = arith.constant 0 : index
    %171 = vector.load %arg14[%c48_161, %c0_162] : memref<192x1024xbf16, #tpu.memory_space<vmem>>, vector<144x1024xbf16>
    %c3_163 = arith.constant 3 : index
    %c0_164 = arith.constant 0 : index
    %c0_165 = arith.constant 0 : index
    %172 = vector.load %arg8[%c3_163, %c0_164, %c0_165] : memref<4x1024x64xbf16, #tpu.memory_space<vmem>>, vector<1x1024x64xbf16>
    %173 = vector.shape_cast %172 : vector<1x1024x64xbf16> to vector<1024x64xbf16>
    %cst_166 = arith.constant dense<0.000000e+00> : vector<144x64xf32>
    %174 = tpu.matmul %171, %173, %cst_166 {dimension_numbers = #tpu.dot_dimension_numbers<[1], [0], [0], [1], [0, 0, 1, 1], [], []>} : vector<144x1024xbf16>, vector<1024x64xbf16>, vector<144x64xf32> -> vector<144x64xf32>
    %175 = arith.addf %170, %174 : vector<144x64xf32>
    %c0_167 = arith.constant 0 : index
    %c0_168 = arith.constant 0 : index
    %176 = vector.load %arg9[%c0_167, %c0_168] : memref<1x64xf32, #tpu.memory_space<vmem>>, vector<1x64xf32>
    %177 = vector.broadcast %176 : vector<1x64xf32> to vector<144x64xf32>
    %178 = arith.addf %175, %177 : vector<144x64xf32>
    %cst_169 = arith.constant 0.000000e+00 : f32
    %179 = vector.broadcast %cst_169 : f32 to vector<144x64xf32>
    %180 = arith.maximumf %178, %179 : vector<144x64xf32>
    %181 = arith.truncf %180 : vector<144x64xf32> to vector<144x64xbf16>
    %c0_170 = arith.constant 0 : index
    %c0_171 = arith.constant 0 : index
    %c0_172 = arith.constant 0 : index
    %182 = vector.load %arg10[%c0_170, %c0_171, %c0_172] : memref<1x144x64xbf16, #tpu.memory_space<vmem>>, vector<1x144x64xbf16>
    %183 = vector.shape_cast %182 : vector<1x144x64xbf16> to vector<144x64xbf16>
    %184 = vector.shape_cast %181 : vector<144x64xbf16> to vector<1x144x64xbf16>
    tpu.vector_store %arg10[%c0_170, %c0_171, %c0_172], %184 {strides = array<i32>} : memref<1x144x64xbf16, #tpu.memory_space<vmem>>, vector<1x144x64xbf16>,
    return
  }
  func.func @transform_0(%arg0: i32) -> (i32, i32, i32) {
    %c0_i32 = arith.constant 0 : i32
    %c0_i32_0 = arith.constant 0 : i32
    %c0_i32_1 = arith.constant 0 : i32
    return %arg0, %c0_i32, %c0_i32_0 : i32, i32, i32
  }
  func.func @transform_1(%arg0: i32) -> (i32, i32) {
    %c0_i32 = arith.constant 0 : i32
    %c0_i32_0 = arith.constant 0 : i32
    %c0_i32_1 = arith.constant 0 : i32
    return %c0_i32, %c0_i32_0 : i32, i32
  }
  func.func @transform_2(%arg0: i32) -> (i32, i32) {
    %c0_i32 = arith.constant 0 : i32
    %c0_i32_0 = arith.constant 0 : i32
    %c0_i32_1 = arith.constant 0 : i32
    return %c0_i32, %c0_i32_0 : i32, i32
  }
  func.func @transform_3(%arg0: i32) -> (i32, i32, i32) {
    %c0_i32 = arith.constant 0 : i32
    %c0_i32_0 = arith.constant 0 : i32
    %c0_i32_1 = arith.constant 0 : i32
    %c0_i32_2 = arith.constant 0 : i32
    return %c0_i32, %c0_i32_0, %c0_i32_1 : i32, i32, i32
  }
  func.func @transform_4(%arg0: i32) -> (i32, i32) {
    %c0_i32 = arith.constant 0 : i32
    %c0_i32_0 = arith.constant 0 : i32
    %c0_i32_1 = arith.constant 0 : i32
    return %c0_i32, %c0_i32_0 : i32, i32
  }
  func.func @transform_5(%arg0: i32) -> (i32, i32, i32) {
    %c0_i32 = arith.constant 0 : i32
    %c0_i32_0 = arith.constant 0 : i32
    %c0_i32_1 = arith.constant 0 : i32
    %c0_i32_2 = arith.constant 0 : i32
    return %c0_i32, %c0_i32_0, %c0_i32_1 : i32, i32, i32
  }
  func.func @transform_6(%arg0: i32) -> (i32, i32) {
    %c0_i32 = arith.constant 0 : i32
    %c0_i32_0 = arith.constant 0 : i32
    %c0_i32_1 = arith.constant 0 : i32
    return %c0_i32, %c0_i32_0 : i32, i32
  }
  func.func @transform_7(%arg0: i32) -> (i32, i32, i32) {
    %c0_i32 = arith.constant 0 : i32
    %c0_i32_0 = arith.constant 0 : i32
    %c0_i32_1 = arith.constant 0 : i32
    %c0_i32_2 = arith.constant 0 : i32
    return %c0_i32, %c0_i32_0, %c0_i32_1 : i32, i32, i32
  }
  func.func @transform_8(%arg0: i32) -> (i32, i32) {
    %c0_i32 = arith.constant 0 : i32
    %c0_i32_0 = arith.constant 0 : i32
    %c0_i32_1 = arith.constant 0 : i32
    return %c0_i32, %c0_i32_0 : i32, i32
  }
  func.func @transform_9(%arg0: i32) -> (i32, i32, i32) {
    %c0_i32 = arith.constant 0 : i32
    %c0_i32_0 = arith.constant 0 : i32
    %c0_i32_1 = arith.constant 0 : i32
    return %arg0, %c0_i32, %c0_i32_0 : i32, i32, i32
  }
}

module attributes {stable_mosaic.version = 11 : i64} {
  func.func @_lin_stack_kernel(%arg0: i32, %arg1: i32, %arg2: memref<2x5184xbf16, #tpu.memory_space<vmem>>, %arg3: memref<5184x256xbf16, #tpu.memory_space<vmem>>, %arg4: memref<1x256xf32, #tpu.memory_space<vmem>>, %arg5: memref<256x128xbf16, #tpu.memory_space<vmem>>, %arg6: memref<1x128xf32, #tpu.memory_space<vmem>>, %arg7: memref<1x2x128xf32, #tpu.memory_space<vmem>>) attributes {dimension_semantics = [#tpu.dimension_semantics<parallel>, #tpu.dimension_semantics<arbitrary>], iteration_bounds = array<i64: 2, 2>, scalar_prefetch = 0 : i64, scratch_operands = 0 : i64, tpu.core_type = #tpu.core_type<tc>, window_params = [{pipeline_mode = #tpu.pipeline_mode<synchronous>, transform_indices = @transform_0, window_bounds = array<i64: 2, 5184>}, {transform_indices = @transform_1, window_bounds = array<i64: 5184, 256>}, {transform_indices = @transform_2, window_bounds = array<i64: 1, 256>}, {transform_indices = @transform_3, window_bounds = array<i64: 256, 128>}, {pipeline_mode = #tpu.pipeline_mode<synchronous>, transform_indices = @transform_4, window_bounds = array<i64: 1, 128>}, {transform_indices = @transform_5, window_bounds = array<i64: 1, 2, 128>}]} {
    %c0 = arith.constant 0 : index
    %c0_0 = arith.constant 0 : index
    %0 = vector.load %arg2[%c0, %c0_0] : memref<2x5184xbf16, #tpu.memory_space<vmem>>, vector<2x5184xbf16>
    %c0_1 = arith.constant 0 : index
    %c0_2 = arith.constant 0 : index
    %1 = vector.load %arg3[%c0_1, %c0_2] : memref<5184x256xbf16, #tpu.memory_space<vmem>>, vector<5184x256xbf16>
    %cst = arith.constant dense<0.000000e+00> : vector<2x256xf32>
    %2 = tpu.matmul %0, %1, %cst {dimension_numbers = #tpu.dot_dimension_numbers<[1], [0], [0], [1], [0, 0, 1, 1], [], []>} : vector<2x5184xbf16>, vector<5184x256xbf16>, vector<2x256xf32> -> vector<2x256xf32>
    %c0_3 = arith.constant 0 : index
    %c0_4 = arith.constant 0 : index
    %3 = vector.load %arg4[%c0_3, %c0_4] : memref<1x256xf32, #tpu.memory_space<vmem>>, vector<1x256xf32>
    %4 = vector.broadcast %3 : vector<1x256xf32> to vector<2x256xf32>
    %5 = arith.addf %2, %4 : vector<2x256xf32>
    %6 = arith.truncf %5 : vector<2x256xf32> to vector<2x256xbf16>
    %c0_5 = arith.constant 0 : index
    %c0_6 = arith.constant 0 : index
    %7 = vector.load %arg5[%c0_5, %c0_6] : memref<256x128xbf16, #tpu.memory_space<vmem>>, vector<256x128xbf16>
    %cst_7 = arith.constant dense<0.000000e+00> : vector<2x128xf32>
    %8 = tpu.matmul %6, %7, %cst_7 {dimension_numbers = #tpu.dot_dimension_numbers<[1], [0], [0], [1], [0, 0, 1, 1], [], []>} : vector<2x256xbf16>, vector<256x128xbf16>, vector<2x128xf32> -> vector<2x128xf32>
    %c0_i32 = arith.constant 0 : i32
    %9 = arith.cmpi eq, %arg1, %c0_i32 : i32
    %10 = arith.extui %9 : i1 to i32
    %c0_i32_8 = arith.constant 0 : i32
    %11 = arith.cmpi ne, %10, %c0_i32_8 : i32
    scf.if %11 {
      %c0_15 = arith.constant 0 : index
      %c0_16 = arith.constant 0 : index
      %18 = vector.load %arg6[%c0_15, %c0_16] : memref<1x128xf32, #tpu.memory_space<vmem>>, vector<1x128xf32>
      %c0_i32_17 = arith.constant 0 : i32
      %19 = arith.cmpi eq, %arg0, %c0_i32_17 : i32
      %20 = arith.extui %19 : i1 to i32
      %21 = arith.sitofp %20 : i32 to f32
      %22 = vector.broadcast %21 : f32 to vector<1x128xf32>
      %23 = arith.mulf %18, %22 : vector<1x128xf32>
      %24 = vector.shape_cast %23 : vector<1x128xf32> to vector<1x128xf32>
      %25 = vector.broadcast %24 : vector<1x128xf32> to vector<2x128xf32>
      %c0_18 = arith.constant 0 : index
      %c0_19 = arith.constant 0 : index
      %c0_20 = arith.constant 0 : index
      %26 = vector.load %arg7[%c0_18, %c0_19, %c0_20] : memref<1x2x128xf32, #tpu.memory_space<vmem>>, vector<1x2x128xf32>
      %27 = vector.shape_cast %26 : vector<1x2x128xf32> to vector<2x128xf32>
      %28 = vector.shape_cast %25 : vector<2x128xf32> to vector<1x2x128xf32>
      tpu.vector_store %arg7[%c0_18, %c0_19, %c0_20], %28 {strides = array<i32>} : memref<1x2x128xf32, #tpu.memory_space<vmem>>, vector<1x2x128xf32>,
    } else {
    }
    %c0_9 = arith.constant 0 : index
    %c0_10 = arith.constant 0 : index
    %c0_11 = arith.constant 0 : index
    %12 = vector.load %arg7[%c0_9, %c0_10, %c0_11] : memref<1x2x128xf32, #tpu.memory_space<vmem>>, vector<1x2x128xf32>
    %13 = vector.shape_cast %12 : vector<1x2x128xf32> to vector<2x128xf32>
    %14 = arith.addf %13, %8 : vector<2x128xf32>
    %c0_12 = arith.constant 0 : index
    %c0_13 = arith.constant 0 : index
    %c0_14 = arith.constant 0 : index
    %15 = vector.load %arg7[%c0_12, %c0_13, %c0_14] : memref<1x2x128xf32, #tpu.memory_space<vmem>>, vector<1x2x128xf32>
    %16 = vector.shape_cast %15 : vector<1x2x128xf32> to vector<2x128xf32>
    %17 = vector.shape_cast %14 : vector<2x128xf32> to vector<1x2x128xf32>
    tpu.vector_store %arg7[%c0_12, %c0_13, %c0_14], %17 {strides = array<i32>} : memref<1x2x128xf32, #tpu.memory_space<vmem>>, vector<1x2x128xf32>,
    return
  }
  func.func @transform_0(%arg0: i32, %arg1: i32) -> (i32, i32) {
    %c0_i32 = arith.constant 0 : i32
    %c0_i32_0 = arith.constant 0 : i32
    %c0_i32_1 = arith.constant 0 : i32
    return %c0_i32, %c0_i32_0 : i32, i32
  }
  func.func @transform_1(%arg0: i32, %arg1: i32) -> (i32, i32) {
    %c2_i32 = arith.constant 2 : i32
    %0 = arith.muli %arg0, %c2_i32 : i32
    %1 = arith.addi %0, %arg1 : i32
    %c0_i32 = arith.constant 0 : i32
    %c0_i32_0 = arith.constant 0 : i32
    return %c0_i32, %1 : i32, i32
  }
  func.func @transform_2(%arg0: i32, %arg1: i32) -> (i32, i32) {
    %c2_i32 = arith.constant 2 : i32
    %0 = arith.muli %arg0, %c2_i32 : i32
    %1 = arith.addi %0, %arg1 : i32
    %c0_i32 = arith.constant 0 : i32
    %c0_i32_0 = arith.constant 0 : i32
    return %c0_i32, %1 : i32, i32
  }
  func.func @transform_3(%arg0: i32, %arg1: i32) -> (i32, i32) {
    %c2_i32 = arith.constant 2 : i32
    %0 = arith.muli %arg0, %c2_i32 : i32
    %1 = arith.addi %0, %arg1 : i32
    %c0_i32 = arith.constant 0 : i32
    %c0_i32_0 = arith.constant 0 : i32
    return %1, %c0_i32 : i32, i32
  }
  func.func @transform_4(%arg0: i32, %arg1: i32) -> (i32, i32) {
    %c0_i32 = arith.constant 0 : i32
    %c0_i32_0 = arith.constant 0 : i32
    %c0_i32_1 = arith.constant 0 : i32
    return %c0_i32, %c0_i32_0 : i32, i32
  }
  func.func @transform_5(%arg0: i32, %arg1: i32) -> (i32, i32, i32) {
    %c0_i32 = arith.constant 0 : i32
    %c0_i32_0 = arith.constant 0 : i32
    %c0_i32_1 = arith.constant 0 : i32
    return %arg0, %c0_i32, %c0_i32_0 : i32, i32, i32
  }
}

</mosaic_0001>

<bundles_post_ra>
// kernel: classifier_forward.3
= control target key start
LH: loop header
LB: loop body
LE: loop exit
PB: predicated region body
PF: predicated region fallthrough
CT: control target
= control target key end

     0   :  { %s9061_s0 = inlined_call_operand.vmem [shape: bf16[2,5184], index: 0, kind: input, shape index: {}]   ;;  %s9062_s1 = inlined_call_operand.hbm [shape: bf16[5184,1024], index: 1, kind: input, shape index: {}]   ;;  %s9063_s2 = inlined_call_operand.hbm [shape: f32[1,1024], index: 2, kind: input, shape index: {}]   ;;  %s9064_s3 = inlined_call_operand.hbm [shape: bf16[1024,128], index: 3, kind: input, shape index: {}]   ;;  %s9065_s4 = inlined_call_operand.hbm [shape: f32[1,128], index: 4, kind: input, shape index: {}]   ;;  %s9066_s5 = inlined_call_operand.vmem [shape: f32[2,2,128], index: 5, kind: output, shape index: {}]  }
   0x1   :  { %9081 = sst [smem:[#allocation18_spill]] %s9063_s2 }
   0x2   :  { %10 = vsyncpa [#allocation3], 0 }
   0x3   :  { %12 = vsyncpa [#allocation3 + $0x1], 0 }
   0x4   :  { %13 = vsyncpa [#allocation5], 0 }
   0x5   :  { %15 = vsyncpa [#allocation5 + $0x1], 0 }
   0x6   :  { %16 = vsyncpa [#allocation8], 0  ;;  %s7906_s18 = smov 0   ;;  %s7908_s19 = smov 0  }
   0x7   :  { %s7910_s20 = smov 0   ;;  %s7912_s21 = smov 0  }
   0x8   :  { %s7914_s22 = smov 0   ;;  %s7916_s23 = smov 0  }
   0x9   :  { %s7918_s24 = smov 0   ;;  %s7920_s25 = smov 0  }
   0xa LB: > { %9082 = sst [smem:[#allocation12_spill]] %s7843_s20  ;;  %s31_s26 = sadd.s32 1, %s7855_s23  ;;  %s7863_s25 = sphi %s7920_s25, %s22_s25   ;;  %s7859_s24 = sphi %s7918_s24, %s9110_s24   ;;  %s7855_s23 = sphi %s7916_s23, %s9109_s23   ;;  %s7851_s22 = sphi %s7914_s22, %s9114_s22   ;;  %s7847_s21 = sphi %s7912_s21, %s9113_s21   ;;  %s7843_s20 = sphi %s7910_s20, %s9106_s20   ;;  %s7839_s19 = sphi %s7908_s19, %s9112_s19   ;;  %s7835_s18 = sphi %s7906_s18, %s9111_s18  }
   0xb   : > { %9083 = sst [smem:[#allocation13_spill]] %s7855_s23  ;;  %s34_s27 = sadd.s32 1, %s7859_s24 }
   0xc   : > { %9084 = sst [smem:[#allocation14_spill]] %s7859_s24  ;;  %p32_p0 = scmp.ge.s32.totalorder %s31_s26, 2 }
   0xd   : > { %s5774_s28 = sshll.u32 %s7859_s24, 1  ;;  %s66_s30 = sadd.s32 1, %s7843_s20 }
   0xe   : > { %s7950_s29 = sadd.s32 %s7855_s23, %s5774_s28  ;;  %s9116_s26 = smov (%p32_p0, %s31_s26), 0 }
   0xf   : > { %9085 = sst [smem:[#allocation15_spill]] %s9116_s26  ;;  %s9118_s27 = smov (!%p32_p0, %s34_s27), %s7859_s24 }
  0x10   : > { %p73_p1 = scmp.ne.s32.totalorder %s7843_s20, %s7839_s19  ;;  %p74_p2 = scmp.eq.s32.totalorder %s7863_s25, 0 }
  0x11   : > { %p36_p3 = scmp.ge.s32.totalorder %s9118_s27, 2  ;;  %p6600_p5 = scmp.lt.s32.totalorder %s7863_s25, 4 }
  0x12   : > { %p75_p4 = por %p74_p2, %p73_p1  ;;  %s7963_s6 = sand.u32 1, %s7843_s20  }
  0x13   : > { %s9120_s27 = smov (%p36_p3, %s9118_s27), 0  ;;  %s247_s13 = sand.u32 1, %s7863_s25  }
  0x14   : > { %9086 = sst [smem:[#allocation16_spill]] %s9120_s27  ;;  %s5775_s8 = sshll.u32 %s9120_s27, 1 }
  0x15   : > { %s62_s10 = sadd.s32 %s5775_s8, %s9116_s26  ;;  %p7969_p6 = pnand %p6600_p5, %p75_p4 }
  0x16   : > { %s63_s12 = ssub.s32 %s7950_s29, %s62_s10  ;;  %s5786_s14 = sshll.u32 %s7963_s6, 1 }
  0x17   : > { %s9087_s11 = scalar_select %p7969_p6, 1, 0 }
  0x18   : > { %p64_p7 = scmp.eq.s32.totalorder %s63_s12, 0  ;;  %s6469_s16 = sshll.u32 %s7950_s29, 5 }
  0x19   : > { %s9089_s2 = sld [smem:[#allocation18_spill]]  ;;  %s251_s8 = scalar_lea.vmem [#allocation4], %s5786_s14 }
  0x1a   : > { %s7977_s15 = scalar_select %p64_p7, %s7843_s20, %s66_s30  }
  0x1b   : > { %s261_s9 = sshll.u32 %s251_s8, 4  ;;  %s7988_s7 = scalar_lea.sflag [#allocation5], %s247_s13  ;;  %s7985_s9 = int_to_ptr.vmem [resolvable:$true] %s261_s9 }
  0x1c   : > { %9088 = sst [smem:[#allocation17_spill]] %s7977_s15  ;;  %p7994_p9 = pneg %p7969_p6 }
  0x1e   : > { %s9090_s30 = scalar_select %p7994_p9, 1, 0 }
  0x1f   : > { %s7983_s24 = scalar_lea.hbm %s9089_s2, %s6469_s16  ;;  %s7676_s14 = scalar_lea.hbm %s9089_s2, 128 }
  0x20   : > { %s7671_s12 = scalar_lea.hbm %s7983_s24, 32  ;;  %p7677_p12 = scmp.lt.u32.totalorder %s7983_s24, %s9089_s2 }
  0x21   : > { %p7672_p8 = scmp.ne.s32.totalorder %s7983_s24, %s7671_s12  ;;  %p7678_p13 = scmp.lt.u32.totalorder %s7676_s14, %s7671_s12 }
  0x22   : > { %p7680_p1 = scmp.lt.u32.totalorder %s7671_s12, %s7983_s24 }
  0x23   : > { %p7674_p10 = pnand %p7994_p9, %p7672_p8  ;;  %p7679_p0 = por %p7678_p13, %p7677_p12 }
  0x25   : > { %p7675_p11 = pneg %p7674_p10  ;;  %p7681_p2 = por %p7680_p1, %p7679_p0 }
  0x27   : > { %p7682_p3 = pnand %p7681_p2, %p7675_p11 }
  0x29   : > { %7685 = shalt.err (!%p7682_p3)
}
  0x2a   : > { %s7686_s13 = scalar_lea.vmem %s7985_s9, 32  ;;  %s7865_s16 = smov [#allocation4]  }
  0x2b   : > { %p7687_p4 = scmp.ne.s32.totalorder %s7985_s9, %s7686_s13  ;;  %s7691_s17 = sshll.u32 %s7865_s16, 4  ;;  %s7692_s17 = int_to_ptr.vmem [resolvable:$false] %s7691_s17 }
  0x2c   : > { %s7693_s28 = scalar_lea.vmem %s7692_s17, 64  ;;  %p7694_p8 = scmp.lt.s32.totalorder %s7985_s9, %s7692_s17 }
  0x2d   : > { %p7689_p5 = pnand %p7687_p4, %p7994_p9  ;;  %p7695_p10 = scmp.lt.s32.totalorder %s7693_s28, %s7686_s13 }
  0x2f   : > { %p7690_p7 = pneg %p7689_p5  ;;  %p7696_p12 = por %p7695_p10, %p7694_p8 }
  0x31   : > { %p7697_p13 = pnand %p7696_p12, %p7690_p7 }
  0x33   : > { %7700 = shalt.err (!%p7697_p13)
}
  0x34   : > { %6595 = dma.hbm_to_vmem [thread:$0]  (!%p7969_p6), %s7983_s24, 32, %s7985_s9, %s7988_s7  }
  0x35   : > { %s9068_s14 = sadd.s32 4294967295, %s7863_s25   ;;  %p79_p11 = scmp.ne.s32.totalorder %s7839_s19, %s7835_s18 }
  0x36   : > { %p8024_p0 = scmp.eq.s32.totalorder %s9068_s14, 0  ;;  %p5780_p1 = scmp.ge.s32.totalorder %s7863_s25, 1 }
  0x37   : > { %p197_p2 = scmp.lt.s32.totalorder %s7863_s25, 5  ;;  %s7866_s18 = smov [#allocation7]  }
  0x38   : > { %s9091_s8 = scalar_select %p8024_p0, 1, 0 }
  0x39   : > { %p8032_p3 = por %p8024_p0, %p79_p11  ;;  %p8036_p4 = pnand %p5780_p1, %p197_p2 }
  0x3a   : > { %s213_s24 = sshll.u32 %s7866_s18, 4  ;;  %s9094_s9 = sshll.u32 %s7950_s29, 7  ;;  %s214_s24 = int_to_ptr.vmem [resolvable:$true] %s213_s24 }
  0x3b   : > { %s9092_s13 = scalar_select %p8032_p3, 1, 0 }
  0x3c   : > { %s9093_s16 = scalar_select %p8036_p4, 1, 0 }
  0x3d   : > { %p6585_p5 = pneg %p8036_p4  ;;  %s8047_s14 = scalar_lea.hbm %s9062_s1, %s9094_s9 }
  0x3e   : > { %s9096_s12 = smul.u32 5184, %s7963_s6  ;;  %s7701_s23 = scalar_lea.hbm %s9065_s4, 16 }
  0x3f   : > { %p8051_p7 = pnand %p6585_p5, %p8024_p0  ;;  %p7702_p8 = scmp.ne.s32.totalorder %s9065_s4, %s7701_s23 }
  0x40   : > { %s228_s2 = scalar_lea.vmem [#allocation2], %s9096_s12  ;;  %p7708_p11 = scmp.lt.u32.totalorder %s7701_s23, %s9065_s4 }
  0x41   : > { %s237_s27 = sshll.u32 %s228_s2, 4  ;;  %p7703_p10 = pneg %p8051_p7  ;;  %s8057_s27 = int_to_ptr.vmem [resolvable:$true] %s237_s27 }
  0x43   : > { %p7704_p12 = pnand %p7703_p10, %p7702_p8 }
  0x45   : > { %p7705_p13 = pneg %p7704_p12 }
  0x47   : > { %p7710_p1 = pnand %p7708_p11, %p7705_p13 }
  0x49   : > { %7713 = shalt.err (!%p7710_p1)
}
  0x4a   : > { %s7714_s2 = scalar_lea.vmem %s214_s24, 16  ;;  %s7721_s26 = scalar_lea.vmem %s214_s24, 32 }
  0x4b   : > { %p7715_p2 = scmp.ne.s32.totalorder %s214_s24, %s7714_s2  ;;  %p7722_p3 = scmp.lt.s32.totalorder %s214_s24, %s214_s24 }
  0x4c   : > { %p7723_p4 = scmp.lt.s32.totalorder %s7721_s26, %s7714_s2 }
  0x4d   : > { %p7717_p5 = pnand %p7715_p2, %p7703_p10 }
  0x4e   : > { %p7724_p6 = por %p7723_p4, %p7722_p3 }
  0x4f   : > { %p7718_p0 = pneg %p7717_p5 }
  0x51   : > { %p7725_p9 = pnand %p7724_p6, %p7718_p0 }
  0x53   : > { %7728 = shalt.err (!%p7725_p9)
}
  0x54   : > { %6588 = dma.hbm_to_vmem [thread:$0]  (!%p8051_p7), %s9065_s4, 16, %s214_s24, [#allocation8]  }
  0x55   : > { %s225_s23 = scalar_lea.sflag [#allocation3], %s7963_s6  ;;  %s7729_s12 = scalar_lea.hbm %s8047_s14, 82944 }
  0x56   : > { %p7730_p8 = scmp.ne.s32.totalorder %s8047_s14, %s7729_s12  ;;  %p9097_p10 = scmp.ne.s32.totalorder %s9090_s30, 0 }
  0x57   : > { %s7734_s10 = scalar_lea.hbm %s9062_s1, 331776  ;;  %p7735_p6 = scmp.lt.u32.totalorder %s8047_s14, %s9062_s1 }
  0x58   : > { %p7732_p12 = pnand %p7730_p8, %p9097_p10  ;;  %p7736_p9 = scmp.lt.u32.totalorder %s7734_s10, %s7729_s12 }
  0x59   : > { %p7738_p4 = scmp.lt.u32.totalorder %s7729_s12, %s8047_s14 }
  0x5a   : > { %p7733_p3 = pneg %p7732_p12  ;;  %p7737_p0 = por %p7736_p9, %p7735_p6 }
  0x5c   : > { %p7739_p13 = por %p7738_p4, %p7737_p0 }
  0x5e   : > { %p7740_p11 = pnand %p7739_p13, %p7733_p3 }
  0x60   : > { %7743 = shalt.err (!%p7740_p11)
}
  0x61   : > { %s7744_s24 = scalar_lea.vmem %s8057_s27, 82944  ;;  %s7867_s2 = smov [#allocation2]  }
  0x62   : > { %p7745_p7 = scmp.ne.s32.totalorder %s8057_s27, %s7744_s24  ;;  %s7749_s26 = sshll.u32 %s7867_s2, 4  ;;  %s7750_s26 = int_to_ptr.vmem [resolvable:$false] %s7749_s26 }
  0x63   : > { %s7751_s20 = scalar_lea.vmem %s7750_s26, 165888  ;;  %p7752_p5 = scmp.lt.s32.totalorder %s8057_s27, %s7750_s26 }
  0x64   : > { %p7747_p1 = pnand %p7745_p7, %p9097_p10  ;;  %p7753_p8 = scmp.lt.s32.totalorder %s7751_s20, %s7744_s24 }
  0x66   : > { %p7748_p2 = pneg %p7747_p1  ;;  %p7754_p12 = por %p7753_p8, %p7752_p5 }
  0x68   : > { %p7755_p6 = pnand %p7754_p12, %p7748_p2 }
  0x6a   : > { %7758 = shalt.err (!%p7755_p6)
}
  0x6b   : > { %s7868_s15 = smov 512   ;;  %s7869_s12 = smov 128  }
  0x6c   : > { %s7870_s28 = smov 8   ;;  %p9098_p3 = scmp.ne.s32.totalorder %s9087_s11, 0 }
  0x6d   : > { %s9099_s18 = sshll.u32 %s7950_s29, 11  ;;  %s9100_s24 = sshll.u32 %s7963_s6, 7 }
  0x6e   : > { %6592 = dma.hbm_to_vmem [thread:$0]  (!%p9098_p3), %s8047_s14, 82944, %s8057_s27, %s225_s23, %s7868_s15, %s7869_s12, %s7870_s28  }
  0x6f   : > { %s8104_s17 = scalar_lea.hbm %s9064_s3, %s9099_s18  ;;  %s272_s2 = scalar_lea.vmem [#allocation6], %s9100_s24 }
  0x70   : > { %s281_s26 = sshll.u32 %s272_s2, 4  ;;  %s7759_s20 = scalar_lea.hbm %s8104_s17, 2048  ;;  %s8108_s26 = int_to_ptr.vmem [resolvable:$true] %s281_s26 }
  0x71   : > { %p7760_p9 = scmp.ne.s32.totalorder %s8104_s17, %s7759_s20  ;;  %s7764_s14 = scalar_lea.hbm %s9064_s3, 8192 }
  0x72   : > { %p7765_p13 = scmp.lt.u32.totalorder %s8104_s17, %s9064_s3  ;;  %p7766_p11 = scmp.lt.u32.totalorder %s7764_s14, %s7759_s20 }
  0x73   : > { %p7762_p0 = pnand %p7760_p9, %p9097_p10  ;;  %p7768_p1 = scmp.lt.u32.totalorder %s7759_s20, %s8104_s17 }
  0x74   : > { %p7767_p7 = por %p7766_p11, %p7765_p13 }
  0x75   : > { %p7763_p4 = pneg %p7762_p0 }
  0x76   : > { %p7769_p2 = por %p7768_p1, %p7767_p7 }
  0x78   : > { %p7770_p5 = pnand %p7769_p2, %p7763_p4 }
  0x7a   : > { %7773 = shalt.err (!%p7770_p5)
}
  0x7b   : > { %s7774_s6 = scalar_lea.vmem %s8108_s26, 2048  ;;  %s7871_s12 = smov [#allocation6]  }
  0x7c   : > { %p7775_p8 = scmp.ne.s32.totalorder %s8108_s26, %s7774_s6  ;;  %s7779_s28 = sshll.u32 %s7871_s12, 4  ;;  %s7780_s28 = int_to_ptr.vmem [resolvable:$false] %s7779_s28 }
  0x7d   : > { %s7781_s18 = scalar_lea.vmem %s7780_s28, 4096  ;;  %p7782_p9 = scmp.lt.s32.totalorder %s8108_s26, %s7780_s28 }
  0x7e   : > { %p7777_p12 = pnand %p7775_p8, %p9097_p10  ;;  %p7783_p0 = scmp.lt.s32.totalorder %s7781_s18, %s7774_s6 }
  0x80   : > { %p7778_p6 = pneg %p7777_p12  ;;  %p7784_p13 = por %p7783_p0, %p7782_p9 }
  0x82   : > { %p7785_p11 = pnand %p7784_p13, %p7778_p6 }
  0x84   : > { %7788 = shalt.err (!%p7785_p11)
}
  0x85   : > { %s7872_s10 = smov 64   ;;  %s7873_s9 = smov 4  }
  0x86   : > { %6598 = dma.hbm_to_vmem [thread:$0]  (!%p9098_p3), %s8104_s17, 2048, %s8108_s26, %s7988_s7, %s7872_s10, %s7872_s10, %s7873_s9  }
  0x87   : > { %p9101_p10 = scmp.ne.s32.totalorder %s9093_s16, 0 }
  0x88   : > { %s295_s30 = sand.u32 (!%p9101_p10), 1, %s7839_s19   ;;  %p9102_p4 = scmp.ne.s32.totalorder (!%p9101_p10), %s9092_s13, 0 }
  0x89   : > { %293 = sbr.rel (%p9101_p10) target bundleno = 1263 (0x4ef), region = 40  ;;  %s296_s2 = scalar_lea.sflag (!%p9101_p10), [#allocation3], %s295_s30 }
  0x8a   : > { %s6574_s24 = smul.u32 (!%p9101_p10), 5184, %s295_s30 }
  0x8c   : > { %s8135_s20 = scalar_lea.vmem (!%p9101_p10), [#allocation2], %s6574_s24 }
  0x90   : > { %7822 = dma.done.wait (%p9102_p4), %s296_s2, 82944  }
  0x91   : > { %7824 = vsyncadd (%p9102_p4), %s296_s2, 4294884352  ;;  %s9103_s27 = sadd.s32 4294967295, %s7863_s25   ;;  %s5795_s7 = sshll.u32 %s295_s30, 1 }
  0x92   : > { %s304_s11 = sand.u32 1, %s9103_s27   ;;  %s8143_s16 = scalar_lea.vmem [#allocation4], %s5795_s7 }
  0x93   : > { %s305_s17 = scalar_lea.sflag [#allocation5], %s304_s11 }
  0x94   : > { %7826 = dma.done.wait (%p9102_p4), %s305_s17, 2080  }
  0x95   : > { %7828 = vsyncadd (%p9102_p4), %s305_s17, 4294965216  ;;  %s5796_s26 = sshll.u32 %s295_s30, 7  ;;  %p9104_p3 = scmp.ne.s32.totalorder %s9091_s8, 0 }
  0x96   : > { %s8149_s29 = scalar_lea.vmem [#allocation6], %s5796_s26 }
  0x97   : > { %7830 = dma.done.wait (%p9104_p3), [#allocation8], 16  }
  0x98   : > { %7832 = vsyncadd (%p9104_p3), [#allocation8], 4294967280  ;;  %p366_p7 = scmp.lt.s32.totalorder %s7851_s22, 1  ;;  %v6674_v0 = vld [vmem:[%s8135_s20 + $0x4] ss:$8 sps:$4 sm:$0xff]   ;;  %v1027_v36 = vlaneseq  ;;  %v373_v56 = vld [vmem:[%s9061_s0 + $0x10] sm:$0xff] }
  0x99   : > { %v6676_v1 = vld [vmem:[%s8135_s20 + $0xa04] ss:$8 sps:$4 sm:$0xff]   ;;  %4586 = vmatprep.subr.bf16.mxu1 %v6674_v0  ;;  %v6678_v2 = vld [vmem:[%s8135_s20] ss:$8 sps:$4 sm:$0xff]   ;;  %v6680_v4 = vld [vmem:[%s8135_s20 + $0x14] ss:$8 sps:$4 sm:$0xff]   ;;  %v1141_v60 = vcombine.high %v373_v56, %v373_v56 }
  0x9a   : > { %s367_s13 = scalar_select %p366_p7, %s7851_s22, 1  ;;  %v6679_v3 = vld [vmem:[%s8135_s20 + $0xa00] ss:$8 sps:$4 sm:$0xff]   ;;  %4996 = vmatprep.subr.bf16.mxu0 %v6676_v1  ;;  %4587 = vmatpush1.bf16.msra.mxu1 %v6678_v2  ;;  %v6682_v5 = vld [vmem:[%s8135_s20 + $0xa14] ss:$8 sps:$4 sm:$0xff]   ;;  %v8201_v42 = vshrl.u32 %v1027_v36, 7 }
  0x9b   : > { %4997 = vmatpush1.bf16.msra.mxu0 %v6679_v3  ;;  %v6684_v6 = vld [vmem:[%s8135_s20 + $0x10] ss:$8 sps:$4 sm:$0xff]   ;;  %4588 = vmatprep.subr.bf16.mxu1 %v6680_v4  ;;  %v6686_v8 = vld [vmem:[%s8135_s20 + $0x24] ss:$8 sps:$4 sm:$0xff]   ;;  %v6690_v10 = vld [vmem:[%s8135_s20 + $0x20] ss:$8 sps:$4 sm:$0xff]  }
  0x9c   : > { %s5798_s14 = sshll.u32 %s367_s13, 1  ;;  %v6685_v7 = vld [vmem:[%s8135_s20 + $0xa10] ss:$8 sps:$4 sm:$0xff]   ;;  %4998 = vmatprep.subr.bf16.mxu0 %v6682_v5  ;;  %v6688_v9 = vld [vmem:[%s8135_s20 + $0xa24] ss:$8 sps:$4 sm:$0xff]   ;;  %vm4582_vm0 = vcmask 523264  }
  0x9d   : > { %s8160_s6 = scalar_lea.vmem %s9066_s5, %s5798_s14  ;;  %v6691_v11 = vld [vmem:[%s8135_s20 + $0xa20] ss:$8 sps:$4 sm:$0xff]   ;;  %v6692_v12 = vld [vmem:[%s8135_s20 + $0x34] ss:$8 sps:$4 sm:$0xff]   ;;  %v6696_v14 = vld [vmem:[%s8135_s20 + $0x30] ss:$8 sps:$4 sm:$0xff]  }
  0x9e   : > { %4589 = vmatpush1.bf16.msra.mxu1 %v6684_v6  ;;  %v6694_v13 = vld [vmem:[%s8135_s20 + $0xa34] ss:$8 sps:$4 sm:$0xff]   ;;  %v6697_v15 = vld [vmem:[%s8135_s20 + $0xa30] ss:$8 sps:$4 sm:$0xff]   ;;  %v6698_v16 = vld [vmem:[%s8135_s20 + $0x44] ss:$8 sps:$4 sm:$0xff]  }
  0x9f   : > { %4999 = vmatpush1.bf16.msra.mxu0 %v6685_v7  ;;  %4590 = vmatprep.subr.bf16.mxu1 %v6686_v8  ;;  %v6700_v17 = vld [vmem:[%s8135_s20 + $0xa44] ss:$8 sps:$4 sm:$0xff]   ;;  %v6702_v18 = vld [vmem:[%s8135_s20 + $0x40] ss:$8 sps:$4 sm:$0xff]   ;;  %v6704_v20 = vld [vmem:[%s8135_s20 + $0x54] ss:$8 sps:$4 sm:$0xff]  }
  0xa0   : > { %5000 = vmatprep.subr.bf16.mxu0 %v6688_v9  ;;  %v6703_v19 = vld [vmem:[%s8135_s20 + $0xa40] ss:$8 sps:$4 sm:$0xff]   ;;  %v6706_v21 = vld [vmem:[%s8135_s20 + $0xa54] ss:$8 sps:$4 sm:$0xff]   ;;  %v6708_v22 = vld [vmem:[%s8135_s20 + $0x50] ss:$8 sps:$4 sm:$0xff]  }
  0xa1   : > { %v6709_v23 = vld [vmem:[%s8135_s20 + $0xa50] ss:$8 sps:$4 sm:$0xff]   ;;  %v6710_v24 = vld [vmem:[%s8135_s20 + $0x64] ss:$8 sps:$4 sm:$0xff]   ;;  %v6714_v26 = vld [vmem:[%s8135_s20 + $0x60] ss:$8 sps:$4 sm:$0xff]  }
  0xa2   : > { %4591 = vmatpush1.bf16.msra.mxu1 %v6690_v10  ;;  %v6712_v25 = vld [vmem:[%s8135_s20 + $0xa64] ss:$8 sps:$4 sm:$0xff]   ;;  %v6715_v27 = vld [vmem:[%s8135_s20 + $0xa60] ss:$8 sps:$4 sm:$0xff]   ;;  %v6716_v28 = vld [vmem:[%s8135_s20 + $0x74] ss:$8 sps:$4 sm:$0xff]  }
  0xa3   : > { %5001 = vmatpush1.bf16.msra.mxu0 %v6691_v11  ;;  %4592 = vmatprep.subr.bf16.mxu1 %v6692_v12  ;;  %v6718_v29 = vld [vmem:[%s8135_s20 + $0xa74] ss:$8 sps:$4 sm:$0xff]   ;;  %v6720_v30 = vld [vmem:[%s8135_s20 + $0x70] ss:$8 sps:$4 sm:$0xff]   ;;  %v6722_v32 = vld [vmem:[%s8135_s20 + $0x84] ss:$8 sps:$4 sm:$0xff]  }
  0xa4   : > { %5002 = vmatprep.subr.bf16.mxu0 %v6694_v13  ;;  %v6721_v31 = vld [vmem:[%s8135_s20 + $0xa70] ss:$8 sps:$4 sm:$0xff]   ;;  %v6724_v33 = vld [vmem:[%s8135_s20 + $0xa84] ss:$8 sps:$4 sm:$0xff]   ;;  %v6726_v34 = vld [vmem:[%s8135_s20 + $0x80] ss:$8 sps:$4 sm:$0xff]  }
  0xa5   : > { %v6727_v35 = vld [vmem:[%s8135_s20 + $0xa80] ss:$8 sps:$4 sm:$0xff]   ;;  %v7874_v37 = vmov 1966171168   ;;  %v6728_v39 = vld [vmem:[%s8135_s20 + $0x94] ss:$8 sps:$4 sm:$0xff]  }
  0xa6   : > { %4593 = vmatpush1.bf16.msra.mxu1 %v6696_v14  ;;  %v1045_v38 = vunpack.c.l.s4 %v7874_v37  ;;  %v6730_v40 = vld [vmem:[%s8135_s20 + $0xa94] ss:$8 sps:$4 sm:$0xff]   ;;  %v6732_v41 = vld [vmem:[%s8135_s20 + $0x90] ss:$8 sps:$4 sm:$0xff]   ;;  %v6734_v45 = vld [vmem:[%s8135_s20 + $0xa4] ss:$8 sps:$4 sm:$0xff]  }
  0xa7   : > { %5003 = vmatpush1.bf16.msra.mxu0 %v6697_v15  ;;  %4594 = vmatprep.subr.bf16.mxu1 %v6698_v16  ;;  %v6733_v44 = vld [vmem:[%s8135_s20 + $0xa90] ss:$8 sps:$4 sm:$0xff]   ;;  %v6736_v46 = vld [vmem:[%s8135_s20 + $0xaa4] ss:$8 sps:$4 sm:$0xff]   ;;  %v6738_v47 = vld [vmem:[%s8135_s20 + $0xa0] ss:$8 sps:$4 sm:$0xff]  }
  0xa8   : > { %5004 = vmatprep.subr.bf16.mxu0 %v6700_v17  ;;  %v1046_v43 = vunpack.c.0.s8 %v1045_v38  ;;  %v6739_v48 = vld [vmem:[%s8135_s20 + $0xaa0] ss:$8 sps:$4 sm:$0xff]   ;;  %v6740_v50 = vld [vmem:[%s8135_s20 + $0xb4] ss:$8 sps:$4 sm:$0xff]   ;;  %v6744_v53 = vld [vmem:[%s8135_s20 + $0xb0] ss:$8 sps:$4 sm:$0xff]  }
  0xa9   : > { %v6742_v51 = vld [vmem:[%s8135_s20 + $0xab4] ss:$8 sps:$4 sm:$0xff]   ;;  %v8216_v52 = vld [vmem:[%s9061_s0] sm:$0xff]  ;;  %v6745_v55 = vld [vmem:[%s8135_s20 + $0xab0] ss:$8 sps:$4 sm:$0xff]   ;;  %p6465_p1 = scmp.ne.s32.totalorder %s7847_s21, 0 }
  0xaa   : > { %4595 = vmatpush1.bf16.msra.mxu1 %v6702_v18  ;;  %v8209_v49 = vsub.s32 %v1046_v43, %v8201_v42  ;;  %v6746_v57 = vld [vmem:[%s8135_s20 + $0xc4] ss:$8 sps:$4 sm:$0xff]   ;;  %v6750_v63 = vld [vmem:[%s8135_s20 + $0xc0] ss:$8 sps:$4 sm:$0xff]   ;;  %v6752_v1 = vld [vmem:[%s8135_s20 + $0xd4] ss:$8 sps:$4 sm:$0xff]  }
  0xab   : > { %5005 = vmatpush1.bf16.msra.mxu0 %v6703_v19  ;;  %4596 = vmatprep.subr.bf16.mxu1 %v6704_v20  ;;  %v6748_v58 = vld [vmem:[%s8135_s20 + $0xac4] ss:$8 sps:$4 sm:$0xff]   ;;  %v6751_v0 = vld [vmem:[%s8135_s20 + $0xac0] ss:$8 sps:$4 sm:$0xff]   ;;  %v6754_v2 = vld [vmem:[%s8135_s20 + $0xad4] ss:$8 sps:$4 sm:$0xff]  }
  0xac   : > { %5006 = vmatprep.subr.bf16.mxu0 %v6706_v21  ;;  %v1050_v54 = vrot.slane %v8216_v52, %v8209_v49  ;;  %v1155_v62 = vrot.slane %v1141_v60, %v8209_v49  ;;  %v6756_v5 = vld [vmem:[%s8135_s20 + $0xd0] ss:$8 sps:$4 sm:$0xff]   ;;  %v6758_v7 = vld [vmem:[%s8135_s20 + $0xe4] ss:$8 sps:$4 sm:$0xff]   ;;  %v6762_v9 = vld [vmem:[%s8135_s20 + $0xe0] ss:$8 sps:$4 sm:$0xff]  }
  0xad   : > { %v6757_v6 = vld [vmem:[%s8135_s20 + $0xad0] ss:$8 sps:$4 sm:$0xff]   ;;  %v6760_v8 = vld [vmem:[%s8135_s20 + $0xae4] ss:$8 sps:$4 sm:$0xff]   ;;  %v6763_v10 = vld [vmem:[%s8135_s20 + $0xae0] ss:$8 sps:$4 sm:$0xff]  }
  0xae   : > { %4597 = vmatpush1.bf16.msra.mxu1 %v6708_v22  ;;  %v1058_v59 = vcombine.high %v1050_v54, %v1050_v54  ;;  %v1157_v3 = vcombine.high %v1155_v62, %v1155_v62  ;;  %v6764_v11 = vld [vmem:[%s8135_s20 + $0xf4] ss:$8 sps:$4 sm:$0xff]   ;;  %v6768_v13 = vld [vmem:[%s8135_s20 + $0xf0] ss:$8 sps:$4 sm:$0xff]   ;;  %v6773_v15 = vld [vmem:[%s8135_s20 + $0x104] ss:$8 sps:$4 sm:$0xff]   ;;  %v8247_v17 = vrot.slane %v1050_v54, %v8209_v49  ;;  %v8250_v18 = vrot.slane %v1155_v62, %v8209_v49 }
  0xaf   : > { %5007 = vmatpush1.bf16.msra.mxu0 %v6709_v23  ;;  %4598 = vmatprep.subr.bf16.mxu1 %v6710_v24  ;;  %v6766_v12 = vld [vmem:[%s8135_s20 + $0xaf4] ss:$8 sps:$4 sm:$0xff]   ;;  %v6769_v14 = vld [vmem:[%s8135_s20 + $0xaf0] ss:$8 sps:$4 sm:$0xff]   ;;  %v6777_v16 = vld [vmem:[%s8135_s20 + $0xb04] ss:$8 sps:$4 sm:$0xff]  }
  0xb0   : > { %5008 = vmatprep.subr.bf16.mxu0 %v6712_v25  ;;  %v1080_v61 = vrot.slane %v1058_v59, %v8209_v49  ;;  %v1185_v4 = vrot.slane %v1157_v3, %v8209_v49  ;;  %v6771_v19 = vld [vmem:[%s8135_s20 + $0x100] ss:$8 sps:$4 sm:$0xff]   ;;  %v6780_v21 = vld [vmem:[%s8135_s20 + $0x114] ss:$8 sps:$4 sm:$0xff]   ;;  %v6778_v25 = vld [vmem:[%s8135_s20 + $0x110] ss:$8 sps:$4 sm:$0xff]  }
  0xb1   : > { %v6775_v20 = vld [vmem:[%s8135_s20 + $0xb00] ss:$8 sps:$4 sm:$0xff]   ;;  %v6783_v22 = vld [vmem:[%s8135_s20 + $0xb14] ss:$8 sps:$4 sm:$0xff]   ;;  %v6801_v36 = vld [vmem:[%s8135_s20 + $0xb44] ss:$8 sps:$4 sm:$0xff]  }
  0xb2   : > { %4599 = vmatpush1.bf16.msra.mxu1 %v6714_v26  ;;  %4618 = vmatprep.mubr.bf16.mxu1 %v1080_v61  ;;  %v1090_v23 = vcombine.high %v1080_v61, %v1080_v61  ;;  %v1189_v24 = vcombine.high %v1185_v4, %v1185_v4  ;;  %v6781_v26 = vld [vmem:[%s8135_s20 + $0xb10] ss:$8 sps:$4 sm:$0xff]   ;;  %v6796_v37 = vld [vmem:[%s8135_s20 + $0x140] ss:$8 sps:$4 sm:$0xff]   ;;  %v6822_v54 = vld [vmem:[%s8135_s20 + $0x184] ss:$8 sps:$4 sm:$0xff]  }
  0xb3   : > { %5009 = vmatpush1.bf16.msra.mxu0 %v6715_v27  ;;  %4600 = vmatprep.subr.bf16.mxu1 %v6716_v28  ;;  %v6786_v27 = vld [vmem:[%s8135_s20 + $0x124] ss:$8 sps:$4 sm:$0xff]   ;;  %v6799_v38 = vld [vmem:[%s8135_s20 + $0xb40] ss:$8 sps:$4 sm:$0xff]   ;;  %v6805_v43 = vld [vmem:[%s8135_s20 + $0xb50] ss:$8 sps:$4 sm:$0xff]  }
  0xb4   : > { %5010 = vmatprep.subr.bf16.mxu0 %v6718_v29  ;;  %5028 = vmatprep.mubr.bf16.mxu0 %v1185_v4  ;;  %v6789_v28 = vld [vmem:[%s8135_s20 + $0xb24] ss:$8 sps:$4 sm:$0xff]   ;;  %v6784_v29 = vld [vmem:[%s8135_s20 + $0x120] ss:$8 sps:$4 sm:$0xff]   ;;  %v6831_v59 = vld [vmem:[%s8135_s20 + $0xb94] ss:$8 sps:$4 sm:$0xff]  }
  0xb5   : > { %v6820_v56 = vld [vmem:[%s8135_s20 + $0x180] ss:$8 sps:$4 sm:$0xff]   ;;  %v6826_v60 = vld [vmem:[%s8135_s20 + $0x190] ss:$8 sps:$4 sm:$0xff]   ;;  %v6834_v62 = vld [vmem:[%s8135_s20 + $0x1a4] ss:$8 sps:$4 sm:$0xff]  }
  0xb6   : > { %4601 = vmatpush1.bf16.msra.mxu1 %v6720_v30  ;;  %v6787_v30 = vld [vmem:[%s8135_s20 + $0xb20] ss:$8 sps:$4 sm:$0xff]   ;;  %v6829_v61 = vld [vmem:[%s8135_s20 + $0xb90] ss:$8 sps:$4 sm:$0xff]   ;;  %v6843_v3 = vld [vmem:[%s8135_s20 + $0xbb4] ss:$8 sps:$4 sm:$0xff]  }
  0xb7   : > { %5011 = vmatpush1.bf16.msra.mxu0 %v6721_v31  ;;  %4602 = vmatprep.subr.bf16.mxu1 %v6722_v32  ;;  %v6792_v31 = vld [vmem:[%s8135_s20 + $0x134] ss:$8 sps:$4 sm:$0xff]   ;;  %v6838_v4 = vld [vmem:[%s8135_s20 + $0x1b0] ss:$8 sps:$4 sm:$0xff]   ;;  %p5622_p2 = scmp.eq.s32.totalorder (!%p6465_p1), %s7851_s22, 0 }
  0xb8   : > { %5012 = vmatprep.subr.bf16.mxu0 %v6724_v33  ;;  %v6795_v32 = vld [vmem:[%s8135_s20 + $0xb34] ss:$8 sps:$4 sm:$0xff]   ;;  %v6790_v33 = vld [vmem:[%s8135_s20 + $0x130] ss:$8 sps:$4 sm:$0xff]  }
  0xba   : > { %4603 = vmatpush1.bf16.msra.mxu1 %v6726_v34  ;;  %v6793_v34 = vld [vmem:[%s8135_s20 + $0xb30] ss:$8 sps:$4 sm:$0xff]  }
  0xbb   : > { %5013 = vmatpush1.bf16.msra.mxu0 %v6727_v35  ;;  %4604 = vmatprep.subr.bf16.mxu1 %v6728_v39  ;;  %v6798_v35 = vld [vmem:[%s8135_s20 + $0x144] ss:$8 sps:$4 sm:$0xff]   ;;  %v6804_v39 = vld [vmem:[%s8135_s20 + $0x154] ss:$8 sps:$4 sm:$0xff]  }
  0xbc   : > { %5014 = vmatprep.subr.bf16.mxu0 %v6730_v40  ;;  %v6807_v40 = vld [vmem:[%s8135_s20 + $0xb54] ss:$8 sps:$4 sm:$0xff]  }
  0xbe   : > { %4605 = vmatpush1.bf16.msra.mxu1 %v6732_v41  ;;  %v6802_v41 = vld [vmem:[%s8135_s20 + $0x150] ss:$8 sps:$4 sm:$0xff]  }
  0xbf   : > { %5015 = vmatpush1.bf16.msra.mxu0 %v6733_v44  ;;  %4606 = vmatprep.subr.bf16.mxu1 %v6734_v45  ;;  %v6810_v44 = vld [vmem:[%s8135_s20 + $0x164] ss:$8 sps:$4 sm:$0xff]  }
  0xc0   : > { %5016 = vmatprep.subr.bf16.mxu0 %v6736_v46  ;;  %v6813_v45 = vld [vmem:[%s8135_s20 + $0xb64] ss:$8 sps:$4 sm:$0xff]   ;;  %v6808_v46 = vld [vmem:[%s8135_s20 + $0x160] ss:$8 sps:$4 sm:$0xff]  }
  0xc2   : > { %4607 = vmatpush1.bf16.msra.mxu1 %v6738_v47  ;;  %v6811_v47 = vld [vmem:[%s8135_s20 + $0xb60] ss:$8 sps:$4 sm:$0xff]  }
  0xc3   : > { %5017 = vmatpush1.bf16.msra.mxu0 %v6739_v48  ;;  %4608 = vmatprep.subr.bf16.mxu1 %v6740_v50  ;;  %v6816_v48 = vld [vmem:[%s8135_s20 + $0x174] ss:$8 sps:$4 sm:$0xff]  }
  0xc4   : > { %5018 = vmatprep.subr.bf16.mxu0 %v6742_v51  ;;  %v6819_v50 = vld [vmem:[%s8135_s20 + $0xb74] ss:$8 sps:$4 sm:$0xff]   ;;  %v6814_v51 = vld [vmem:[%s8135_s20 + $0x170] ss:$8 sps:$4 sm:$0xff]  }
  0xc6   : > { %4609 = vmatpush1.bf16.msra.mxu1 %v6744_v53  ;;  %v6817_v53 = vld [vmem:[%s8135_s20 + $0xb70] ss:$8 sps:$4 sm:$0xff]  }
  0xc7   : > { %5019 = vmatpush1.bf16.msra.mxu0 %v6745_v55  ;;  %4610 = vmatprep.subr.bf16.mxu1 %v6746_v57  ;;  %v6825_v55 = vld [vmem:[%s8135_s20 + $0xb84] ss:$8 sps:$4 sm:$0xff]   ;;  %v6823_v57 = vld [vmem:[%s8135_s20 + $0xb80] ss:$8 sps:$4 sm:$0xff]  }
  0xc8   : > { %5020 = vmatprep.subr.bf16.mxu0 %v6748_v58  ;;  %v6828_v58 = vld [vmem:[%s8135_s20 + $0x194] ss:$8 sps:$4 sm:$0xff]  }
  0xca   : > { %4611 = vmatpush1.bf16.msra.mxu1 %v6750_v63  ;;  %v6837_v63 = vld [vmem:[%s8135_s20 + $0xba4] ss:$8 sps:$4 sm:$0xff]  }
  0xcb   : > { %5021 = vmatpush1.bf16.msra.mxu0 %v6751_v0  ;;  %4612 = vmatprep.subr.bf16.mxu1 %v6752_v1  ;;  %v6832_v0 = vld [vmem:[%s8135_s20 + $0x1a0] ss:$8 sps:$4 sm:$0xff]  }
  0xcc   : > { %5022 = vmatprep.subr.bf16.mxu0 %v6754_v2  ;;  %v6835_v1 = vld [vmem:[%s8135_s20 + $0xba0] ss:$8 sps:$4 sm:$0xff]   ;;  %v6840_v2 = vld [vmem:[%s8135_s20 + $0x1b4] ss:$8 sps:$4 sm:$0xff]  }
  0xce   : > { %4613 = vmatpush1.bf16.msra.mxu1 %v6756_v5  ;;  %v6841_v5 = vld [vmem:[%s8135_s20 + $0xbb0] ss:$8 sps:$4 sm:$0xff]  }
  0xcf   : > { %5023 = vmatpush1.bf16.msra.mxu0 %v6757_v6  ;;  %4614 = vmatprep.subr.bf16.mxu1 %v6758_v7  ;;  %v6846_v6 = vld [vmem:[%s8135_s20 + $0x1c4] ss:$8 sps:$4 sm:$0xff]  }
  0xd0   : > { %5024 = vmatprep.subr.bf16.mxu0 %v6760_v8  ;;  %v6849_v7 = vld [vmem:[%s8135_s20 + $0xbc4] ss:$8 sps:$4 sm:$0xff]   ;;  %v6844_v8 = vld [vmem:[%s8135_s20 + $0x1c0] ss:$8 sps:$4 sm:$0xff]  }
  0xd2   : > { %4615 = vmatpush1.bf16.msra.mxu1 %v6762_v9  ;;  %v6847_v9 = vld [vmem:[%s8135_s20 + $0xbc0] ss:$8 sps:$4 sm:$0xff]  }
  0xd3   : > { %5025 = vmatpush1.bf16.msra.mxu0 %v6763_v10  ;;  %4616 = vmatprep.subr.bf16.mxu1 %v6764_v11  ;;  %v6852_v10 = vld [vmem:[%s8135_s20 + $0x1d4] ss:$8 sps:$4 sm:$0xff]  }
  0xd4   : > { %5026 = vmatprep.subr.bf16.mxu0 %v6766_v12  ;;  %v6855_v11 = vld [vmem:[%s8135_s20 + $0xbd4] ss:$8 sps:$4 sm:$0xff]   ;;  %v6850_v12 = vld [vmem:[%s8135_s20 + $0x1d0] ss:$8 sps:$4 sm:$0xff]  }
  0xd6   : > { %4617 = vmatpush1.bf16.msra.mxu1 %v6768_v13  ;;  %v6853_v13 = vld [vmem:[%s8135_s20 + $0xbd0] ss:$8 sps:$4 sm:$0xff]  }
  0xd7   : > { %5027 = vmatpush1.bf16.msra.mxu0 %v6769_v14  ;;  %4627 = vmatprep.subr.bf16.mxu1 %v6773_v15  ;;  %v6858_v14 = vld [vmem:[%s8135_s20 + $0x1e4] ss:$8 sps:$4 sm:$0xff]  }
  0xd8   : > { %5037 = vmatprep.subr.bf16.mxu0 %v6777_v16  ;;  %v6861_v15 = vld [vmem:[%s8135_s20 + $0xbe4] ss:$8 sps:$4 sm:$0xff]   ;;  %v1043_v16 = vcombine.high %v8216_v52, %v8216_v52  ;;  %v6865_v52 = vld [vmem:[%s8135_s20 + $0xbf0] ss:$8 sps:$4 sm:$0xff]  }
  0xd9   : > { %4619 = vmatmul.mubr.bf16.vlgmr.msra.gmra.mrb[0].mxu1 %v8247_v17 }
  0xda   : > { %5029 = vmatmul.mubr.bf16.vlgmr.msra.gmra.mrb[0].mxu0 %v8250_v18  ;;  %4628 = vmatpush1.bf16.msra.mxu1 %v6771_v19  ;;  %v6856_v19 = vld [vmem:[%s8135_s20 + $0x1e0] ss:$8 sps:$4 sm:$0xff]  }
  0xdb   : > { %5038 = vmatpush1.bf16.msra.mxu0 %v6775_v20  ;;  %4629 = vmatprep.subr.bf16.mxu1 %v6780_v21  ;;  %v6859_v20 = vld [vmem:[%s8135_s20 + $0xbe0] ss:$8 sps:$4 sm:$0xff]   ;;  %v6864_v21 = vld [vmem:[%s8135_s20 + $0x1f4] ss:$8 sps:$4 sm:$0xff]  }
  0xdc   : > { %5039 = vmatprep.subr.bf16.mxu0 %v6783_v22  ;;  %4659 = vmatprep.mubr.bf16.mxu1 %v1090_v23  ;;  %v6867_v22 = vld [vmem:[%s8135_s20 + $0xbf4] ss:$8 sps:$4 sm:$0xff]   ;;  %v8317_v23 = vrot.slane %v1043_v16, %v8209_v49  ;;  %v6934_v16 = vld [vmem:[%s8135_s20 + $0x2b0] ss:$8 sps:$4 sm:$0xff]  }
  0xdd   : > { %5069 = vmatprep.mubr.bf16.mxu0 %v1189_v24  ;;  %v6862_v24 = vld [vmem:[%s8135_s20 + $0x1f0] ss:$8 sps:$4 sm:$0xff]  }
  0xde   : > { %4630 = vmatpush1.bf16.msra.mxu1 %v6778_v25  ;;  %v6870_v25 = vld [vmem:[%s8135_s20 + $0x204] ss:$8 sps:$4 sm:$0xff]  }
  0xdf   : > { %5040 = vmatpush1.bf16.msra.mxu0 %v6781_v26  ;;  %4631 = vmatprep.subr.bf16.mxu1 %v6786_v27  ;;  %v6873_v26 = vld [vmem:[%s8135_s20 + $0xc04] ss:$8 sps:$4 sm:$0xff]   ;;  %v1059_v27 = vcombine.high %v8317_v23, %v8317_v23 }
  0xe0   : > { %5041 = vmatprep.subr.bf16.mxu0 %v6789_v28  ;;  %v1088_v28 = vcombine.high %v8247_v17, %v8247_v17  ;;  %v8339_v17 = vld [vmem:[%s9061_s0 + $0x18] sm:$0xff] }
  0xe2   : > { %4632 = vmatpush1.bf16.msra.mxu1 %v6784_v29  ;;  %v1187_v29 = vcombine.high %v8250_v18, %v8250_v18  ;;  %v6874_v18 = vld [vmem:[%s8135_s20 + $0x210] ss:$8 sps:$4 sm:$0xff]  }
  0xe3   : > { %5042 = vmatpush1.bf16.msra.mxu0 %v6787_v30  ;;  %4633 = vmatprep.subr.bf16.mxu1 %v6792_v31  ;;  %v6868_v30 = vld [vmem:[%s8135_s20 + $0x200] ss:$8 sps:$4 sm:$0xff]  }
  0xe4   : > { %5043 = vmatprep.subr.bf16.mxu0 %v6795_v32  ;;  %v6871_v31 = vld [vmem:[%s8135_s20 + $0xc00] ss:$8 sps:$4 sm:$0xff]   ;;  %v6876_v32 = vld [vmem:[%s8135_s20 + $0x214] ss:$8 sps:$4 sm:$0xff]  }
  0xe6   : > { %4634 = vmatpush1.bf16.msra.mxu1 %v6790_v33  ;;  %v6879_v33 = vld [vmem:[%s8135_s20 + $0xc14] ss:$8 sps:$4 sm:$0xff]  }
  0xe7   : > { %5044 = vmatpush1.bf16.msra.mxu0 %v6793_v34  ;;  %4635 = vmatprep.subr.bf16.mxu1 %v6798_v35  ;;  %v8334_v34 = vrot.slane %v1059_v27, %v8209_v49  ;;  %v8344_v35 = vrot.slane %v8339_v17, %v8209_v49  ;;  %v6949_v27 = vld [vmem:[%s8135_s20 + $0xcd0] ss:$8 sps:$4 sm:$0xff]  }
  0xe8   : > { %5045 = vmatprep.subr.bf16.mxu0 %v6801_v36  ;;  %v6877_v36 = vld [vmem:[%s8135_s20 + $0xc10] ss:$8 sps:$4 sm:$0xff]  }
  0xea   : > { %4636 = vmatpush1.bf16.msra.mxu1 %v6796_v37  ;;  %v6882_v37 = vld [vmem:[%s8135_s20 + $0x224] ss:$8 sps:$4 sm:$0xff]  }
  0xeb   : > { %5046 = vmatpush1.bf16.msra.mxu0 %v6799_v38  ;;  %4637 = vmatprep.subr.bf16.mxu1 %v6804_v39  ;;  %v6885_v38 = vld [vmem:[%s8135_s20 + $0xc24] ss:$8 sps:$4 sm:$0xff]   ;;  %v1205_v39 = vcombine.high %v8344_v35, %v8344_v35 }
  0xec   : > { %5047 = vmatprep.subr.bf16.mxu0 %v6807_v40  ;;  %v6880_v40 = vld [vmem:[%s8135_s20 + $0x220] ss:$8 sps:$4 sm:$0xff]  }
  0xee   : > { %4638 = vmatpush1.bf16.msra.mxu1 %v6802_v41  ;;  %v8354_v41 = vrot.slane %v1205_v39, %v8209_v49  ;;  %v6964_v39 = vld [vmem:[%s8135_s20 + $0x300] ss:$8 sps:$4 sm:$0xff]  }
  0xef   : > { %5048 = vmatpush1.bf16.msra.mxu0 %v6805_v43  ;;  %4639 = vmatprep.subr.bf16.mxu1 %v6810_v44  ;;  %v6883_v43 = vld [vmem:[%s8135_s20 + $0xc20] ss:$8 sps:$4 sm:$0xff]   ;;  %v6888_v44 = vld [vmem:[%s8135_s20 + $0x234] ss:$8 sps:$4 sm:$0xff]  }
  0xf0   : > { %5049 = vmatprep.subr.bf16.mxu0 %v6813_v45  ;;  %v6891_v45 = vld [vmem:[%s8135_s20 + $0xc34] ss:$8 sps:$4 sm:$0xff]  }
  0xf2   : > { %4640 = vmatpush1.bf16.msra.mxu1 %v6808_v46  ;;  %v6886_v46 = vld [vmem:[%s8135_s20 + $0x230] ss:$8 sps:$4 sm:$0xff]  }
  0xf3   : > { %5050 = vmatpush1.bf16.msra.mxu0 %v6811_v47  ;;  %4641 = vmatprep.subr.bf16.mxu1 %v6816_v48  ;;  %v6889_v47 = vld [vmem:[%s8135_s20 + $0xc30] ss:$8 sps:$4 sm:$0xff]   ;;  %v6894_v48 = vld [vmem:[%s8135_s20 + $0x244] ss:$8 sps:$4 sm:$0xff]  }
  0xf4   : > { %5051 = vmatprep.subr.bf16.mxu0 %v6819_v50  ;;  %v6897_v50 = vld [vmem:[%s8135_s20 + $0xc44] ss:$8 sps:$4 sm:$0xff]  }
  0xf6   : > { %4642 = vmatpush1.bf16.msra.mxu1 %v6814_v51  ;;  %v6892_v51 = vld [vmem:[%s8135_s20 + $0x240] ss:$8 sps:$4 sm:$0xff]  }
  0xf7   : > { %5052 = vmatpush1.bf16.msra.mxu0 %v6817_v53  ;;  %4643 = vmatprep.subr.bf16.mxu1 %v6822_v54  ;;  %v6895_v53 = vld [vmem:[%s8135_s20 + $0xc40] ss:$8 sps:$4 sm:$0xff]   ;;  %v6900_v54 = vld [vmem:[%s8135_s20 + $0x254] ss:$8 sps:$4 sm:$0xff]  }
  0xf8   : > { %5053 = vmatprep.subr.bf16.mxu0 %v6825_v55  ;;  %v6903_v55 = vld [vmem:[%s8135_s20 + $0xc54] ss:$8 sps:$4 sm:$0xff]  }
  0xfa   : > { %4644 = vmatpush1.bf16.msra.mxu1 %v6820_v56  ;;  %v6898_v56 = vld [vmem:[%s8135_s20 + $0x250] ss:$8 sps:$4 sm:$0xff]  }
  0xfb   : > { %5054 = vmatpush1.bf16.msra.mxu0 %v6823_v57  ;;  %4645 = vmatprep.subr.bf16.mxu1 %v6828_v58  ;;  %v6901_v57 = vld [vmem:[%s8135_s20 + $0xc50] ss:$8 sps:$4 sm:$0xff]   ;;  %v6906_v58 = vld [vmem:[%s8135_s20 + $0x264] ss:$8 sps:$4 sm:$0xff]  }
  0xfc   : > { %5055 = vmatprep.subr.bf16.mxu0 %v6831_v59  ;;  %v6909_v59 = vld [vmem:[%s8135_s20 + $0xc64] ss:$8 sps:$4 sm:$0xff]  }
  0xfe   : > { %4646 = vmatpush1.bf16.msra.mxu1 %v6826_v60  ;;  %v6904_v60 = vld [vmem:[%s8135_s20 + $0x260] ss:$8 sps:$4 sm:$0xff]  }
  0xff   : > { %5056 = vmatpush1.bf16.msra.mxu0 %v6829_v61  ;;  %4647 = vmatprep.subr.bf16.mxu1 %v6834_v62  ;;  %v6907_v61 = vld [vmem:[%s8135_s20 + $0xc60] ss:$8 sps:$4 sm:$0xff]   ;;  %v6912_v62 = vld [vmem:[%s8135_s20 + $0x274] ss:$8 sps:$4 sm:$0xff]  }
 0x100   : > { %5057 = vmatprep.subr.bf16.mxu0 %v6837_v63  ;;  %v6915_v63 = vld [vmem:[%s8135_s20 + $0xc74] ss:$8 sps:$4 sm:$0xff]  }
 0x102   : > { %4648 = vmatpush1.bf16.msra.mxu1 %v6832_v0  ;;  %v6910_v0 = vld [vmem:[%s8135_s20 + $0x270] ss:$8 sps:$4 sm:$0xff]  }
 0x103   : > { %5058 = vmatpush1.bf16.msra.mxu0 %v6835_v1  ;;  %4649 = vmatprep.subr.bf16.mxu1 %v6840_v2  ;;  %v6913_v1 = vld [vmem:[%s8135_s20 + $0xc70] ss:$8 sps:$4 sm:$0xff]   ;;  %v6918_v2 = vld [vmem:[%s8135_s20 + $0x284] ss:$8 sps:$4 sm:$0xff]  }
 0x104   : > { %5059 = vmatprep.subr.bf16.mxu0 %v6843_v3  ;;  %v6921_v3 = vld [vmem:[%s8135_s20 + $0xc84] ss:$8 sps:$4 sm:$0xff]  }
 0x106   : > { %4650 = vmatpush1.bf16.msra.mxu1 %v6838_v4  ;;  %v6916_v4 = vld [vmem:[%s8135_s20 + $0x280] ss:$8 sps:$4 sm:$0xff]  }
 0x107   : > { %5060 = vmatpush1.bf16.msra.mxu0 %v6841_v5  ;;  %4651 = vmatprep.subr.bf16.mxu1 %v6846_v6  ;;  %v6919_v5 = vld [vmem:[%s8135_s20 + $0xc80] ss:$8 sps:$4 sm:$0xff]   ;;  %v6924_v6 = vld [vmem:[%s8135_s20 + $0x294] ss:$8 sps:$4 sm:$0xff]  }
 0x108   : > { %5061 = vmatprep.subr.bf16.mxu0 %v6849_v7  ;;  %v6927_v7 = vld [vmem:[%s8135_s20 + $0xc94] ss:$8 sps:$4 sm:$0xff]  }
 0x10a   : > { %4652 = vmatpush1.bf16.msra.mxu1 %v6844_v8  ;;  %v6922_v8 = vld [vmem:[%s8135_s20 + $0x290] ss:$8 sps:$4 sm:$0xff]  }
 0x10b   : > { %5062 = vmatpush1.bf16.msra.mxu0 %v6847_v9  ;;  %4653 = vmatprep.subr.bf16.mxu1 %v6852_v10  ;;  %v6925_v9 = vld [vmem:[%s8135_s20 + $0xc90] ss:$8 sps:$4 sm:$0xff]   ;;  %v6930_v10 = vld [vmem:[%s8135_s20 + $0x2a4] ss:$8 sps:$4 sm:$0xff]  }
 0x10c   : > { %5063 = vmatprep.subr.bf16.mxu0 %v6855_v11  ;;  %v6933_v11 = vld [vmem:[%s8135_s20 + $0xca4] ss:$8 sps:$4 sm:$0xff]  }
 0x10e   : > { %4654 = vmatpush1.bf16.msra.mxu1 %v6850_v12  ;;  %v6928_v12 = vld [vmem:[%s8135_s20 + $0x2a0] ss:$8 sps:$4 sm:$0xff]  }
 0x10f   : > { %5064 = vmatpush1.bf16.msra.mxu0 %v6853_v13  ;;  %4655 = vmatprep.subr.bf16.mxu1 %v6858_v14  ;;  %v6931_v13 = vld [vmem:[%s8135_s20 + $0xca0] ss:$8 sps:$4 sm:$0xff]   ;;  %v6936_v14 = vld [vmem:[%s8135_s20 + $0x2b4] ss:$8 sps:$4 sm:$0xff]  }
 0x110   : > { %5065 = vmatprep.subr.bf16.mxu0 %v6861_v15  ;;  %v6939_v15 = vld [vmem:[%s8135_s20 + $0xcb4] ss:$8 sps:$4 sm:$0xff]  }
 0x112   : > { %4656 = vmatpush1.bf16.msra.mxu1 %v6856_v19  ;;  %v6937_v19 = vld [vmem:[%s8135_s20 + $0xcb0] ss:$8 sps:$4 sm:$0xff]  }
 0x113   : > { %5066 = vmatpush1.bf16.msra.mxu0 %v6859_v20  ;;  %4657 = vmatprep.subr.bf16.mxu1 %v6864_v21  ;;  %v6942_v20 = vld [vmem:[%s8135_s20 + $0x2c4] ss:$8 sps:$4 sm:$0xff]  }
 0x114   : > { %5067 = vmatprep.subr.bf16.mxu0 %v6867_v22  ;;  %v6945_v21 = vld [vmem:[%s8135_s20 + $0xcc4] ss:$8 sps:$4 sm:$0xff]   ;;  %v6940_v22 = vld [vmem:[%s8135_s20 + $0x2c0] ss:$8 sps:$4 sm:$0xff]  }
 0x116   : > { %4658 = vmatpush1.bf16.msra.mxu1 %v6862_v24  ;;  %v6943_v24 = vld [vmem:[%s8135_s20 + $0xcc0] ss:$8 sps:$4 sm:$0xff]  }
 0x117   : > { %5068 = vmatpush1.bf16.msra.mxu0 %v6865_v52  ;;  %4668 = vmatprep.subr.bf16.mxu1 %v6870_v25  ;;  %v6948_v52 = vld [vmem:[%s8135_s20 + $0x2d4] ss:$8 sps:$4 sm:$0xff]  }
 0x118   : > { %5078 = vmatprep.subr.bf16.mxu0 %v6873_v26  ;;  %v6951_v25 = vld [vmem:[%s8135_s20 + $0xcd4] ss:$8 sps:$4 sm:$0xff]   ;;  %v6946_v26 = vld [vmem:[%s8135_s20 + $0x2d0] ss:$8 sps:$4 sm:$0xff]  }
 0x119   : > { %4660 = vmatmul.mubr.bf16.vlgmr.msra.gmra.mrb[0].mxu1 %v1088_v28  ;;  %v6954_v28 = vld [vmem:[%s8135_s20 + $0x2e4] ss:$8 sps:$4 sm:$0xff]  }
 0x11a   : > { %5070 = vmatmul.mubr.bf16.vlgmr.msra.gmra.mrb[0].mxu0 %v1187_v29  ;;  %4669 = vmatpush1.bf16.msra.mxu1 %v6868_v30  ;;  %v6957_v29 = vld [vmem:[%s8135_s20 + $0xce4] ss:$8 sps:$4 sm:$0xff]   ;;  %v6952_v30 = vld [vmem:[%s8135_s20 + $0x2e0] ss:$8 sps:$4 sm:$0xff]  }
 0x11b   : > { %5079 = vmatpush1.bf16.msra.mxu0 %v6871_v31  ;;  %4670 = vmatprep.subr.bf16.mxu1 %v6876_v32  ;;  %v6955_v31 = vld [vmem:[%s8135_s20 + $0xce0] ss:$8 sps:$4 sm:$0xff]   ;;  %v6960_v32 = vld [vmem:[%s8135_s20 + $0x2f4] ss:$8 sps:$4 sm:$0xff]  }
 0x11c   : > { %5080 = vmatprep.subr.bf16.mxu0 %v6879_v33  ;;  %4700 = vmatprep.mubr.bf16.mxu1 %v8334_v34  ;;  %v6963_v33 = vld [vmem:[%s8135_s20 + $0xcf4] ss:$8 sps:$4 sm:$0xff]  }
 0x11d   : > { %5110 = vmatprep.mubr.bf16.mxu0 %v8354_v41 }
 0x11e   : > { %4671 = vmatpush1.bf16.msra.mxu1 %v6874_v18  ;;  %v6958_v18 = vld [vmem:[%s8135_s20 + $0x2f0] ss:$8 sps:$4 sm:$0xff]  }
 0x11f   : > { %5081 = vmatpush1.bf16.msra.mxu0 %v6877_v36  ;;  %4672 = vmatprep.subr.bf16.mxu1 %v6882_v37  ;;  %v6961_v36 = vld [vmem:[%s8135_s20 + $0xcf0] ss:$8 sps:$4 sm:$0xff]   ;;  %v6966_v37 = vld [vmem:[%s8135_s20 + $0x304] ss:$8 sps:$4 sm:$0xff]  }
 0x120   : > { %5082 = vmatprep.subr.bf16.mxu0 %v6885_v38  ;;  %v6969_v38 = vld [vmem:[%s8135_s20 + $0xd04] ss:$8 sps:$4 sm:$0xff]  }
 0x122   : > { %4673 = vmatpush1.bf16.msra.mxu1 %v6880_v40  ;;  %v8415_v40 = vrot.slane %v8317_v23, %v8209_v49  ;;  %v1237_v23 = vcombine.high %v8354_v41, %v8354_v41  ;;  %v6976_v41 = vld [vmem:[%s8135_s20 + $0x320] ss:$8 sps:$4 sm:$0xff]  }
 0x123   : > { %5083 = vmatpush1.bf16.msra.mxu0 %v6883_v43  ;;  %4674 = vmatprep.subr.bf16.mxu1 %v6888_v44  ;;  %v8419_v43 = vrot.slane %v8344_v35, %v8209_v49  ;;  %v6967_v44 = vld [vmem:[%s8135_s20 + $0xd00] ss:$8 sps:$4 sm:$0xff]   ;;  %v6970_v35 = vld [vmem:[%s8135_s20 + $0x310] ss:$8 sps:$4 sm:$0xff]  }
 0x124   : > { %5084 = vmatprep.subr.bf16.mxu0 %v6891_v45  ;;  %v6972_v45 = vld [vmem:[%s8135_s20 + $0x314] ss:$8 sps:$4 sm:$0xff]  }
 0x126   : > { %4675 = vmatpush1.bf16.msra.mxu1 %v6886_v46  ;;  %v6975_v46 = vld [vmem:[%s8135_s20 + $0xd14] ss:$8 sps:$4 sm:$0xff]  }
 0x127   : > { %5085 = vmatpush1.bf16.msra.mxu0 %v6889_v47  ;;  %4676 = vmatprep.subr.bf16.mxu1 %v6894_v48  ;;  %v1091_v47 = vcombine.high %v8334_v34, %v8334_v34  ;;  %v6973_v48 = vld [vmem:[%s8135_s20 + $0xd10] ss:$8 sps:$4 sm:$0xff]   ;;  %v6981_v34 = vld [vmem:[%s8135_s20 + $0xd24] ss:$8 sps:$4 sm:$0xff]  }
 0x128   : > { %5086 = vmatprep.subr.bf16.mxu0 %v6897_v50  ;;  %v6978_v50 = vld [vmem:[%s8135_s20 + $0x324] ss:$8 sps:$4 sm:$0xff]  }
 0x12a   : > { %4677 = vmatpush1.bf16.msra.mxu1 %v6892_v51  ;;  %v6979_v51 = vld [vmem:[%s8135_s20 + $0xd20] ss:$8 sps:$4 sm:$0xff]  }
 0x12b   : > { %5087 = vmatpush1.bf16.msra.mxu0 %v6895_v53  ;;  %4678 = vmatprep.subr.bf16.mxu1 %v6900_v54  ;;  %v6984_v53 = vld [vmem:[%s8135_s20 + $0x334] ss:$8 sps:$4 sm:$0xff]  }
 0x12c   : > { %5088 = vmatprep.subr.bf16.mxu0 %v6903_v55  ;;  %v6987_v54 = vld [vmem:[%s8135_s20 + $0xd34] ss:$8 sps:$4 sm:$0xff]   ;;  %v6982_v55 = vld [vmem:[%s8135_s20 + $0x330] ss:$8 sps:$4 sm:$0xff]  }
 0x12e   : > { %4679 = vmatpush1.bf16.msra.mxu1 %v6898_v56  ;;  %v6985_v56 = vld [vmem:[%s8135_s20 + $0xd30] ss:$8 sps:$4 sm:$0xff]  }
 0x12f   : > { %5089 = vmatpush1.bf16.msra.mxu0 %v6901_v57  ;;  %4680 = vmatprep.subr.bf16.mxu1 %v6906_v58  ;;  %v6990_v57 = vld [vmem:[%s8135_s20 + $0x344] ss:$8 sps:$4 sm:$0xff]  }
 0x130   : > { %5090 = vmatprep.subr.bf16.mxu0 %v6909_v59  ;;  %v6993_v58 = vld [vmem:[%s8135_s20 + $0xd44] ss:$8 sps:$4 sm:$0xff]   ;;  %v6988_v59 = vld [vmem:[%s8135_s20 + $0x340] ss:$8 sps:$4 sm:$0xff]  }
 0x132   : > { %4681 = vmatpush1.bf16.msra.mxu1 %v6904_v60  ;;  %v6991_v60 = vld [vmem:[%s8135_s20 + $0xd40] ss:$8 sps:$4 sm:$0xff]  }
 0x133   : > { %5091 = vmatpush1.bf16.msra.mxu0 %v6907_v61  ;;  %4682 = vmatprep.subr.bf16.mxu1 %v6912_v62  ;;  %v6996_v61 = vld [vmem:[%s8135_s20 + $0x354] ss:$8 sps:$4 sm:$0xff]  }
 0x134   : > { %5092 = vmatprep.subr.bf16.mxu0 %v6915_v63  ;;  %v6999_v62 = vld [vmem:[%s8135_s20 + $0xd54] ss:$8 sps:$4 sm:$0xff]   ;;  %v6994_v63 = vld [vmem:[%s8135_s20 + $0x350] ss:$8 sps:$4 sm:$0xff]  }
 0x136   : > { %4683 = vmatpush1.bf16.msra.mxu1 %v6910_v0  ;;  %v6997_v0 = vld [vmem:[%s8135_s20 + $0xd50] ss:$8 sps:$4 sm:$0xff]  }
 0x137   : > { %5093 = vmatpush1.bf16.msra.mxu0 %v6913_v1  ;;  %4684 = vmatprep.subr.bf16.mxu1 %v6918_v2  ;;  %v7002_v1 = vld [vmem:[%s8135_s20 + $0x364] ss:$8 sps:$4 sm:$0xff]  }
 0x138   : > { %5094 = vmatprep.subr.bf16.mxu0 %v6921_v3  ;;  %v7005_v2 = vld [vmem:[%s8135_s20 + $0xd64] ss:$8 sps:$4 sm:$0xff]   ;;  %v7000_v3 = vld [vmem:[%s8135_s20 + $0x360] ss:$8 sps:$4 sm:$0xff]  }
 0x13a   : > { %4685 = vmatpush1.bf16.msra.mxu1 %v6916_v4  ;;  %v7003_v4 = vld [vmem:[%s8135_s20 + $0xd60] ss:$8 sps:$4 sm:$0xff]  }
 0x13b   : > { %5095 = vmatpush1.bf16.msra.mxu0 %v6919_v5  ;;  %4686 = vmatprep.subr.bf16.mxu1 %v6924_v6  ;;  %v7008_v5 = vld [vmem:[%s8135_s20 + $0x374] ss:$8 sps:$4 sm:$0xff]  }
 0x13c   : > { %5096 = vmatprep.subr.bf16.mxu0 %v6927_v7  ;;  %v7011_v6 = vld [vmem:[%s8135_s20 + $0xd74] ss:$8 sps:$4 sm:$0xff]   ;;  %v7006_v7 = vld [vmem:[%s8135_s20 + $0x370] ss:$8 sps:$4 sm:$0xff]  }
 0x13e   : > { %4687 = vmatpush1.bf16.msra.mxu1 %v6922_v8  ;;  %v7009_v8 = vld [vmem:[%s8135_s20 + $0xd70] ss:$8 sps:$4 sm:$0xff]  }
 0x13f   : > { %5097 = vmatpush1.bf16.msra.mxu0 %v6925_v9  ;;  %4688 = vmatprep.subr.bf16.mxu1 %v6930_v10  ;;  %v7014_v9 = vld [vmem:[%s8135_s20 + $0x384] ss:$8 sps:$4 sm:$0xff]  }
 0x140   : > { %5098 = vmatprep.subr.bf16.mxu0 %v6933_v11  ;;  %v7017_v10 = vld [vmem:[%s8135_s20 + $0xd84] ss:$8 sps:$4 sm:$0xff]   ;;  %v7012_v11 = vld [vmem:[%s8135_s20 + $0x380] ss:$8 sps:$4 sm:$0xff]  }
 0x142   : > { %4689 = vmatpush1.bf16.msra.mxu1 %v6928_v12  ;;  %v7015_v12 = vld [vmem:[%s8135_s20 + $0xd80] ss:$8 sps:$4 sm:$0xff]  }
 0x143   : > { %5099 = vmatpush1.bf16.msra.mxu0 %v6931_v13  ;;  %4690 = vmatprep.subr.bf16.mxu1 %v6936_v14  ;;  %v7020_v13 = vld [vmem:[%s8135_s20 + $0x394] ss:$8 sps:$4 sm:$0xff]  }
 0x144   : > { %5100 = vmatprep.subr.bf16.mxu0 %v6939_v15  ;;  %v7023_v14 = vld [vmem:[%s8135_s20 + $0xd94] ss:$8 sps:$4 sm:$0xff]   ;;  %v7018_v15 = vld [vmem:[%s8135_s20 + $0x390] ss:$8 sps:$4 sm:$0xff]  }
 0x146   : > { %4691 = vmatpush1.bf16.msra.mxu1 %v6934_v16  ;;  %v7021_v16 = vld [vmem:[%s8135_s20 + $0xd90] ss:$8 sps:$4 sm:$0xff]  }
 0x147   : > { %5101 = vmatpush1.bf16.msra.mxu0 %v6937_v19  ;;  %4692 = vmatprep.subr.bf16.mxu1 %v6942_v20  ;;  %v7026_v19 = vld [vmem:[%s8135_s20 + $0x3a4] ss:$8 sps:$4 sm:$0xff]  }
 0x148   : > { %5102 = vmatprep.subr.bf16.mxu0 %v6945_v21  ;;  %v7029_v20 = vld [vmem:[%s8135_s20 + $0xda4] ss:$8 sps:$4 sm:$0xff]   ;;  %v7024_v21 = vld [vmem:[%s8135_s20 + $0x3a0] ss:$8 sps:$4 sm:$0xff]  }
 0x14a   : > { %4693 = vmatpush1.bf16.msra.mxu1 %v6940_v22  ;;  %v7027_v22 = vld [vmem:[%s8135_s20 + $0xda0] ss:$8 sps:$4 sm:$0xff]  }
 0x14b   : > { %5103 = vmatpush1.bf16.msra.mxu0 %v6943_v24  ;;  %4694 = vmatprep.subr.bf16.mxu1 %v6948_v52  ;;  %v7032_v24 = vld [vmem:[%s8135_s20 + $0x3b4] ss:$8 sps:$4 sm:$0xff]  }
 0x14c   : > { %5104 = vmatprep.subr.bf16.mxu0 %v6951_v25  ;;  %v7035_v52 = vld [vmem:[%s8135_s20 + $0xdb4] ss:$8 sps:$4 sm:$0xff]   ;;  %v7030_v25 = vld [vmem:[%s8135_s20 + $0x3b0] ss:$8 sps:$4 sm:$0xff]  }
 0x14e   : > { %4695 = vmatpush1.bf16.msra.mxu1 %v6946_v26  ;;  %v7033_v26 = vld [vmem:[%s8135_s20 + $0xdb0] ss:$8 sps:$4 sm:$0xff]  }
 0x14f   : > { %5105 = vmatpush1.bf16.msra.mxu0 %v6949_v27  ;;  %4696 = vmatprep.subr.bf16.mxu1 %v6954_v28  ;;  %v7038_v27 = vld [vmem:[%s8135_s20 + $0x3c4] ss:$8 sps:$4 sm:$0xff]  }
 0x150   : > { %5106 = vmatprep.subr.bf16.mxu0 %v6957_v29  ;;  %v7041_v28 = vld [vmem:[%s8135_s20 + $0xdc4] ss:$8 sps:$4 sm:$0xff]   ;;  %v7036_v29 = vld [vmem:[%s8135_s20 + $0x3c0] ss:$8 sps:$4 sm:$0xff]  }
 0x152   : > { %4697 = vmatpush1.bf16.msra.mxu1 %v6952_v30  ;;  %v7039_v30 = vld [vmem:[%s8135_s20 + $0xdc0] ss:$8 sps:$4 sm:$0xff]  }
 0x153   : > { %5107 = vmatpush1.bf16.msra.mxu0 %v6955_v31  ;;  %4698 = vmatprep.subr.bf16.mxu1 %v6960_v32  ;;  %v7044_v31 = vld [vmem:[%s8135_s20 + $0x3d4] ss:$8 sps:$4 sm:$0xff]  }
 0x154   : > { %5108 = vmatprep.subr.bf16.mxu0 %v6963_v33  ;;  %v7047_v32 = vld [vmem:[%s8135_s20 + $0xdd4] ss:$8 sps:$4 sm:$0xff]   ;;  %v7042_v33 = vld [vmem:[%s8135_s20 + $0x3d0] ss:$8 sps:$4 sm:$0xff]  }
 0x156   : > { %4699 = vmatpush1.bf16.msra.mxu1 %v6958_v18  ;;  %v7045_v18 = vld [vmem:[%s8135_s20 + $0xdd0] ss:$8 sps:$4 sm:$0xff]  }
 0x157   : > { %5109 = vmatpush1.bf16.msra.mxu0 %v6961_v36  ;;  %4709 = vmatprep.subr.bf16.mxu1 %v6966_v37  ;;  %v7050_v36 = vld [vmem:[%s8135_s20 + $0x3e4] ss:$8 sps:$4 sm:$0xff]  }
 0x158   : > { %5119 = vmatprep.subr.bf16.mxu0 %v6969_v38  ;;  %v7053_v37 = vld [vmem:[%s8135_s20 + $0xde4] ss:$8 sps:$4 sm:$0xff]   ;;  %v7048_v38 = vld [vmem:[%s8135_s20 + $0x3e0] ss:$8 sps:$4 sm:$0xff]  }
 0x159   : > { %4701 = vmatmul.mubr.bf16.vlgmr.msra.gmra.mrb[0].mxu1 %v8415_v40 }
 0x15a   : > { %5111 = vmatmul.mubr.bf16.vlgmr.msra.gmra.mrb[0].mxu0 %v8419_v43  ;;  %4710 = vmatpush1.bf16.msra.mxu1 %v6964_v39  ;;  %v1190_v39 = vcombine.high %v8339_v17, %v8339_v17  ;;  %v7057_v17 = vld [vmem:[%s8135_s20 + $0xdf0] ss:$8 sps:$4 sm:$0xff]  }
 0x15b   : > { %5120 = vmatpush1.bf16.msra.mxu0 %v6967_v44  ;;  %4711 = vmatprep.subr.bf16.mxu1 %v6972_v45  ;;  %v7051_v44 = vld [vmem:[%s8135_s20 + $0xde0] ss:$8 sps:$4 sm:$0xff]  }
 0x15c   : > { %5121 = vmatprep.subr.bf16.mxu0 %v6975_v46  ;;  %4741 = vmatprep.mubr.bf16.mxu1 %v1091_v47  ;;  %v8489_v45 = vld.sshfl [vmem:[%s9061_s0 + $0x8] sm:$0xff pattern:$0x75316420]  ;;  %v7056_v46 = vld [vmem:[%s8135_s20 + $0x3f4] ss:$8 sps:$4 sm:$0xff]  }
 0x15d   : > { %5151 = vmatprep.mubr.bf16.mxu0 %v1237_v23  ;;  %v7059_v47 = vld [vmem:[%s8135_s20 + $0xdf4] ss:$8 sps:$4 sm:$0xff]   ;;  %v8494_v23 = vrot.slane %v1190_v39, %v8209_v49  ;;  %v7134_v39 = vld [vmem:[%s8135_s20 + $0x4c4] ss:$8 sps:$4 sm:$0xff]  }
 0x15e   : > { %4712 = vmatpush1.bf16.msra.mxu1 %v6970_v35  ;;  %v7054_v35 = vld [vmem:[%s8135_s20 + $0x3f0] ss:$8 sps:$4 sm:$0xff]  }
 0x15f   : > { %5122 = vmatpush1.bf16.msra.mxu0 %v6973_v48  ;;  %4713 = vmatprep.subr.bf16.mxu1 %v6978_v50  ;;  %v7062_v48 = vld [vmem:[%s8135_s20 + $0x404] ss:$8 sps:$4 sm:$0xff]  }
 0x160   : > { %5123 = vmatprep.subr.bf16.mxu0 %v6981_v34  ;;  %v7065_v50 = vld [vmem:[%s8135_s20 + $0xe04] ss:$8 sps:$4 sm:$0xff]   ;;  %v1107_v34 = vcombine.high %v8489_v45, %v8489_v45 }
 0x162   : > { %4714 = vmatpush1.bf16.msra.mxu1 %v6976_v41  ;;  %v1206_v41 = vcombine.high %v8494_v23, %v8494_v23 }
 0x163   : > { %5124 = vmatpush1.bf16.msra.mxu0 %v6979_v51  ;;  %4715 = vmatprep.subr.bf16.mxu1 %v6984_v53  ;;  %v7060_v51 = vld [vmem:[%s8135_s20 + $0x400] ss:$8 sps:$4 sm:$0xff]  }
 0x164   : > { %5125 = vmatprep.subr.bf16.mxu0 %v6987_v54  ;;  %v7063_v53 = vld [vmem:[%s8135_s20 + $0xe00] ss:$8 sps:$4 sm:$0xff]   ;;  %v1089_v54 = vcombine.high %v8415_v40, %v8415_v40  ;;  %v7066_v40 = vld [vmem:[%s8135_s20 + $0x410] ss:$8 sps:$4 sm:$0xff]  }
 0x166   : > { %4716 = vmatpush1.bf16.msra.mxu1 %v6982_v55  ;;  %v1235_v55 = vcombine.high %v8419_v43, %v8419_v43  ;;  %v7069_v43 = vld [vmem:[%s8135_s20 + $0xe10] ss:$8 sps:$4 sm:$0xff]  }
 0x167   : > { %5126 = vmatpush1.bf16.msra.mxu0 %v6985_v56  ;;  %4717 = vmatprep.subr.bf16.mxu1 %v6990_v57  ;;  %v7068_v56 = vld [vmem:[%s8135_s20 + $0x414] ss:$8 sps:$4 sm:$0xff]  }
 0x168   : > { %5127 = vmatprep.subr.bf16.mxu0 %v6993_v58  ;;  %v7071_v57 = vld [vmem:[%s8135_s20 + $0xe14] ss:$8 sps:$4 sm:$0xff]   ;;  %v8513_v58 = vrot.slane %v1107_v34, %v8209_v49  ;;  %v7146_v34 = vld [vmem:[%s8135_s20 + $0x4e4] ss:$8 sps:$4 sm:$0xff]  }
 0x16a   : > { %4718 = vmatpush1.bf16.msra.mxu1 %v6988_v59  ;;  %v8516_v59 = vrot.slane %v1206_v41, %v8209_v49  ;;  %v7149_v41 = vld [vmem:[%s8135_s20 + $0xee4] ss:$8 sps:$4 sm:$0xff]  }
 0x16b   : > { %5128 = vmatpush1.bf16.msra.mxu0 %v6991_v60  ;;  %4719 = vmatprep.subr.bf16.mxu1 %v6996_v61  ;;  %v7074_v60 = vld [vmem:[%s8135_s20 + $0x424] ss:$8 sps:$4 sm:$0xff]  }
 0x16c   : > { %5129 = vmatprep.subr.bf16.mxu0 %v6999_v62  ;;  %v7077_v61 = vld [vmem:[%s8135_s20 + $0xe24] ss:$8 sps:$4 sm:$0xff]   ;;  %v7072_v62 = vld [vmem:[%s8135_s20 + $0x420] ss:$8 sps:$4 sm:$0xff]  }
 0x16e   : > { %4720 = vmatpush1.bf16.msra.mxu1 %v6994_v63  ;;  %v7075_v63 = vld [vmem:[%s8135_s20 + $0xe20] ss:$8 sps:$4 sm:$0xff]  }
 0x16f   : > { %5130 = vmatpush1.bf16.msra.mxu0 %v6997_v0  ;;  %4721 = vmatprep.subr.bf16.mxu1 %v7002_v1  ;;  %v7080_v0 = vld [vmem:[%s8135_s20 + $0x434] ss:$8 sps:$4 sm:$0xff]  }
 0x170   : > { %5131 = vmatprep.subr.bf16.mxu0 %v7005_v2  ;;  %v7083_v1 = vld [vmem:[%s8135_s20 + $0xe34] ss:$8 sps:$4 sm:$0xff]   ;;  %v7078_v2 = vld [vmem:[%s8135_s20 + $0x430] ss:$8 sps:$4 sm:$0xff]  }
 0x172   : > { %4722 = vmatpush1.bf16.msra.mxu1 %v7000_v3  ;;  %v7081_v3 = vld [vmem:[%s8135_s20 + $0xe30] ss:$8 sps:$4 sm:$0xff]  }
 0x173   : > { %5132 = vmatpush1.bf16.msra.mxu0 %v7003_v4  ;;  %4723 = vmatprep.subr.bf16.mxu1 %v7008_v5  ;;  %v7086_v4 = vld [vmem:[%s8135_s20 + $0x444] ss:$8 sps:$4 sm:$0xff]  }
 0x174   : > { %5133 = vmatprep.subr.bf16.mxu0 %v7011_v6  ;;  %v7089_v5 = vld [vmem:[%s8135_s20 + $0xe44] ss:$8 sps:$4 sm:$0xff]   ;;  %v7084_v6 = vld [vmem:[%s8135_s20 + $0x440] ss:$8 sps:$4 sm:$0xff]  }
 0x176   : > { %4724 = vmatpush1.bf16.msra.mxu1 %v7006_v7  ;;  %v7087_v7 = vld [vmem:[%s8135_s20 + $0xe40] ss:$8 sps:$4 sm:$0xff]  }
 0x177   : > { %5134 = vmatpush1.bf16.msra.mxu0 %v7009_v8  ;;  %4725 = vmatprep.subr.bf16.mxu1 %v7014_v9  ;;  %v7092_v8 = vld [vmem:[%s8135_s20 + $0x454] ss:$8 sps:$4 sm:$0xff]  }
 0x178   : > { %5135 = vmatprep.subr.bf16.mxu0 %v7017_v10  ;;  %v7095_v9 = vld [vmem:[%s8135_s20 + $0xe54] ss:$8 sps:$4 sm:$0xff]   ;;  %v7090_v10 = vld [vmem:[%s8135_s20 + $0x450] ss:$8 sps:$4 sm:$0xff]  }
 0x17a   : > { %4726 = vmatpush1.bf16.msra.mxu1 %v7012_v11  ;;  %v7093_v11 = vld [vmem:[%s8135_s20 + $0xe50] ss:$8 sps:$4 sm:$0xff]  }
 0x17b   : > { %5136 = vmatpush1.bf16.msra.mxu0 %v7015_v12  ;;  %4727 = vmatprep.subr.bf16.mxu1 %v7020_v13  ;;  %v7098_v12 = vld [vmem:[%s8135_s20 + $0x464] ss:$8 sps:$4 sm:$0xff]  }
 0x17c   : > { %5137 = vmatprep.subr.bf16.mxu0 %v7023_v14  ;;  %v7101_v13 = vld [vmem:[%s8135_s20 + $0xe64] ss:$8 sps:$4 sm:$0xff]   ;;  %v7096_v14 = vld [vmem:[%s8135_s20 + $0x460] ss:$8 sps:$4 sm:$0xff]  }
 0x17e   : > { %4728 = vmatpush1.bf16.msra.mxu1 %v7018_v15  ;;  %v7099_v15 = vld [vmem:[%s8135_s20 + $0xe60] ss:$8 sps:$4 sm:$0xff]  }
 0x17f   : > { %5138 = vmatpush1.bf16.msra.mxu0 %v7021_v16  ;;  %4729 = vmatprep.subr.bf16.mxu1 %v7026_v19  ;;  %v7104_v16 = vld [vmem:[%s8135_s20 + $0x474] ss:$8 sps:$4 sm:$0xff]  }
 0x180   : > { %5139 = vmatprep.subr.bf16.mxu0 %v7029_v20  ;;  %v7107_v19 = vld [vmem:[%s8135_s20 + $0xe74] ss:$8 sps:$4 sm:$0xff]   ;;  %v7102_v20 = vld [vmem:[%s8135_s20 + $0x470] ss:$8 sps:$4 sm:$0xff]  }
 0x182   : > { %4730 = vmatpush1.bf16.msra.mxu1 %v7024_v21  ;;  %v7105_v21 = vld [vmem:[%s8135_s20 + $0xe70] ss:$8 sps:$4 sm:$0xff]  }
 0x183   : > { %5140 = vmatpush1.bf16.msra.mxu0 %v7027_v22  ;;  %4731 = vmatprep.subr.bf16.mxu1 %v7032_v24  ;;  %v7110_v22 = vld [vmem:[%s8135_s20 + $0x484] ss:$8 sps:$4 sm:$0xff]  }
 0x184   : > { %5141 = vmatprep.subr.bf16.mxu0 %v7035_v52  ;;  %v7113_v24 = vld [vmem:[%s8135_s20 + $0xe84] ss:$8 sps:$4 sm:$0xff]   ;;  %v7108_v52 = vld [vmem:[%s8135_s20 + $0x480] ss:$8 sps:$4 sm:$0xff]  }
 0x186   : > { %4732 = vmatpush1.bf16.msra.mxu1 %v7030_v25  ;;  %v7111_v25 = vld [vmem:[%s8135_s20 + $0xe80] ss:$8 sps:$4 sm:$0xff]  }
 0x187   : > { %5142 = vmatpush1.bf16.msra.mxu0 %v7033_v26  ;;  %4733 = vmatprep.subr.bf16.mxu1 %v7038_v27  ;;  %v7116_v26 = vld [vmem:[%s8135_s20 + $0x494] ss:$8 sps:$4 sm:$0xff]  }
 0x188   : > { %5143 = vmatprep.subr.bf16.mxu0 %v7041_v28  ;;  %v7119_v27 = vld [vmem:[%s8135_s20 + $0xe94] ss:$8 sps:$4 sm:$0xff]   ;;  %v7114_v28 = vld [vmem:[%s8135_s20 + $0x490] ss:$8 sps:$4 sm:$0xff]  }
 0x18a   : > { %4734 = vmatpush1.bf16.msra.mxu1 %v7036_v29  ;;  %v7117_v29 = vld [vmem:[%s8135_s20 + $0xe90] ss:$8 sps:$4 sm:$0xff]  }
 0x18b   : > { %5144 = vmatpush1.bf16.msra.mxu0 %v7039_v30  ;;  %4735 = vmatprep.subr.bf16.mxu1 %v7044_v31  ;;  %v7122_v30 = vld [vmem:[%s8135_s20 + $0x4a4] ss:$8 sps:$4 sm:$0xff]  }
 0x18c   : > { %5145 = vmatprep.subr.bf16.mxu0 %v7047_v32  ;;  %v7125_v31 = vld [vmem:[%s8135_s20 + $0xea4] ss:$8 sps:$4 sm:$0xff]   ;;  %v7120_v32 = vld [vmem:[%s8135_s20 + $0x4a0] ss:$8 sps:$4 sm:$0xff]  }
 0x18e   : > { %4736 = vmatpush1.bf16.msra.mxu1 %v7042_v33  ;;  %v7123_v33 = vld [vmem:[%s8135_s20 + $0xea0] ss:$8 sps:$4 sm:$0xff]  }
 0x18f   : > { %5146 = vmatpush1.bf16.msra.mxu0 %v7045_v18  ;;  %4737 = vmatprep.subr.bf16.mxu1 %v7050_v36  ;;  %v7128_v18 = vld [vmem:[%s8135_s20 + $0x4b4] ss:$8 sps:$4 sm:$0xff]  }
 0x190   : > { %5147 = vmatprep.subr.bf16.mxu0 %v7053_v37  ;;  %v7131_v36 = vld [vmem:[%s8135_s20 + $0xeb4] ss:$8 sps:$4 sm:$0xff]   ;;  %v7126_v37 = vld [vmem:[%s8135_s20 + $0x4b0] ss:$8 sps:$4 sm:$0xff]  }
 0x192   : > { %4738 = vmatpush1.bf16.msra.mxu1 %v7048_v38  ;;  %v7129_v38 = vld [vmem:[%s8135_s20 + $0xeb0] ss:$8 sps:$4 sm:$0xff]  }
 0x193   : > { %5148 = vmatpush1.bf16.msra.mxu0 %v7051_v44  ;;  %4739 = vmatprep.subr.bf16.mxu1 %v7056_v46  ;;  %v7137_v44 = vld [vmem:[%s8135_s20 + $0xec4] ss:$8 sps:$4 sm:$0xff]   ;;  %v7132_v46 = vld [vmem:[%s8135_s20 + $0x4c0] ss:$8 sps:$4 sm:$0xff]  }
 0x194   : > { %5149 = vmatprep.subr.bf16.mxu0 %v7059_v47  ;;  %v7135_v47 = vld [vmem:[%s8135_s20 + $0xec0] ss:$8 sps:$4 sm:$0xff]  }
 0x196   : > { %4740 = vmatpush1.bf16.msra.mxu1 %v7054_v35  ;;  %v7140_v35 = vld [vmem:[%s8135_s20 + $0x4d4] ss:$8 sps:$4 sm:$0xff]  }
 0x197   : > { %5150 = vmatpush1.bf16.msra.mxu0 %v7057_v17  ;;  %4750 = vmatprep.subr.bf16.mxu1 %v7062_v48  ;;  %v7143_v17 = vld [vmem:[%s8135_s20 + $0xed4] ss:$8 sps:$4 sm:$0xff]   ;;  %v7138_v48 = vld [vmem:[%s8135_s20 + $0x4d0] ss:$8 sps:$4 sm:$0xff]  }
 0x198   : > { %5160 = vmatprep.subr.bf16.mxu0 %v7065_v50  ;;  %v7141_v50 = vld [vmem:[%s8135_s20 + $0xed0] ss:$8 sps:$4 sm:$0xff]  }
 0x199   : > { %4742 = vmatmul.mubr.bf16.vlgmr.msra.gmra.mrb[0].mxu1 %v1089_v54  ;;  %v7152_v54 = vld [vmem:[%s8135_s20 + $0x4f4] ss:$8 sps:$4 sm:$0xff]  }
 0x19a   : > { %5152 = vmatmul.mubr.bf16.vlgmr.msra.gmra.mrb[0].mxu0 %v1235_v55  ;;  %4751 = vmatpush1.bf16.msra.mxu1 %v7060_v51  ;;  %v7144_v51 = vld [vmem:[%s8135_s20 + $0x4e0] ss:$8 sps:$4 sm:$0xff]   ;;  %v7155_v55 = vld [vmem:[%s8135_s20 + $0xef4] ss:$8 sps:$4 sm:$0xff]  }
 0x19b   : > { %5161 = vmatpush1.bf16.msra.mxu0 %v7063_v53  ;;  %4752 = vmatprep.subr.bf16.mxu1 %v7068_v56  ;;  %v7147_v53 = vld [vmem:[%s8135_s20 + $0xee0] ss:$8 sps:$4 sm:$0xff]   ;;  %v7150_v56 = vld [vmem:[%s8135_s20 + $0x4f0] ss:$8 sps:$4 sm:$0xff]  }
 0x19c   : > { %5162 = vmatprep.subr.bf16.mxu0 %v7071_v57  ;;  %4782 = vmatprep.mubr.bf16.mxu1 %v8513_v58  ;;  %v7153_v57 = vld [vmem:[%s8135_s20 + $0xef0] ss:$8 sps:$4 sm:$0xff]  }
 0x19d   : > { %5192 = vmatprep.mubr.bf16.mxu0 %v8516_v59 }
 0x19e   : > { %4753 = vmatpush1.bf16.msra.mxu1 %v7066_v40  ;;  %v7158_v40 = vld [vmem:[%s8135_s20 + $0x504] ss:$8 sps:$4 sm:$0xff]  }
 0x19f   : > { %5163 = vmatpush1.bf16.msra.mxu0 %v7069_v43  ;;  %4754 = vmatprep.subr.bf16.mxu1 %v7074_v60  ;;  %v7162_v43 = vld [vmem:[%s8135_s20 + $0xf04] ss:$8 sps:$4 sm:$0xff]   ;;  %v8582_v60 = vrot.slane %v8489_v45, %v8209_v49  ;;  %v1139_v45 = vcombine.high %v8513_v58, %v8513_v58 }
 0x1a0   : > { %5164 = vmatprep.subr.bf16.mxu0 %v7077_v61  ;;  %v8586_v61 = vrot.slane %v8494_v23, %v8209_v49  ;;  %v7163_v23 = vld [vmem:[%s8135_s20 + $0x510] ss:$8 sps:$4 sm:$0xff]   ;;  %v7171_v58 = vld [vmem:[%s8135_s20 + $0x524] ss:$8 sps:$4 sm:$0xff]  }
 0x1a2   : > { %4755 = vmatpush1.bf16.msra.mxu1 %v7072_v62  ;;  %v7156_v62 = vld [vmem:[%s8135_s20 + $0x500] ss:$8 sps:$4 sm:$0xff]  }
 0x1a3   : > { %5165 = vmatpush1.bf16.msra.mxu0 %v7075_v63  ;;  %4756 = vmatprep.subr.bf16.mxu1 %v7080_v0  ;;  %v7160_v63 = vld [vmem:[%s8135_s20 + $0xf00] ss:$8 sps:$4 sm:$0xff]   ;;  %v7165_v0 = vld [vmem:[%s8135_s20 + $0x514] ss:$8 sps:$4 sm:$0xff]  }
 0x1a4   : > { %5166 = vmatprep.subr.bf16.mxu0 %v7083_v1  ;;  %v7168_v1 = vld [vmem:[%s8135_s20 + $0xf14] ss:$8 sps:$4 sm:$0xff]  }
 0x1a6   : > { %4757 = vmatpush1.bf16.msra.mxu1 %v7078_v2  ;;  %v1238_v2 = vcombine.high %v8516_v59, %v8516_v59  ;;  %v7169_v59 = vld [vmem:[%s8135_s20 + $0x520] ss:$8 sps:$4 sm:$0xff]  }
 0x1a7   : > { %5167 = vmatpush1.bf16.msra.mxu0 %v7081_v3  ;;  %4758 = vmatprep.subr.bf16.mxu1 %v7086_v4  ;;  %v7166_v3 = vld [vmem:[%s8135_s20 + $0xf10] ss:$8 sps:$4 sm:$0xff]   ;;  %v7174_v4 = vld [vmem:[%s8135_s20 + $0xf24] ss:$8 sps:$4 sm:$0xff]  }
 0x1a8   : > { %5168 = vmatprep.subr.bf16.mxu0 %v7089_v5  ;;  %v7172_v5 = vld [vmem:[%s8135_s20 + $0xf20] ss:$8 sps:$4 sm:$0xff]  }
 0x1aa   : > { %4759 = vmatpush1.bf16.msra.mxu1 %v7084_v6  ;;  %v7177_v6 = vld [vmem:[%s8135_s20 + $0x534] ss:$8 sps:$4 sm:$0xff]  }
 0x1ab   : > { %5169 = vmatpush1.bf16.msra.mxu0 %v7087_v7  ;;  %4760 = vmatprep.subr.bf16.mxu1 %v7092_v8  ;;  %v7180_v7 = vld [vmem:[%s8135_s20 + $0xf34] ss:$8 sps:$4 sm:$0xff]   ;;  %v7175_v8 = vld [vmem:[%s8135_s20 + $0x530] ss:$8 sps:$4 sm:$0xff]  }
 0x1ac   : > { %5170 = vmatprep.subr.bf16.mxu0 %v7095_v9  ;;  %v7178_v9 = vld [vmem:[%s8135_s20 + $0xf30] ss:$8 sps:$4 sm:$0xff]  }
 0x1ae   : > { %4761 = vmatpush1.bf16.msra.mxu1 %v7090_v10  ;;  %v7183_v10 = vld [vmem:[%s8135_s20 + $0x544] ss:$8 sps:$4 sm:$0xff]  }
 0x1af   : > { %5171 = vmatpush1.bf16.msra.mxu0 %v7093_v11  ;;  %4762 = vmatprep.subr.bf16.mxu1 %v7098_v12  ;;  %v7186_v11 = vld [vmem:[%s8135_s20 + $0xf44] ss:$8 sps:$4 sm:$0xff]   ;;  %v7181_v12 = vld [vmem:[%s8135_s20 + $0x540] ss:$8 sps:$4 sm:$0xff]  }
 0x1b0   : > { %5172 = vmatprep.subr.bf16.mxu0 %v7101_v13  ;;  %v7184_v13 = vld [vmem:[%s8135_s20 + $0xf40] ss:$8 sps:$4 sm:$0xff]  }
 0x1b2   : > { %4763 = vmatpush1.bf16.msra.mxu1 %v7096_v14  ;;  %v7189_v14 = vld [vmem:[%s8135_s20 + $0x554] ss:$8 sps:$4 sm:$0xff]  }
 0x1b3   : > { %5173 = vmatpush1.bf16.msra.mxu0 %v7099_v15  ;;  %4764 = vmatprep.subr.bf16.mxu1 %v7104_v16  ;;  %v7192_v15 = vld [vmem:[%s8135_s20 + $0xf54] ss:$8 sps:$4 sm:$0xff]   ;;  %v7187_v16 = vld [vmem:[%s8135_s20 + $0x550] ss:$8 sps:$4 sm:$0xff]  }
 0x1b4   : > { %5174 = vmatprep.subr.bf16.mxu0 %v7107_v19  ;;  %v7190_v19 = vld [vmem:[%s8135_s20 + $0xf50] ss:$8 sps:$4 sm:$0xff]  }
 0x1b6   : > { %4765 = vmatpush1.bf16.msra.mxu1 %v7102_v20  ;;  %v7195_v20 = vld [vmem:[%s8135_s20 + $0x564] ss:$8 sps:$4 sm:$0xff]  }
 0x1b7   : > { %5175 = vmatpush1.bf16.msra.mxu0 %v7105_v21  ;;  %4766 = vmatprep.subr.bf16.mxu1 %v7110_v22  ;;  %v7198_v21 = vld [vmem:[%s8135_s20 + $0xf64] ss:$8 sps:$4 sm:$0xff]   ;;  %v7193_v22 = vld [vmem:[%s8135_s20 + $0x560] ss:$8 sps:$4 sm:$0xff]  }
 0x1b8   : > { %5176 = vmatprep.subr.bf16.mxu0 %v7113_v24  ;;  %v7196_v24 = vld [vmem:[%s8135_s20 + $0xf60] ss:$8 sps:$4 sm:$0xff]  }
 0x1ba   : > { %4767 = vmatpush1.bf16.msra.mxu1 %v7108_v52  ;;  %v7201_v52 = vld [vmem:[%s8135_s20 + $0x574] ss:$8 sps:$4 sm:$0xff]  }
 0x1bb   : > { %5177 = vmatpush1.bf16.msra.mxu0 %v7111_v25  ;;  %4768 = vmatprep.subr.bf16.mxu1 %v7116_v26  ;;  %v7204_v25 = vld [vmem:[%s8135_s20 + $0xf74] ss:$8 sps:$4 sm:$0xff]   ;;  %v7199_v26 = vld [vmem:[%s8135_s20 + $0x570] ss:$8 sps:$4 sm:$0xff]  }
 0x1bc   : > { %5178 = vmatprep.subr.bf16.mxu0 %v7119_v27  ;;  %v7202_v27 = vld [vmem:[%s8135_s20 + $0xf70] ss:$8 sps:$4 sm:$0xff]  }
 0x1be   : > { %4769 = vmatpush1.bf16.msra.mxu1 %v7114_v28  ;;  %v7207_v28 = vld [vmem:[%s8135_s20 + $0x584] ss:$8 sps:$4 sm:$0xff]  }
 0x1bf   : > { %5179 = vmatpush1.bf16.msra.mxu0 %v7117_v29  ;;  %4770 = vmatprep.subr.bf16.mxu1 %v7122_v30  ;;  %v7210_v29 = vld [vmem:[%s8135_s20 + $0xf84] ss:$8 sps:$4 sm:$0xff]   ;;  %v7205_v30 = vld [vmem:[%s8135_s20 + $0x580] ss:$8 sps:$4 sm:$0xff]  }
 0x1c0   : > { %5180 = vmatprep.subr.bf16.mxu0 %v7125_v31  ;;  %v7208_v31 = vld [vmem:[%s8135_s20 + $0xf80] ss:$8 sps:$4 sm:$0xff]  }
 0x1c2   : > { %4771 = vmatpush1.bf16.msra.mxu1 %v7120_v32  ;;  %v7213_v32 = vld [vmem:[%s8135_s20 + $0x594] ss:$8 sps:$4 sm:$0xff]  }
 0x1c3   : > { %5181 = vmatpush1.bf16.msra.mxu0 %v7123_v33  ;;  %4772 = vmatprep.subr.bf16.mxu1 %v7128_v18  ;;  %v7216_v33 = vld [vmem:[%s8135_s20 + $0xf94] ss:$8 sps:$4 sm:$0xff]   ;;  %v7211_v18 = vld [vmem:[%s8135_s20 + $0x590] ss:$8 sps:$4 sm:$0xff]  }
 0x1c4   : > { %5182 = vmatprep.subr.bf16.mxu0 %v7131_v36  ;;  %v7214_v36 = vld [vmem:[%s8135_s20 + $0xf90] ss:$8 sps:$4 sm:$0xff]  }
 0x1c6   : > { %4773 = vmatpush1.bf16.msra.mxu1 %v7126_v37  ;;  %v7219_v37 = vld [vmem:[%s8135_s20 + $0x5a4] ss:$8 sps:$4 sm:$0xff]  }
 0x1c7   : > { %5183 = vmatpush1.bf16.msra.mxu0 %v7129_v38  ;;  %4774 = vmatprep.subr.bf16.mxu1 %v7134_v39  ;;  %v7222_v38 = vld [vmem:[%s8135_s20 + $0xfa4] ss:$8 sps:$4 sm:$0xff]   ;;  %v7217_v39 = vld [vmem:[%s8135_s20 + $0x5a0] ss:$8 sps:$4 sm:$0xff]  }
 0x1c8   : > { %5184 = vmatprep.subr.bf16.mxu0 %v7137_v44  ;;  %v7220_v44 = vld [vmem:[%s8135_s20 + $0xfa0] ss:$8 sps:$4 sm:$0xff]  }
 0x1ca   : > { %4775 = vmatpush1.bf16.msra.mxu1 %v7132_v46  ;;  %v7225_v46 = vld [vmem:[%s8135_s20 + $0x5b4] ss:$8 sps:$4 sm:$0xff]  }
 0x1cb   : > { %5185 = vmatpush1.bf16.msra.mxu0 %v7135_v47  ;;  %4776 = vmatprep.subr.bf16.mxu1 %v7140_v35  ;;  %v7228_v47 = vld [vmem:[%s8135_s20 + $0xfb4] ss:$8 sps:$4 sm:$0xff]   ;;  %v7223_v35 = vld [vmem:[%s8135_s20 + $0x5b0] ss:$8 sps:$4 sm:$0xff]  }
 0x1cc   : > { %5186 = vmatprep.subr.bf16.mxu0 %v7143_v17  ;;  %v7226_v17 = vld [vmem:[%s8135_s20 + $0xfb0] ss:$8 sps:$4 sm:$0xff]  }
 0x1ce   : > { %4777 = vmatpush1.bf16.msra.mxu1 %v7138_v48  ;;  %v7231_v48 = vld [vmem:[%s8135_s20 + $0x5c4] ss:$8 sps:$4 sm:$0xff]  }
 0x1cf   : > { %5187 = vmatpush1.bf16.msra.mxu0 %v7141_v50  ;;  %4778 = vmatprep.subr.bf16.mxu1 %v7146_v34  ;;  %v7234_v50 = vld [vmem:[%s8135_s20 + $0xfc4] ss:$8 sps:$4 sm:$0xff]   ;;  %v7229_v34 = vld [vmem:[%s8135_s20 + $0x5c0] ss:$8 sps:$4 sm:$0xff]  }
 0x1d0   : > { %5188 = vmatprep.subr.bf16.mxu0 %v7149_v41  ;;  %v7232_v41 = vld [vmem:[%s8135_s20 + $0xfc0] ss:$8 sps:$4 sm:$0xff]  }
 0x1d2   : > { %4779 = vmatpush1.bf16.msra.mxu1 %v7144_v51  ;;  %v7237_v51 = vld [vmem:[%s8135_s20 + $0x5d4] ss:$8 sps:$4 sm:$0xff]  }
 0x1d3   : > { %5189 = vmatpush1.bf16.msra.mxu0 %v7147_v53  ;;  %4780 = vmatprep.subr.bf16.mxu1 %v7152_v54  ;;  %v7240_v53 = vld [vmem:[%s8135_s20 + $0xfd4] ss:$8 sps:$4 sm:$0xff]   ;;  %v7235_v54 = vld [vmem:[%s8135_s20 + $0x5d0] ss:$8 sps:$4 sm:$0xff]  }
 0x1d4   : > { %5190 = vmatprep.subr.bf16.mxu0 %v7155_v55  ;;  %v7238_v55 = vld [vmem:[%s8135_s20 + $0xfd0] ss:$8 sps:$4 sm:$0xff]  }
 0x1d6   : > { %4781 = vmatpush1.bf16.msra.mxu1 %v7150_v56  ;;  %v7243_v56 = vld [vmem:[%s8135_s20 + $0x5e4] ss:$8 sps:$4 sm:$0xff]  }
 0x1d7   : > { %5191 = vmatpush1.bf16.msra.mxu0 %v7153_v57  ;;  %4791 = vmatprep.subr.bf16.mxu1 %v7158_v40  ;;  %v7246_v57 = vld [vmem:[%s8135_s20 + $0xfe4] ss:$8 sps:$4 sm:$0xff]  }
 0x1d8   : > { %5201 = vmatprep.subr.bf16.mxu0 %v7162_v43  ;;  %v8653_v40 = vld [vmem:[%s9061_s0 + $0x20] sm:$0xff]  ;;  %v7667_v43 = vld [vmem:[%s9061_s0 + $0x8] sm:$0xff] }
 0x1d9   : > { %4783 = vmatmul.mubr.bf16.vlgmr.msra.gmra.mrb[0].mxu1 %v8582_v60 }
 0x1da   : > { %5193 = vmatmul.mubr.bf16.vlgmr.msra.gmra.mrb[0].mxu0 %v8586_v61  ;;  %4792 = vmatpush1.bf16.msra.mxu1 %v7156_v62  ;;  %v1092_v62 = vcombine.high %v7667_v43, %v7667_v43  ;;  %v7324_v43 = vld [vmem:[%s8135_s20 + $0x10b4] ss:$8 sps:$4 sm:$0xff]  }
 0x1db   : > { %5202 = vmatpush1.bf16.msra.mxu0 %v7160_v63  ;;  %4793 = vmatprep.subr.bf16.mxu1 %v7165_v0  ;;  %v7241_v63 = vld [vmem:[%s8135_s20 + $0x5e0] ss:$8 sps:$4 sm:$0xff]  }
 0x1dc   : > { %5203 = vmatprep.subr.bf16.mxu0 %v7168_v1  ;;  %4823 = vmatprep.mubr.bf16.mxu1 %v1139_v45  ;;  %v7244_v0 = vld [vmem:[%s8135_s20 + $0xfe0] ss:$8 sps:$4 sm:$0xff]   ;;  %v7249_v1 = vld [vmem:[%s8135_s20 + $0x5f4] ss:$8 sps:$4 sm:$0xff]  }
 0x1dd   : > { %5233 = vmatprep.mubr.bf16.mxu0 %v1238_v2  ;;  %v7252_v45 = vld [vmem:[%s8135_s20 + $0xff4] ss:$8 sps:$4 sm:$0xff]   ;;  %v8663_v2 = vrot.slane %v1092_v62, %v8209_v49  ;;  %v7319_v62 = vld [vmem:[%s8135_s20 + $0x6b0] ss:$8 sps:$4 sm:$0xff]  }
 0x1de   : > { %4794 = vmatpush1.bf16.msra.mxu1 %v7163_v23  ;;  %v8667_v23 = vrot.slane %v8653_v40, %v8209_v49 }
 0x1df   : > { %5204 = vmatpush1.bf16.msra.mxu0 %v7166_v3  ;;  %4795 = vmatprep.subr.bf16.mxu1 %v7171_v58  ;;  %v7247_v3 = vld [vmem:[%s8135_s20 + $0x5f0] ss:$8 sps:$4 sm:$0xff]  }
 0x1e0   : > { %5205 = vmatprep.subr.bf16.mxu0 %v7174_v4  ;;  %v7250_v58 = vld [vmem:[%s8135_s20 + $0xff0] ss:$8 sps:$4 sm:$0xff]   ;;  %v7255_v4 = vld [vmem:[%s8135_s20 + $0x604] ss:$8 sps:$4 sm:$0xff]  }
 0x1e2   : > { %4796 = vmatpush1.bf16.msra.mxu1 %v7169_v59  ;;  %v7258_v59 = vld [vmem:[%s8135_s20 + $0x1004] ss:$8 sps:$4 sm:$0xff]  }
 0x1e3   : > { %5206 = vmatpush1.bf16.msra.mxu0 %v7172_v5  ;;  %4797 = vmatprep.subr.bf16.mxu1 %v7177_v6  ;;  %v1108_v5 = vcombine.high %v8663_v2, %v8663_v2  ;;  %v1254_v6 = vcombine.high %v8667_v23, %v8667_v23 }
 0x1e4   : > { %5207 = vmatprep.subr.bf16.mxu0 %v7180_v7  ;;  %v1137_v7 = vcombine.high %v8582_v60, %v8582_v60 }
 0x1e5   : > { %v8689_v60 = vrot.slane %v1254_v6, %v8209_v49  ;;  %v7339_v6 = vld [vmem:[%s8135_s20 + $0x6e4] ss:$8 sps:$4 sm:$0xff]  }
 0x1e6   : > { %4798 = vmatpush1.bf16.msra.mxu1 %v7175_v8  ;;  %v1236_v8 = vcombine.high %v8586_v61, %v8586_v61  ;;  %v7259_v61 = vld [vmem:[%s8135_s20 + $0x610] ss:$8 sps:$4 sm:$0xff]  }
 0x1e7   : > { %5208 = vmatpush1.bf16.msra.mxu0 %v7178_v9  ;;  %4799 = vmatprep.subr.bf16.mxu1 %v7183_v10  ;;  %v7253_v9 = vld [vmem:[%s8135_s20 + $0x600] ss:$8 sps:$4 sm:$0xff]  }
 0x1e8   : > { %5209 = vmatprep.subr.bf16.mxu0 %v7186_v11  ;;  %v7256_v10 = vld [vmem:[%s8135_s20 + $0x1000] ss:$8 sps:$4 sm:$0xff]   ;;  %v7261_v11 = vld [vmem:[%s8135_s20 + $0x614] ss:$8 sps:$4 sm:$0xff]  }
 0x1ea   : > { %4800 = vmatpush1.bf16.msra.mxu1 %v7181_v12  ;;  %v7264_v12 = vld [vmem:[%s8135_s20 + $0x1014] ss:$8 sps:$4 sm:$0xff]  }
 0x1eb   : > { %5210 = vmatpush1.bf16.msra.mxu0 %v7184_v13  ;;  %4801 = vmatprep.subr.bf16.mxu1 %v7189_v14  ;;  %v8686_v13 = vrot.slane %v1108_v5, %v8209_v49  ;;  %v7262_v14 = vld [vmem:[%s8135_s20 + $0x1010] ss:$8 sps:$4 sm:$0xff]  }
 0x1ec   : > { %5211 = vmatprep.subr.bf16.mxu0 %v7192_v15  ;;  %v7267_v15 = vld [vmem:[%s8135_s20 + $0x624] ss:$8 sps:$4 sm:$0xff]   ;;  %v7334_v5 = vld [vmem:[%s8135_s20 + $0x10d0] ss:$8 sps:$4 sm:$0xff]  }
 0x1ee   : > { %4802 = vmatpush1.bf16.msra.mxu1 %v7187_v16  ;;  %v7270_v16 = vld [vmem:[%s8135_s20 + $0x1024] ss:$8 sps:$4 sm:$0xff]  }
 0x1ef   : > { %5212 = vmatpush1.bf16.msra.mxu0 %v7190_v19  ;;  %4803 = vmatprep.subr.bf16.mxu1 %v7195_v20  ;;  %v7265_v19 = vld [vmem:[%s8135_s20 + $0x620] ss:$8 sps:$4 sm:$0xff]  }
 0x1f0   : > { %5213 = vmatprep.subr.bf16.mxu0 %v7198_v21  ;;  %v7268_v20 = vld [vmem:[%s8135_s20 + $0x1020] ss:$8 sps:$4 sm:$0xff]   ;;  %v7273_v21 = vld [vmem:[%s8135_s20 + $0x634] ss:$8 sps:$4 sm:$0xff]  }
 0x1f2   : > { %4804 = vmatpush1.bf16.msra.mxu1 %v7193_v22  ;;  %v7276_v22 = vld [vmem:[%s8135_s20 + $0x1034] ss:$8 sps:$4 sm:$0xff]  }
 0x1f3   : > { %5214 = vmatpush1.bf16.msra.mxu0 %v7196_v24  ;;  %4805 = vmatprep.subr.bf16.mxu1 %v7201_v52  ;;  %v7271_v24 = vld [vmem:[%s8135_s20 + $0x630] ss:$8 sps:$4 sm:$0xff]  }
 0x1f4   : > { %5215 = vmatprep.subr.bf16.mxu0 %v7204_v25  ;;  %v7274_v52 = vld [vmem:[%s8135_s20 + $0x1030] ss:$8 sps:$4 sm:$0xff]   ;;  %v7279_v25 = vld [vmem:[%s8135_s20 + $0x644] ss:$8 sps:$4 sm:$0xff]  }
 0x1f6   : > { %4806 = vmatpush1.bf16.msra.mxu1 %v7199_v26  ;;  %v7282_v26 = vld [vmem:[%s8135_s20 + $0x1044] ss:$8 sps:$4 sm:$0xff]  }
 0x1f7   : > { %5216 = vmatpush1.bf16.msra.mxu0 %v7202_v27  ;;  %4807 = vmatprep.subr.bf16.mxu1 %v7207_v28  ;;  %v7277_v27 = vld [vmem:[%s8135_s20 + $0x640] ss:$8 sps:$4 sm:$0xff]  }
 0x1f8   : > { %5217 = vmatprep.subr.bf16.mxu0 %v7210_v29  ;;  %v7280_v28 = vld [vmem:[%s8135_s20 + $0x1040] ss:$8 sps:$4 sm:$0xff]   ;;  %v7285_v29 = vld [vmem:[%s8135_s20 + $0x654] ss:$8 sps:$4 sm:$0xff]  }
 0x1fa   : > { %4808 = vmatpush1.bf16.msra.mxu1 %v7205_v30  ;;  %v7288_v30 = vld [vmem:[%s8135_s20 + $0x1054] ss:$8 sps:$4 sm:$0xff]  }
 0x1fb   : > { %5218 = vmatpush1.bf16.msra.mxu0 %v7208_v31  ;;  %4809 = vmatprep.subr.bf16.mxu1 %v7213_v32  ;;  %v7283_v31 = vld [vmem:[%s8135_s20 + $0x650] ss:$8 sps:$4 sm:$0xff]  }
 0x1fc   : > { %5219 = vmatprep.subr.bf16.mxu0 %v7216_v33  ;;  %v7286_v32 = vld [vmem:[%s8135_s20 + $0x1050] ss:$8 sps:$4 sm:$0xff]   ;;  %v7291_v33 = vld [vmem:[%s8135_s20 + $0x664] ss:$8 sps:$4 sm:$0xff]  }
 0x1fe   : > { %4810 = vmatpush1.bf16.msra.mxu1 %v7211_v18  ;;  %v7294_v18 = vld [vmem:[%s8135_s20 + $0x1064] ss:$8 sps:$4 sm:$0xff]  }
 0x1ff   : > { %5220 = vmatpush1.bf16.msra.mxu0 %v7214_v36  ;;  %4811 = vmatprep.subr.bf16.mxu1 %v7219_v37  ;;  %v7289_v36 = vld [vmem:[%s8135_s20 + $0x660] ss:$8 sps:$4 sm:$0xff]  }
 0x200   : > { %5221 = vmatprep.subr.bf16.mxu0 %v7222_v38  ;;  %v7292_v37 = vld [vmem:[%s8135_s20 + $0x1060] ss:$8 sps:$4 sm:$0xff]   ;;  %v7297_v38 = vld [vmem:[%s8135_s20 + $0x674] ss:$8 sps:$4 sm:$0xff]  }
 0x202   : > { %4812 = vmatpush1.bf16.msra.mxu1 %v7217_v39  ;;  %v7300_v39 = vld [vmem:[%s8135_s20 + $0x1074] ss:$8 sps:$4 sm:$0xff]  }
 0x203   : > { %5222 = vmatpush1.bf16.msra.mxu0 %v7220_v44  ;;  %4813 = vmatprep.subr.bf16.mxu1 %v7225_v46  ;;  %v7295_v44 = vld [vmem:[%s8135_s20 + $0x670] ss:$8 sps:$4 sm:$0xff]  }
 0x204   : > { %5223 = vmatprep.subr.bf16.mxu0 %v7228_v47  ;;  %v7298_v46 = vld [vmem:[%s8135_s20 + $0x1070] ss:$8 sps:$4 sm:$0xff]   ;;  %v7303_v47 = vld [vmem:[%s8135_s20 + $0x684] ss:$8 sps:$4 sm:$0xff]  }
 0x206   : > { %4814 = vmatpush1.bf16.msra.mxu1 %v7223_v35  ;;  %v7306_v35 = vld [vmem:[%s8135_s20 + $0x1084] ss:$8 sps:$4 sm:$0xff]  }
 0x207   : > { %5224 = vmatpush1.bf16.msra.mxu0 %v7226_v17  ;;  %4815 = vmatprep.subr.bf16.mxu1 %v7231_v48  ;;  %v7301_v17 = vld [vmem:[%s8135_s20 + $0x680] ss:$8 sps:$4 sm:$0xff]  }
 0x208   : > { %5225 = vmatprep.subr.bf16.mxu0 %v7234_v50  ;;  %v7304_v48 = vld [vmem:[%s8135_s20 + $0x1080] ss:$8 sps:$4 sm:$0xff]   ;;  %v7309_v50 = vld [vmem:[%s8135_s20 + $0x694] ss:$8 sps:$4 sm:$0xff]  }
 0x20a   : > { %4816 = vmatpush1.bf16.msra.mxu1 %v7229_v34  ;;  %v7312_v34 = vld [vmem:[%s8135_s20 + $0x1094] ss:$8 sps:$4 sm:$0xff]  }
 0x20b   : > { %5226 = vmatpush1.bf16.msra.mxu0 %v7232_v41  ;;  %4817 = vmatprep.subr.bf16.mxu1 %v7237_v51  ;;  %v7307_v41 = vld [vmem:[%s8135_s20 + $0x690] ss:$8 sps:$4 sm:$0xff]  }
 0x20c   : > { %5227 = vmatprep.subr.bf16.mxu0 %v7240_v53  ;;  %v7310_v51 = vld [vmem:[%s8135_s20 + $0x1090] ss:$8 sps:$4 sm:$0xff]   ;;  %v7315_v53 = vld [vmem:[%s8135_s20 + $0x6a4] ss:$8 sps:$4 sm:$0xff]  }
 0x20e   : > { %4818 = vmatpush1.bf16.msra.mxu1 %v7235_v54  ;;  %v7318_v54 = vld [vmem:[%s8135_s20 + $0x10a4] ss:$8 sps:$4 sm:$0xff]  }
 0x20f   : > { %5228 = vmatpush1.bf16.msra.mxu0 %v7238_v55  ;;  %4819 = vmatprep.subr.bf16.mxu1 %v7243_v56  ;;  %v7313_v55 = vld [vmem:[%s8135_s20 + $0x6a0] ss:$8 sps:$4 sm:$0xff]  }
 0x210   : > { %5229 = vmatprep.subr.bf16.mxu0 %v7246_v57  ;;  %v7316_v56 = vld [vmem:[%s8135_s20 + $0x10a0] ss:$8 sps:$4 sm:$0xff]   ;;  %v7321_v57 = vld [vmem:[%s8135_s20 + $0x6b4] ss:$8 sps:$4 sm:$0xff]  }
 0x212   : > { %4820 = vmatpush1.bf16.msra.mxu1 %v7241_v63  ;;  %v7322_v63 = vld [vmem:[%s8135_s20 + $0x10b0] ss:$8 sps:$4 sm:$0xff]  }
 0x213   : > { %5230 = vmatpush1.bf16.msra.mxu0 %v7244_v0  ;;  %4821 = vmatprep.subr.bf16.mxu1 %v7249_v1  ;;  %v7327_v0 = vld [vmem:[%s8135_s20 + $0x6c4] ss:$8 sps:$4 sm:$0xff]  }
 0x214   : > { %5231 = vmatprep.subr.bf16.mxu0 %v7252_v45  ;;  %v7330_v1 = vld [vmem:[%s8135_s20 + $0x10c4] ss:$8 sps:$4 sm:$0xff]   ;;  %v7325_v45 = vld [vmem:[%s8135_s20 + $0x6c0] ss:$8 sps:$4 sm:$0xff]  }
 0x216   : > { %4822 = vmatpush1.bf16.msra.mxu1 %v7247_v3  ;;  %v7328_v3 = vld [vmem:[%s8135_s20 + $0x10c0] ss:$8 sps:$4 sm:$0xff]  }
 0x217   : > { %5232 = vmatpush1.bf16.msra.mxu0 %v7250_v58  ;;  %4832 = vmatprep.subr.bf16.mxu1 %v7255_v4  ;;  %v7333_v58 = vld [vmem:[%s8135_s20 + $0x6d4] ss:$8 sps:$4 sm:$0xff]  }
 0x218   : > { %5242 = vmatprep.subr.bf16.mxu0 %v7258_v59  ;;  %v7336_v4 = vld [vmem:[%s8135_s20 + $0x10d4] ss:$8 sps:$4 sm:$0xff]   ;;  %v7331_v59 = vld [vmem:[%s8135_s20 + $0x6d0] ss:$8 sps:$4 sm:$0xff]  }
 0x219   : > { %4824 = vmatmul.mubr.bf16.vlgmr.msra.gmra.mrb[0].mxu1 %v1137_v7  ;;  %v7342_v7 = vld [vmem:[%s8135_s20 + $0x10e4] ss:$8 sps:$4 sm:$0xff]  }
 0x21a   : > { %5234 = vmatmul.mubr.bf16.vlgmr.msra.gmra.mrb[0].mxu0 %v1236_v8  ;;  %4833 = vmatpush1.bf16.msra.mxu1 %v7253_v9  ;;  %v7337_v8 = vld [vmem:[%s8135_s20 + $0x6e0] ss:$8 sps:$4 sm:$0xff]  }
 0x21b   : > { %5243 = vmatpush1.bf16.msra.mxu0 %v7256_v10  ;;  %4834 = vmatprep.subr.bf16.mxu1 %v7261_v11  ;;  %v7340_v9 = vld [vmem:[%s8135_s20 + $0x10e0] ss:$8 sps:$4 sm:$0xff]   ;;  %v7345_v10 = vld [vmem:[%s8135_s20 + $0x6f4] ss:$8 sps:$4 sm:$0xff]  }
 0x21c   : > { %5244 = vmatprep.subr.bf16.mxu0 %v7264_v12  ;;  %4864 = vmatprep.mubr.bf16.mxu1 %v8686_v13  ;;  %v7348_v11 = vld [vmem:[%s8135_s20 + $0x10f4] ss:$8 sps:$4 sm:$0xff]   ;;  %v7343_v12 = vld [vmem:[%s8135_s20 + $0x6f0] ss:$8 sps:$4 sm:$0xff]  }
 0x21d   : > { %5274 = vmatprep.mubr.bf16.mxu0 %v8689_v60 }
 0x21e   : > { %4835 = vmatpush1.bf16.msra.mxu1 %v7259_v61  ;;  %v7346_v61 = vld [vmem:[%s8135_s20 + $0x10f0] ss:$8 sps:$4 sm:$0xff]  }
 0x21f   : > { %5245 = vmatpush1.bf16.msra.mxu0 %v7262_v14  ;;  %4836 = vmatprep.subr.bf16.mxu1 %v7267_v15  ;;  %v7352_v14 = vld [vmem:[%s8135_s20 + $0x704] ss:$8 sps:$4 sm:$0xff]  }
 0x220   : > { %5246 = vmatprep.subr.bf16.mxu0 %v7270_v16  ;;  %v7355_v15 = vld [vmem:[%s8135_s20 + $0x1104] ss:$8 sps:$4 sm:$0xff]   ;;  %v8755_v16 = vrot.slane %v8663_v2, %v8209_v49  ;;  %v1140_v2 = vcombine.high %v8686_v13, %v8686_v13 }
 0x221   : > { %v7364_v13 = vld [vmem:[%s8135_s20 + $0x724] ss:$8 sps:$4 sm:$0xff]  }
 0x222   : > { %4837 = vmatpush1.bf16.msra.mxu1 %v7265_v19  ;;  %v8759_v19 = vrot.slane %v8667_v23, %v8209_v49  ;;  %v7356_v23 = vld [vmem:[%s8135_s20 + $0x710] ss:$8 sps:$4 sm:$0xff]  }
 0x223   : > { %5247 = vmatpush1.bf16.msra.mxu0 %v7268_v20  ;;  %4838 = vmatprep.subr.bf16.mxu1 %v7273_v21  ;;  %v7350_v20 = vld [vmem:[%s8135_s20 + $0x700] ss:$8 sps:$4 sm:$0xff]  }
 0x224   : > { %5248 = vmatprep.subr.bf16.mxu0 %v7276_v22  ;;  %v7353_v21 = vld [vmem:[%s8135_s20 + $0x1100] ss:$8 sps:$4 sm:$0xff]   ;;  %v7358_v22 = vld [vmem:[%s8135_s20 + $0x714] ss:$8 sps:$4 sm:$0xff]  }
 0x226   : > { %4839 = vmatpush1.bf16.msra.mxu1 %v7271_v24  ;;  %v7361_v24 = vld [vmem:[%s8135_s20 + $0x1114] ss:$8 sps:$4 sm:$0xff]  }
 0x227   : > { %5249 = vmatpush1.bf16.msra.mxu0 %v7274_v52  ;;  %4840 = vmatprep.subr.bf16.mxu1 %v7279_v25  ;;  %v1286_v52 = vcombine.high %v8689_v60, %v8689_v60  ;;  %v7359_v25 = vld [vmem:[%s8135_s20 + $0x1110] ss:$8 sps:$4 sm:$0xff]   ;;  %v7362_v60 = vld [vmem:[%s8135_s20 + $0x720] ss:$8 sps:$4 sm:$0xff]  }
 0x228   : > { %5250 = vmatprep.subr.bf16.mxu0 %v7282_v26  ;;  %v7367_v26 = vld [vmem:[%s8135_s20 + $0x1124] ss:$8 sps:$4 sm:$0xff]  }
 0x22a   : > { %4841 = vmatpush1.bf16.msra.mxu1 %v7277_v27  ;;  %v7365_v27 = vld [vmem:[%s8135_s20 + $0x1120] ss:$8 sps:$4 sm:$0xff]  }
 0x22b   : > { %5251 = vmatpush1.bf16.msra.mxu0 %v7280_v28  ;;  %4842 = vmatprep.subr.bf16.mxu1 %v7285_v29  ;;  %v7370_v28 = vld [vmem:[%s8135_s20 + $0x734] ss:$8 sps:$4 sm:$0xff]  }
 0x22c   : > { %5252 = vmatprep.subr.bf16.mxu0 %v7288_v30  ;;  %v7373_v29 = vld [vmem:[%s8135_s20 + $0x1134] ss:$8 sps:$4 sm:$0xff]   ;;  %v7368_v30 = vld [vmem:[%s8135_s20 + $0x730] ss:$8 sps:$4 sm:$0xff]  }
 0x22e   : > { %4843 = vmatpush1.bf16.msra.mxu1 %v7283_v31  ;;  %v7371_v31 = vld [vmem:[%s8135_s20 + $0x1130] ss:$8 sps:$4 sm:$0xff]  }
 0x22f   : > { %5253 = vmatpush1.bf16.msra.mxu0 %v7286_v32  ;;  %4844 = vmatprep.subr.bf16.mxu1 %v7291_v33  ;;  %v7376_v32 = vld [vmem:[%s8135_s20 + $0x744] ss:$8 sps:$4 sm:$0xff]  }
 0x230   : > { %5254 = vmatprep.subr.bf16.mxu0 %v7294_v18  ;;  %v7379_v33 = vld [vmem:[%s8135_s20 + $0x1144] ss:$8 sps:$4 sm:$0xff]   ;;  %v7374_v18 = vld [vmem:[%s8135_s20 + $0x740] ss:$8 sps:$4 sm:$0xff]  }
 0x232   : > { %4845 = vmatpush1.bf16.msra.mxu1 %v7289_v36  ;;  %v7377_v36 = vld [vmem:[%s8135_s20 + $0x1140] ss:$8 sps:$4 sm:$0xff]  }
 0x233   : > { %5255 = vmatpush1.bf16.msra.mxu0 %v7292_v37  ;;  %4846 = vmatprep.subr.bf16.mxu1 %v7297_v38  ;;  %v7382_v37 = vld [vmem:[%s8135_s20 + $0x754] ss:$8 sps:$4 sm:$0xff]  }
 0x234   : > { %5256 = vmatprep.subr.bf16.mxu0 %v7300_v39  ;;  %v7385_v38 = vld [vmem:[%s8135_s20 + $0x1154] ss:$8 sps:$4 sm:$0xff]   ;;  %v7380_v39 = vld [vmem:[%s8135_s20 + $0x750] ss:$8 sps:$4 sm:$0xff]  }
 0x236   : > { %4847 = vmatpush1.bf16.msra.mxu1 %v7295_v44  ;;  %v7383_v44 = vld [vmem:[%s8135_s20 + $0x1150] ss:$8 sps:$4 sm:$0xff]  }
 0x237   : > { %5257 = vmatpush1.bf16.msra.mxu0 %v7298_v46  ;;  %4848 = vmatprep.subr.bf16.mxu1 %v7303_v47  ;;  %v7388_v46 = vld [vmem:[%s8135_s20 + $0x764] ss:$8 sps:$4 sm:$0xff]  }
 0x238   : > { %5258 = vmatprep.subr.bf16.mxu0 %v7306_v35  ;;  %v7391_v47 = vld [vmem:[%s8135_s20 + $0x1164] ss:$8 sps:$4 sm:$0xff]   ;;  %v7386_v35 = vld [vmem:[%s8135_s20 + $0x760] ss:$8 sps:$4 sm:$0xff]  }
 0x23a   : > { %4849 = vmatpush1.bf16.msra.mxu1 %v7301_v17  ;;  %v7389_v17 = vld [vmem:[%s8135_s20 + $0x1160] ss:$8 sps:$4 sm:$0xff]  }
 0x23b   : > { %5259 = vmatpush1.bf16.msra.mxu0 %v7304_v48  ;;  %4850 = vmatprep.subr.bf16.mxu1 %v7309_v50  ;;  %v7394_v48 = vld [vmem:[%s8135_s20 + $0x774] ss:$8 sps:$4 sm:$0xff]  }
 0x23c   : > { %5260 = vmatprep.subr.bf16.mxu0 %v7312_v34  ;;  %v7397_v50 = vld [vmem:[%s8135_s20 + $0x1174] ss:$8 sps:$4 sm:$0xff]   ;;  %v7392_v34 = vld [vmem:[%s8135_s20 + $0x770] ss:$8 sps:$4 sm:$0xff]  }
 0x23e   : > { %4851 = vmatpush1.bf16.msra.mxu1 %v7307_v41  ;;  %v7395_v41 = vld [vmem:[%s8135_s20 + $0x1170] ss:$8 sps:$4 sm:$0xff]  }
 0x23f   : > { %5261 = vmatpush1.bf16.msra.mxu0 %v7310_v51  ;;  %4852 = vmatprep.subr.bf16.mxu1 %v7315_v53  ;;  %v7400_v51 = vld [vmem:[%s8135_s20 + $0x784] ss:$8 sps:$4 sm:$0xff]  }
 0x240   : > { %5262 = vmatprep.subr.bf16.mxu0 %v7318_v54  ;;  %v7403_v53 = vld [vmem:[%s8135_s20 + $0x1184] ss:$8 sps:$4 sm:$0xff]   ;;  %v7398_v54 = vld [vmem:[%s8135_s20 + $0x780] ss:$8 sps:$4 sm:$0xff]  }
 0x242   : > { %4853 = vmatpush1.bf16.msra.mxu1 %v7313_v55  ;;  %v7401_v55 = vld [vmem:[%s8135_s20 + $0x1180] ss:$8 sps:$4 sm:$0xff]  }
 0x243   : > { %5263 = vmatpush1.bf16.msra.mxu0 %v7316_v56  ;;  %4854 = vmatprep.subr.bf16.mxu1 %v7321_v57  ;;  %v7406_v56 = vld [vmem:[%s8135_s20 + $0x794] ss:$8 sps:$4 sm:$0xff]  }
 0x244   : > { %5264 = vmatprep.subr.bf16.mxu0 %v7324_v43  ;;  %v7409_v57 = vld [vmem:[%s8135_s20 + $0x1194] ss:$8 sps:$4 sm:$0xff]   ;;  %v7404_v43 = vld [vmem:[%s8135_s20 + $0x790] ss:$8 sps:$4 sm:$0xff]  }
 0x246   : > { %4855 = vmatpush1.bf16.msra.mxu1 %v7319_v62  ;;  %v7407_v62 = vld [vmem:[%s8135_s20 + $0x1190] ss:$8 sps:$4 sm:$0xff]  }
 0x247   : > { %5265 = vmatpush1.bf16.msra.mxu0 %v7322_v63  ;;  %4856 = vmatprep.subr.bf16.mxu1 %v7327_v0  ;;  %v7412_v63 = vld [vmem:[%s8135_s20 + $0x7a4] ss:$8 sps:$4 sm:$0xff]  }
 0x248   : > { %5266 = vmatprep.subr.bf16.mxu0 %v7330_v1  ;;  %v7415_v0 = vld [vmem:[%s8135_s20 + $0x11a4] ss:$8 sps:$4 sm:$0xff]   ;;  %v7410_v1 = vld [vmem:[%s8135_s20 + $0x7a0] ss:$8 sps:$4 sm:$0xff]  }
 0x24a   : > { %4857 = vmatpush1.bf16.msra.mxu1 %v7325_v45  ;;  %v7413_v45 = vld [vmem:[%s8135_s20 + $0x11a0] ss:$8 sps:$4 sm:$0xff]  }
 0x24b   : > { %5267 = vmatpush1.bf16.msra.mxu0 %v7328_v3  ;;  %4858 = vmatprep.subr.bf16.mxu1 %v7333_v58  ;;  %v7418_v3 = vld [vmem:[%s8135_s20 + $0x7b4] ss:$8 sps:$4 sm:$0xff]  }
 0x24c   : > { %5268 = vmatprep.subr.bf16.mxu0 %v7336_v4  ;;  %v7421_v58 = vld [vmem:[%s8135_s20 + $0x11b4] ss:$8 sps:$4 sm:$0xff]   ;;  %v7416_v4 = vld [vmem:[%s8135_s20 + $0x7b0] ss:$8 sps:$4 sm:$0xff]  }
 0x24e   : > { %4859 = vmatpush1.bf16.msra.mxu1 %v7331_v59  ;;  %v7419_v59 = vld [vmem:[%s8135_s20 + $0x11b0] ss:$8 sps:$4 sm:$0xff]  }
 0x24f   : > { %5269 = vmatpush1.bf16.msra.mxu0 %v7334_v5  ;;  %4860 = vmatprep.subr.bf16.mxu1 %v7339_v6  ;;  %v7424_v5 = vld [vmem:[%s8135_s20 + $0x7c4] ss:$8 sps:$4 sm:$0xff]  }
 0x250   : > { %5270 = vmatprep.subr.bf16.mxu0 %v7342_v7  ;;  %v7427_v6 = vld [vmem:[%s8135_s20 + $0x11c4] ss:$8 sps:$4 sm:$0xff]   ;;  %v7422_v7 = vld [vmem:[%s8135_s20 + $0x7c0] ss:$8 sps:$4 sm:$0xff]  }
 0x252   : > { %4861 = vmatpush1.bf16.msra.mxu1 %v7337_v8  ;;  %v7425_v8 = vld [vmem:[%s8135_s20 + $0x11c0] ss:$8 sps:$4 sm:$0xff]  }
 0x253   : > { %5271 = vmatpush1.bf16.msra.mxu0 %v7340_v9  ;;  %4862 = vmatprep.subr.bf16.mxu1 %v7345_v10  ;;  %v7430_v9 = vld [vmem:[%s8135_s20 + $0x7d4] ss:$8 sps:$4 sm:$0xff]  }
 0x254   : > { %5272 = vmatprep.subr.bf16.mxu0 %v7348_v11  ;;  %v7433_v10 = vld [vmem:[%s8135_s20 + $0x11d4] ss:$8 sps:$4 sm:$0xff]   ;;  %v7428_v11 = vld [vmem:[%s8135_s20 + $0x7d0] ss:$8 sps:$4 sm:$0xff]  }
 0x256   : > { %4863 = vmatpush1.bf16.msra.mxu1 %v7343_v12  ;;  %v7431_v12 = vld [vmem:[%s8135_s20 + $0x11d0] ss:$8 sps:$4 sm:$0xff]  }
 0x257   : > { %5273 = vmatpush1.bf16.msra.mxu0 %v7346_v61  ;;  %4873 = vmatprep.subr.bf16.mxu1 %v7352_v14  ;;  %v7436_v61 = vld [vmem:[%s8135_s20 + $0x7e4] ss:$8 sps:$4 sm:$0xff]  }
 0x258   : > { %5283 = vmatprep.subr.bf16.mxu0 %v7355_v15  ;;  %v7439_v14 = vld [vmem:[%s8135_s20 + $0x11e4] ss:$8 sps:$4 sm:$0xff]   ;;  %v1239_v15 = vcombine.high %v8653_v40, %v8653_v40  ;;  %v7440_v40 = vld [vmem:[%s8135_s20 + $0x7f0] ss:$8 sps:$4 sm:$0xff]  }
 0x259   : > { %4865 = vmatmul.mubr.bf16.vlgmr.msra.gmra.mrb[0].mxu1 %v8755_v16 }
 0x25a   : > { %5275 = vmatmul.mubr.bf16.vlgmr.msra.gmra.mrb[0].mxu0 %v8759_v19  ;;  %4874 = vmatpush1.bf16.msra.mxu1 %v7350_v20  ;;  %v7434_v20 = vld [vmem:[%s8135_s20 + $0x7e0] ss:$8 sps:$4 sm:$0xff]  }
 0x25b   : > { %5284 = vmatpush1.bf16.msra.mxu0 %v7353_v21  ;;  %4875 = vmatprep.subr.bf16.mxu1 %v7358_v22  ;;  %v7437_v21 = vld [vmem:[%s8135_s20 + $0x11e0] ss:$8 sps:$4 sm:$0xff]   ;;  %v7442_v22 = vld [vmem:[%s8135_s20 + $0x7f4] ss:$8 sps:$4 sm:$0xff]  }
 0x25c   : > { %5285 = vmatprep.subr.bf16.mxu0 %v7361_v24  ;;  %4905 = vmatprep.mubr.bf16.mxu1 %v1140_v2  ;;  %v7445_v24 = vld [vmem:[%s8135_s20 + $0x11f4] ss:$8 sps:$4 sm:$0xff]  }
 0x25d   : > { %5315 = vmatprep.mubr.bf16.mxu0 %v1286_v52  ;;  %v8832_v2 = vld.sshfl [vmem:[%s9061_s0 + $0x10] sm:$0xff pattern:$0x75316420]  ;;  %v8835_v52 = vrot.slane %v1239_v15, %v8209_v49 }
 0x25e   : > { %4876 = vmatpush1.bf16.msra.mxu1 %v7356_v23  ;;  %v7443_v23 = vld [vmem:[%s8135_s20 + $0x11f0] ss:$8 sps:$4 sm:$0xff]  }
 0x25f   : > { %5286 = vmatpush1.bf16.msra.mxu0 %v7359_v25  ;;  %4877 = vmatprep.subr.bf16.mxu1 %v7364_v13  ;;  %v7448_v25 = vld [vmem:[%s8135_s20 + $0x804] ss:$8 sps:$4 sm:$0xff]   ;;  %v7515_v15 = vld [vmem:[%s8135_s20 + $0x12b0] ss:$8 sps:$4 sm:$0xff]  }
 0x260   : > { %5287 = vmatprep.subr.bf16.mxu0 %v7367_v26  ;;  %v7451_v13 = vld [vmem:[%s8135_s20 + $0x1204] ss:$8 sps:$4 sm:$0xff]   ;;  %v1156_v26 = vcombine.high %v8832_v2, %v8832_v2 }
 0x262   : > { %4878 = vmatpush1.bf16.msra.mxu1 %v7362_v60  ;;  %v1255_v60 = vcombine.high %v8835_v52, %v8835_v52 }
 0x263   : > { %5288 = vmatpush1.bf16.msra.mxu0 %v7365_v27  ;;  %4879 = vmatprep.subr.bf16.mxu1 %v7370_v28  ;;  %v1138_v27 = vcombine.high %v8755_v16, %v8755_v16  ;;  %v1284_v28 = vcombine.high %v8759_v19, %v8759_v19  ;;  %v7452_v19 = vld [vmem:[%s8135_s20 + $0x810] ss:$8 sps:$4 sm:$0xff]  }
 0x264   : > { %5289 = vmatprep.subr.bf16.mxu0 %v7373_v29  ;;  %v7446_v29 = vld [vmem:[%s8135_s20 + $0x800] ss:$8 sps:$4 sm:$0xff]   ;;  %v8857_v16 = vrot.slane %v1255_v60, %v8209_v49  ;;  %v7535_v60 = vld [vmem:[%s8135_s20 + $0x12e4] ss:$8 sps:$4 sm:$0xff]  }
 0x266   : > { %4880 = vmatpush1.bf16.msra.mxu1 %v7368_v30  ;;  %v7449_v30 = vld [vmem:[%s8135_s20 + $0x1200] ss:$8 sps:$4 sm:$0xff]  }
 0x267   : > { %5290 = vmatpush1.bf16.msra.mxu0 %v7371_v31  ;;  %4881 = vmatprep.subr.bf16.mxu1 %v7376_v32  ;;  %v7454_v31 = vld [vmem:[%s8135_s20 + $0x814] ss:$8 sps:$4 sm:$0xff]  }
 0x268   : > { %5291 = vmatprep.subr.bf16.mxu0 %v7379_v33  ;;  %v7457_v32 = vld [vmem:[%s8135_s20 + $0x1214] ss:$8 sps:$4 sm:$0xff]   ;;  %v8854_v33 = vrot.slane %v1156_v26, %v8209_v49  ;;  %v7532_v26 = vld [vmem:[%s8135_s20 + $0x8e4] ss:$8 sps:$4 sm:$0xff]  }
 0x26a   : > { %4882 = vmatpush1.bf16.msra.mxu1 %v7374_v18  ;;  %v7455_v18 = vld [vmem:[%s8135_s20 + $0x1210] ss:$8 sps:$4 sm:$0xff]  }
 0x26b   : > { %5292 = vmatpush1.bf16.msra.mxu0 %v7377_v36  ;;  %4883 = vmatprep.subr.bf16.mxu1 %v7382_v37  ;;  %v7460_v36 = vld [vmem:[%s8135_s20 + $0x824] ss:$8 sps:$4 sm:$0xff]  }
 0x26c   : > { %5293 = vmatprep.subr.bf16.mxu0 %v7385_v38  ;;  %v7463_v37 = vld [vmem:[%s8135_s20 + $0x1224] ss:$8 sps:$4 sm:$0xff]   ;;  %v7458_v38 = vld [vmem:[%s8135_s20 + $0x820] ss:$8 sps:$4 sm:$0xff]  }
 0x26e   : > { %4884 = vmatpush1.bf16.msra.mxu1 %v7380_v39  ;;  %v7461_v39 = vld [vmem:[%s8135_s20 + $0x1220] ss:$8 sps:$4 sm:$0xff]  }
 0x26f   : > { %5294 = vmatpush1.bf16.msra.mxu0 %v7383_v44  ;;  %4885 = vmatprep.subr.bf16.mxu1 %v7388_v46  ;;  %v7466_v44 = vld [vmem:[%s8135_s20 + $0x834] ss:$8 sps:$4 sm:$0xff]  }
 0x270   : > { %5295 = vmatprep.subr.bf16.mxu0 %v7391_v47  ;;  %v7469_v46 = vld [vmem:[%s8135_s20 + $0x1234] ss:$8 sps:$4 sm:$0xff]   ;;  %v7464_v47 = vld [vmem:[%s8135_s20 + $0x830] ss:$8 sps:$4 sm:$0xff]  }
 0x272   : > { %4886 = vmatpush1.bf16.msra.mxu1 %v7386_v35  ;;  %v7467_v35 = vld [vmem:[%s8135_s20 + $0x1230] ss:$8 sps:$4 sm:$0xff]  }
 0x273   : > { %5296 = vmatpush1.bf16.msra.mxu0 %v7389_v17  ;;  %4887 = vmatprep.subr.bf16.mxu1 %v7394_v48  ;;  %v7472_v17 = vld [vmem:[%s8135_s20 + $0x844] ss:$8 sps:$4 sm:$0xff]  }
 0x274   : > { %5297 = vmatprep.subr.bf16.mxu0 %v7397_v50  ;;  %v7475_v48 = vld [vmem:[%s8135_s20 + $0x1244] ss:$8 sps:$4 sm:$0xff]   ;;  %v7470_v50 = vld [vmem:[%s8135_s20 + $0x840] ss:$8 sps:$4 sm:$0xff]  }
 0x276   : > { %4888 = vmatpush1.bf16.msra.mxu1 %v7392_v34  ;;  %v7473_v34 = vld [vmem:[%s8135_s20 + $0x1240] ss:$8 sps:$4 sm:$0xff]  }
 0x277   : > { %5298 = vmatpush1.bf16.msra.mxu0 %v7395_v41  ;;  %4889 = vmatprep.subr.bf16.mxu1 %v7400_v51  ;;  %v7478_v41 = vld [vmem:[%s8135_s20 + $0x854] ss:$8 sps:$4 sm:$0xff]  }
 0x278   : > { %5299 = vmatprep.subr.bf16.mxu0 %v7403_v53  ;;  %v7481_v51 = vld [vmem:[%s8135_s20 + $0x1254] ss:$8 sps:$4 sm:$0xff]   ;;  %v7476_v53 = vld [vmem:[%s8135_s20 + $0x850] ss:$8 sps:$4 sm:$0xff]  }
 0x27a   : > { %4890 = vmatpush1.bf16.msra.mxu1 %v7398_v54  ;;  %v7479_v54 = vld [vmem:[%s8135_s20 + $0x1250] ss:$8 sps:$4 sm:$0xff]  }
 0x27b   : > { %5300 = vmatpush1.bf16.msra.mxu0 %v7401_v55  ;;  %4891 = vmatprep.subr.bf16.mxu1 %v7406_v56  ;;  %v7484_v55 = vld [vmem:[%s8135_s20 + $0x864] ss:$8 sps:$4 sm:$0xff]  }
 0x27c   : > { %5301 = vmatprep.subr.bf16.mxu0 %v7409_v57  ;;  %v7487_v56 = vld [vmem:[%s8135_s20 + $0x1264] ss:$8 sps:$4 sm:$0xff]   ;;  %v7482_v57 = vld [vmem:[%s8135_s20 + $0x860] ss:$8 sps:$4 sm:$0xff]  }
 0x27e   : > { %4892 = vmatpush1.bf16.msra.mxu1 %v7404_v43  ;;  %v7485_v43 = vld [vmem:[%s8135_s20 + $0x1260] ss:$8 sps:$4 sm:$0xff]  }
 0x27f   : > { %5302 = vmatpush1.bf16.msra.mxu0 %v7407_v62  ;;  %4893 = vmatprep.subr.bf16.mxu1 %v7412_v63  ;;  %v7490_v62 = vld [vmem:[%s8135_s20 + $0x874] ss:$8 sps:$4 sm:$0xff]  }
 0x280   : > { %5303 = vmatprep.subr.bf16.mxu0 %v7415_v0  ;;  %v7493_v63 = vld [vmem:[%s8135_s20 + $0x1274] ss:$8 sps:$4 sm:$0xff]   ;;  %v7488_v0 = vld [vmem:[%s8135_s20 + $0x870] ss:$8 sps:$4 sm:$0xff]  }
 0x282   : > { %4894 = vmatpush1.bf16.msra.mxu1 %v7410_v1  ;;  %v7491_v1 = vld [vmem:[%s8135_s20 + $0x1270] ss:$8 sps:$4 sm:$0xff]  }
 0x283   : > { %5304 = vmatpush1.bf16.msra.mxu0 %v7413_v45  ;;  %4895 = vmatprep.subr.bf16.mxu1 %v7418_v3  ;;  %v7496_v45 = vld [vmem:[%s8135_s20 + $0x884] ss:$8 sps:$4 sm:$0xff]  }
 0x284   : > { %5305 = vmatprep.subr.bf16.mxu0 %v7421_v58  ;;  %v7499_v3 = vld [vmem:[%s8135_s20 + $0x1284] ss:$8 sps:$4 sm:$0xff]   ;;  %v7494_v58 = vld [vmem:[%s8135_s20 + $0x880] ss:$8 sps:$4 sm:$0xff]  }
 0x286   : > { %4896 = vmatpush1.bf16.msra.mxu1 %v7416_v4  ;;  %v7497_v4 = vld [vmem:[%s8135_s20 + $0x1280] ss:$8 sps:$4 sm:$0xff]  }
 0x287   : > { %5306 = vmatpush1.bf16.msra.mxu0 %v7419_v59  ;;  %4897 = vmatprep.subr.bf16.mxu1 %v7424_v5  ;;  %v7502_v59 = vld [vmem:[%s8135_s20 + $0x894] ss:$8 sps:$4 sm:$0xff]  }
 0x288   : > { %5307 = vmatprep.subr.bf16.mxu0 %v7427_v6  ;;  %v7505_v5 = vld [vmem:[%s8135_s20 + $0x1294] ss:$8 sps:$4 sm:$0xff]   ;;  %v7500_v6 = vld [vmem:[%s8135_s20 + $0x890] ss:$8 sps:$4 sm:$0xff]  }
 0x28a   : > { %4898 = vmatpush1.bf16.msra.mxu1 %v7422_v7  ;;  %v7503_v7 = vld [vmem:[%s8135_s20 + $0x1290] ss:$8 sps:$4 sm:$0xff]  }
 0x28b   : > { %5308 = vmatpush1.bf16.msra.mxu0 %v7425_v8  ;;  %4899 = vmatprep.subr.bf16.mxu1 %v7430_v9  ;;  %v7508_v8 = vld [vmem:[%s8135_s20 + $0x8a4] ss:$8 sps:$4 sm:$0xff]  }
 0x28c   : > { %5309 = vmatprep.subr.bf16.mxu0 %v7433_v10  ;;  %v7511_v9 = vld [vmem:[%s8135_s20 + $0x12a4] ss:$8 sps:$4 sm:$0xff]   ;;  %v7506_v10 = vld [vmem:[%s8135_s20 + $0x8a0] ss:$8 sps:$4 sm:$0xff]  }
 0x28e   : > { %4900 = vmatpush1.bf16.msra.mxu1 %v7428_v11  ;;  %v7509_v11 = vld [vmem:[%s8135_s20 + $0x12a0] ss:$8 sps:$4 sm:$0xff]  }
 0x28f   : > { %5310 = vmatpush1.bf16.msra.mxu0 %v7431_v12  ;;  %4901 = vmatprep.subr.bf16.mxu1 %v7436_v61  ;;  %v7514_v12 = vld [vmem:[%s8135_s20 + $0x8b4] ss:$8 sps:$4 sm:$0xff]  }
 0x290   : > { %5311 = vmatprep.subr.bf16.mxu0 %v7439_v14  ;;  %v7517_v61 = vld [vmem:[%s8135_s20 + $0x12b4] ss:$8 sps:$4 sm:$0xff]   ;;  %v7512_v14 = vld [vmem:[%s8135_s20 + $0x8b0] ss:$8 sps:$4 sm:$0xff]  }
 0x292   : > { %4902 = vmatpush1.bf16.msra.mxu1 %v7434_v20  ;;  %v7520_v20 = vld [vmem:[%s8135_s20 + $0x8c4] ss:$8 sps:$4 sm:$0xff]  }
 0x293   : > { %5312 = vmatpush1.bf16.msra.mxu0 %v7437_v21  ;;  %4903 = vmatprep.subr.bf16.mxu1 %v7442_v22  ;;  %v7523_v21 = vld [vmem:[%s8135_s20 + $0x12c4] ss:$8 sps:$4 sm:$0xff]   ;;  %v7518_v22 = vld [vmem:[%s8135_s20 + $0x8c0] ss:$8 sps:$4 sm:$0xff]  }
 0x294   : > { %5313 = vmatprep.subr.bf16.mxu0 %v7445_v24  ;;  %v7521_v24 = vld [vmem:[%s8135_s20 + $0x12c0] ss:$8 sps:$4 sm:$0xff]  }
 0x296   : > { %4904 = vmatpush1.bf16.msra.mxu1 %v7440_v40  ;;  %v7526_v40 = vld [vmem:[%s8135_s20 + $0x8d4] ss:$8 sps:$4 sm:$0xff]  }
 0x297   : > { %5314 = vmatpush1.bf16.msra.mxu0 %v7443_v23  ;;  %4914 = vmatprep.subr.bf16.mxu1 %v7448_v25  ;;  %v7529_v23 = vld [vmem:[%s8135_s20 + $0x12d4] ss:$8 sps:$4 sm:$0xff]   ;;  %v7524_v25 = vld [vmem:[%s8135_s20 + $0x8d0] ss:$8 sps:$4 sm:$0xff]  }
 0x298   : > { %5324 = vmatprep.subr.bf16.mxu0 %v7451_v13  ;;  %v7527_v13 = vld [vmem:[%s8135_s20 + $0x12d0] ss:$8 sps:$4 sm:$0xff]  }
 0x299   : > { %4906 = vmatmul.mubr.bf16.vlgmr.msra.gmra.mrb[0].mxu1 %v1138_v27  ;;  %v7530_v27 = vld [vmem:[%s8135_s20 + $0x8e0] ss:$8 sps:$4 sm:$0xff]  }
 0x29a   : > { %5316 = vmatmul.mubr.bf16.vlgmr.msra.gmra.mrb[0].mxu0 %v1284_v28  ;;  %4915 = vmatpush1.bf16.msra.mxu1 %v7446_v29  ;;  %v7533_v28 = vld [vmem:[%s8135_s20 + $0x12e0] ss:$8 sps:$4 sm:$0xff]   ;;  %v7538_v29 = vld [vmem:[%s8135_s20 + $0x8f4] ss:$8 sps:$4 sm:$0xff]  }
 0x29b   : > { %5325 = vmatpush1.bf16.msra.mxu0 %v7449_v30  ;;  %4916 = vmatprep.subr.bf16.mxu1 %v7454_v31  ;;  %v7541_v30 = vld [vmem:[%s8135_s20 + $0x12f4] ss:$8 sps:$4 sm:$0xff]   ;;  %v7536_v31 = vld [vmem:[%s8135_s20 + $0x8f0] ss:$8 sps:$4 sm:$0xff]  }
 0x29c   : > { %5326 = vmatprep.subr.bf16.mxu0 %v7457_v32  ;;  %4946 = vmatprep.mubr.bf16.mxu1 %v8854_v33  ;;  %v7539_v32 = vld [vmem:[%s8135_s20 + $0x12f0] ss:$8 sps:$4 sm:$0xff]  }
 0x29d   : > { %5356 = vmatprep.mubr.bf16.mxu0 %v8857_v16 }
 0x29e   : > { %4917 = vmatpush1.bf16.msra.mxu1 %v7452_v19  ;;  %v7544_v19 = vld [vmem:[%s8135_s20 + $0x904] ss:$8 sps:$4 sm:$0xff]  }
 0x29f   : > { %5327 = vmatpush1.bf16.msra.mxu0 %v7455_v18  ;;  %4918 = vmatprep.subr.bf16.mxu1 %v7460_v36  ;;  %v7548_v18 = vld [vmem:[%s8135_s20 + $0x1304] ss:$8 sps:$4 sm:$0xff]   ;;  %v8923_v36 = vrot.slane %v8832_v2, %v8209_v49  ;;  %v1188_v2 = vcombine.high %v8854_v33, %v8854_v33 }
 0x2a0   : > { %5328 = vmatprep.subr.bf16.mxu0 %v7463_v37  ;;  %v8927_v37 = vrot.slane %v8835_v52, %v8209_v49  ;;  %v7549_v52 = vld [vmem:[%s8135_s20 + $0x910] ss:$8 sps:$4 sm:$0xff]   ;;  %v7557_v33 = vld [vmem:[%s8135_s20 + $0x924] ss:$8 sps:$4 sm:$0xff]  }
 0x2a2   : > { %4919 = vmatpush1.bf16.msra.mxu1 %v7458_v38  ;;  %v7542_v38 = vld [vmem:[%s8135_s20 + $0x900] ss:$8 sps:$4 sm:$0xff]  }
 0x2a3   : > { %5329 = vmatpush1.bf16.msra.mxu0 %v7461_v39  ;;  %4920 = vmatprep.subr.bf16.mxu1 %v7466_v44  ;;  %v7546_v39 = vld [vmem:[%s8135_s20 + $0x1300] ss:$8 sps:$4 sm:$0xff]   ;;  %v7551_v44 = vld [vmem:[%s8135_s20 + $0x914] ss:$8 sps:$4 sm:$0xff]  }
 0x2a4   : > { %5330 = vmatprep.subr.bf16.mxu0 %v7469_v46  ;;  %v7554_v46 = vld [vmem:[%s8135_s20 + $0x1314] ss:$8 sps:$4 sm:$0xff]  }
 0x2a6   : > { %4921 = vmatpush1.bf16.msra.mxu1 %v7464_v47  ;;  %v1287_v47 = vcombine.high %v8857_v16, %v8857_v16  ;;  %v7555_v16 = vld [vmem:[%s8135_s20 + $0x920] ss:$8 sps:$4 sm:$0xff]  }
 0x2a7   : > { %5331 = vmatpush1.bf16.msra.mxu0 %v7467_v35  ;;  %4922 = vmatprep.subr.bf16.mxu1 %v7472_v17  ;;  %v7552_v35 = vld [vmem:[%s8135_s20 + $0x1310] ss:$8 sps:$4 sm:$0xff]   ;;  %v7560_v17 = vld [vmem:[%s8135_s20 + $0x1324] ss:$8 sps:$4 sm:$0xff]  }
 0x2a8   : > { %5332 = vmatprep.subr.bf16.mxu0 %v7475_v48  ;;  %v7558_v48 = vld [vmem:[%s8135_s20 + $0x1320] ss:$8 sps:$4 sm:$0xff]  }
 0x2aa   : > { %4923 = vmatpush1.bf16.msra.mxu1 %v7470_v50  ;;  %v7563_v50 = vld [vmem:[%s8135_s20 + $0x934] ss:$8 sps:$4 sm:$0xff]  }
 0x2ab   : > { %5333 = vmatpush1.bf16.msra.mxu0 %v7473_v34  ;;  %4924 = vmatprep.subr.bf16.mxu1 %v7478_v41  ;;  %v7566_v34 = vld [vmem:[%s8135_s20 + $0x1334] ss:$8 sps:$4 sm:$0xff]   ;;  %v7561_v41 = vld [vmem:[%s8135_s20 + $0x930] ss:$8 sps:$4 sm:$0xff]  }
 0x2ac   : > { %5334 = vmatprep.subr.bf16.mxu0 %v7481_v51  ;;  %v7564_v51 = vld [vmem:[%s8135_s20 + $0x1330] ss:$8 sps:$4 sm:$0xff]  }
 0x2ae   : > { %4925 = vmatpush1.bf16.msra.mxu1 %v7476_v53  ;;  %v7569_v53 = vld [vmem:[%s8135_s20 + $0x944] ss:$8 sps:$4 sm:$0xff]  }
 0x2af   : > { %5335 = vmatpush1.bf16.msra.mxu0 %v7479_v54  ;;  %4926 = vmatprep.subr.bf16.mxu1 %v7484_v55  ;;  %v7572_v54 = vld [vmem:[%s8135_s20 + $0x1344] ss:$8 sps:$4 sm:$0xff]   ;;  %v7567_v55 = vld [vmem:[%s8135_s20 + $0x940] ss:$8 sps:$4 sm:$0xff]  }
 0x2b0   : > { %5336 = vmatprep.subr.bf16.mxu0 %v7487_v56  ;;  %v7570_v56 = vld [vmem:[%s8135_s20 + $0x1340] ss:$8 sps:$4 sm:$0xff]  }
 0x2b2   : > { %4927 = vmatpush1.bf16.msra.mxu1 %v7482_v57  ;;  %v7575_v57 = vld [vmem:[%s8135_s20 + $0x954] ss:$8 sps:$4 sm:$0xff]  }
 0x2b3   : > { %5337 = vmatpush1.bf16.msra.mxu0 %v7485_v43  ;;  %4928 = vmatprep.subr.bf16.mxu1 %v7490_v62  ;;  %v7578_v43 = vld [vmem:[%s8135_s20 + $0x1354] ss:$8 sps:$4 sm:$0xff]   ;;  %v7573_v62 = vld [vmem:[%s8135_s20 + $0x950] ss:$8 sps:$4 sm:$0xff]  }
 0x2b4   : > { %5338 = vmatprep.subr.bf16.mxu0 %v7493_v63  ;;  %v7576_v63 = vld [vmem:[%s8135_s20 + $0x1350] ss:$8 sps:$4 sm:$0xff]  }
 0x2b6   : > { %4929 = vmatpush1.bf16.msra.mxu1 %v7488_v0  ;;  %v7581_v0 = vld [vmem:[%s8135_s20 + $0x964] ss:$8 sps:$4 sm:$0xff]  }
 0x2b7   : > { %5339 = vmatpush1.bf16.msra.mxu0 %v7491_v1  ;;  %4930 = vmatprep.subr.bf16.mxu1 %v7496_v45  ;;  %v7584_v1 = vld [vmem:[%s8135_s20 + $0x1364] ss:$8 sps:$4 sm:$0xff]   ;;  %v7579_v45 = vld [vmem:[%s8135_s20 + $0x960] ss:$8 sps:$4 sm:$0xff]  }
 0x2b8   : > { %5340 = vmatprep.subr.bf16.mxu0 %v7499_v3  ;;  %v7582_v3 = vld [vmem:[%s8135_s20 + $0x1360] ss:$8 sps:$4 sm:$0xff]  }
 0x2ba   : > { %4931 = vmatpush1.bf16.msra.mxu1 %v7494_v58  ;;  %v7587_v58 = vld [vmem:[%s8135_s20 + $0x974] ss:$8 sps:$4 sm:$0xff]  }
 0x2bb   : > { %5341 = vmatpush1.bf16.msra.mxu0 %v7497_v4  ;;  %4932 = vmatprep.subr.bf16.mxu1 %v7502_v59  ;;  %v7590_v4 = vld [vmem:[%s8135_s20 + $0x1374] ss:$8 sps:$4 sm:$0xff]   ;;  %v7585_v59 = vld [vmem:[%s8135_s20 + $0x970] ss:$8 sps:$4 sm:$0xff]  }
 0x2bc   : > { %5342 = vmatprep.subr.bf16.mxu0 %v7505_v5  ;;  %v7588_v5 = vld [vmem:[%s8135_s20 + $0x1370] ss:$8 sps:$4 sm:$0xff]  }
 0x2be   : > { %4933 = vmatpush1.bf16.msra.mxu1 %v7500_v6  ;;  %v7593_v6 = vld [vmem:[%s8135_s20 + $0x984] ss:$8 sps:$4 sm:$0xff]  }
 0x2bf   : > { %5343 = vmatpush1.bf16.msra.mxu0 %v7503_v7  ;;  %4934 = vmatprep.subr.bf16.mxu1 %v7508_v8  ;;  %v7596_v7 = vld [vmem:[%s8135_s20 + $0x1384] ss:$8 sps:$4 sm:$0xff]   ;;  %v7591_v8 = vld [vmem:[%s8135_s20 + $0x980] ss:$8 sps:$4 sm:$0xff]  }
 0x2c0   : > { %5344 = vmatprep.subr.bf16.mxu0 %v7511_v9  ;;  %v7594_v9 = vld [vmem:[%s8135_s20 + $0x1380] ss:$8 sps:$4 sm:$0xff]  }
 0x2c2   : > { %4935 = vmatpush1.bf16.msra.mxu1 %v7506_v10  ;;  %v7599_v10 = vld [vmem:[%s8135_s20 + $0x994] ss:$8 sps:$4 sm:$0xff]  }
 0x2c3   : > { %5345 = vmatpush1.bf16.msra.mxu0 %v7509_v11  ;;  %4936 = vmatprep.subr.bf16.mxu1 %v7514_v12  ;;  %v7602_v11 = vld [vmem:[%s8135_s20 + $0x1394] ss:$8 sps:$4 sm:$0xff]   ;;  %v7597_v12 = vld [vmem:[%s8135_s20 + $0x990] ss:$8 sps:$4 sm:$0xff]  }
 0x2c4   : > { %5346 = vmatprep.subr.bf16.mxu0 %v7517_v61  ;;  %v7600_v61 = vld [vmem:[%s8135_s20 + $0x1390] ss:$8 sps:$4 sm:$0xff]  }
 0x2c6   : > { %4937 = vmatpush1.bf16.msra.mxu1 %v7512_v14  ;;  %v7605_v14 = vld [vmem:[%s8135_s20 + $0x9a4] ss:$8 sps:$4 sm:$0xff]  }
 0x2c7   : > { %5347 = vmatpush1.bf16.msra.mxu0 %v7515_v15  ;;  %4938 = vmatprep.subr.bf16.mxu1 %v7520_v20  ;;  %v7608_v15 = vld [vmem:[%s8135_s20 + $0x13a4] ss:$8 sps:$4 sm:$0xff]   ;;  %v7603_v20 = vld [vmem:[%s8135_s20 + $0x9a0] ss:$8 sps:$4 sm:$0xff]  }
 0x2c8   : > { %5348 = vmatprep.subr.bf16.mxu0 %v7523_v21  ;;  %v7606_v21 = vld [vmem:[%s8135_s20 + $0x13a0] ss:$8 sps:$4 sm:$0xff]  }
 0x2ca   : > { %4939 = vmatpush1.bf16.msra.mxu1 %v7518_v22  ;;  %v7611_v22 = vld [vmem:[%s8135_s20 + $0x9b4] ss:$8 sps:$4 sm:$0xff]  }
 0x2cb   : > { %5349 = vmatpush1.bf16.msra.mxu0 %v7521_v24  ;;  %4940 = vmatprep.subr.bf16.mxu1 %v7526_v40  ;;  %v7614_v24 = vld [vmem:[%s8135_s20 + $0x13b4] ss:$8 sps:$4 sm:$0xff]   ;;  %v7609_v40 = vld [vmem:[%s8135_s20 + $0x9b0] ss:$8 sps:$4 sm:$0xff]  }
 0x2cc   : > { %5350 = vmatprep.subr.bf16.mxu0 %v7529_v23  ;;  %v7612_v23 = vld [vmem:[%s8135_s20 + $0x13b0] ss:$8 sps:$4 sm:$0xff]  }
 0x2ce   : > { %4941 = vmatpush1.bf16.msra.mxu1 %v7524_v25  ;;  %v7617_v25 = vld [vmem:[%s8135_s20 + $0x9c4] ss:$8 sps:$4 sm:$0xff]  }
 0x2cf   : > { %5351 = vmatpush1.bf16.msra.mxu0 %v7527_v13  ;;  %4942 = vmatprep.subr.bf16.mxu1 %v7532_v26  ;;  %v7620_v13 = vld [vmem:[%s8135_s20 + $0x13c4] ss:$8 sps:$4 sm:$0xff]   ;;  %v7615_v26 = vld [vmem:[%s8135_s20 + $0x9c0] ss:$8 sps:$4 sm:$0xff]  }
 0x2d0   : > { %5352 = vmatprep.subr.bf16.mxu0 %v7535_v60  ;;  %v7618_v60 = vld [vmem:[%s8135_s20 + $0x13c0] ss:$8 sps:$4 sm:$0xff]  }
 0x2d2   : > { %4943 = vmatpush1.bf16.msra.mxu1 %v7530_v27  ;;  %v7623_v27 = vld [vmem:[%s8135_s20 + $0x9d4] ss:$8 sps:$4 sm:$0xff]  }
 0x2d3   : > { %5353 = vmatpush1.bf16.msra.mxu0 %v7533_v28  ;;  %4944 = vmatprep.subr.bf16.mxu1 %v7538_v29  ;;  %v7626_v28 = vld [vmem:[%s8135_s20 + $0x13d4] ss:$8 sps:$4 sm:$0xff]   ;;  %v7621_v29 = vld [vmem:[%s8135_s20 + $0x9d0] ss:$8 sps:$4 sm:$0xff]  }
 0x2d4   : > { %5354 = vmatprep.subr.bf16.mxu0 %v7541_v30  ;;  %v7624_v30 = vld [vmem:[%s8135_s20 + $0x13d0] ss:$8 sps:$4 sm:$0xff]  }
 0x2d6   : > { %4945 = vmatpush1.bf16.msra.mxu1 %v7536_v31  ;;  %v7629_v31 = vld [vmem:[%s8135_s20 + $0x9e4] ss:$8 sps:$4 sm:$0xff]  }
 0x2d7   : > { %5355 = vmatpush1.bf16.msra.mxu0 %v7539_v32  ;;  %4955 = vmatprep.subr.bf16.mxu1 %v7544_v19  ;;  %v7632_v32 = vld [vmem:[%s8135_s20 + $0x13e4] ss:$8 sps:$4 sm:$0xff]   ;;  %v7627_v19 = vld [vmem:[%s8135_s20 + $0x9e0] ss:$8 sps:$4 sm:$0xff]  }
 0x2d8   : > { %5365 = vmatprep.subr.bf16.mxu0 %v7548_v18  ;;  %v7630_v18 = vld [vmem:[%s8135_s20 + $0x13e0] ss:$8 sps:$4 sm:$0xff]  }
 0x2d9   : > { %4947 = vmatmul.mubr.bf16.vlgmr.msra.gmra.mrb[0].mxu1 %v8923_v36 }
 0x2da   : > { %5357 = vmatmul.mubr.bf16.vlgmr.msra.gmra.mrb[0].mxu0 %v8927_v37  ;;  %4956 = vmatpush1.bf16.msra.mxu1 %v7542_v38  ;;  %v7635_v38 = vld [vmem:[%s8135_s20 + $0x9f4] ss:$8 sps:$4 sm:$0xff]  }
 0x2db   : > { %5366 = vmatpush1.bf16.msra.mxu0 %v7546_v39  ;;  %4957 = vmatprep.subr.bf16.mxu1 %v7551_v44  ;;  %v7638_v39 = vld [vmem:[%s8135_s20 + $0x13f4] ss:$8 sps:$4 sm:$0xff]   ;;  %v7633_v44 = vld [vmem:[%s8135_s20 + $0x9f0] ss:$8 sps:$4 sm:$0xff]  }
 0x2dc   : > { %5367 = vmatprep.subr.bf16.mxu0 %v7554_v46  ;;  %4987 = vmatprep.mubr.bf16.mxu1 %v1188_v2  ;;  %v7636_v46 = vld [vmem:[%s8135_s20 + $0x13f0] ss:$8 sps:$4 sm:$0xff]   ;;  %v7641_v2 = vld [vmem:[%s8135_s20 + $0x1404] ss:$8 sps:$4 sm:$0xff]  }
 0x2dd   : > { %5397 = vmatprep.mubr.bf16.mxu0 %v1287_v47  ;;  %v7651_v47 = vld [vmem:[%s8149_s29 + $0x40] sm:$0xff]  }
 0x2de   : > { %4958 = vmatpush1.bf16.msra.mxu1 %v7549_v52  ;;  %v1186_v52 = vcombine.high %v8923_v36, %v8923_v36  ;;  %v7642_v36 = vld [vmem:[%s8135_s20 + $0x1410] ss:$8 sps:$4 sm:$0xff]  }
 0x2df   : > { %5368 = vmatpush1.bf16.msra.mxu0 %v7552_v35  ;;  %4959 = vmatprep.subr.bf16.mxu1 %v7557_v33  ;;  %v1285_v35 = vcombine.high %v8927_v37, %v8927_v37  ;;  %v7639_v33 = vld [vmem:[%s8135_s20 + $0x1400] ss:$8 sps:$4 sm:$0xff]   ;;  %v7647_v37 = vld [vmem:[%s8135_s20 + $0x1424] ss:$8 sps:$4 sm:$0xff]  }
 0x2e0   : > { %5369 = vmatprep.subr.bf16.mxu0 %v7560_v17  ;;  %v7644_v17 = vld [vmem:[%s8135_s20 + $0x1414] ss:$8 sps:$4 sm:$0xff]  }
 0x2e2   : > { %4960 = vmatpush1.bf16.msra.mxu1 %v7555_v16  ;;  %v7652_v16 = vld [vmem:[%s8149_s29] sm:$0xff]  }
 0x2e3   : > { %5370 = vmatpush1.bf16.msra.mxu0 %v7558_v48  ;;  %4961 = vmatprep.subr.bf16.mxu1 %v7563_v50  ;;  %v7653_v48 = vld [vmem:[%s8149_s29 + $0x48] sm:$0xff]   ;;  %v7875_v50 = vmov 0  }
 0x2e4   : > { %5371 = vmatprep.subr.bf16.mxu0 %v7566_v34  ;;  %v7654_v34 = vld [vmem:[%s8149_s29 + $0x8] sm:$0xff]  }
 0x2e6   : > { %4962 = vmatpush1.bf16.msra.mxu1 %v7561_v41  ;;  %v7655_v41 = vld [vmem:[%s8149_s29 + $0x50] sm:$0xff]  }
 0x2e7   : > { %5372 = vmatpush1.bf16.msra.mxu0 %v7564_v51  ;;  %4963 = vmatprep.subr.bf16.mxu1 %v7569_v53  ;;  %v7645_v51 = vld [vmem:[%s8135_s20 + $0x1420] ss:$8 sps:$4 sm:$0xff]   ;;  %v7650_v53 = vld [vmem:[%s8135_s20 + $0x1434] ss:$8 sps:$4 sm:$0xff]  }
 0x2e8   : > { %5373 = vmatprep.subr.bf16.mxu0 %v7572_v54  ;;  %v7648_v54 = vld [vmem:[%s8135_s20 + $0x1430] ss:$8 sps:$4 sm:$0xff]  }
 0x2ea   : > { %4964 = vmatpush1.bf16.msra.mxu1 %v7567_v55  ;;  %v5799_v55 = vld.sshfl [vmem:[%s9061_s0 + $0x28] sm:$0x1 pattern:$0x75316420] }
 0x2eb   : > { %5374 = vmatpush1.bf16.msra.mxu0 %v7570_v56  ;;  %4965 = vmatprep.subr.bf16.mxu1 %v7575_v57  ;;  %v1301_v56 = vrot.slane %v5799_v55, %v8209_v49  ;;  %v7656_v57 = vld [vmem:[%s8149_s29 + $0x10] sm:$0xff]  }
 0x2ec   : > { %5375 = vmatprep.subr.bf16.mxu0 %v7578_v43  ;;  %v7657_v43 = vld [vmem:[%s8149_s29 + $0x58] sm:$0xff]   ;;  %v7663_v49 = vld [vmem:[%s8149_s29 + $0x70] sm:$0xff]  }
 0x2ee   : > { %4966 = vmatpush1.bf16.msra.mxu1 %v7573_v62  ;;  %v7658_v62 = vld [vmem:[%s8149_s29 + $0x18] sm:$0xff]  }
 0x2ef   : > { %5376 = vmatpush1.bf16.msra.mxu0 %v7576_v63  ;;  %4967 = vmatprep.subr.bf16.mxu1 %v7581_v0  ;;  %v7659_v63 = vld [vmem:[%s8149_s29 + $0x60] sm:$0xff]  }
 0x2f0   : > { %5377 = vmatprep.subr.bf16.mxu0 %v7584_v1  ;;  %v7660_v0 = vld [vmem:[%s8149_s29 + $0x20] sm:$0xff]   ;;  %v7661_v1 = vld [vmem:[%s8149_s29 + $0x68] sm:$0xff]  }
 0x2f2   : > { %4968 = vmatpush1.bf16.msra.mxu1 %v7579_v45  ;;  %v7662_v45 = vld [vmem:[%s8149_s29 + $0x28] sm:$0xff]  }
 0x2f3   : > { %5378 = vmatpush1.bf16.msra.mxu0 %v7582_v3  ;;  %4969 = vmatprep.subr.bf16.mxu1 %v7587_v58  ;;  %v7664_v3 = vld [vmem:[%s8149_s29 + $0x30] sm:$0xff]   ;;  %v7665_v58 = vld [vmem:[%s8149_s29 + $0x78] sm:$0xff]  }
 0x2f4   : > { %5379 = vmatprep.subr.bf16.mxu0 %v7590_v4  ;;  %v7666_v4 = vld [vmem:[%s8149_s29 + $0x38] sm:$0xff]  }
 0x2f6   : > { %4970 = vmatpush1.bf16.msra.mxu1 %v7585_v59 }
 0x2f7   : > { %5380 = vmatpush1.bf16.msra.mxu0 %v7588_v5  ;;  %4971 = vmatprep.subr.bf16.mxu1 %v7593_v6 }
 0x2f8   : > { %5381 = vmatprep.subr.bf16.mxu0 %v7596_v7 }
 0x2fa   : > { %4972 = vmatpush1.bf16.msra.mxu1 %v7591_v8  ;;  %v1029_v8 = vsub.s32 0, %v8201_v42 }
 0x2fb   : > { %5382 = vmatpush1.bf16.msra.mxu0 %v7594_v9  ;;  %4973 = vmatprep.subr.bf16.mxu1 %v7599_v10  ;;  %v1025_v9 = vld [vmem:[%s8143_s16] sm:$0x3]  ;;  %v1033_v10 = vsub.s32 1, %v8201_v42  ;;  %v5621_v42 = vld [vmem:[#allocation7] sm:$0x1] (!%p6465_p1) }
 0x2fc   : > { %5383 = vmatprep.subr.bf16.mxu0 %v7602_v11  ;;  %v1030_v11 = vrot.slane %v1025_v9, %v1029_v8 }
 0x2fe   : > { %4974 = vmatpush1.bf16.msra.mxu1 %v7597_v12  ;;  %v1034_v12 = vrot.slane %v1025_v9, %v1033_v10 }
 0x2ff   : > { %5384 = vmatpush1.bf16.msra.mxu0 %v7600_v61  ;;  %4975 = vmatprep.subr.bf16.mxu1 %v7605_v14 }
 0x300   : > { %5385 = vmatprep.subr.bf16.mxu0 %v7608_v15 }
 0x302   : > { %4976 = vmatpush1.bf16.msra.mxu1 %v7603_v20 }
 0x303   : > { %5386 = vmatpush1.bf16.msra.mxu0 %v7606_v21  ;;  %4977 = vmatprep.subr.bf16.mxu1 %v7611_v22 }
 0x304   : > { %5387 = vmatprep.subr.bf16.mxu0 %v7614_v24 }
 0x306   : > { %4978 = vmatpush1.bf16.msra.mxu1 %v7609_v40 }
 0x307   : > { %5388 = vmatpush1.bf16.msra.mxu0 %v7612_v23  ;;  %4979 = vmatprep.subr.bf16.mxu1 %v7617_v25 }
 0x308   : > { %5389 = vmatprep.subr.bf16.mxu0 %v7620_v13 }
 0x30a   : > { %4980 = vmatpush1.bf16.msra.mxu1 %v7615_v26 }
 0x30b   : > { %5390 = vmatpush1.bf16.msra.mxu0 %v7618_v60  ;;  %4981 = vmatprep.subr.bf16.mxu1 %v7623_v27 }
 0x30c   : > { %5391 = vmatprep.subr.bf16.mxu0 %v7626_v28 }
 0x30e   : > { %4982 = vmatpush1.bf16.msra.mxu1 %v7621_v29 }
 0x30f   : > { %5392 = vmatpush1.bf16.msra.mxu0 %v7624_v30  ;;  %4983 = vmatprep.subr.bf16.mxu1 %v7629_v31 }
 0x310   : > { %5393 = vmatprep.subr.bf16.mxu0 %v7632_v32 }
 0x312   : > { %4984 = vmatpush1.bf16.msra.mxu1 %v7627_v19 }
 0x313   : > { %5394 = vmatpush1.bf16.msra.mxu0 %v7630_v18  ;;  %4985 = vmatprep.subr.bf16.mxu1 %v7635_v38 }
 0x314   : > { %5395 = vmatprep.subr.bf16.mxu0 %v7638_v39 }
 0x316   : > { %4986 = vmatpush1.bf16.msra.mxu1 %v7633_v44 }
 0x317   : > { %5396 = vmatpush1.bf16.msra.mxu0 %v7636_v46  ;;  %6471 = vmatprep.subr.bf16.mxu1 %v7651_v47 }
 0x318   : > { %5406 = vmatprep.subr.bf16.mxu0 %v7641_v2 }
 0x319   : > { %4988 = vmatmul.mubr.bf16.vlgmr.msra.gmra.mrb[0].mxu1 %v1186_v52 }
 0x31a   : > { %5398 = vmatmul.mubr.bf16.vlgmr.msra.gmra.mrb[0].mxu0 %v1285_v35  ;;  %6472 = vmatpush3.bf16.msra.mxu1 %v7652_v16 }
 0x31b   : > { %5407 = vmatpush1.bf16.msra.mxu0 %v7639_v33  ;;  %5438 = vmatprep.mubr.bf16.mxu0 %v7875_v50 }
 0x31c   : > { %5408 = vmatprep.subr.bf16.mxu0 %v7644_v17  ;;  %6473 = vmatprep.subr.bf16.mxu1 %v7653_v48 }
 0x31e   : > { %6474 = vmatpush3.bf16.msra.mxu1 %v7654_v34 }
 0x31f   : > { %5409 = vmatpush1.bf16.msra.mxu0 %v7642_v36  ;;  %6475 = vmatprep.subr.bf16.mxu1 %v7655_v41 }
 0x320   : > { %5410 = vmatprep.subr.bf16.mxu0 %v7647_v37 }
 0x322   : > { %6476 = vmatpush3.bf16.msra.mxu1 %v7656_v57 }
 0x323   : > { %5411 = vmatpush1.bf16.msra.mxu0 %v7645_v51  ;;  %6477 = vmatprep.subr.bf16.mxu1 %v7657_v43 }
 0x324   : > { %5412 = vmatprep.subr.bf16.mxu0 %v7650_v53 }
 0x326   : > { %6478 = vmatpush3.bf16.msra.mxu1 %v7658_v62 }
 0x327   : > { %5413 = vmatpush1.bf16.msra.mxu0 %v7648_v54  ;;  %6479 = vmatprep.subr.bf16.mxu1 %v7659_v63 }
 0x32a   : > { %6448 = vmatmul.mubr.msk.bf16.vlgmr.msra.gmra.mrb[0].mxu0 %vm4582_vm0, %v1301_v56  ;;  %6480 = vmatpush3.bf16.msra.mxu1 %v7660_v0 }
 0x32b   : > { %6481 = vmatprep.subr.bf16.mxu1 %v7661_v1 }
 0x32e   : > { %6482 = vmatpush3.bf16.msra.mxu1 %v7662_v45 }
 0x32f   : > { %6483 = vmatprep.subr.bf16.mxu1 %v7663_v49 }
 0x332   : > { %6484 = vmatpush3.bf16.msra.mxu1 %v7664_v3 }
 0x333   : > { %6485 = vmatprep.subr.bf16.mxu1 %v7665_v58 }
 0x336   : > { %6486 = vmatpush3.bf16.msra.mxu1 %v7666_v4 }
 0x3ec   : > { %v4989_v59 = vpop.f32.mrb[0].mxu1 }
 0x3ed   : > { %v4991_v5 = vpop.f32.mrb[1].mxu1  ;;  %v6493_v61 = vadd.f32 %v4989_v59, %v1030_v11 }
 0x3ee   : > { %v4993_v6 = vpop.f32.mrb[2].mxu1  ;;  %v6495_v14 = vadd.f32 %v4991_v5, %v1034_v12 }
 0x3ef   : > { %v4994_v7 = vpop.f32.mrb[3].mxu1 }
 0x3fd   : > { %v5440_v15 = vpop.f32.mrb[0].mxu0 }
 0x3fe   : > { %v6494_v20 = vadd.f32 %v6493_v61, %v5440_v15  ;;  %v5442_v21 = vpop.f32.mrb[1].mxu0 }
 0x3ff   : > { %v6496_v22 = vadd.f32 %v6495_v14, %v5442_v21  ;;  %v5444_v24 = vpop.f32.mrb[2].mxu0 }
 0x400   : > { %v5445_v40 = vpop.f32.mrb[3].mxu0  ;;  %v5447_v25 = vpack.c.bf16 %v6494_v20, %v6494_v20 }
 0x401   : > { %v5448_v23 = vpack.c.bf16 %v6496_v22, %v6496_v22 }
 0x403   : > { %5609 = vmatprep.mubr.bf16.mxu1 %v5448_v23 }
 0x404   : > { %5610 = vmatmul.mubr.bf16.vlgmr.msra.gmra.mrb[4].mxu1 %v5447_v25 }
 0x4d4   : > { %5620 = sbr.rel (%p6465_p1) target bundleno = 1253 (0x4e5), region = 60 }
 0x4d7   : > { %v6487_v13 = vpop.f32.mrb[4].mxu1 }
 0x4d8   : > { %v6488_v26 = vpop.f32.mrb[5].mxu1 }
 0x4d9   : > { %v6489_v60 = vadd.f32 %v6488_v26, %v6487_v13  ;;  %v6490_v27 = vpop.f32.mrb[6].mxu1 }
 0x4da   : > { %v6491_v28 = vpop.f32.mrb[7].mxu1 }
 0x4db   : > { %s5623_s20 = scalar_select %p5622_p2, 1, 0 }
 0x4dd   : > { %s5624_s16 = scvt.s32.f32 %s5623_s20 }
 0x4df   : > { %v5625_v29 = vstv %s5624_s16 }
 0x4e0   : > { %v5626_v30 = vmul.f32 %v5625_v29, %v5621_v42 }
 0x4e2   : > { %v5631_v31 = vrot.slane %v5626_v30, %v1029_v8 }
 0x4e4   : > { %5633 = vst [vmem:[%s8160_s6] sm:$0x3] %v5631_v31 }
 0x4e5 PF:  {}
 0x4eb   : > { %v5634_v32 = vld [vmem:[%s8160_s6] sm:$0x3] }
 0x4ec   : > { %v5635_v19 = vadd.f32 %v6489_v60, %v5634_v32 }
 0x4ee   : > { %5636 = vst [vmem:[%s8160_s6] sm:$0x3] %v5635_v19 }
 0x4ef PF: > { %s22_s25 = sadd.s32 1, %s7863_s25   ;;  %s9105_s21 = sld [smem:[#allocation12_spill]] }
 0x4f0   : > { %p19_p5 = scmp.ge.s32.totalorder %s22_s25, 6   ;;  %s9106_s20 = sld [smem:[#allocation17_spill]] }
 0x4f1   : > { %s9107_s22 = sld [smem:[#allocation13_spill]]  ;;  %s9108_s29 = sld [smem:[#allocation14_spill]] }
 0x4f2   : > { %s9109_s23 = sld [smem:[#allocation15_spill]]  ;;  %s9110_s24 = sld [smem:[#allocation16_spill]] }
 0x4f3   : > { %s9111_s18 = smov %s7839_s19  ;;  %21 = sbr.rel (!%p19_p5) target bundleno = 10 (0xa), region = 112 }
 0x4f5   : > { %s9112_s19 = smov %s9105_s21 }
 0x4f7   : > { %s9113_s21 = smov %s9107_s22  ;;  %s9114_s22 = smov %s9108_s29 }
 0x4fa   :  { %5656 = vsyncpa [#allocation3], 1 }
 0x4fb   :  { %5658 = vsyncpa [#allocation3 + $0x1], 1 }
 0x4fc   :  { %5659 = vsyncpa [#allocation5], 1 }
 0x4fd   :  { %5661 = vsyncpa [#allocation5 + $0x1], 1 }
 0x4fe   :  { %5662 = vsyncpa [#allocation8], 1 }

// kernel: classifier_forward.2
= control target key start
LH: loop header
LB: loop body
LE: loop exit
PB: predicated region body
PF: predicated region fallthrough
CT: control target
= control target key end

     0   :  { %14 = vsyncpa [#allocation7], 0  ;;  %s18599_s0 = inlined_call_operand.vmem [shape: bf16[2,144,64], index: 0, kind: input, shape index: {}]   ;;  %s18600_s1 = inlined_call_operand.hbm [shape: bf16[64,64], index: 1, kind: input, shape index: {}]   ;;  %s18601_s2 = inlined_call_operand.hbm [shape: f32[1,64], index: 2, kind: input, shape index: {}]   ;;  %s18602_s3 = inlined_call_operand.hbm [shape: bf16[4,256,128], index: 3, kind: input, shape index: {}]   ;;  %s18603_s4 = inlined_call_operand.hbm [shape: f32[1,128], index: 4, kind: input, shape index: {}]   ;;  %s18604_s5 = inlined_call_operand.hbm [shape: bf16[4,512,256], index: 5, kind: input, shape index: {}]   ;;  %s18605_s6 = inlined_call_operand.hbm [shape: f32[1,256], index: 6, kind: input, shape index: {}]   ;;  %s18606_s7 = inlined_call_operand.vmem [shape: bf16[4,1024,64], index: 7, kind: input, shape index: {}]   ;;  %s18607_s8 = inlined_call_operand.hbm [shape: f32[1,64], index: 8, kind: input, shape index: {}]   ;;  %s18608_s9 = inlined_call_operand.vmem [shape: bf16[2,144,64], index: 9, kind: output, shape index: {}]  }
   0x1   :  { %15 = vsyncpa [#allocation9], 0 }
   0x2   :  { %16 = vsyncpa [#allocation12], 0 }
   0x3   :  { %17 = vsyncpa [#allocation15], 0  ;;  %s14890_s30 = smov 0  }
   0x4 LB: > { %s14824_s10 = smov [#allocation8]   ;;  %s14896_s12 = sadd.s32 4294967295, %s14822_s30   ;;  %s14822_s30 = sphi %s14890_s30, %s23_s30  }
   0x5   : > { %s274_s11 = sshll.u32 %s14824_s10, 4  ;;  %p10834_p0 = scmp.ge.s32.totalorder %s14822_s30, 1  ;;  %s14901_s11 = int_to_ptr.vmem [resolvable:$true] %s274_s11 }
   0x6   : > { %p248_p1 = scmp.lt.s32.totalorder %s14822_s30, 3  ;;  %p18609_p2 = scmp.eq.s32.totalorder %s14896_s12, 0 }
   0x7   : > { %s14825_s14 = smov [#allocation11]   ;;  %s14826_s16 = smov [#allocation14]  }
   0x8   : > { %p14903_p3 = pnand %p10834_p0, %p248_p1  ;;  %s298_s15 = sshll.u32 %s14825_s14, 4  ;;  %s14909_s15 = int_to_ptr.vmem [resolvable:$true] %s298_s15 }
   0x9   : > { %s322_s17 = sshll.u32 %s14826_s16, 4  ;;  %s14827_s19 = smov [#allocation6]   ;;  %s14917_s17 = int_to_ptr.vmem [resolvable:$true] %s322_s17 }
   0xa   : > { %s18742_s13 = scalar_select %p14903_p3, 1, 0 }
   0xb   : > { %p13622_p4 = pneg %p14903_p3  ;;  %s260_s20 = sshll.u32 %s14827_s19, 4  ;;  %s14919_s20 = int_to_ptr.vmem [resolvable:$true] %s260_s20 }
   0xc   : > { %s14604_s23 = scalar_lea.hbm %s18601_s2, 16 }
   0xd   : > { %p14913_p5 = pnand %p18609_p2, %p13622_p4  ;;  %p14605_p6 = scmp.ne.s32.totalorder %s18601_s2, %s14604_s23 }
   0xe   : > { %p14611_p10 = scmp.lt.u32.totalorder %s14604_s23, %s18601_s2 }
   0xf   : > { %p14929_p7 = pneg %p14913_p5 }
  0x11   : > { %p14607_p8 = pnand %p14929_p7, %p14605_p6 }
  0x13   : > { %p14608_p9 = pneg %p14607_p8 }
  0x15   : > { %p14613_p11 = pnand %p14611_p10, %p14608_p9 }
  0x17   : > { %14616 = shalt.err (!%p14613_p11)
}
  0x18   : > { %s14617_s29 = scalar_lea.vmem %s14901_s11, 16  ;;  %s14624_s10 = scalar_lea.vmem %s14901_s11, 32 }
  0x19   : > { %p14618_p12 = scmp.ne.s32.totalorder %s14901_s11, %s14617_s29  ;;  %p14625_p1 = scmp.lt.s32.totalorder %s14901_s11, %s14901_s11 }
  0x1a   : > { %p14626_p4 = scmp.lt.s32.totalorder %s14624_s10, %s14617_s29 }
  0x1b   : > { %p14620_p13 = pnand %p14618_p12, %p14929_p7 }
  0x1c   : > { %p14627_p6 = por %p14626_p4, %p14625_p1 }
  0x1d   : > { %p14621_p0 = pneg %p14620_p13 }
  0x1f   : > { %p14628_p8 = pnand %p14627_p6, %p14621_p0 }
  0x21   : > { %14631 = shalt.err (!%p14628_p8)
}
  0x22   : > { %13628 = dma.hbm_to_vmem [thread:$0]  (!%p14913_p5), %s18601_s2, 16, %s14901_s11, [#allocation9]  }
  0x23   : > { %s14632_s22 = scalar_lea.hbm %s18603_s4, 16 }
  0x24   : > { %p14633_p9 = scmp.ne.s32.totalorder %s18603_s4, %s14632_s22  ;;  %p14639_p12 = scmp.lt.u32.totalorder %s14632_s22, %s18603_s4 }
  0x26   : > { %p14635_p10 = pnand %p14633_p9, %p14929_p7 }
  0x28   : > { %p14636_p11 = pneg %p14635_p10 }
  0x2a   : > { %p14641_p13 = pnand %p14639_p12, %p14636_p11 }
  0x2c   : > { %14644 = shalt.err (!%p14641_p13)
}
  0x2d   : > { %s14645_s11 = scalar_lea.vmem %s14909_s15, 16  ;;  %s14652_s28 = scalar_lea.vmem %s14909_s15, 32 }
  0x2e   : > { %p14646_p0 = scmp.ne.s32.totalorder %s14909_s15, %s14645_s11  ;;  %p14653_p6 = scmp.lt.s32.totalorder %s14909_s15, %s14909_s15 }
  0x2f   : > { %p14654_p8 = scmp.lt.s32.totalorder %s14652_s28, %s14645_s11 }
  0x30   : > { %p14648_p1 = pnand %p14646_p0, %p14929_p7 }
  0x31   : > { %p14655_p9 = por %p14654_p8, %p14653_p6 }
  0x32   : > { %p14649_p4 = pneg %p14648_p1 }
  0x34   : > { %p14656_p10 = pnand %p14655_p9, %p14649_p4 }
  0x36   : > { %14659 = shalt.err (!%p14656_p10)
}
  0x37   : > { %13634 = dma.hbm_to_vmem [thread:$0]  (!%p14913_p5), %s18603_s4, 16, %s14909_s15, [#allocation12]  }
  0x38   : > { %s14660_s19 = scalar_lea.hbm %s18605_s6, 32 }
  0x39   : > { %p14661_p11 = scmp.ne.s32.totalorder %s18605_s6, %s14660_s19  ;;  %p14667_p0 = scmp.lt.u32.totalorder %s14660_s19, %s18605_s6 }
  0x3b   : > { %p14663_p12 = pnand %p14661_p11, %p14929_p7 }
  0x3d   : > { %p14664_p13 = pneg %p14663_p12 }
  0x3f   : > { %p14669_p1 = pnand %p14667_p0, %p14664_p13 }
  0x41   : > { %14672 = shalt.err (!%p14669_p1)
}
  0x42   : > { %s14673_s15 = scalar_lea.vmem %s14917_s17, 32  ;;  %p14681_p9 = scmp.lt.s32.totalorder %s14917_s17, %s14917_s17 }
  0x43   : > { %p14674_p4 = scmp.ne.s32.totalorder %s14917_s17, %s14673_s15  ;;  %p14682_p10 = scmp.lt.s32.totalorder %s14673_s15, %s14673_s15 }
  0x45   : > { %p14676_p6 = pnand %p14674_p4, %p14929_p7  ;;  %p14683_p11 = por %p14682_p10, %p14681_p9 }
  0x47   : > { %p14677_p8 = pneg %p14676_p6 }
  0x49   : > { %p14684_p12 = pnand %p14683_p11, %p14677_p8 }
  0x4b   : > { %14687 = shalt.err (!%p14684_p12)
}
  0x4c   : > { %13640 = dma.hbm_to_vmem [thread:$0]  (!%p14913_p5), %s18605_s6, 32, %s14917_s17, [#allocation15]  }
  0x4d   : > { %s14688_s29 = scalar_lea.hbm %s18600_s1, 512 }
  0x4e   : > { %p14689_p13 = scmp.ne.s32.totalorder %s18600_s1, %s14688_s29  ;;  %p14695_p4 = scmp.lt.u32.totalorder %s14688_s29, %s18600_s1 }
  0x50   : > { %p14691_p0 = pnand %p14689_p13, %p14929_p7 }
  0x52   : > { %p14692_p1 = pneg %p14691_p0 }
  0x54   : > { %p14697_p6 = pnand %p14695_p4, %p14692_p1 }
  0x56   : > { %14700 = shalt.err (!%p14697_p6)
}
  0x57   : > { %s14701_s17 = scalar_lea.vmem %s14919_s20, 512  ;;  %p14709_p11 = scmp.lt.s32.totalorder %s14919_s20, %s14919_s20 }
  0x58   : > { %p14702_p8 = scmp.ne.s32.totalorder %s14919_s20, %s14701_s17  ;;  %p14710_p12 = scmp.lt.s32.totalorder %s14701_s17, %s14701_s17 }
  0x5a   : > { %p14704_p9 = pnand %p14702_p8, %p14929_p7  ;;  %p14711_p13 = por %p14710_p12, %p14709_p11 }
  0x5c   : > { %p14705_p10 = pneg %p14704_p9 }
  0x5e   : > { %p14712_p0 = pnand %p14711_p13, %p14705_p10 }
  0x60   : > { %14715 = shalt.err (!%p14712_p0)
}
  0x61   : > { %s14828_s21 = smov 64   ;;  %s14829_s22 = smov 4  }
  0x62   : > { %13625 = dma.hbm_to_vmem [thread:$0]  (!%p14913_p5), %s18600_s1, 512, %s14919_s20, [#allocation7], %s14828_s21, %s14828_s21, %s14829_s22  }
  0x63   : > { %s14830_s15 = smov [#allocation10]   ;;  %s14831_s27 = smov [#allocation13]  }
  0x64   : > { %s284_s25 = sshll.u32 %s14830_s15, 4  ;;  %s308_s11 = sshll.u32 %s14831_s27, 4  ;;  %s285_s25 = int_to_ptr.vmem [resolvable:$true] %s284_s25  ;;  %s309_s11 = int_to_ptr.vmem [resolvable:$true] %s308_s11 }
  0x65   : > { %s14716_s10 = scalar_lea.hbm %s18602_s3, 8192 }
  0x66   : > { %p14717_p1 = scmp.ne.s32.totalorder %s18602_s3, %s14716_s10  ;;  %p14723_p8 = scmp.lt.u32.totalorder %s14716_s10, %s18602_s3 }
  0x68   : > { %p14719_p4 = pnand %p14717_p1, %p14929_p7 }
  0x6a   : > { %p14720_p6 = pneg %p14719_p4 }
  0x6c   : > { %p14725_p9 = pnand %p14723_p8, %p14720_p6 }
  0x6e   : > { %14728 = shalt.err (!%p14725_p9)
}
  0x6f   : > { %s14729_s20 = scalar_lea.vmem %s285_s25, 8192  ;;  %p14737_p13 = scmp.lt.s32.totalorder %s285_s25, %s285_s25 }
  0x70   : > { %p14730_p10 = scmp.ne.s32.totalorder %s285_s25, %s14729_s20  ;;  %p14738_p0 = scmp.lt.s32.totalorder %s14729_s20, %s14729_s20 }
  0x72   : > { %p14732_p11 = pnand %p14730_p10, %p14929_p7  ;;  %p14739_p2 = por %p14738_p0, %p14737_p13 }
  0x74   : > { %p14733_p12 = pneg %p14732_p11 }
  0x76   : > { %p14740_p3 = pnand %p14739_p2, %p14733_p12 }
  0x78   : > { %14743 = shalt.err (!%p14740_p3)
}
  0x79   : > { %13631 = dma.hbm_to_vmem [thread:$0]  (!%p14913_p5), %s18602_s3, 8192, %s285_s25, [#allocation9], %s14828_s21, %s14828_s21, %s14829_s22  }
  0x7a   : > { %s14744_s28 = scalar_lea.hbm %s18604_s5, 32768 }
  0x7b   : > { %p14745_p1 = scmp.ne.s32.totalorder %s18604_s5, %s14744_s28  ;;  %p14751_p3 = scmp.lt.u32.totalorder %s14744_s28, %s18604_s5 }
  0x7d   : > { %p14747_p4 = pnand %p14745_p1, %p14929_p7 }
  0x7f   : > { %p14748_p2 = pneg %p14747_p4 }
  0x81   : > { %p14753_p6 = pnand %p14751_p3, %p14748_p2 }
  0x83   : > { %14756 = shalt.err (!%p14753_p6)
}
  0x84   : > { %s14757_s19 = scalar_lea.vmem %s309_s11, 32768  ;;  %p14765_p11 = scmp.lt.s32.totalorder %s309_s11, %s309_s11 }
  0x85   : > { %p14758_p8 = scmp.ne.s32.totalorder %s309_s11, %s14757_s19  ;;  %p14766_p12 = scmp.lt.s32.totalorder %s14757_s19, %s14757_s19 }
  0x87   : > { %p14760_p9 = pnand %p14758_p8, %p14929_p7  ;;  %p14767_p13 = por %p14766_p12, %p14765_p11 }
  0x89   : > { %p14761_p10 = pneg %p14760_p9 }
  0x8b   : > { %p14768_p0 = pnand %p14767_p13, %p14761_p10 }
  0x8d   : > { %14771 = shalt.err (!%p14768_p0)
}
  0x8e   : > { %s14832_s21 = smov 128   ;;  %s14833_s22 = smov 8  }
  0x8f   : > { %13637 = dma.hbm_to_vmem [thread:$0]  (!%p14913_p5), %s18604_s5, 32768, %s309_s11, [#allocation12], %s14832_s21, %s14832_s21, %s14833_s22  }
  0x90   : > { %s14834_s20 = smov [#allocation16]   ;;  %s14772_s27 = scalar_lea.hbm %s18607_s8, 16 }
  0x91   : > { %s336_s23 = sshll.u32 %s14834_s20, 4  ;;  %p14773_p1 = scmp.ne.s32.totalorder %s18607_s8, %s14772_s27  ;;  %s337_s23 = int_to_ptr.vmem [resolvable:$true] %s336_s23 }
  0x92   : > { %p14779_p3 = scmp.lt.u32.totalorder %s14772_s27, %s18607_s8 }
  0x93   : > { %p14775_p4 = pnand %p14773_p1, %p14929_p7 }
  0x95   : > { %p14776_p2 = pneg %p14775_p4 }
  0x97   : > { %p14781_p6 = pnand %p14779_p3, %p14776_p2 }
  0x99   : > { %14784 = shalt.err (!%p14781_p6)
}
  0x9a   : > { %s14785_s11 = scalar_lea.vmem %s337_s23, 16  ;;  %s14792_s16 = scalar_lea.vmem %s337_s23, 32 }
  0x9b   : > { %p14786_p8 = scmp.ne.s32.totalorder %s337_s23, %s14785_s11  ;;  %p14793_p11 = scmp.lt.s32.totalorder %s337_s23, %s337_s23 }
  0x9c   : > { %p14794_p12 = scmp.lt.s32.totalorder %s14792_s16, %s14785_s11 }
  0x9d   : > { %p14788_p9 = pnand %p14786_p8, %p14929_p7 }
  0x9e   : > { %p14795_p13 = por %p14794_p12, %p14793_p11 }
  0x9f   : > { %p14789_p10 = pneg %p14788_p9 }
  0xa1   : > { %p14796_p0 = pnand %p14795_p13, %p14789_p10 }
  0xa3   : > { %14799 = shalt.err (!%p14796_p0)
}
  0xa4   : > { %13643 = dma.hbm_to_vmem [thread:$0]  (!%p14913_p5), %s18607_s8, 16, %s337_s23, [#allocation15]  }
  0xa5   : > { %p18745_p1 = scmp.ne.s32.totalorder %s18742_s13, 0 }
  0xa7   : > { %357 = sbr.rel (%p18745_p1) target bundleno = 2712 (0xa98), region = 56 }
  0xae   : > { %p18746_p4 = scmp.eq.s32.totalorder %s14896_s12, 0 }
  0xb0   : > { %14805 = dma.done.wait (%p18746_p4), [#allocation7], 512   ;;  %p18747_p7 = pmov %p18746_p4 }
  0xb1   : > { %p18748_p2 = pmov %p18746_p4 }
  0xb2   : > { %14807 = vsyncadd (%p18747_p7), [#allocation7], 4294966784 }
  0xb3   : > { %14809 = dma.done.wait (%p18748_p2), [#allocation9], 8208   ;;  %p18749_p3 = pmov %p18748_p2 }
  0xb4   : > { %p18750_p6 = pmov %p18748_p2 }
  0xb5   : > { %14811 = vsyncadd (%p18749_p3), [#allocation9], 4294959088 }
  0xb6   : > { %14813 = dma.done.wait (%p18750_p6), [#allocation12], 32784   ;;  %p18751_p5 = pmov %p18748_p2 }
  0xb7   : > { %p18752_p8 = pmov %p18748_p2 }
  0xb8   : > { %14815 = vsyncadd (%p18751_p5), [#allocation12], 4294934512 }
  0xb9   : > { %14817 = dma.done.wait (%p18752_p8), [#allocation15], 48   ;;  %p18753_p9 = pmov %p18748_p2 }
  0xba   : > { %vm783_vm0 = vcmask 523264   ;;  %p417_p10 = scmp.lt.s32.totalorder %s14896_s12, 1  ;;  %v14835_v0 = vmov 0.0   ;;  %vm14836_vm1 = vmmov 0   ;;  %v13681_v1 = vld [vmem:[#allocation6] sm:$0xff]   ;;  %v13682_v2 = vld [vmem:[#allocation6 + $0x8] sm:$0xff]   ;;  %v428_v15 = vlaneseq }
  0xbb   : > { %14819 = vsyncadd (%p18753_p9), [#allocation15], 4294967248  ;;  %5770 = vst [vmem:[#allocation2 + $0x8] sm:$0xff] %v14835_v0  ;;  %13289 = vmatprep.subr.bf16.mxu0 %v14835_v0  ;;  %13297 = vmatprep.mubr.msk.bf16.mxu0 %vm14836_vm1, %v14835_v0  ;;  %v13683_v3 = vld [vmem:[#allocation6 + $0x10] sm:$0xff]   ;;  %v13684_v4 = vld [vmem:[#allocation6 + $0x18] sm:$0xff]   ;;  %v18754_v62 = vmov 0 }
  0xbc   : > { %989 = vst.msk [vmem:[#allocation2 + $0x10] sm:$0xff] %vm783_vm0, %v14835_v0  ;;  %1008 = vst.msk [vmem:[#allocation2 + $0x140] sm:$0xff] %vm783_vm0, %v14835_v0  ;;  %s19143_s12 = smov (!%p417_p10, %s14896_s12), 1  ;;  %13333 = vmatprep.subr.bf16.mxu1 %v14835_v0  ;;  %13313 = vmatprep.mubr.msk.bf16.mxu1 %vm14836_vm1, %v14835_v0  ;;  %v15136_v16 = vshrl.u32 %v428_v15, 7  ;;  %v13694_v19 = vld [vmem:[#allocation10 + $0xc0] sm:$0xff]   ;;  %v13698_v24 = vld [vmem:[#allocation10 + $0xc8] sm:$0xff]  }
  0xbd   : > { %5772 = vst [vmem:[#allocation2 + $0x18] sm:$0xff] %v14835_v0  ;;  %5810 = vst [vmem:[#allocation2 + $0x148] sm:$0xff] %v14835_v0  ;;  %s13593_s13 = smul.u32 72, %s19143_s12  ;;  %13290 = vmatpush3.bf16.msra.mxu0 %v13681_v1  ;;  %13337 = vmatpush3.bf16.msra.mxu1 %v13681_v1  ;;  %v13695_v21 = vld [vmem:[#allocation10 + $0x80] sm:$0xff]   ;;  %v13699_v25 = vld [vmem:[#allocation10 + $0x48] sm:$0xff]   ;;  %v18757_v63 = vmov 0 }
  0xbe   : > { %13291 = vmatprep.subr.bf16.mxu0 %v14835_v0  ;;  %13334 = vmatprep.subr.bf16.mxu1 %v14835_v0  ;;  %v13696_v22 = vld [vmem:[#allocation10 + $0x40] sm:$0xff]   ;;  %v430_v26 = vadd.s32 8, %v15136_v16  ;;  %v15144_v27 = vadd.s32 24, %v15136_v16  ;;  %v15147_v28 = vadd.s32 40, %v15136_v16  ;;  %v13700_v29 = vld [vmem:[#allocation10 + $0x88] sm:$0xff]   ;;  %v15150_v30 = vadd.s32 56, %v15136_v16 }
  0xbf   : > { %s15107_s22 = scalar_lea.vmem %s18599_s0, %s13593_s13  ;;  %v13697_v23 = vld [vmem:[#allocation10] sm:$0xff]   ;;  %v438_v31 = vadd.s32 72, %v15136_v16  ;;  %v15154_v32 = vadd.s32 88, %v15136_v16  ;;  %v13701_v33 = vld [vmem:[#allocation10 + $0x8] sm:$0xff]   ;;  %v13703_v34 = vld [vmem:[#allocation10 + $0xd0] sm:$0xff]   ;;  %v15161_v46 = vadd.s32 104, %v15136_v16  ;;  %s18510_s11 = scalar_lea.vmem %s18608_s9, %s13593_s13 }
  0xc0   : > { %v13685_v5 = vld [vmem:[%s15107_s22] sm:$0xff]   ;;  %v13686_v7 = vld [vmem:[%s15107_s22 + $0x8] sm:$0xff]   ;;  %v13687_v9 = vld [vmem:[%s15107_s22 + $0x10] sm:$0xff]   ;;  %v458_v36 = vand.u32 15, %v430_v26  ;;  %v472_v37 = vand.u32 15, %v15144_v27  ;;  %v486_v38 = vand.u32 15, %v15147_v28 }
  0xc1   : > { %13292 = vmatpush3.bf16.msra.mxu0 %v13682_v2  ;;  %13338 = vmatpush3.bf16.msra.mxu1 %v13682_v2  ;;  %v13688_v6 = vld [vmem:[%s15107_s22 + $0x20] sm:$0xff]   ;;  %v13690_v8 = vld [vmem:[%s15107_s22 + $0x28] sm:$0xff]   ;;  %v13691_v10 = vld [vmem:[%s15107_s22 + $0x30] sm:$0xff]   ;;  %v500_v40 = vand.u32 15, %v15150_v30  ;;  %v514_v41 = vand.u32 15, %v438_v31  ;;  %v528_v42 = vand.u32 15, %v15154_v32 }
  0xc2   : > { %13293 = vmatprep.subr.bf16.mxu0 %v14835_v0  ;;  %13335 = vmatprep.subr.bf16.mxu1 %v14835_v0  ;;  %v13689_v11 = vld [vmem:[%s15107_s22 + $0x18] sm:$0xff]   ;;  %v13693_v13 = vld [vmem:[%s15107_s22 + $0x40] sm:$0xff]   ;;  %v14398_v20 = vld [vmem:[#allocation2 + $0x8] sm:$0xff]  ;;  %v542_v55 = vand.u32 15, %v15161_v46  ;;  %v15165_v58 = vadd.s32 120, %v15136_v16  ;;  %vm15169_vm2 = vcmp.lt.s32.totalorder %v458_v36, 9 }
  0xc3   : > { %v13692_v12 = vld [vmem:[%s15107_s22 + $0x38] sm:$0xff]   ;;  %v15134_v14 = vld [vmem:[#allocation2 + $0x10] sm:$0x80]  ;;  %v15138_v17 = vld [vmem:[#allocation2 + $0x140] sm:$0x1]  ;;  %v18755_v62 = vsel %vm15169_vm2, 4294967295, %v18754_v62 }
  0xc4   : > { %2536 = vst [vmem:[#allocation2 + $0x10] sm:$0xff] %v14835_v0  ;;  %v15140_v18 = vld [vmem:[#allocation2 + $0x140] sm:$0x3]  ;;  %v13702_v35 = vld [vmem:[#allocation10 + $0x50] sm:$0xff]   ;;  %v13712_v49 = vld [vmem:[#allocation10 + $0xe0] sm:$0xff]   ;;  %vm15173_vm3 = vcmp.lt.s32.totalorder %v514_v41, 9  ;;  %v1256_v26 = vpack.c.bf16 %v15138_v17, %v15138_v17 }
  0xc5   : > { %13294 = vmatpush3.bf16.msra.mxu0 %v13683_v3  ;;  %13339 = vmatpush3.bf16.msra.mxu1 %v13683_v3  ;;  %2555 = vst [vmem:[#allocation2 + $0x140] sm:$0xff] %v14398_v20  ;;  %v13705_v39 = vld [vmem:[#allocation10 + $0x90] sm:$0xff]   ;;  %v13706_v44 = vld [vmem:[#allocation10 + $0x58] sm:$0xff]   ;;  %v13710_v50 = vld [vmem:[#allocation10 + $0x60] sm:$0xff]   ;;  %v18758_v63 = vsel %vm15173_vm3, 4294967295, %v18757_v63  ;;  %vm15181_vm4 = vcmp.lt.s32.totalorder %v472_v37, 9 }
  0xc6   : > { %13295 = vmatprep.subr.bf16.mxu0 %v14835_v0  ;;  %13336 = vmatprep.subr.bf16.mxu1 %v14835_v0  ;;  %v13704_v43 = vld [vmem:[#allocation10 + $0x10] sm:$0xff]   ;;  %v13708_v45 = vld [vmem:[#allocation10 + $0xd8] sm:$0xff]   ;;  %v13713_v51 = vld [vmem:[#allocation10 + $0xa0] sm:$0xff]   ;;  %18756 = vst [vmem:[#allocation21_spill] sm:$0xff] %v18755_v62  ;;  %v18760_v15 = vmov 0  ;;  %vm15185_vm5 = vcmp.lt.s32.totalorder %v528_v42, 9 }
  0xc7   : > { %v13709_v47 = vld [vmem:[#allocation10 + $0x98] sm:$0xff]   ;;  %v13711_v52 = vld [vmem:[#allocation10 + $0x20] sm:$0xff]   ;;  %v13716_v53 = vld [vmem:[#allocation10 + $0xe8] sm:$0xff]   ;;  %18759 = vst [vmem:[#allocation22_spill] sm:$0xff] %v18758_v63  ;;  %v18761_v15 = vsel %vm15181_vm4, 4294967295, %v18760_v15  ;;  %vm15205_vm6 = vcmp.lt.s32.totalorder %v486_v38, 9 }
  0xc8   : > { %v13707_v48 = vld [vmem:[#allocation10 + $0x18] sm:$0xff]   ;;  %v13714_v54 = vld [vmem:[#allocation10 + $0x68] sm:$0xff]   ;;  %v13717_v59 = vld [vmem:[#allocation10 + $0x70] sm:$0xff]   ;;  %18762 = vst [vmem:[#allocation23_spill] sm:$0xff] %v18761_v15  ;;  %v18765_v17 = vmov 0  ;;  %vm15211_vm7 = vcmp.lt.s32.totalorder %v542_v55, 9 }
  0xc9   : > { %13296 = vmatpush3.bf16.msra.mxu0 %v13684_v4  ;;  %13340 = vmatpush3.bf16.msra.mxu1 %v13684_v4  ;;  %v13715_v56 = vld [vmem:[#allocation10 + $0x28] sm:$0xff]   ;;  %v13719_v60 = vld [vmem:[#allocation10 + $0x30] sm:$0xff]   ;;  %v15167_v61 = vld [vmem:[#allocation8] ss:$0 sm:$0xff]  ;;  %v18766_v17 = vsel %vm15205_vm6, 4294967295, %v18765_v17  ;;  %v556_v46 = vand.u32 15, %v15165_v58 }
  0xca   : > { %11889 = vmatprep.subr.bf16.mxu1 %v13694_v19  ;;  %11959 = vmatprep.subr.bf16.mxu0 %v13696_v22  ;;  %v13718_v57 = vld [vmem:[#allocation10 + $0xa8] sm:$0xff]   ;;  %v18763_v19 = vmov 0  ;;  %18767 = vst [vmem:[#allocation24_spill] sm:$0xff] %v18766_v17  ;;  %vm18614_vm8 = vcmask 1046528   ;;  %vm18611_vm9 = vsmask.f32 7424 }
  0xcb   : > { %v18764_v19 = vsel %vm15185_vm5, 4294967295, %v18763_v19  ;;  %vm18633_vm10 = vsmask.f32 4352  ;;  %vm15259_vm11 = vcmp.lt.s32.totalorder %v500_v40, 9  ;;  %vm15263_vm12 = vcmp.lt.s32.totalorder %v556_v46, 9  ;;  %v13725_v46 = vld [vmem:[#allocation10 + $0xb8] sm:$0xff]  }
  0xcc   : > { %13298 = vmatmul.mubr.msk.bf16.vlgmr.msra.gmra.mrb[0].mxu0 %vm783_vm0, %v13685_v5  ;;  %13314 = vmatmul.mubr.msk.bf16.vlgmr.msra.gmra.mrb[0].mxu1 %vm783_vm0, %v13688_v6  ;;  %s14838_s25 = smov 64   ;;  %vm1218_vm14 = vcmask 1048064   ;;  %vm14839_vm15 = vmmov 1  }
  0xcd   : > { %13301 = vmatprep.mubr.msk.bf16.mxu0 %vm14836_vm1, %v14835_v0  ;;  %13317 = vmatprep.mubr.msk.bf16.mxu1 %vm14836_vm1, %v14835_v0 }
  0xce   : > { %11890 = vmatpush3.bf16.msra.mxu1 %v13695_v21  ;;  %11960 = vmatpush3.bf16.msra.mxu0 %v13697_v23 }
  0xcf   : > { %11891 = vmatprep.subr.bf16.mxu1 %v13698_v24  ;;  %11961 = vmatprep.subr.bf16.mxu0 %v13699_v25 }
  0xd2   : > { %11892 = vmatpush3.bf16.msra.mxu1 %v13700_v29  ;;  %11962 = vmatpush3.bf16.msra.mxu0 %v13701_v33 }
  0xd3   : > { %11893 = vmatprep.subr.bf16.mxu1 %v13703_v34  ;;  %11963 = vmatprep.subr.bf16.mxu0 %v13702_v35 }
  0xd4   : > { %13302 = vmatmul.mubr.msk.bf16.gmra.mrb[4].mxu0 %vm783_vm0, %v13686_v7  ;;  %13318 = vmatmul.mubr.msk.bf16.gmra.mrb[4].mxu1 %vm783_vm0, %v13690_v8 }
  0xd5   : > { %13305 = vmatprep.mubr.msk.bf16.mxu0 %vm14836_vm1, %v14835_v0  ;;  %13321 = vmatprep.mubr.msk.bf16.mxu1 %vm14836_vm1, %v14835_v0 }
  0xd6   : > { %11894 = vmatpush3.bf16.msra.mxu1 %v13705_v39  ;;  %11964 = vmatpush3.bf16.msra.mxu0 %v13704_v43 }
  0xd7   : > { %11895 = vmatprep.subr.bf16.mxu1 %v13708_v45  ;;  %11965 = vmatprep.subr.bf16.mxu0 %v13706_v44  ;;  %v18768_v44 = vmov 0 }
  0xd8   : > { %v18769_v44 = vsel %vm15211_vm7, 4294967295, %v18768_v44 }
  0xd9   : > { %18770 = vst [vmem:[#allocation25_spill] sm:$0xff] %v18769_v44 }
  0xda   : > { %11896 = vmatpush3.bf16.msra.mxu1 %v13709_v47  ;;  %11966 = vmatpush3.bf16.msra.mxu0 %v13707_v48  ;;  %v15219_v47 = vadd.s32 136, %v15136_v16  ;;  %v15221_v48 = vshll.u32 %v1256_v26, 16 }
  0xdb   : > { %11897 = vmatprep.subr.bf16.mxu1 %v13712_v49  ;;  %11967 = vmatprep.subr.bf16.mxu0 %v13710_v50 }
  0xdc   : > { %13306 = vmatmul.mubr.msk.bf16.gmra.mrb[8].mxu0 %vm783_vm0, %v13687_v9  ;;  %13322 = vmatmul.mubr.msk.bf16.gmra.mrb[8].mxu1 %vm783_vm0, %v13691_v10 }
  0xdd   : > { %13309 = vmatprep.mubr.msk.bf16.mxu0 %vm14836_vm1, %v14835_v0  ;;  %13325 = vmatprep.mubr.msk.bf16.mxu1 %vm14836_vm1, %v14835_v0 }
  0xde   : > { %11898 = vmatpush3.bf16.msra.mxu1 %v13713_v51  ;;  %11968 = vmatpush3.bf16.msra.mxu0 %v13711_v52 }
  0xdf   : > { %11899 = vmatprep.subr.bf16.mxu1 %v13716_v53  ;;  %11969 = vmatprep.subr.bf16.mxu0 %v13714_v54 }
  0xe2   : > { %11900 = vmatpush3.bf16.msra.mxu1 %v13718_v57  ;;  %11970 = vmatpush3.bf16.msra.mxu0 %v13715_v56  ;;  %v13720_v56 = vld [vmem:[#allocation10 + $0x78] sm:$0xff]  }
  0xe3   : > { %11971 = vmatprep.subr.bf16.mxu0 %v13717_v59 }
  0xe4   : > { %13310 = vmatmul.mubr.msk.bf16.gmra.mrb[12].mxu0 %vm783_vm0, %v13689_v11  ;;  %13326 = vmatmul.mubr.msk.bf16.gmra.mrb[12].mxu1 %vm783_vm0, %v13692_v12 }
  0xe5   : > { %13329 = vmatprep.mubr.msk.bf16.mxu1 %vm14836_vm1, %v14835_v0  ;;  %vm15606_vm1 = vmpackc.low %vm15181_vm4, %vm14839_vm15 }
  0xe6   : > { %11972 = vmatpush3.bf16.msra.mxu0 %v13719_v60 }
  0xe7   : > { %11973 = vmatprep.subr.bf16.mxu0 %v13720_v56 }
  0xec   : > { %13330 = vmatmul.mubr.msk.bf16.gmra.mrb[16].mxu1 %vm783_vm0, %v13693_v13 }
 0x19f   : > { %v845_v0 = vpop.f32.mrb[0].mxu0  ;;  %v877_v1 = vpop.f32.mrb[0].mxu1 }
 0x1a0   : > { %v846_v2 = vadd.f32 %v15167_v61, %v845_v0  ;;  %v13299_v3 = vpop.f32.mrb[1].mxu0  ;;  %v878_v4 = vadd.f32 %v15167_v61, %v877_v1  ;;  %v13315_v5 = vpop.f32.mrb[1].mxu1  ;;  %v570_v0 = vand.u32 15, %v15219_v47 }
 0x1a1   : > { %v848_v6 = vpop.f32.mrb[2].mxu0  ;;  %v880_v7 = vpop.f32.mrb[2].mxu1  ;;  %v13722_v3 = vld [vmem:[#allocation10 + $0x38] sm:$0xff]  }
 0x1a2   : > { %v916_v8 = vmax.f32 %v846_v2, 0.0  ;;  %v849_v9 = vadd.f32 %v15167_v61, %v848_v6  ;;  %v13300_v10 = vpop.f32.mrb[3].mxu0  ;;  %v924_v11 = vmax.f32 %v878_v4, 0.0  ;;  %v881_v12 = vadd.f32 %v15167_v61, %v880_v7  ;;  %v13316_v13 = vpop.f32.mrb[3].mxu1  ;;  %v13721_v2 = vld [vmem:[#allocation10 + $0xf0] sm:$0xff]   ;;  %11974 = vmatpush3.bf16.msra.mxu0 %v13722_v3  ;;  %v13726_v3 = vld [vmem:[#allocation10 + $0x140] sm:$0xff]  }
 0x1a3   : > { %v13723_v4 = vld [vmem:[#allocation10 + $0xb0] sm:$0xff]   ;;  %11901 = vmatprep.subr.bf16.mxu1 %v13721_v2  ;;  %vm15307_vm13 = vcmp.lt.s32.totalorder %v570_v0, 9 }
 0x1a4   : > { %990 = vst.msk [vmem:[#allocation2 + $0x20] sm:$0xff] %vm783_vm0, %v916_v8  ;;  %v917_v20 = vmax.f32 %v849_v9, 0.0  ;;  %998 = vst.msk [vmem:[#allocation2 + $0xa0] sm:$0xff] %vm783_vm0, %v924_v11  ;;  %v925_v21 = vmax.f32 %v881_v12, 0.0  ;;  %v1332_v9 = vrot.slane %v15221_v48, 1  ;;  %11902 = vmatpush3.bf16.msra.mxu1 %v13723_v4 }
 0x1a6   : > { %v971_v22 = vsel %vm15169_vm2, %v917_v20, 0.0  ;;  %v979_v23 = vsel %vm15173_vm3, %v925_v21, 0.0  ;;  %v14837_v21 = vmov 0  }
 0x1a7   : > { %991 = vst.msk [vmem:[#allocation2 + $0x30] sm:$0xff] %vm783_vm0, %v971_v22  ;;  %v853_v24 = vpop.f32.mrb[4].mxu0  ;;  %999 = vst.msk [vmem:[#allocation2 + $0xb0] sm:$0xff] %vm783_vm0, %v979_v23  ;;  %v885_v25 = vpop.f32.mrb[4].mxu1  ;;  %1861 = vmatprep.mubr.bf16.mxu0 %v14837_v21 }
 0x1a8   : > { %v854_v27 = vadd.f32 %v15167_v61, %v853_v24  ;;  %v13303_v29 = vpop.f32.mrb[5].mxu0  ;;  %v886_v31 = vadd.f32 %v15167_v61, %v885_v25  ;;  %v13319_v32 = vpop.f32.mrb[5].mxu1  ;;  %1013 = vst [vmem:[#allocation3 + $0x8] sm:$0xff] %v14837_v21  ;;  %1862 = vmatmul.mubr.bf16.vlgmr.msra.gmra.mrb[16].mxu0 %v14837_v21 }
 0x1a9   : > { %v856_v33 = vpop.f32.mrb[6].mxu0  ;;  %v888_v34 = vpop.f32.mrb[6].mxu1 }
 0x1aa   : > { %v918_v35 = vmax.f32 %v854_v27, 0.0  ;;  %v857_v36 = vadd.f32 %v15167_v61, %v856_v33  ;;  %v13304_v37 = vpop.f32.mrb[7].mxu0  ;;  %v926_v39 = vmax.f32 %v886_v31, 0.0  ;;  %v889_v41 = vadd.f32 %v15167_v61, %v888_v34  ;;  %v13320_v42 = vpop.f32.mrb[7].mxu1 }
 0x1ab   : > { %v15209_v43 = vld [vmem:[#allocation2 + $0x20] sm:$0xff]  ;;  %v18771_v31 = vmov 0  ;;  %v18774_v33 = vmov 0 }
 0x1ac   : > { %v15215_v45 = vld [vmem:[#allocation2 + $0xa0] sm:$0xff]  ;;  %992 = vst.msk [vmem:[#allocation2 + $0x40] sm:$0xff] %vm783_vm0, %v918_v35  ;;  %v919_v28 = vmax.f32 %v857_v36, 0.0  ;;  %1000 = vst.msk [vmem:[#allocation2 + $0xc0] sm:$0xff] %vm783_vm0, %v926_v39  ;;  %v927_v49 = vmax.f32 %v889_v41, 0.0  ;;  %v1037_v51 = vpack.c.bf16 %v15209_v43, %v15134_v14  ;;  %v18772_v31 = vsel %vm15259_vm11, 4294967295, %v18771_v31 }
 0x1ad   : > { %v1352_v38 = vld [vmem:[#allocation2 + $0x20] sm:$0xfc]  ;;  %18773 = vst [vmem:[#allocation26_spill] sm:$0xff] %v18772_v31  ;;  %v18775_v33 = vsel %vm15263_vm12, 4294967295, %v18774_v33  ;;  %v13724_v37 = vld [vmem:[#allocation10 + $0xf8] sm:$0xff]  }
 0x1ae   : > { %v1228_v50 = vld [vmem:[#allocation2 + $0x20] sm:$0xfe]  ;;  %v973_v52 = vsel %vm15181_vm4, %v919_v28, 0.0  ;;  %v15229_v53 = vld [vmem:[#allocation2 + $0x30] sm:$0xff]  ;;  %v981_v54 = vsel %vm15185_vm5, %v927_v49, 0.0  ;;  %v1049_v57 = vshrl.u32 %v1037_v51, 16  ;;  %11903 = vmatprep.subr.bf16.mxu1 %v13724_v37 }
 0x1af   : > { %v15233_v55 = vld [vmem:[#allocation2 + $0xb0] sm:$0xff]  ;;  %993 = vst.msk [vmem:[#allocation2 + $0x50] sm:$0xff] %vm783_vm0, %v973_v52  ;;  %v861_v58 = vpop.f32.mrb[8].mxu0  ;;  %v1371_v59 = vpack.c.bf16 %v15229_v53, %v1352_v38  ;;  %1001 = vst.msk [vmem:[#allocation2 + $0xd0] sm:$0xff] %vm783_vm0, %v981_v54  ;;  %v893_v14 = vpop.f32.mrb[8].mxu1  ;;  %v15244_v1 = vpack.c.bf16 %v15229_v53, %v1228_v50  ;;  %v1052_v36 = vshll.u32 %v1037_v51, 16  ;;  %v1173_v28 = vpack.c.bf16 %v15229_v53, %v15209_v43 }
 0x1b0   : > { %v15240_v60 = vpack.c.bf16 %v15233_v55, %v15215_v45  ;;  %v862_v5 = vadd.f32 %v15167_v61, %v861_v58  ;;  %v13307_v6 = vpop.f32.mrb[9].mxu0  ;;  %v894_v7 = vadd.f32 %v15167_v61, %v893_v14  ;;  %v13323_v8 = vpop.f32.mrb[9].mxu1  ;;  %v15253_v22 = vrot.slane %v1049_v57, 3  ;;  %18776 = vst [vmem:[#allocation27_spill] sm:$0xff] %v18775_v33  ;;  %11904 = vmatpush3.bf16.msra.mxu1 %v13725_v46  ;;  %v13728_v46 = vld [vmem:[#allocation10 + $0x1c0] sm:$0xff]  }
 0x1b1   : > { %v864_v10 = vpop.f32.mrb[10].mxu0  ;;  %v15249_v11 = vrot.slane %v1371_v59, 1  ;;  %v896_v12 = vpop.f32.mrb[10].mxu1  ;;  %v1261_v20 = vshll.u32 %v15244_v1, 16  ;;  %v1259_v34 = vshrl.u32 %v15244_v1, 16  ;;  %v1054_v38 = vrot.slane %v1052_v36, 4  ;;  %12029 = vmatprep.subr.bf16.mxu1 %v13726_v3  ;;  %12099 = vmatprep.subr.bf16.mxu0 %v13728_v46 }
 0x1b2   : > { %v1399_v13 = vrot.slane %v15240_v60, 1  ;;  %v920_v23 = vmax.f32 %v862_v5, 0.0  ;;  %v865_v24 = vadd.f32 %v15167_v61, %v864_v10  ;;  %v13308_v25 = vpop.f32.mrb[11].mxu0  ;;  %v928_v26 = vmax.f32 %v894_v7, 0.0  ;;  %v13324_v29 = vpop.f32.mrb[11].mxu1 }
 0x1b3   : > { %v897_v27 = vadd.f32 %v15167_v61, %v896_v12  ;;  %v1354_v32 = vld [vmem:[#allocation2 + $0x40] sm:$0xff]  ;;  %v1263_v35 = vrot.slane %v1261_v20, 1  ;;  %v1290_v39 = vshll.u32 %v15240_v60, 16  ;;  %v1294_v49 = vshrl.u32 %v15240_v60, 16 }
 0x1b4   : > { %994 = vst.msk [vmem:[#allocation2 + $0x60] sm:$0xff] %vm783_vm0, %v920_v23  ;;  %v921_v41 = vmax.f32 %v865_v24, 0.0  ;;  %1002 = vst.msk [vmem:[#allocation2 + $0xe0] sm:$0xff] %vm783_vm0, %v928_v26  ;;  %v1362_v40 = vld [vmem:[#allocation2 + $0xc0] sm:$0xff]  ;;  %v1038_v42 = vpack.c.bf16 %v1354_v32, %v15229_v53  ;;  %v1055_v25 = vor.u32 %v1054_v38, %v15253_v22 }
 0x1b5   : > { %v929_v30 = vmax.f32 %v897_v27, 0.0  ;;  %v1264_v2 = vor.u32 %v1263_v35, %v1259_v34  ;;  %v15288_v4 = vrot.slane %v1290_v39, 1  ;;  %v15296_v26 = vpack.c.bf16 %v1362_v40, %v15233_v55  ;;  %v13729_v38 = vld [vmem:[#allocation10 + $0x180] sm:$0xff]  }
 0x1b6   : > { %v975_v50 = vsel %vm15205_vm6, %v921_v41, 0.0  ;;  %v1355_v51 = vld [vmem:[#allocation2 + $0x50] sm:$0xff]  ;;  %v1057_v56 = vshrl.u32 %v1038_v42, 16  ;;  %v1060_v57 = vshll.u32 %v1038_v42, 16  ;;  %v18777_v55 = vmov 0  ;;  %12100 = vmatpush3.bf16.msra.mxu0 %v13729_v38 }
 0x1b7   : > { %v983_v52 = vsel %vm15211_vm7, %v929_v30, 0.0  ;;  %v15279_v54 = vld [vmem:[#allocation2 + $0xd0] sm:$0xff]  ;;  %995 = vst.msk [vmem:[#allocation2 + $0x70] sm:$0xff] %vm783_vm0, %v975_v50  ;;  %v869_v58 = vpop.f32.mrb[12].mxu0  ;;  %v15282_v59 = vpack.c.bf16 %v1355_v51, %v1354_v32  ;;  %v901_v14 = vpop.f32.mrb[12].mxu1  ;;  %v18778_v55 = vsel %vm15307_vm13, 4294967295, %v18777_v55 }
 0x1b8   : > { %1003 = vst.msk [vmem:[#allocation2 + $0xf0] sm:$0xff] %vm783_vm0, %v983_v52  ;;  %v15286_v1 = vpack.c.bf16 %v15279_v54, %v1362_v40  ;;  %v870_v5 = vadd.f32 %v15167_v61, %v869_v58  ;;  %v13311_v6 = vpop.f32.mrb[13].mxu0  ;;  %v902_v7 = vadd.f32 %v15167_v61, %v901_v14  ;;  %v13327_v8 = vpop.f32.mrb[13].mxu1  ;;  %v1059_v10 = vrot.slane %v1057_v56, 3  ;;  %18779 = vst [vmem:[#allocation28_spill] sm:$0xff] %v18778_v55  ;;  %v13732_v38 = vld [vmem:[#allocation10 + $0x1c8] sm:$0xff]  }
 0x1b9   : > { %v1062_v12 = vrot.slane %v1060_v57, 4  ;;  %v872_v20 = vpop.f32.mrb[14].mxu0  ;;  %v1393_v21 = vrot.slane %v15282_v59, 1  ;;  %v904_v23 = vpop.f32.mrb[14].mxu1  ;;  %v1266_v24 = vshll.u32 %v15282_v59, 16  ;;  %v1296_v56 = vor.u32 %v1294_v49, %v15288_v4  ;;  %12101 = vmatprep.subr.bf16.mxu0 %v13732_v38  ;;  %v13737_v38 = vld [vmem:[#allocation10 + $0x190] sm:$0xff]  }
 0x1ba   : > { %v922_v27 = vmax.f32 %v870_v5, 0.0  ;;  %v873_v29 = vadd.f32 %v15167_v61, %v872_v20  ;;  %v13312_v32 = vpop.f32.mrb[15].mxu0  ;;  %v930_v34 = vmax.f32 %v902_v7, 0.0  ;;  %v905_v35 = vadd.f32 %v15167_v61, %v904_v23  ;;  %v13328_v36 = vpop.f32.mrb[15].mxu1  ;;  %v13901_v33 = vld [vmem:[#allocation13 + $0xf4] ss:$8 sps:$4 sm:$0xff]  }
 0x1bb   : > { %v1394_v37 = vsel %vm18614_vm8, %v15249_v11, %v1393_v21  ;;  %v1356_v39 = vld [vmem:[#allocation2 + $0x60] sm:$0xff]  ;;  %v1401_v22 = vrot.slane %v15286_v1, 1  ;;  %v1268_v41 = vrot.slane %v1266_v24, 1  ;;  %v1063_v30 = vor.u32 %v1062_v12, %v1059_v10 }
 0x1bc   : > { %996 = vst.msk [vmem:[#allocation2 + $0x80] sm:$0xff] %vm783_vm0, %v922_v27  ;;  %v923_v40 = vmax.f32 %v873_v29, 0.0  ;;  %1411 = vrot.lane.b32.xlu0 %v1394_v37, %s14838_s25  ;;  %1004 = vst.msk [vmem:[#allocation2 + $0x100] sm:$0xff] %vm783_vm0, %v930_v34  ;;  %v931_v11 = vmax.f32 %v905_v35, 0.0  ;;  %v1039_v42 = vpack.c.bf16 %v1356_v39, %v1355_v51  ;;  %v1298_v47 = vshll.u32 %v15286_v1, 16  ;;  %v1364_v0 = vld [vmem:[#allocation2 + $0xe0] sm:$0xff] }
 0x1bd   : > { %v1269_v50 = vsel %vm18611_vm9, %v1264_v2, %v1268_v41  ;;  %v1064_v52 = vsel %vm18633_vm10, %v1055_v25, %v1063_v30  ;;  %v1093_v57 = vshrl.u32 %v15296_v26, 16  ;;  %v1270_v8 = vshrl.u32 %v15282_v59, 16 }
 0x1be   : > { %v977_v58 = vsel %vm15259_vm11, %v923_v40, 0.0  ;;  %v1357_v14 = vld [vmem:[#allocation2 + $0x70] sm:$0xff]  ;;  %v985_v51 = vsel %vm15263_vm12, %v931_v11, 0.0  ;;  %1343 = vst.msk [vmem:[#allocation3 + $0x18] sm:$0xff] %vm783_vm0, %v1269_v50  ;;  %1146 = vst.msk [vmem:[#allocation3 + $0x10] sm:$0xff] %vm783_vm0, %v1064_v52  ;;  %v1066_v2 = vshrl.u32 %v1039_v42, 16  ;;  %v1043_v50 = vpack.c.bf16 %v1364_v0, %v15279_v54 }
 0x1bf   : > { %v15323_v3 = vld [vmem:[#allocation2 + $0xf0] sm:$0xff]  ;;  %v1069_v5 = vshll.u32 %v1039_v42, 16  ;;  %997 = vst.msk [vmem:[#allocation2 + $0x90] sm:$0xff] %vm783_vm0, %v977_v58  ;;  %v15328_v49 = vpack.c.bf16 %v1357_v14, %v1356_v39  ;;  %1005 = vst.msk [vmem:[#allocation2 + $0x110] sm:$0xff] %vm783_vm0, %v985_v51  ;;  %v909_v6 = vpop.f32.mrb[16].mxu1  ;;  %v1300_v10 = vrot.slane %v1298_v47, 1  ;;  %v1272_v32 = vor.u32 %v1270_v8, %v1268_v41 }
 0x1c0   : > { %v15332_v7 = vpack.c.bf16 %v15323_v3, %v1364_v0  ;;  %1191 = vrot.lane.b32.xlu0 %v1173_v28, %s14838_s25  ;;  %v910_v12 = vadd.f32 %v15167_v61, %v909_v6  ;;  %v13331_v20 = vpop.f32.mrb[17].mxu1  ;;  %v1068_v23 = vrot.slane %v1066_v2, 3  ;;  %v1096_v25 = vshll.u32 %v15296_v26, 16  ;;  %v13733_v47 = vld [vmem:[#allocation10 + $0x188] sm:$0xff]  }
 0x1c1   : > { %v1071_v24 = vrot.slane %v1069_v5, 4  ;;  %v1395_v27 = vrot.slane %v15328_v49, 1  ;;  %v912_v29 = vpop.f32.mrb[18].mxu1  ;;  %v1274_v34 = vshll.u32 %v15328_v49, 16  ;;  %v1095_v35 = vrot.slane %v1093_v57, 3  ;;  %12102 = vmatpush3.bf16.msra.mxu0 %v13733_v47 }
 0x1c2   : > { %v932_v36 = vmax.f32 %v910_v12, 0.0  ;;  %v913_v37 = vadd.f32 %v15167_v61, %v912_v29  ;;  %v13332_v39 = vpop.f32.mrb[19].mxu1  ;;  %v1301_v53 = vsel %vm18611_vm9, %v1296_v56, %v1300_v10  ;;  %v1403_v26 = vrot.slane %v15332_v7, 1 }
 0x1c3   : > { %v1072_v43 = vor.u32 %v1071_v24, %v1068_v23  ;;  %v1396_v28 = vsel %vm18614_vm8, %v1393_v21, %v1395_v27  ;;  %v1358_v40 = vld [vmem:[#allocation2 + $0x80] sm:$0xff]  ;;  %v1276_v11 = vrot.slane %v1274_v34, 1  ;;  %1347 = vst.msk [vmem:[#allocation3 + $0x58] sm:$0xff] %vm783_vm0, %v1301_v53  ;;  %v1098_v41 = vrot.slane %v1096_v25, 4 }
 0x1c4   : > { %1413 = vrot.lane.b32.xlu1 %v1396_v28, %s14838_s25  ;;  %1006 = vst.msk [vmem:[#allocation2 + $0x120] sm:$0xff] %vm783_vm0, %v932_v36  ;;  %v933_v61 = vmax.f32 %v913_v37, 0.0  ;;  %v1040_v46 = vpack.c.bf16 %v1358_v40, %v1357_v14  ;;  %v15359_v21 = vsel %vm18614_vm8, %v1399_v13, %v1401_v22  ;;  %v1278_v56 = vshrl.u32 %v15328_v49, 16  ;;  %v1366_v12 = vld [vmem:[#allocation2 + $0x100] sm:$0xff] }
 0x1c5   : > { %v1073_v42 = vsel %vm18633_vm10, %v1063_v30, %v1072_v43  ;;  %v1277_v52 = vsel %vm18611_vm9, %v1272_v32, %v1276_v11  ;;  %v1302_v30 = vshrl.u32 %v15286_v1, 16  ;;  %v1102_v51 = vshrl.u32 %v1043_v50, 16 }
 0x1c6   : > { %1147 = vst.msk [vmem:[#allocation3 + $0x20] sm:$0xff] %vm783_vm0, %v1073_v42  ;;  %v1359_v57 = vld [vmem:[#allocation2 + $0x90] sm:$0xff]  ;;  %v987_v58 = vsel %vm15307_vm13, %v933_v61, 0.0  ;;  %1344 = vst.msk [vmem:[#allocation3 + $0x28] sm:$0xff] %vm783_vm0, %v1277_v52  ;;  %v1075_v0 = vshrl.u32 %v1040_v46, 16  ;;  %v1078_v14 = vshll.u32 %v1040_v46, 16  ;;  %v1280_v5 = vor.u32 %v1278_v56, %v1276_v11 }
 0x1c7   : > { %v15367_v54 = vld [vmem:[#allocation2 + $0x110] sm:$0xff]  ;;  %v1374_v2 = vpack.c.bf16 %v1359_v57, %v1358_v40  ;;  %1007 = vst.msk [vmem:[#allocation2 + $0x130] sm:$0xff] %vm783_vm0, %v987_v58  ;;  %v1041_v6 = vpack.c.bf16 %v15215_v45, %v1359_v57  ;;  %v1105_v8 = vshll.u32 %v1043_v50, 16  ;;  %v1099_v24 = vor.u32 %v1098_v41, %v1095_v35 }
 0x1c8   : > { %1193 = vrot.lane.b32.xlu1 %v15282_v59, %s14838_s25  ;;  %v1077_v20 = vrot.slane %v1075_v0, 3  ;;  %v1080_v23 = vrot.slane %v1078_v14, 4  ;;  %v1104_v25 = vrot.slane %v1102_v51, 3  ;;  %v15375_v32 = vpack.c.bf16 %v15367_v54, %v1366_v12  ;;  %v13736_v42 = vld [vmem:[#allocation10 + $0x1d0] sm:$0xff]  }
 0x1c9   : > { %v1397_v29 = vrot.slane %v1374_v2, 1  ;;  %v1282_v34 = vshll.u32 %v1374_v2, 16  ;;  %v1304_v36 = vor.u32 %v1302_v30, %v1300_v10  ;;  %v1084_v39 = vshrl.u32 %v1041_v6, 16  ;;  %12103 = vmatprep.subr.bf16.mxu0 %v13736_v42 }
 0x1ca   : > { %v1081_v37 = vor.u32 %v1080_v23, %v1077_v20  ;;  %v1087_v53 = vshll.u32 %v1041_v6, 16  ;;  %v1107_v45 = vrot.slane %v1105_v8, 4  ;;  %v1286_v11 = vshrl.u32 %v1374_v2, 16  ;;  %12104 = vmatpush3.bf16.msra.mxu0 %v13737_v38 }
 0x1cb   : > { %v1398_v28 = vsel %vm18614_vm8, %v1395_v27, %v1397_v29  ;;  %v1400_v59 = vsel %vm18614_vm8, %v1397_v29, %v1399_v13  ;;  %v1284_v40 = vrot.slane %v1282_v34, 1  ;;  %v1086_v10 = vrot.slane %v1084_v39, 3  ;;  %v1368_v50 = vld [vmem:[#allocation2 + $0x120] sm:$0xff] }
 0x1cc   : > { %1195 = vrot.lane.b32.xlu1 %v15328_v49, %s14838_s25  ;;  %1415 = vrot.lane.b32.xlu0 %v1398_v28, %s14838_s25  ;;  %v1082_v35 = vsel %vm18633_vm10, %v1072_v43, %v1081_v37  ;;  %v1089_v41 = vrot.slane %v1087_v53, 4  ;;  %v1108_v61 = vor.u32 %v1107_v45, %v1104_v25  ;;  %v1306_v13 = vshll.u32 %v15332_v7, 16  ;;  %v13740_v39 = vld [vmem:[#allocation10 + $0x1d8] sm:$0xff]  }
 0x1cd   : > { %1148 = vst.msk [vmem:[#allocation3 + $0x30] sm:$0xff] %vm783_vm0, %v1082_v35  ;;  %v1285_v27 = vsel %vm18611_vm9, %v1280_v5, %v1284_v40  ;;  %v1288_v46 = vor.u32 %v1286_v11, %v1284_v40  ;;  %v1044_v47 = vpack.c.bf16 %v1366_v12, %v15323_v3  ;;  %v1310_v56 = vshrl.u32 %v15332_v7, 16  ;;  %12105 = vmatprep.subr.bf16.mxu0 %v13740_v39  ;;  %v13742_v39 = vld [vmem:[#allocation10 + $0x160] sm:$0xff]  }
 0x1ce   : > { %v1369_v49 = vld [vmem:[#allocation2 + $0x130] sm:$0xff]  ;;  %1345 = vst.msk [vmem:[#allocation3 + $0x38] sm:$0xff] %vm783_vm0, %v1285_v27  ;;  %v1090_v52 = vor.u32 %v1089_v41, %v1086_v10  ;;  %v1109_v43 = vsel %vm18633_vm10, %v1099_v24, %v1108_v61  ;;  %v1314_v30 = vshll.u32 %v15375_v32, 16  ;;  %v1308_v3 = vrot.slane %v1306_v13, 1 }
 0x1cf   : > { %v1036_v57 = vld [vmem:[#allocation2 + $0x130] sm:$0x7f]  ;;  %v15393_v58 = vpack.c.bf16 %v1369_v49, %v1368_v50  ;;  %v1293_v0 = vsel %vm18611_vm9, %v1288_v46, %v15288_v4  ;;  %1151 = vst.msk [vmem:[#allocation3 + $0x60] sm:$0xff] %vm783_vm0, %v1109_v43  ;;  %v1111_v14 = vshrl.u32 %v1044_v47, 16  ;;  %v1114_v6 = vshll.u32 %v1044_v47, 16 }
 0x1d0   : > { %1417 = vrot.lane.b32.xlu0 %v1400_v59, %s14838_s25  ;;  %1197 = vrot.lane.b32.xlu1 %v1374_v2, %s14838_s25  ;;  %1346 = vst.msk [vmem:[#allocation3 + $0x48] sm:$0xff] %vm783_vm0, %v1293_v0  ;;  %v1091_v51 = vsel %vm18633_vm10, %v1081_v37, %v1090_v52  ;;  %v1100_v5 = vsel %vm18633_vm10, %v1090_v52, %v1099_v24  ;;  %v1316_v8 = vrot.slane %v1314_v30, 1  ;;  %v1405_v12 = vrot.slane %v15375_v32, 1  ;;  %v13741_v59 = vld [vmem:[#allocation10 + $0x198] sm:$0xff]   ;;  %v13752_v30 = vld [vmem:[#allocation10 + $0x1f0] sm:$0xff]  }
 0x1d1   : > { %1149 = vst.msk [vmem:[#allocation3 + $0x40] sm:$0xff] %vm783_vm0, %v1091_v51  ;;  %1150 = vst.msk [vmem:[#allocation3 + $0x50] sm:$0xff] %vm783_vm0, %v1100_v5  ;;  %v1309_v4 = vsel %vm18611_vm9, %v1304_v36, %v1308_v3  ;;  %v1113_v20 = vrot.slane %v1111_v14, 3  ;;  %v1312_v23 = vor.u32 %v1310_v56, %v1308_v3  ;;  %v1116_v2 = vrot.slane %v1114_v6, 4  ;;  %12106 = vmatpush3.bf16.msra.mxu0 %v13741_v59  ;;  %v13749_v56 = vld [vmem:[#allocation10 + $0x1a8] sm:$0xff]   ;;  %v13754_v0 = vld [vmem:[#allocation10 + $0x1f8] sm:$0xff]  }
 0x1d2   : > { %1348 = vst.msk [vmem:[#allocation3 + $0x68] sm:$0xff] %vm783_vm0, %v1309_v4  ;;  %v1045_v25 = vpack.c.bf16 %v1368_v50, %v15367_v54  ;;  %v1318_v29 = vshrl.u32 %v15375_v32, 16  ;;  %v1322_v24 = vshll.u32 %v15393_v58, 16  ;;  %v1404_v34 = vsel %vm18614_vm8, %v1401_v22, %v1403_v26  ;;  %v13755_v3 = vld [vmem:[#allocation10 + $0x1b8] sm:$0xff]   ;;  %v13727_v5 = vld [vmem:[#allocation10 + $0x100] sm:$0xff]   ;;  %v13730_v6 = vld [vmem:[#allocation10 + $0x148] sm:$0xff]  }
 0x1d3   : > { %v1317_v37 = vsel %vm18611_vm9, %v1312_v23, %v1316_v8  ;;  %v1046_v36 = vpack.c.bf16 %v1036_v57, %v1036_v57  ;;  %v1117_v54 = vor.u32 %v1116_v2, %v1113_v20  ;;  %v1326_v35 = vshrl.u32 %v15393_v58, 16  ;;  %v13753_v57 = vld [vmem:[#allocation10 + $0x1b0] sm:$0xff]   ;;  %v13731_v4 = vld [vmem:[#allocation10 + $0x108] sm:$0xff]   ;;  %v13743_v59 = vld [vmem:[#allocation10 + $0x120] sm:$0xff]  }
 0x1d4   : > { %1419 = vrot.lane.b32.xlu0 %v15359_v21, %s14838_s25  ;;  %1199 = vrot.lane.b32.xlu1 %v15240_v60, %s14838_s25  ;;  %1349 = vst.msk [vmem:[#allocation3 + $0x78] sm:$0xff] %vm783_vm0, %v1317_v37  ;;  %v1120_v53 = vshrl.u32 %v1045_v25, 16  ;;  %v1123_v45 = vshll.u32 %v1045_v25, 16  ;;  %v1320_v28 = vor.u32 %v1318_v29, %v1316_v8  ;;  %v1324_v40 = vrot.slane %v1322_v24, 1  ;;  %v13734_v20 = vld [vmem:[#allocation10 + $0x150] sm:$0xff]   ;;  %v13738_v24 = vld [vmem:[#allocation10 + $0x158] sm:$0xff]  }
 0x1d5   : > { %v1129_v11 = vshrl.u32 %v1046_v36, 16  ;;  %v1132_v22 = vshll.u32 %v1046_v36, 16  ;;  %v1118_v10 = vsel %vm18633_vm10, %v1108_v61, %v1117_v54  ;;  %v1407_v13 = vrot.slane %v15393_v58, 1  ;;  %v13735_v29 = vld [vmem:[#allocation10 + $0x110] sm:$0xff]  }
 0x1d6   : > { %v1122_v21 = vrot.slane %v1120_v53, 3  ;;  %v1125_v41 = vrot.slane %v1123_v45, 4  ;;  %1152 = vst.msk [vmem:[#allocation3 + $0x70] sm:$0xff] %vm783_vm0, %v1118_v10  ;;  %v1325_v60 = vsel %vm18611_vm9, %v1320_v28, %v1324_v40  ;;  %v1328_v46 = vor.u32 %v1326_v35, %v1324_v40  ;;  %v13746_v10 = vld [vmem:[#allocation10 + $0x168] sm:$0xff]  }
 0x1d7   : > { %v1131_v42 = vrot.slane %v1129_v11, 3  ;;  %v1134_v27 = vrot.slane %v1132_v22, 4  ;;  %1350 = vst.msk [vmem:[#allocation3 + $0x88] sm:$0xff] %vm783_vm0, %v1325_v60  ;;  %v1406_v61 = vsel %vm18614_vm8, %v1403_v26, %v1405_v12  ;;  %v1380_v47 = vpack.c.bf16 %v15140_v18, %v15140_v18  ;;  %v13744_v26 = vld [vmem:[#allocation10 + $0x1e0] sm:$0xff]  }
 0x1d8   : > { %1201 = vrot.lane.b32.xlu1 %v15286_v1, %s14838_s25  ;;  %1421 = vrot.lane.b32.xlu0 %v1404_v34, %s14838_s25  ;;  %v1126_v38 = vor.u32 %v1125_v41, %v1122_v21  ;;  %v1333_v49 = vsel %vm18611_vm9, %v1328_v46, %v1332_v9  ;;  %v1408_v18 = vsel %vm18614_vm8, %v1405_v12, %v1407_v13  ;;  %v13745_v9 = vld [vmem:[#allocation10 + $0x1a0] sm:$0xff]   ;;  %v13747_v21 = vld [vmem:[#allocation10 + $0x128] sm:$0xff]   ;;  %vm15669_vm9 = vmpackc.low %vm15259_vm11, %vm14839_vm15 }
 0x1d9   : > { %v1135_v50 = vor.u32 %v1134_v27, %v1131_v42  ;;  %1351 = vst.msk [vmem:[#allocation3 + $0x98] sm:$0xff] %vm783_vm0, %v1333_v49  ;;  %v1409_v48 = vrot.slane %v1380_v47, 1  ;;  %12107 = vmatprep.subr.bf16.mxu0 %v13744_v26  ;;  %v13750_v42 = vld [vmem:[#allocation10 + $0x170] sm:$0xff]  }
 0x1da   : > { %v1127_v1 = vsel %vm18633_vm10, %v1117_v54, %v1126_v38  ;;  %12108 = vmatpush3.bf16.msra.mxu0 %v13745_v9  ;;  %v13739_v54 = vld [vmem:[#allocation10 + $0x118] sm:$0xff]   ;;  %v13751_v27 = vld [vmem:[#allocation10 + $0x130] sm:$0xff]  }
 0x1db   : > { %1153 = vst.msk [vmem:[#allocation3 + $0x80] sm:$0xff] %vm783_vm0, %v1127_v1  ;;  %v1136_v52 = vsel %vm18633_vm10, %v1126_v38, %v1135_v50  ;;  %v1410_v43 = vsel %vm18614_vm8, %v1407_v13, %v1409_v48  ;;  %v13757_v50 = vld [vmem:[#allocation10 + $0x138] sm:$0xff]   ;;  %vm15701_vm8 = vmpackc.low %vm15173_vm3, %vm14839_vm15 }
 0x1dc   : > { %1203 = vrot.lane.b32.xlu1 %v15332_v7, %s14838_s25  ;;  %1423 = vrot.lane.b32.xlu0 %v1406_v61, %s14838_s25  ;;  %1154 = vst.msk [vmem:[#allocation3 + $0x90] sm:$0xff] %vm783_vm0, %v1136_v52  ;;  %v13748_v7 = vld [vmem:[#allocation10 + $0x1e8] sm:$0xff]   ;;  %v13756_v61 = vld [vmem:[#allocation10 + $0x178] sm:$0xff]   ;;  %vm15570_vm0 = vmpackc.low %vm15169_vm2, %vm14839_vm15 }
 0x1dd   : > { %12109 = vmatprep.subr.bf16.mxu0 %v13748_v7 }
 0x1de   : > { %12110 = vmatpush3.bf16.msra.mxu0 %v13749_v56 }
 0x1df   : > { %12111 = vmatprep.subr.bf16.mxu0 %v13752_v30 }
 0x1e0   : > { %1205 = vrot.lane.b32.xlu1 %v15375_v32, %s14838_s25  ;;  %1425 = vrot.lane.b32.xlu0 %v1408_v18, %s14838_s25 }
 0x1e2   : > { %12112 = vmatpush3.bf16.msra.mxu0 %v13753_v57 }
 0x1e3   : > { %12113 = vmatprep.subr.bf16.mxu0 %v13754_v0 }
 0x1e4   : > { %1207 = vrot.lane.b32.xlu1 %v15393_v58, %s14838_s25  ;;  %1427 = vrot.lane.b32.xlu0 %v1410_v43, %s14838_s25 }
 0x1e6   : > { %12114 = vmatpush3.bf16.msra.mxu0 %v13755_v3 }
 0x22e   : > { %v1412_v32 = vpop.permute.xlu0 %1411 }
 0x22f   : > { %1438 = vst.msk [vmem:[#allocation3 + $0x18] sm:$0xff] %vm1218_vm14, %v1412_v32 }
 0x232   : > { %v1192_v14 = vpop.permute.xlu0 %1191 }
 0x233   : > { %1219 = vst.msk [vmem:[#allocation3 + $0x10] sm:$0xff] %vm1218_vm14, %v1192_v14 }
 0x236   : > { %v1414_v58 = vpop.permute.xlu1 %1413  ;;  %v1450_v51 = vld [vmem:[#allocation3 + $0x18] sm:$0xff] }
 0x237   : > { %1439 = vst.msk [vmem:[#allocation3 + $0x28] sm:$0xff] %vm1218_vm14, %v1414_v58  ;;  %1660 = vmatprep.mubr.bf16.mxu1 %v1450_v51  ;;  %1869 = vmatprep.mubr.bf16.mxu0 %v1450_v51  ;;  %v14399_v51 = vld [vmem:[#allocation3 + $0x8] sm:$0xff] }
 0x23a   : > { %v1194_v8 = vpop.permute.xlu1 %1193  ;;  %v1449_v12 = vld [vmem:[#allocation3 + $0x10] sm:$0xff] }
 0x23b   : > { %1220 = vst.msk [vmem:[#allocation3 + $0x20] sm:$0xff] %vm1218_vm14, %v1194_v8  ;;  %1661 = vmatmul.mubr.bf16.vlgmr.msra.gmra.mrb[20].mxu1 %v1449_v12  ;;  %1870 = vmatmul.mubr.bf16.gmra.mrb[20].mxu0 %v1449_v12  ;;  %v13761_v8 = vld [vmem:[#allocation13 + $0x210] ss:$8 sps:$4 sm:$0xff]   ;;  %v13763_v12 = vld [vmem:[#allocation13 + $0x214] ss:$8 sps:$4 sm:$0xff]  }
 0x23c   : > { %12030 = vmatpush3.bf16.msra.mxu1 %v13727_v5  ;;  %v13758_v5 = vld [vmem:[#allocation13 + $0x200] ss:$8 sps:$4 sm:$0xff]  }
 0x23d   : > { %12031 = vmatprep.subr.bf16.mxu1 %v13730_v6  ;;  %v13760_v6 = vld [vmem:[#allocation13 + $0x204] ss:$8 sps:$4 sm:$0xff]  }
 0x23e   : > { %v1196_v23 = vpop.permute.xlu1 %1195  ;;  %v1416_v2 = vpop.permute.xlu0 %1415  ;;  %v15459_v25 = vld [vmem:[#allocation3 + $0x28] sm:$0xff] }
 0x23f   : > { %1221 = vst.msk [vmem:[#allocation3 + $0x30] sm:$0xff] %vm1218_vm14, %v1196_v23  ;;  %1440 = vst.msk [vmem:[#allocation3 + $0x38] sm:$0xff] %vm1218_vm14, %v1416_v2  ;;  %1668 = vmatprep.mubr.bf16.mxu1 %v15459_v25  ;;  %1877 = vmatprep.mubr.bf16.mxu0 %v15459_v25  ;;  %v13767_v23 = vld [vmem:[#allocation13 + $0x230] ss:$8 sps:$4 sm:$0xff]   ;;  %v13769_v2 = vld [vmem:[#allocation13 + $0x234] ss:$8 sps:$4 sm:$0xff]  }
 0x240   : > { %12032 = vmatpush3.bf16.msra.mxu1 %v13731_v4  ;;  %v13766_v4 = vld [vmem:[#allocation13 + $0x224] ss:$8 sps:$4 sm:$0xff]  }
 0x241   : > { %12033 = vmatprep.subr.bf16.mxu1 %v13734_v20  ;;  %v13764_v20 = vld [vmem:[#allocation13 + $0x220] ss:$8 sps:$4 sm:$0xff]  }
 0x242   : > { %v1418_v34 = vpop.permute.xlu0 %1417  ;;  %v1198_v37 = vpop.permute.xlu1 %1197  ;;  %v15465_v36 = vld [vmem:[#allocation3 + $0x20] sm:$0xff] }
 0x243   : > { %1441 = vst.msk [vmem:[#allocation3 + $0x48] sm:$0xff] %vm1218_vm14, %v1418_v34  ;;  %1222 = vst.msk [vmem:[#allocation3 + $0x40] sm:$0xff] %vm1218_vm14, %v1198_v37  ;;  %1669 = vmatmul.mubr.bf16.gmra.mrb[24].mxu1 %v15465_v36  ;;  %1878 = vmatmul.mubr.bf16.gmra.mrb[24].mxu0 %v15465_v36  ;;  %v13773_v34 = vld [vmem:[#allocation13 + $0x250] ss:$8 sps:$4 sm:$0xff]   ;;  %v13778_v37 = vld [vmem:[#allocation13 + $0x264] ss:$8 sps:$4 sm:$0xff]  }
 0x244   : > { %12034 = vmatpush3.bf16.msra.mxu1 %v13735_v29  ;;  %v13770_v29 = vld [vmem:[#allocation13 + $0x240] ss:$8 sps:$4 sm:$0xff]  }
 0x245   : > { %12035 = vmatprep.subr.bf16.mxu1 %v13738_v24  ;;  %v13775_v24 = vld [vmem:[#allocation13 + $0x254] ss:$8 sps:$4 sm:$0xff]  }
 0x246   : > { %v1420_v53 = vpop.permute.xlu0 %1419  ;;  %v1200_v45 = vpop.permute.xlu1 %1199  ;;  %v15471_v28 = vld [vmem:[#allocation3 + $0x38] sm:$0xff]  ;;  %v15477_v40 = vld [vmem:[#allocation3 + $0x30] sm:$0xff] }
 0x247   : > { %1442 = vst.msk [vmem:[#allocation3 + $0x58] sm:$0xff] %vm1218_vm14, %v1420_v53  ;;  %1223 = vst.msk [vmem:[#allocation3 + $0x50] sm:$0xff] %vm1218_vm14, %v1200_v45  ;;  %1676 = vmatprep.mubr.bf16.mxu1 %v15471_v28  ;;  %1885 = vmatprep.mubr.bf16.mxu0 %v15471_v28  ;;  %v13782_v53 = vld [vmem:[#allocation13 + $0x280] ss:$8 sps:$4 sm:$0xff]   ;;  %v13784_v45 = vld [vmem:[#allocation13 + $0x284] ss:$8 sps:$4 sm:$0xff]  }
 0x248   : > { %12036 = vmatpush3.bf16.msra.mxu1 %v13739_v54  ;;  %v13781_v54 = vld [vmem:[#allocation13 + $0x274] ss:$8 sps:$4 sm:$0xff]  }
 0x249   : > { %12037 = vmatprep.subr.bf16.mxu1 %v13742_v39  ;;  %v13779_v39 = vld [vmem:[#allocation13 + $0x270] ss:$8 sps:$4 sm:$0xff]  }
 0x24a   : > { %v1202_v11 = vpop.permute.xlu1 %1201  ;;  %v15479_v22 = vld [vmem:[#allocation3 + $0x48] sm:$0xff]  ;;  %v1422_v35 = vpop.permute.xlu0 %1421  ;;  %v1455_v46 = vld [vmem:[#allocation3 + $0x40] sm:$0xff] }
 0x24b   : > { %1677 = vmatmul.mubr.bf16.gmra.mrb[28].mxu1 %v15477_v40  ;;  %1886 = vmatmul.mubr.bf16.gmra.mrb[28].mxu0 %v15477_v40  ;;  %1224 = vst.msk [vmem:[#allocation3 + $0x60] sm:$0xff] %vm1218_vm14, %v1202_v11  ;;  %1443 = vst.msk [vmem:[#allocation3 + $0x68] sm:$0xff] %vm1218_vm14, %v1422_v35  ;;  %v13788_v11 = vld [vmem:[#allocation13 + $0x2a0] ss:$8 sps:$4 sm:$0xff]   ;;  %v13791_v35 = vld [vmem:[#allocation13 + $0x2b0] ss:$8 sps:$4 sm:$0xff]  }
 0x24c   : > { %1684 = vmatprep.mubr.bf16.mxu1 %v15479_v22  ;;  %1893 = vmatprep.mubr.bf16.mxu0 %v15479_v22 }
 0x24d   : > { %12038 = vmatpush3.bf16.msra.mxu1 %v13743_v59  ;;  %v13785_v59 = vld [vmem:[#allocation13 + $0x290] ss:$8 sps:$4 sm:$0xff]  }
 0x24e   : > { %v1204_v41 = vpop.permute.xlu1 %1203  ;;  %v1424_v60 = vpop.permute.xlu0 %1423  ;;  %12039 = vmatprep.subr.bf16.mxu1 %v13746_v10  ;;  %v1458_v47 = vld [vmem:[#allocation3 + $0x58] sm:$0xff]  ;;  %v1457_v52 = vld [vmem:[#allocation3 + $0x50] sm:$0xff] }
 0x24f   : > { %1225 = vst.msk [vmem:[#allocation3 + $0x70] sm:$0xff] %vm1218_vm14, %v1204_v41  ;;  %1444 = vst.msk [vmem:[#allocation3 + $0x78] sm:$0xff] %vm1218_vm14, %v1424_v60  ;;  %v13796_v10 = vld [vmem:[#allocation13 + $0x2c4] ss:$8 sps:$4 sm:$0xff]   ;;  %v13794_v41 = vld [vmem:[#allocation13 + $0x2c0] ss:$8 sps:$4 sm:$0xff]  }
 0x250   : > { %v15507_v60 = vld [vmem:[#allocation2 + $0x8] sm:$0xff] }
 0x251   : > { %12040 = vmatpush3.bf16.msra.mxu1 %v13747_v21  ;;  %v15505_v21 = vld [vmem:[#allocation2 + $0x10] sm:$0x80] }
 0x252   : > { %v1206_v13 = vpop.permute.xlu1 %1205  ;;  %v1426_v38 = vpop.permute.xlu0 %1425  ;;  %12041 = vmatprep.subr.bf16.mxu1 %v13750_v42  ;;  %v1460_v26 = vld [vmem:[#allocation3 + $0x68] sm:$0xff]  ;;  %v1459_v18 = vld [vmem:[#allocation3 + $0x60] sm:$0xff]  ;;  %5771 = vst [vmem:[#allocation2 + $0x10] sm:$0xff] %v15507_v60 }
 0x253   : > { %1685 = vmatmul.mubr.bf16.gmra.mrb[32].mxu1 %v1455_v46  ;;  %1894 = vmatmul.mubr.bf16.gmra.mrb[32].mxu0 %v1455_v46  ;;  %1226 = vst.msk [vmem:[#allocation3 + $0x80] sm:$0xff] %vm1218_vm14, %v1206_v13  ;;  %1445 = vst.msk [vmem:[#allocation3 + $0x88] sm:$0xff] %vm1218_vm14, %v1426_v38  ;;  %v13799_v42 = vld [vmem:[#allocation13 + $0x2d4] ss:$8 sps:$4 sm:$0xff]   ;;  %v13800_v13 = vld [vmem:[#allocation13 + $0x2e0] ss:$8 sps:$4 sm:$0xff]  }
 0x254   : > { %1692 = vmatprep.mubr.bf16.mxu1 %v1458_v47  ;;  %1901 = vmatprep.mubr.bf16.mxu0 %v1458_v47  ;;  %v13805_v38 = vld [vmem:[#allocation13 + $0x2f4] ss:$8 sps:$4 sm:$0xff]  }
 0x255   : > { %12042 = vmatpush3.bf16.msra.mxu1 %v13751_v27  ;;  %v13797_v27 = vld [vmem:[#allocation13 + $0x2d0] ss:$8 sps:$4 sm:$0xff]  }
 0x256   : > { %v1208_v49 = vpop.permute.xlu1 %1207  ;;  %v1428_v1 = vpop.permute.xlu0 %1427  ;;  %12043 = vmatprep.subr.bf16.mxu1 %v13756_v61  ;;  %v1462_v48 = vld [vmem:[#allocation3 + $0x78] sm:$0xff]  ;;  %v1461_v9 = vld [vmem:[#allocation3 + $0x70] sm:$0xff] }
 0x257   : > { %1227 = vst.msk [vmem:[#allocation3 + $0x90] sm:$0xff] %vm1218_vm14, %v1208_v49  ;;  %1446 = vst.msk [vmem:[#allocation3 + $0x98] sm:$0xff] %vm1218_vm14, %v1428_v1  ;;  %v13803_v61 = vld [vmem:[#allocation13 + $0x2f0] ss:$8 sps:$4 sm:$0xff]  }
 0x258   : > { %vm15637_vm14 = vmpackc.low %vm15205_vm6, %vm14839_vm15 }
 0x259   : > { %12044 = vmatpush3.bf16.msra.mxu1 %v13757_v50 }
 0x25a   : > { %v1464_v43 = vld [vmem:[#allocation3 + $0x88] sm:$0xff]  ;;  %v1463_v7 = vld [vmem:[#allocation3 + $0x80] sm:$0xff]  ;;  %3431 = vmatprep.subr.bf16.mxu1 %v13760_v6 }
 0x25b   : > { %1693 = vmatmul.mubr.bf16.gmra.mrb[36].mxu1 %v1457_v52  ;;  %1902 = vmatmul.mubr.bf16.gmra.mrb[36].mxu0 %v1457_v52 }
 0x25c   : > { %1700 = vmatprep.mubr.bf16.mxu1 %v1460_v26  ;;  %1909 = vmatprep.mubr.bf16.mxu0 %v1460_v26 }
 0x25e   : > { %v1498_v56 = vld [vmem:[#allocation3 + $0x98] sm:$0xff]  ;;  %v1497_v30 = vld [vmem:[#allocation3 + $0x90] sm:$0xff] }
 0x263   : > { %1701 = vmatmul.mubr.bf16.gmra.mrb[40].mxu1 %v1459_v18  ;;  %1910 = vmatmul.mubr.bf16.gmra.mrb[40].mxu0 %v1459_v18 }
 0x264   : > { %1708 = vmatprep.mubr.bf16.mxu1 %v1462_v48  ;;  %1917 = vmatprep.mubr.bf16.mxu0 %v1462_v48 }
 0x26b   : > { %1709 = vmatmul.mubr.bf16.gmra.mrb[44].mxu1 %v1461_v9  ;;  %1918 = vmatmul.mubr.bf16.gmra.mrb[44].mxu0 %v1461_v9 }
 0x26c   : > { %1716 = vmatprep.mubr.bf16.mxu1 %v1464_v43  ;;  %1925 = vmatprep.mubr.bf16.mxu0 %v1464_v43 }
 0x273   : > { %1717 = vmatmul.mubr.bf16.gmra.mrb[48].mxu1 %v1463_v7  ;;  %1926 = vmatmul.mubr.bf16.gmra.mrb[48].mxu0 %v1463_v7 }
 0x274   : > { %1724 = vmatprep.mubr.bf16.mxu1 %v1498_v56  ;;  %2383 = vmatprep.mubr.bf16.mxu0 %v15471_v28 }
 0x27b   : > { %1725 = vmatmul.mubr.bf16.gmra.mrb[52].mxu1 %v1497_v30  ;;  %2384 = vmatmul.mubr.bf16.vlgmr.msra.gmra.mrb[52].mxu0 %v15477_v40  ;;  %v11975_v57 = vpop.f32.mrb[16].mxu0 }
 0x27c   : > { %2113 = vmatprep.mubr.bf16.mxu1 %v15459_v25  ;;  %2391 = vmatprep.mubr.bf16.mxu0 %v15479_v22  ;;  %v11976_v0 = vpop.f32.mrb[17].mxu0  ;;  %v13772_v25 = vld [vmem:[#allocation13 + $0x244] ss:$8 sps:$4 sm:$0xff]  }
 0x27d   : > { %v15499_v3 = vadd.f32 %v11976_v0, %v11975_v57  ;;  %v11978_v32 = vpop.f32.mrb[18].mxu0 }
 0x27e   : > { %v11979_v14 = vpop.f32.mrb[19].mxu0 }
 0x27f   : > { %v15502_v58 = vadd.f32 %v11979_v14, %v11978_v32 }
 0x283   : > { %2114 = vmatmul.mubr.bf16.vlgmr.msra.gmra.mrb[56].mxu1 %v15465_v36  ;;  %2392 = vmatmul.mubr.bf16.gmra.mrb[56].mxu0 %v1455_v46  ;;  %v13776_v36 = vld [vmem:[#allocation13 + $0x260] ss:$8 sps:$4 sm:$0xff]  }
 0x284   : > { %2121 = vmatprep.mubr.bf16.mxu1 %v15471_v28  ;;  %2399 = vmatprep.mubr.bf16.mxu0 %v1458_v47  ;;  %v13787_v28 = vld [vmem:[#allocation13 + $0x294] ss:$8 sps:$4 sm:$0xff]  }
 0x285   : > { %3432 = vmatpush1.bf16.msra.mxu1 %v13758_v5 }
 0x286   : > { %3433 = vmatprep.subr.bf16.mxu1 %v13763_v12 }
 0x289   : > { %3434 = vmatpush1.bf16.msra.mxu1 %v13761_v8 }
 0x28a   : > { %3435 = vmatprep.subr.bf16.mxu1 %v13766_v4 }
 0x28b   : > { %2122 = vmatmul.mubr.bf16.gmra.mrb[60].mxu1 %v15477_v40  ;;  %2400 = vmatmul.mubr.bf16.gmra.mrb[60].mxu0 %v1457_v52  ;;  %v13790_v40 = vld [vmem:[#allocation13 + $0x2a4] ss:$8 sps:$4 sm:$0xff]  }
 0x28c   : > { %2129 = vmatprep.mubr.bf16.mxu1 %v15479_v22  ;;  %2407 = vmatprep.mubr.bf16.mxu0 %v1460_v26  ;;  %v13793_v22 = vld [vmem:[#allocation13 + $0x2b4] ss:$8 sps:$4 sm:$0xff]  }
 0x28d   : > { %3436 = vmatpush1.bf16.msra.mxu1 %v13764_v20 }
 0x28e   : > { %3437 = vmatprep.subr.bf16.mxu1 %v13769_v2 }
 0x291   : > { %3438 = vmatpush1.bf16.msra.mxu1 %v13767_v23 }
 0x292   : > { %3439 = vmatprep.subr.bf16.mxu1 %v13772_v25 }
 0x293   : > { %2130 = vmatmul.mubr.bf16.gmra.mrb[64].mxu1 %v1455_v46  ;;  %2408 = vmatmul.mubr.bf16.gmra.mrb[64].mxu0 %v1459_v18  ;;  %v13802_v46 = vld [vmem:[#allocation13 + $0x2e4] ss:$8 sps:$4 sm:$0xff]  }
 0x294   : > { %2137 = vmatprep.mubr.bf16.mxu1 %v1458_v47  ;;  %2415 = vmatprep.mubr.bf16.mxu0 %v1462_v48  ;;  %v13808_v47 = vld [vmem:[#allocation13 + $0x304] ss:$8 sps:$4 sm:$0xff]  }
 0x295   : > { %3440 = vmatpush1.bf16.msra.mxu1 %v13770_v29 }
 0x296   : > { %3441 = vmatprep.subr.bf16.mxu1 %v13775_v24 }
 0x299   : > { %3442 = vmatpush1.bf16.msra.mxu1 %v13773_v34 }
 0x29a   : > { %3443 = vmatprep.subr.bf16.mxu1 %v13778_v37 }
 0x29b   : > { %2138 = vmatmul.mubr.bf16.gmra.mrb[68].mxu1 %v1457_v52  ;;  %2416 = vmatmul.mubr.bf16.gmra.mrb[68].mxu0 %v1461_v9 }
 0x29c   : > { %2145 = vmatprep.mubr.bf16.mxu1 %v1460_v26  ;;  %2423 = vmatprep.mubr.bf16.mxu0 %v1464_v43 }
 0x29d   : > { %3444 = vmatpush1.bf16.msra.mxu1 %v13776_v36 }
 0x29e   : > { %3445 = vmatprep.subr.bf16.mxu1 %v13781_v54 }
 0x2a1   : > { %3446 = vmatpush1.bf16.msra.mxu1 %v13779_v39 }
 0x2a2   : > { %3447 = vmatprep.subr.bf16.mxu1 %v13784_v45 }
 0x2a3   : > { %2146 = vmatmul.mubr.bf16.gmra.mrb[72].mxu1 %v1459_v18  ;;  %2424 = vmatmul.mubr.bf16.gmra.mrb[72].mxu0 %v1463_v7 }
 0x2a4   : > { %2153 = vmatprep.mubr.bf16.mxu1 %v1462_v48  ;;  %2431 = vmatprep.mubr.bf16.mxu0 %v1498_v56 }
 0x2a5   : > { %3448 = vmatpush1.bf16.msra.mxu1 %v13782_v53 }
 0x2a6   : > { %3449 = vmatprep.subr.bf16.mxu1 %v13787_v28 }
 0x2a9   : > { %3450 = vmatpush1.bf16.msra.mxu1 %v13785_v59 }
 0x2aa   : > { %3451 = vmatprep.subr.bf16.mxu1 %v13790_v40 }
 0x2ab   : > { %2154 = vmatmul.mubr.bf16.gmra.mrb[76].mxu1 %v1461_v9  ;;  %2432 = vmatmul.mubr.bf16.gmra.mrb[76].mxu0 %v1497_v30 }
 0x2ac   : > { %2161 = vmatprep.mubr.bf16.mxu1 %v1464_v43  ;;  %2439 = vmatprep.mubr.bf16.mxu0 %v14399_v51 }
 0x2ad   : > { %3452 = vmatpush1.bf16.msra.mxu1 %v13788_v11 }
 0x2ae   : > { %3453 = vmatprep.subr.bf16.mxu1 %v13793_v22 }
 0x2b1   : > { %3454 = vmatpush1.bf16.msra.mxu1 %v13791_v35 }
 0x2b2   : > { %3455 = vmatprep.subr.bf16.mxu1 %v13796_v10 }
 0x2b3   : > { %2162 = vmatmul.mubr.bf16.gmra.mrb[80].mxu1 %v1463_v7  ;;  %2440 = vmatmul.mubr.bf16.gmra.mrb[80].mxu0 %v14399_v51 }
 0x2b4   : > { %2169 = vmatprep.mubr.bf16.mxu1 %v1498_v56  ;;  %2447 = vmatprep.mubr.bf16.mxu0 %v14399_v51 }
 0x2b5   : > { %3456 = vmatpush1.bf16.msra.mxu1 %v13794_v41 }
 0x2b6   : > { %3457 = vmatprep.subr.bf16.mxu1 %v13799_v42 }
 0x2b9   : > { %3458 = vmatpush1.bf16.msra.mxu1 %v13797_v27 }
 0x2ba   : > { %3459 = vmatprep.subr.bf16.mxu1 %v13802_v46 }
 0x2bb   : > { %2170 = vmatmul.mubr.bf16.gmra.mrb[84].mxu1 %v1497_v30  ;;  %2448 = vmatmul.mubr.bf16.gmra.mrb[84].mxu0 %v14399_v51 }
 0x2bc   : > { %2177 = vmatprep.mubr.bf16.mxu1 %v14399_v51 }
 0x2bd   : > { %3460 = vmatpush1.bf16.msra.mxu1 %v13800_v13 }
 0x2be   : > { %3461 = vmatprep.subr.bf16.mxu1 %v13805_v38 }
 0x2c1   : > { %3462 = vmatpush1.bf16.msra.mxu1 %v13803_v61 }
 0x2c2   : > { %3554 = vmatprep.subr.bf16.mxu1 %v13808_v47 }
 0x2c3   : > { %2178 = vmatmul.mubr.bf16.gmra.mrb[88].mxu1 %v14399_v51 }
 0x30e   : > { %v11905_v50 = vpop.f32.mrb[20].mxu1  ;;  %v11981_v49 = vpop.f32.mrb[20].mxu0 }
 0x30f   : > { %v11906_v1 = vpop.f32.mrb[21].mxu1  ;;  %v11982_v52 = vpop.f32.mrb[21].mxu0 }
 0x310   : > { %v11907_v26 = vadd.f32 %v11906_v1, %v11905_v50  ;;  %v11983_v18 = vadd.f32 %v11982_v52, %v11981_v49  ;;  %v11908_v48 = vpop.f32.mrb[22].mxu1  ;;  %v11984_v9 = vpop.f32.mrb[22].mxu0  ;;  %v15526_v52 = vld [vmem:[#allocation2 + $0x140] sm:$0x3] }
 0x311   : > { %v11909_v43 = vpop.f32.mrb[23].mxu1  ;;  %v11985_v7 = vpop.f32.mrb[23].mxu0 }
 0x312   : > { %v15511_v56 = vadd.f32 %v15499_v3, %v11907_v26  ;;  %v11910_v30 = vadd.f32 %v11909_v43, %v11908_v48  ;;  %v11986_v57 = vadd.f32 %v11985_v7, %v11984_v9  ;;  %v15528_v26 = vld [vmem:[#allocation2 + $0x140] sm:$0x1] }
 0x313   : > { %5809 = vst [vmem:[#allocation2 + $0x140] sm:$0xff] %v15507_v60 }
 0x314   : > { %v15514_v0 = vadd.f32 %v15502_v58, %v11910_v30 }
 0x316   : > { %v11911_v32 = vpop.f32.mrb[24].mxu1  ;;  %v11987_v14 = vpop.f32.mrb[24].mxu0 }
 0x317   : > { %v11912_v51 = vpop.f32.mrb[25].mxu1  ;;  %v11988_v5 = vpop.f32.mrb[25].mxu0 }
 0x318   : > { %v11913_v6 = vadd.f32 %v11912_v51, %v11911_v32  ;;  %v11989_v8 = vadd.f32 %v11988_v5, %v11987_v14  ;;  %v11914_v12 = vpop.f32.mrb[26].mxu1  ;;  %v11990_v4 = vpop.f32.mrb[26].mxu0 }
 0x319   : > { %v11915_v20 = vpop.f32.mrb[27].mxu1  ;;  %v11991_v23 = vpop.f32.mrb[27].mxu0 }
 0x31a   : > { %v15516_v2 = vadd.f32 %v11983_v18, %v11913_v6  ;;  %v11916_v25 = vadd.f32 %v11915_v20, %v11914_v12  ;;  %v11992_v3 = vadd.f32 %v11991_v23, %v11990_v4 }
 0x31c   : > { %v15518_v29 = vadd.f32 %v11986_v57, %v11916_v25 }
 0x31e   : > { %v11917_v24 = vpop.f32.mrb[28].mxu1  ;;  %v11993_v34 = vpop.f32.mrb[28].mxu0 }
 0x31f   : > { %v11918_v58 = vpop.f32.mrb[29].mxu1  ;;  %v11994_v37 = vpop.f32.mrb[29].mxu0 }
 0x320   : > { %v11919_v36 = vadd.f32 %v11918_v58, %v11917_v24  ;;  %v11995_v54 = vadd.f32 %v11994_v37, %v11993_v34  ;;  %v11920_v39 = vpop.f32.mrb[30].mxu1  ;;  %v11996_v53 = vpop.f32.mrb[30].mxu0 }
 0x321   : > { %v11921_v45 = vpop.f32.mrb[31].mxu1  ;;  %v11997_v28 = vpop.f32.mrb[31].mxu0 }
 0x322   : > { %v15520_v59 = vadd.f32 %v11989_v8, %v11919_v36  ;;  %v11922_v40 = vadd.f32 %v11921_v45, %v11920_v39  ;;  %v11998_v11 = vadd.f32 %v11997_v28, %v11996_v53 }
 0x324   : > { %v15522_v22 = vadd.f32 %v11992_v3, %v11922_v40 }
 0x326   : > { %v11923_v35 = vpop.f32.mrb[32].mxu1  ;;  %v11999_v10 = vpop.f32.mrb[32].mxu0 }
 0x327   : > { %v11924_v41 = vpop.f32.mrb[33].mxu1  ;;  %v12000_v42 = vpop.f32.mrb[33].mxu0 }
 0x328   : > { %v11925_v27 = vadd.f32 %v11924_v41, %v11923_v35  ;;  %v12001_v46 = vadd.f32 %v12000_v42, %v11999_v10  ;;  %v11926_v13 = vpop.f32.mrb[34].mxu1  ;;  %v12002_v38 = vpop.f32.mrb[34].mxu0 }
 0x329   : > { %v11927_v61 = vpop.f32.mrb[35].mxu1  ;;  %v12003_v47 = vpop.f32.mrb[35].mxu0 }
 0x32a   : > { %v15524_v50 = vadd.f32 %v11995_v54, %v11925_v27  ;;  %v11928_v49 = vadd.f32 %v11927_v61, %v11926_v13  ;;  %v12004_v1 = vadd.f32 %v12003_v47, %v12002_v38 }
 0x32c   : > { %v15530_v18 = vadd.f32 %v11998_v11, %v11928_v49 }
 0x32e   : > { %v11929_v48 = vpop.f32.mrb[36].mxu1  ;;  %v12005_v9 = vpop.f32.mrb[36].mxu0 }
 0x32f   : > { %v11930_v43 = vpop.f32.mrb[37].mxu1  ;;  %v12006_v7 = vpop.f32.mrb[37].mxu0 }
 0x330   : > { %v11931_v30 = vadd.f32 %v11930_v43, %v11929_v48  ;;  %v12007_v57 = vadd.f32 %v12006_v7, %v12005_v9  ;;  %v11932_v32 = vpop.f32.mrb[38].mxu1  ;;  %v12008_v14 = vpop.f32.mrb[38].mxu0 }
 0x331   : > { %v11933_v51 = vpop.f32.mrb[39].mxu1  ;;  %v12009_v5 = vpop.f32.mrb[39].mxu0 }
 0x332   : > { %v15533_v6 = vadd.f32 %v12001_v46, %v11931_v30  ;;  %v11934_v8 = vadd.f32 %v11933_v51, %v11932_v32  ;;  %v12010_v12 = vadd.f32 %v12009_v5, %v12008_v14 }
 0x334   : > { %v15535_v4 = vadd.f32 %v12004_v1, %v11934_v8 }
 0x336   : > { %v11935_v20 = vpop.f32.mrb[40].mxu1  ;;  %v12011_v23 = vpop.f32.mrb[40].mxu0 }
 0x337   : > { %v11936_v25 = vpop.f32.mrb[41].mxu1  ;;  %v12012_v60 = vpop.f32.mrb[41].mxu0 }
 0x338   : > { %v11937_v3 = vadd.f32 %v11936_v25, %v11935_v20  ;;  %v12013_v24 = vadd.f32 %v12012_v60, %v12011_v23  ;;  %v11938_v34 = vpop.f32.mrb[42].mxu1  ;;  %v12014_v58 = vpop.f32.mrb[42].mxu0 }
 0x339   : > { %v11939_v37 = vpop.f32.mrb[43].mxu1  ;;  %v12015_v36 = vpop.f32.mrb[43].mxu0 }
 0x33a   : > { %v15537_v54 = vadd.f32 %v12007_v57, %v11937_v3  ;;  %v11940_v39 = vadd.f32 %v11939_v37, %v11938_v34  ;;  %v12016_v53 = vadd.f32 %v12015_v36, %v12014_v58 }
 0x33c   : > { %v15539_v45 = vadd.f32 %v12010_v12, %v11940_v39 }
 0x33e   : > { %v11941_v28 = vpop.f32.mrb[44].mxu1  ;;  %v12017_v40 = vpop.f32.mrb[44].mxu0 }
 0x33f   : > { %v11942_v11 = vpop.f32.mrb[45].mxu1  ;;  %v12018_v35 = vpop.f32.mrb[45].mxu0 }
 0x340   : > { %v11943_v10 = vadd.f32 %v11942_v11, %v11941_v28  ;;  %v12019_v41 = vadd.f32 %v12018_v35, %v12017_v40  ;;  %v11944_v42 = vpop.f32.mrb[46].mxu1  ;;  %v12020_v27 = vpop.f32.mrb[46].mxu0 }
 0x341   : > { %v11945_v46 = vpop.f32.mrb[47].mxu1  ;;  %v12021_v13 = vpop.f32.mrb[47].mxu0 }
 0x342   : > { %v15541_v38 = vadd.f32 %v12013_v24, %v11943_v10  ;;  %v11946_v61 = vadd.f32 %v11945_v46, %v11944_v42  ;;  %v12022_v47 = vadd.f32 %v12021_v13, %v12020_v27 }
 0x344   : > { %v15543_v49 = vadd.f32 %v12016_v53, %v11946_v61 }
 0x346   : > { %v11947_v1 = vpop.f32.mrb[48].mxu1  ;;  %v12023_v48 = vpop.f32.mrb[48].mxu0 }
 0x347   : > { %v11948_v9 = vpop.f32.mrb[49].mxu1  ;;  %v12024_v43 = vpop.f32.mrb[49].mxu0 }
 0x348   : > { %v11949_v7 = vadd.f32 %v11948_v9, %v11947_v1  ;;  %v12025_v30 = vadd.f32 %v12024_v43, %v12023_v48  ;;  %v11950_v57 = vpop.f32.mrb[50].mxu1  ;;  %v12026_v32 = vpop.f32.mrb[50].mxu0 }
 0x349   : > { %v11951_v14 = vpop.f32.mrb[51].mxu1  ;;  %v12027_v51 = vpop.f32.mrb[51].mxu0 }
 0x34a   : > { %v15545_v5 = vadd.f32 %v12019_v41, %v11949_v7  ;;  %v11952_v8 = vadd.f32 %v11951_v14, %v11950_v57  ;;  %v12028_v12 = vadd.f32 %v12027_v51, %v12026_v32  ;;  %v15554_v7 = vld [vmem:[#allocation11] ss:$0 sm:$0xff] }
 0x34c   : > { %v15547_v20 = vadd.f32 %v12022_v47, %v11952_v8 }
 0x34e   : > { %v11953_v23 = vpop.f32.mrb[52].mxu1  ;;  %v12115_v25 = vpop.f32.mrb[52].mxu0 }
 0x34f   : > { %v11954_v60 = vpop.f32.mrb[53].mxu1  ;;  %v12116_v3 = vpop.f32.mrb[53].mxu0 }
 0x350   : > { %v11955_v24 = vadd.f32 %v11954_v60, %v11953_v23  ;;  %v12117_v34 = vadd.f32 %v12116_v3, %v12115_v25  ;;  %v11956_v58 = vpop.f32.mrb[54].mxu1  ;;  %v12118_v37 = vpop.f32.mrb[54].mxu0 }
 0x351   : > { %v11957_v36 = vpop.f32.mrb[55].mxu1  ;;  %v12119_v39 = vpop.f32.mrb[55].mxu0 }
 0x352   : > { %v15549_v53 = vadd.f32 %v12025_v30, %v11955_v24  ;;  %v11958_v28 = vadd.f32 %v11957_v36, %v11956_v58  ;;  %v12120_v40 = vadd.f32 %v12119_v39, %v12118_v37 }
 0x354   : > { %v15551_v11 = vadd.f32 %v12028_v12, %v11958_v28 }
 0x356   : > { %v12045_v35 = vpop.f32.mrb[56].mxu1  ;;  %v12121_v10 = vpop.f32.mrb[56].mxu0 }
 0x357   : > { %v12046_v41 = vpop.f32.mrb[57].mxu1  ;;  %v12122_v42 = vpop.f32.mrb[57].mxu0 }
 0x358   : > { %v12047_v27 = vadd.f32 %v12046_v41, %v12045_v35  ;;  %v12123_v46 = vadd.f32 %v12122_v42, %v12121_v10  ;;  %v12048_v13 = vpop.f32.mrb[58].mxu1  ;;  %v12124_v61 = vpop.f32.mrb[58].mxu0 }
 0x359   : > { %v12049_v47 = vpop.f32.mrb[59].mxu1  ;;  %v12125_v1 = vpop.f32.mrb[59].mxu0 }
 0x35a   : > { %v2186_v48 = vadd.f32 %v12047_v27, %v15511_v56  ;;  %v12050_v9 = vadd.f32 %v12049_v47, %v12048_v13  ;;  %v12126_v43 = vadd.f32 %v12125_v1, %v12124_v61 }
 0x35c   : > { %v2456_v30 = vadd.f32 %v12117_v34, %v2186_v48  ;;  %v2187_v57 = vadd.f32 %v12050_v9, %v15514_v0 }
 0x35e   : > { %v2481_v32 = vadd.f32 %v15554_v7, %v2456_v30  ;;  %v2457_v14 = vadd.f32 %v12120_v40, %v2187_v57  ;;  %v12051_v51 = vpop.f32.mrb[60].mxu1  ;;  %v12127_v8 = vpop.f32.mrb[60].mxu0 }
 0x35f   : > { %v12052_v12 = vpop.f32.mrb[61].mxu1  ;;  %v12128_v23 = vpop.f32.mrb[61].mxu0 }
 0x360   : > { %v2499_v25 = vmax.f32 %v2481_v32, 0.0  ;;  %v2482_v60 = vadd.f32 %v15554_v7, %v2457_v14  ;;  %v12053_v3 = vadd.f32 %v12052_v12, %v12051_v51  ;;  %v12129_v24 = vadd.f32 %v12128_v23, %v12127_v8  ;;  %v12054_v56 = vpop.f32.mrb[62].mxu1  ;;  %v12130_v58 = vpop.f32.mrb[62].mxu0 }
 0x361   : > { %v12055_v37 = vpop.f32.mrb[63].mxu1  ;;  %v12131_v36 = vpop.f32.mrb[63].mxu0 }
 0x362   : > { %2537 = vst [vmem:[#allocation2 + $0x20] sm:$0xff] %v2499_v25  ;;  %v2500_v34 = vmax.f32 %v2482_v60, 0.0  ;;  %v2188_v0 = vadd.f32 %v12053_v3, %v15516_v2  ;;  %v12056_v39 = vadd.f32 %v12055_v37, %v12054_v56  ;;  %v12132_v28 = vadd.f32 %v12131_v36, %v12130_v58 }
 0x363   : > { %v2590_v40 = vpack.c.bf16 %v2499_v25, %v15505_v21  ;;  %v13914_v21 = vld [vmem:[#allocation13 + $0x140] ss:$8 sps:$4 sm:$0xff]  }
 0x364   : > { %v15563_v35 = vsel %vm15169_vm2, %v2500_v34, 0.0  ;;  %v2458_v10 = vadd.f32 %v12123_v46, %v2188_v0  ;;  %v2189_v41 = vadd.f32 %v12056_v39, %v15518_v29  ;;  %v15574_v2 = vpack.c.bf16 %v2500_v34, %v2499_v25 }
 0x365   : > { %v2601_v29 = vshrl.u32 %v2590_v40, 16  ;;  %v2604_v51 = vshll.u32 %v2590_v40, 16 }
 0x366   : > { %v2483_v42 = vadd.f32 %v15554_v7, %v2458_v10  ;;  %v2459_v27 = vadd.f32 %v12126_v43, %v2189_v41  ;;  %v12057_v13 = vpop.f32.mrb[64].mxu1  ;;  %v12133_v61 = vpop.f32.mrb[64].mxu0  ;;  %14408 = vmatprep.mubr.msk.bf16.mxu1 %vm15570_vm0, %v15574_v2 }
 0x367   : > { %v12058_v47 = vpop.f32.mrb[65].mxu1  ;;  %v12134_v1 = vpop.f32.mrb[65].mxu0  ;;  %v2603_v37 = vrot.slane %v2601_v29, 3  ;;  %v2606_v36 = vrot.slane %v2604_v51, 4 }
 0x368   : > { %v2501_v46 = vmax.f32 %v2483_v42, 0.0  ;;  %v2484_v48 = vadd.f32 %v15554_v7, %v2459_v27  ;;  %v12059_v9 = vadd.f32 %v12058_v47, %v12057_v13  ;;  %v12135_v43 = vadd.f32 %v12134_v1, %v12133_v61  ;;  %v12060_v30 = vpop.f32.mrb[66].mxu1  ;;  %v12136_v57 = vpop.f32.mrb[66].mxu0 }
 0x369   : > { %v12061_v32 = vpop.f32.mrb[67].mxu1  ;;  %v12137_v14 = vpop.f32.mrb[67].mxu0 }
 0x36a   : > { %v2502_v8 = vmax.f32 %v2484_v48, 0.0  ;;  %v2190_v12 = vadd.f32 %v12059_v9, %v15520_v59  ;;  %v12062_v23 = vadd.f32 %v12061_v32, %v12060_v30  ;;  %v12138_v25 = vadd.f32 %v12137_v14, %v12136_v57  ;;  %v13806_v57 = vld [vmem:[#allocation13 + $0x300] ss:$8 sps:$4 sm:$0xff]  }
 0x36b   : > { %v2591_v60 = vpack.c.bf16 %v2501_v46, %v15563_v35  ;;  %v2607_v32 = vor.u32 %v2606_v36, %v2603_v37 }
 0x36c   : > { %v2520_v3 = vsel %vm15181_vm4, %v2502_v8, 0.0  ;;  %v2460_v56 = vadd.f32 %v12129_v24, %v2190_v12  ;;  %v2191_v58 = vadd.f32 %v12062_v23, %v15522_v22  ;;  %v15610_v37 = vpack.c.bf16 %v2502_v8, %v2501_v46 }
 0x36d   : > { %v2609_v34 = vshrl.u32 %v2591_v60, 16  ;;  %v2612_v0 = vshll.u32 %v2591_v60, 16  ;;  %v15585_v39 = vpack.c.bf16 %v2520_v3, %v2501_v46  ;;  %v13811_v60 = vld [vmem:[#allocation13 + $0x314] ss:$8 sps:$4 sm:$0xff]  }
 0x36e   : > { %v2485_v40 = vadd.f32 %v15554_v7, %v2460_v56  ;;  %v2461_v10 = vadd.f32 %v12132_v28, %v2191_v58  ;;  %v12063_v59 = vpop.f32.mrb[68].mxu1  ;;  %v12139_v41 = vpop.f32.mrb[68].mxu0 }
 0x36f   : > { %v12064_v42 = vpop.f32.mrb[69].mxu1  ;;  %v12140_v27 = vpop.f32.mrb[69].mxu0  ;;  %v2611_v13 = vrot.slane %v2609_v34, 3  ;;  %v2614_v61 = vrot.slane %v2612_v0, 4 }
 0x370   : > { %v15588_v47 = vmax.f32 %v2485_v40, 0.0  ;;  %v15591_v24 = vadd.f32 %v15554_v7, %v2461_v10  ;;  %v12065_v22 = vadd.f32 %v12064_v42, %v12063_v59  ;;  %v12141_v1 = vadd.f32 %v12140_v27, %v12139_v41  ;;  %v12066_v29 = vpop.f32.mrb[70].mxu1  ;;  %v12142_v48 = vpop.f32.mrb[70].mxu0  ;;  %v13814_v27 = vld [vmem:[#allocation13 + $0x324] ss:$8 sps:$4 sm:$0xff]  }
 0x371   : > { %v12067_v9 = vpop.f32.mrb[71].mxu1  ;;  %v12143_v30 = vpop.f32.mrb[71].mxu0  ;;  %v2615_v28 = vor.u32 %v2614_v61, %v2611_v13 }
 0x372   : > { %v2504_v14 = vmax.f32 %v15591_v24, 0.0  ;;  %v2192_v51 = vadd.f32 %v12065_v22, %v15524_v50  ;;  %v12068_v12 = vadd.f32 %v12067_v9, %v12066_v29  ;;  %v12144_v23 = vadd.f32 %v12143_v30, %v12142_v48  ;;  %v14007_v50 = vld [vmem:[#allocation13 + $0x530] ss:$8 sps:$4 sm:$0xff]  }
 0x373   : > { %v15596_v56 = vsel %vm18633_vm10, %v2607_v32, %v2615_v28  ;;  %v2592_v58 = vpack.c.bf16 %v15588_v47, %v2520_v3  ;;  %v13809_v3 = vld [vmem:[#allocation13 + $0x310] ss:$8 sps:$4 sm:$0xff]  }
 0x374   : > { %v2522_v34 = vsel %vm15205_vm6, %v2504_v14, 0.0  ;;  %v2462_v0 = vadd.f32 %v12135_v43, %v2192_v51  ;;  %v2193_v40 = vadd.f32 %v12068_v12, %v15530_v18  ;;  %3464 = vmatmul.mubr.bf16.vlgmr.msra.gmra.mrb[92].mxu1 %v15596_v56  ;;  %v13812_v51 = vld [vmem:[#allocation13 + $0x320] ss:$8 sps:$4 sm:$0xff]  }
 0x375   : > { %3555 = vmatpush1.bf16.msra.mxu1 %v13806_v57  ;;  %14411 = vmatprep.mubr.msk.bf16.mxu1 %vm15606_vm1, %v15610_v37  ;;  %v2618_v43 = vshrl.u32 %v2592_v58, 16  ;;  %v2621_v36 = vshll.u32 %v2592_v58, 16  ;;  %v15616_v18 = vpack.c.bf16 %v2522_v34, %v15588_v47 }
 0x376   : > { %v2487_v10 = vadd.f32 %v15554_v7, %v2462_v0  ;;  %v2463_v59 = vadd.f32 %v12138_v25, %v2193_v40  ;;  %v12069_v41 = vpop.f32.mrb[72].mxu1  ;;  %v12145_v42 = vpop.f32.mrb[72].mxu0  ;;  %3556 = vmatprep.subr.bf16.mxu1 %v13811_v60  ;;  %v13817_v40 = vld [vmem:[#allocation13 + $0x334] ss:$8 sps:$4 sm:$0xff]  }
 0x377   : > { %v12070_v13 = vpop.f32.mrb[73].mxu1  ;;  %v12146_v46 = vpop.f32.mrb[73].mxu0  ;;  %v2620_v8 = vrot.slane %v2618_v43, 3  ;;  %v2623_v61 = vrot.slane %v2621_v36, 4 }
 0x378   : > { %v15619_v24 = vmax.f32 %v2487_v10, 0.0  ;;  %v15622_v22 = vadd.f32 %v15554_v7, %v2463_v59  ;;  %v12071_v29 = vadd.f32 %v12070_v13, %v12069_v41  ;;  %v12147_v48 = vadd.f32 %v12146_v46, %v12145_v42  ;;  %v12072_v9 = vpop.f32.mrb[74].mxu1  ;;  %v12148_v30 = vpop.f32.mrb[74].mxu0 }
 0x379   : > { %v12073_v57 = vpop.f32.mrb[75].mxu1  ;;  %v12149_v32 = vpop.f32.mrb[75].mxu0  ;;  %3557 = vmatpush1.bf16.msra.mxu1 %v13809_v3  ;;  %v2624_v25 = vor.u32 %v2623_v61, %v2620_v8  ;;  %v13820_v8 = vld [vmem:[#allocation13 + $0x344] ss:$8 sps:$4 sm:$0xff]  }
 0x37a   : > { %v2506_v12 = vmax.f32 %v15622_v22, 0.0  ;;  %v2194_v60 = vadd.f32 %v12071_v29, %v15533_v6  ;;  %v12074_v58 = vadd.f32 %v12073_v57, %v12072_v9  ;;  %v12150_v0 = vadd.f32 %v12149_v32, %v12148_v30  ;;  %3558 = vmatprep.subr.bf16.mxu1 %v13814_v27  ;;  %v14142_v6 = vld [vmem:[%s18606_s7 + $0x240] sm:$0xff]  }
 0x37b   : > { %v15627_v43 = vsel %vm18633_vm10, %v2615_v28, %v2624_v25  ;;  %v2593_v36 = vpack.c.bf16 %v15619_v24, %v2522_v34  ;;  %v15642_v28 = vpack.c.bf16 %v2504_v14, %v15588_v47  ;;  %12169 = vmatprep.subr.bf16.mxu0 %v14142_v6  ;;  %v14170_v6 = vld [vmem:[%s18606_s7 + $0x2c0] sm:$0xff]  }
 0x37c   : > { %v2524_v10 = vsel %vm15259_vm11, %v2506_v12, 0.0  ;;  %v2464_v59 = vadd.f32 %v12141_v1, %v2194_v60  ;;  %v2195_v3 = vadd.f32 %v12074_v58, %v15535_v4  ;;  %3474 = vmatmul.mubr.bf16.gmra.mrb[96].mxu1 %v15627_v43  ;;  %v13815_v1 = vld [vmem:[#allocation13 + $0x330] ss:$8 sps:$4 sm:$0xff]  }
 0x37d   : > { %14414 = vmatprep.mubr.msk.bf16.mxu1 %vm15637_vm14, %v15642_v28  ;;  %3559 = vmatpush1.bf16.msra.mxu1 %v13812_v51  ;;  %v2627_v34 = vshrl.u32 %v2593_v36, 16  ;;  %v2630_v4 = vshll.u32 %v2593_v36, 16  ;;  %v15648_v41 = vpack.c.bf16 %v2524_v10, %v15619_v24  ;;  %v13818_v36 = vld [vmem:[#allocation13 + $0x340] ss:$8 sps:$4 sm:$0xff]  }
 0x37e   : > { %v2489_v42 = vadd.f32 %v15554_v7, %v2464_v59  ;;  %v2465_v27 = vadd.f32 %v12144_v23, %v2195_v3  ;;  %v12075_v13 = vpop.f32.mrb[76].mxu1  ;;  %v12151_v46 = vpop.f32.mrb[76].mxu0  ;;  %3560 = vmatprep.subr.bf16.mxu1 %v13817_v40 }
 0x37f   : > { %v12076_v47 = vpop.f32.mrb[77].mxu1  ;;  %v12152_v14 = vpop.f32.mrb[77].mxu0  ;;  %v2629_v61 = vrot.slane %v2627_v34, 3  ;;  %v2632_v22 = vrot.slane %v2630_v4, 4  ;;  %v13823_v4 = vld [vmem:[#allocation13 + $0x354] ss:$8 sps:$4 sm:$0xff]  }
 0x380   : > { %v15651_v29 = vmax.f32 %v2489_v42, 0.0  ;;  %v15654_v9 = vadd.f32 %v15554_v7, %v2465_v27  ;;  %v12077_v30 = vadd.f32 %v12076_v47, %v12075_v13  ;;  %v12153_v57 = vadd.f32 %v12152_v14, %v12151_v46  ;;  %v12078_v32 = vpop.f32.mrb[78].mxu1  ;;  %v12154_v51 = vpop.f32.mrb[78].mxu0 }
 0x381   : > { %v12079_v60 = vpop.f32.mrb[79].mxu1  ;;  %v12155_v58 = vpop.f32.mrb[79].mxu0  ;;  %3561 = vmatpush1.bf16.msra.mxu1 %v13815_v1  ;;  %v2633_v23 = vor.u32 %v2632_v22, %v2629_v61 }
 0x382   : > { %v2508_v40 = vmax.f32 %v15654_v9, 0.0  ;;  %v2196_v59 = vadd.f32 %v12077_v30, %v15537_v54  ;;  %v12080_v3 = vadd.f32 %v12079_v60, %v12078_v32  ;;  %v12156_v34 = vadd.f32 %v12155_v58, %v12154_v51  ;;  %3562 = vmatprep.subr.bf16.mxu1 %v13820_v8  ;;  %v13826_v9 = vld [vmem:[#allocation13 + $0x364] ss:$8 sps:$4 sm:$0xff]   ;;  %v14103_v54 = vld [vmem:[#allocation13 + $0x730] ss:$8 sps:$4 sm:$0xff]  }
 0x383   : > { %v15659_v42 = vsel %vm18633_vm10, %v2624_v25, %v2633_v23  ;;  %v2594_v27 = vpack.c.bf16 %v15651_v29, %v2524_v10  ;;  %v15674_v25 = vpack.c.bf16 %v2506_v12, %v15619_v24 }
 0x384   : > { %v2526_v13 = vsel %vm15173_vm3, %v2508_v40, 0.0  ;;  %v2466_v46 = vadd.f32 %v12147_v48, %v2196_v59  ;;  %v2197_v1 = vadd.f32 %v12080_v3, %v15539_v45  ;;  %3484 = vmatmul.mubr.bf16.gmra.mrb[100].mxu1 %v15659_v42  ;;  %v13821_v48 = vld [vmem:[#allocation13 + $0x350] ss:$8 sps:$4 sm:$0xff]   ;;  %vm15727_vm3 = vmpackc.low %vm15185_vm5, %vm14839_vm15 }
 0x385   : > { %14417 = vmatprep.mubr.msk.bf16.mxu1 %vm15669_vm9, %v15674_v25  ;;  %3563 = vmatpush1.bf16.msra.mxu1 %v13818_v36  ;;  %v2636_v10 = vshrl.u32 %v2594_v27, 16  ;;  %v2639_v45 = vshll.u32 %v2594_v27, 16  ;;  %v15680_v8 = vpack.c.bf16 %v2526_v13, %v15651_v29 }
 0x386   : > { %v2491_v47 = vadd.f32 %v15554_v7, %v2466_v46  ;;  %v2467_v14 = vadd.f32 %v12150_v0, %v2197_v1  ;;  %v12081_v61 = vpop.f32.mrb[80].mxu1  ;;  %v12157_v22 = vpop.f32.mrb[80].mxu0  ;;  %3564 = vmatprep.subr.bf16.mxu1 %v13823_v4  ;;  %v13824_v1 = vld [vmem:[#allocation13 + $0x360] ss:$8 sps:$4 sm:$0xff]  }
 0x387   : > { %v12082_v24 = vpop.f32.mrb[81].mxu1  ;;  %v12158_v12 = vpop.f32.mrb[81].mxu0  ;;  %v2638_v30 = vrot.slane %v2636_v10, 3  ;;  %v2641_v32 = vrot.slane %v2639_v45, 4 }
 0x388   : > { %v15683_v51 = vmax.f32 %v2491_v47, 0.0  ;;  %v15686_v60 = vadd.f32 %v15554_v7, %v2467_v14  ;;  %v12083_v58 = vadd.f32 %v12082_v24, %v12081_v61  ;;  %v12084_v36 = vpop.f32.mrb[82].mxu1  ;;  %v12159_v59 = vadd.f32 %v12158_v12, %v12157_v22  ;;  %v12160_v3 = vpop.f32.mrb[82].mxu0  ;;  %v13829_v47 = vld [vmem:[#allocation13 + $0x374] ss:$8 sps:$4 sm:$0xff]  }
 0x389   : > { %v12085_v27 = vpop.f32.mrb[83].mxu1  ;;  %v12161_v46 = vpop.f32.mrb[83].mxu0  ;;  %3565 = vmatpush1.bf16.msra.mxu1 %v13821_v48  ;;  %v2642_v0 = vor.u32 %v2641_v32, %v2638_v30 }
 0x38a   : > { %v2510_v4 = vmax.f32 %v15686_v60, 0.0  ;;  %v2198_v31 = vadd.f32 %v12083_v58, %v15541_v38  ;;  %v12086_v10 = vadd.f32 %v12085_v27, %v12084_v36  ;;  %v12162_v45 = vadd.f32 %v12161_v46, %v12160_v3  ;;  %3566 = vmatprep.subr.bf16.mxu1 %v13826_v9  ;;  %v13832_v60 = vld [vmem:[#allocation13 + $0x384] ss:$8 sps:$4 sm:$0xff]   ;;  %v14391_v38 = vld [vmem:[%s18606_s7 + $0x7a0] sm:$0xff]  }
 0x38b   : > { %v15691_v14 = vsel %vm18633_vm10, %v2633_v23, %v2642_v0  ;;  %v2595_v61 = vpack.c.bf16 %v15683_v51, %v2526_v13  ;;  %v15706_v23 = vpack.c.bf16 %v2508_v40, %v15651_v29 }
 0x38c   : > { %v2528_v22 = vsel %vm15185_vm5, %v2510_v4, 0.0  ;;  %v2468_v24 = vadd.f32 %v12153_v57, %v2198_v31  ;;  %v2199_v48 = vadd.f32 %v12086_v10, %v15543_v49  ;;  %3494 = vmatmul.mubr.bf16.gmra.mrb[104].mxu1 %v15691_v14  ;;  %v13827_v31 = vld [vmem:[#allocation13 + $0x370] ss:$8 sps:$4 sm:$0xff]   ;;  %vm15752_vm5 = vmpackc.low %vm15211_vm7, %vm14839_vm15 }
 0x38d   : > { %14420 = vmatprep.mubr.msk.bf16.mxu1 %vm15701_vm8, %v15706_v23  ;;  %3567 = vmatpush1.bf16.msra.mxu1 %v13824_v1  ;;  %v2645_v57 = vshrl.u32 %v2595_v61, 16  ;;  %v2648_v49 = vshll.u32 %v2595_v61, 16  ;;  %v15712_v13 = vpack.c.bf16 %v2528_v22, %v15683_v51 }
 0x38e   : > { %v2493_v9 = vadd.f32 %v15554_v7, %v2468_v24  ;;  %v2469_v12 = vadd.f32 %v12156_v34, %v2199_v48  ;;  %v12087_v30 = vpop.f32.mrb[84].mxu1  ;;  %v12163_v32 = vpop.f32.mrb[84].mxu0  ;;  %3568 = vmatprep.subr.bf16.mxu1 %v13829_v47  ;;  %v13830_v34 = vld [vmem:[#allocation13 + $0x380] ss:$8 sps:$4 sm:$0xff]  }
 0x38f   : > { %v12088_v29 = vpop.f32.mrb[85].mxu1  ;;  %v12164_v40 = vpop.f32.mrb[85].mxu0  ;;  %v2647_v58 = vrot.slane %v2645_v57, 3  ;;  %v2650_v36 = vrot.slane %v2648_v49, 4  ;;  %v13835_v57 = vld [vmem:[#allocation13 + $0x394] ss:$8 sps:$4 sm:$0xff]  }
 0x390   : > { %v2511_v3 = vmax.f32 %v2493_v9, 0.0  ;;  %v2494_v27 = vadd.f32 %v15554_v7, %v2469_v12  ;;  %v12089_v46 = vadd.f32 %v12088_v29, %v12087_v30  ;;  %v12090_v1 = vpop.f32.mrb[86].mxu1  ;;  %v12165_v10 = vadd.f32 %v12164_v40, %v12163_v32  ;;  %v12166_v61 = vpop.f32.mrb[86].mxu0  ;;  %v13838_v29 = vld [vmem:[#allocation13 + $0x3a4] ss:$8 sps:$4 sm:$0xff]  }
 0x391   : > { %v12091_v63 = vpop.f32.mrb[87].mxu1  ;;  %v12167_v17 = vpop.f32.mrb[87].mxu0  ;;  %v2651_v15 = vor.u32 %v2650_v36, %v2647_v58  ;;  %3569 = vmatpush1.bf16.msra.mxu1 %v13827_v31 }
 0x392   : > { %v2512_v24 = vmax.f32 %v2494_v27, 0.0  ;;  %v2200_v47 = vadd.f32 %v12089_v46, %v15545_v5  ;;  %v12092_v48 = vadd.f32 %v12091_v63, %v12090_v1  ;;  %v12168_v62 = vadd.f32 %v12167_v17, %v12166_v61  ;;  %3570 = vmatprep.subr.bf16.mxu1 %v13832_v60 }
 0x393   : > { %v15718_v49 = vsel %vm18633_vm10, %v2642_v0, %v2651_v15  ;;  %v2596_v9 = vpack.c.bf16 %v2511_v3, %v2528_v22  ;;  %v15732_v17 = vpack.c.bf16 %v2510_v4, %v15683_v51 }
 0x394   : > { %v2530_v12 = vsel %vm15211_vm7, %v2512_v24, 0.0  ;;  %v2470_v30 = vadd.f32 %v12159_v59, %v2200_v47  ;;  %v2201_v32 = vadd.f32 %v12092_v48, %v15547_v20  ;;  %3504 = vmatmul.mubr.bf16.gmra.mrb[108].mxu1 %v15718_v49  ;;  %v13833_v20 = vld [vmem:[#allocation13 + $0x390] ss:$8 sps:$4 sm:$0xff]   ;;  %vm15774_vm7 = vmpackc.low %vm15263_vm12, %vm14839_vm15 }
 0x395   : > { %14423 = vmatprep.mubr.msk.bf16.mxu1 %vm15727_vm3, %v15732_v17  ;;  %3571 = vmatpush1.bf16.msra.mxu1 %v13830_v34  ;;  %v2654_v5 = vshrl.u32 %v2596_v9, 16  ;;  %v2657_v59 = vshll.u32 %v2596_v9, 16  ;;  %v15737_v0 = vpack.c.bf16 %v2530_v12, %v2511_v3  ;;  %v13836_v34 = vld [vmem:[#allocation13 + $0x3a0] ss:$8 sps:$4 sm:$0xff]  }
 0x396   : > { %v2495_v22 = vadd.f32 %v15554_v7, %v2470_v30  ;;  %v2471_v31 = vadd.f32 %v12162_v45, %v2201_v32  ;;  %v12093_v60 = vpop.f32.mrb[88].mxu1  ;;  %3572 = vmatprep.subr.bf16.mxu1 %v13835_v57  ;;  %v13841_v57 = vld [vmem:[#allocation13 + $0x3b4] ss:$8 sps:$4 sm:$0xff]  }
 0x397   : > { %v12094_v40 = vpop.f32.mrb[89].mxu1  ;;  %v2656_v58 = vrot.slane %v2654_v5, 3  ;;  %v2659_v51 = vrot.slane %v2657_v59, 4 }
 0x398   : > { %v2513_v4 = vmax.f32 %v2495_v22, 0.0  ;;  %v2496_v36 = vadd.f32 %v15554_v7, %v2471_v31  ;;  %v12095_v27 = vadd.f32 %v12094_v40, %v12093_v60  ;;  %v12096_v46 = vpop.f32.mrb[90].mxu1 }
 0x399   : > { %v12097_v1 = vpop.f32.mrb[91].mxu1  ;;  %v2660_v61 = vor.u32 %v2659_v51, %v2656_v58  ;;  %3573 = vmatpush1.bf16.msra.mxu1 %v13833_v20  ;;  %v13842_v51 = vld [vmem:[#allocation13 + $0x3c0] ss:$8 sps:$4 sm:$0xff]  }
 0x39a   : > { %v2514_v47 = vmax.f32 %v2496_v36, 0.0  ;;  %v2202_v48 = vadd.f32 %v12095_v27, %v15549_v53  ;;  %v12098_v9 = vadd.f32 %v12097_v1, %v12096_v46  ;;  %3574 = vmatprep.subr.bf16.mxu1 %v13838_v29  ;;  %v2597_v45 = vpack.c.bf16 %v2513_v4, %v2530_v12  ;;  %v13844_v29 = vld [vmem:[#allocation13 + $0x3c4] ss:$8 sps:$4 sm:$0xff]   ;;  %v13847_v46 = vld [vmem:[#allocation13 + $0x3d4] ss:$8 sps:$4 sm:$0xff]  }
 0x39b   : > { %v15743_v30 = vsel %vm18633_vm10, %v2651_v15, %v2660_v61  ;;  %v15756_v12 = vpack.c.bf16 %v2512_v24, %v2511_v3 }
 0x39c   : > { %v2532_v32 = vsel %vm15263_vm12, %v2514_v47, 0.0  ;;  %v2472_v5 = vadd.f32 %v12165_v10, %v2202_v48  ;;  %v2203_v59 = vadd.f32 %v12098_v9, %v15551_v11  ;;  %3514 = vmatmul.mubr.bf16.gmra.mrb[112].mxu1 %v15743_v30  ;;  %v2663_v20 = vshrl.u32 %v2597_v45, 16  ;;  %v13839_v11 = vld [vmem:[#allocation13 + $0x3b0] ss:$8 sps:$4 sm:$0xff]   ;;  %vm15792_vm12 = vmpackc.low %vm15307_vm13, %vm14839_vm15 }
 0x39d   : > { %14426 = vmatprep.mubr.msk.bf16.mxu1 %vm15752_vm5, %v15756_v12  ;;  %3575 = vmatpush1.bf16.msra.mxu1 %v13836_v34  ;;  %v2666_v15 = vshll.u32 %v2597_v45, 16  ;;  %v15761_v10 = vpack.c.bf16 %v2532_v32, %v2513_v4  ;;  %v15778_v9 = vpack.c.bf16 %v2514_v47, %v2513_v4  ;;  %v13845_v45 = vld [vmem:[#allocation13 + $0x3d0] ss:$8 sps:$4 sm:$0xff]   ;;  %v13853_v4 = vld [vmem:[#allocation13 + $0x3f4] ss:$8 sps:$4 sm:$0xff]   ;;  %vm18800_vm15 = vcmask 1046528  }
 0x39e   : > { %v2497_v22 = vadd.f32 %v15554_v7, %v2472_v5  ;;  %v2473_v31 = vadd.f32 %v12168_v62, %v2203_v59  ;;  %v2665_v60 = vrot.slane %v2663_v20, 3  ;;  %3576 = vmatprep.subr.bf16.mxu1 %v13841_v57  ;;  %v13850_v5 = vld [vmem:[#allocation13 + $0x3e4] ss:$8 sps:$4 sm:$0xff]   ;;  %v13848_v20 = vld [vmem:[#allocation13 + $0x3e0] ss:$8 sps:$4 sm:$0xff]  }
 0x39f   : > { %v2668_v40 = vrot.slane %v2666_v15, 4  ;;  %v2743_v47 = vld [vmem:[#allocation2 + $0x20] sm:$0xfe] }
 0x3a0   : > { %v2515_v58 = vmax.f32 %v2497_v22, 0.0  ;;  %v2498_v3 = vadd.f32 %v15554_v7, %v2473_v31  ;;  %v18794_v7 = vmov 0  ;;  %v18797_v22 = vmov 0 }
 0x3a1   : > { %v2669_v24 = vor.u32 %v2668_v40, %v2665_v60  ;;  %3577 = vmatpush1.bf16.msra.mxu1 %v13839_v11  ;;  %v18795_v7 = vsel %vm15774_vm7, 4294967295, %v18794_v7  ;;  %v18798_v22 = vsel %vm15792_vm12, 4294967295, %v18797_v22  ;;  %v13851_v40 = vld [vmem:[#allocation13 + $0x3f0] ss:$8 sps:$4 sm:$0xff]  }
 0x3a2   : > { %v2516_v36 = vmax.f32 %v2498_v3, 0.0  ;;  %3578 = vmatprep.subr.bf16.mxu1 %v13844_v29  ;;  %v2598_v27 = vpack.c.bf16 %v2515_v58, %v2532_v32  ;;  %18796 = vst [vmem:[#allocation29_spill] sm:$0xff] %v18795_v7  ;;  %18799 = vst [vmem:[#allocation30_spill] sm:$0xff] %v18798_v22  ;;  %v2866_v29 = vld [vmem:[#allocation2 + $0x20] sm:$0xfc]  ;;  %v2762_v3 = vpack.c.bf16 %v15563_v35, %v2743_v47 }
 0x3a3   : > { %v15766_v1 = vsel %vm18633_vm10, %v2660_v61, %v2669_v24 }
 0x3a4   : > { %v2534_v62 = vsel %vm15307_vm13, %v2516_v36, 0.0  ;;  %3524 = vmatmul.mubr.bf16.gmra.mrb[116].mxu1 %v15766_v1  ;;  %v2672_v34 = vshrl.u32 %v2598_v27, 16  ;;  %v2675_v48 = vshll.u32 %v2598_v27, 16  ;;  %v15796_v31 = vpack.c.bf16 %v2516_v36, %v2515_v58 }
 0x3a5   : > { %2554 = vst [vmem:[#allocation2 + $0x130] sm:$0xff] %v2534_v62  ;;  %14429 = vmatprep.mubr.msk.bf16.mxu1 %vm15774_vm7, %v15778_v9  ;;  %3579 = vmatpush1.bf16.msra.mxu1 %v13842_v51  ;;  %v15783_v61 = vpack.c.bf16 %v2534_v62, %v2515_v58  ;;  %v2775_v58 = vshll.u32 %v2762_v3, 16  ;;  %v2906_v36 = vrot.slane %v15585_v39, 1  ;;  %vm18801_vm13 = vsmask.f32 7424 }
 0x3a6   : > { %v2674_v57 = vrot.slane %v2672_v34, 3  ;;  %v2677_v32 = vrot.slane %v2675_v48, 4  ;;  %3580 = vmatprep.subr.bf16.mxu1 %v13847_v46  ;;  %v2885_v46 = vpack.c.bf16 %v15563_v35, %v2866_v29  ;;  %v2773_v35 = vshrl.u32 %v2762_v3, 16  ;;  %v13859_v29 = vld [vmem:[#allocation13 + $0x14] ss:$8 sps:$4 sm:$0xff]  }
 0x3a7   : > { %v13857_v3 = vld [vmem:[#allocation13 + $0x10] ss:$8 sps:$4 sm:$0xff]  }
 0x3a8   : > { %v2678_v59 = vor.u32 %v2677_v32, %v2674_v57  ;;  %v2777_v32 = vrot.slane %v2775_v58, 1  ;;  %v13860_v58 = vld [vmem:[#allocation13 + $0x20] ss:$8 sps:$4 sm:$0xff]  }
 0x3a9   : > { %3581 = vmatpush1.bf16.msra.mxu1 %v13845_v45  ;;  %v2905_v45 = vrot.slane %v2885_v46, 1 }
 0x3aa   : > { %v15786_v15 = vsel %vm18633_vm10, %v2669_v24, %v2678_v59  ;;  %3582 = vmatprep.subr.bf16.mxu1 %v13850_v5  ;;  %v13856_v24 = vld [vmem:[#allocation13 + $0x4] ss:$8 sps:$4 sm:$0xff]   ;;  %v2780_v5 = vshll.u32 %v15585_v39, 16 }
 0x3ac   : > { %3534 = vmatmul.mubr.bf16.gmra.mrb[120].mxu1 %v15786_v15  ;;  %v2589_v11 = vld [vmem:[#allocation2 + $0x130] sm:$0x7f]  ;;  %v2782_v47 = vrot.slane %v2780_v5, 1 }
 0x3ad   : > { %14432 = vmatprep.mubr.msk.bf16.mxu1 %vm15792_vm12, %v15796_v31  ;;  %3583 = vmatpush1.bf16.msra.mxu1 %v13848_v20  ;;  %v2599_v60 = vpack.c.bf16 %v2589_v11, %v2589_v11  ;;  %v15810_v20 = vsel %vm18800_vm15, %v2905_v45, %v2906_v36  ;;  %v2908_v11 = vrot.slane %v15616_v18, 1  ;;  %v13868_v5 = vld [vmem:[#allocation13 + $0x44] ss:$8 sps:$4 sm:$0xff]  }
 0x3ae   : > { %3584 = vmatprep.subr.bf16.mxu1 %v13853_v4  ;;  %v2778_v4 = vor.u32 %v2777_v32, %v2773_v35  ;;  %v2792_v35 = vshrl.u32 %v15616_v18, 16 }
 0x3af   : > { %v2681_v51 = vshrl.u32 %v2599_v60, 16  ;;  %v2684_v27 = vshll.u32 %v2599_v60, 16  ;;  %v13854_v60 = vld [vmem:[#allocation13] ss:$8 sps:$4 sm:$0xff]  }
 0x3b1   : > { %v2683_v62 = vrot.slane %v2681_v51, 3  ;;  %v2686_v34 = vrot.slane %v2684_v27, 4  ;;  %3585 = vmatpush1.bf16.msra.mxu1 %v13851_v40  ;;  %v2788_v40 = vshll.u32 %v15616_v18, 16  ;;  %v13862_v51 = vld [vmem:[#allocation13 + $0x24] ss:$8 sps:$4 sm:$0xff]   ;;  %v2784_v27 = vshrl.u32 %v15585_v39, 16 }
 0x3b2   : > { %3997 = vmatprep.subr.bf16.mxu1 %v13856_v24  ;;  %v13863_v39 = vld [vmem:[#allocation13 + $0x30] ss:$8 sps:$4 sm:$0xff]  }
 0x3b3   : > { %v2687_v48 = vor.u32 %v2686_v34, %v2683_v62  ;;  %v2790_v46 = vrot.slane %v2788_v40, 1  ;;  %v2910_v62 = vrot.slane %v15648_v41, 1  ;;  %v2786_v34 = vor.u32 %v2784_v27, %v2782_v47  ;;  %v13871_v40 = vld [vmem:[#allocation13 + $0x54] ss:$8 sps:$4 sm:$0xff]   ;;  %v13869_v18 = vld [vmem:[#allocation13 + $0x50] ss:$8 sps:$4 sm:$0xff]  }
 0x3b4   : > { %v13874_v27 = vld [vmem:[#allocation13 + $0x64] ss:$8 sps:$4 sm:$0xff]  }
 0x3b5   : > { %v15805_v57 = vsel %vm18633_vm10, %v2678_v59, %v2687_v48  ;;  %v15815_v59 = vsel %vm18801_vm13, %v2778_v4, %v2782_v47  ;;  %vm18802_vm10 = vmmov %vm18800_vm15  ;;  %v13865_v48 = vld [vmem:[#allocation13 + $0x34] ss:$8 sps:$4 sm:$0xff]   ;;  %v15826_v45 = vsel %vm18801_vm13, %v2786_v34, %v2790_v46  ;;  %v2912_v47 = vrot.slane %v15680_v8, 1 }
 0x3b6   : > { %3544 = vmatmul.mubr.bf16.gmra.mrb[124].mxu1 %v15805_v57  ;;  %v15820_v24 = vsel %vm18802_vm10, %v2906_v36, %v2908_v11  ;;  %v2796_v36 = vshll.u32 %v15648_v41, 16  ;;  %v15831_v32 = vsel %vm18802_vm10, %v2908_v11, %v2910_v62  ;;  %vm18803_vm15 = vmmov %vm18801_vm13  ;;  %v2804_v11 = vshll.u32 %v15680_v8, 16 }
 0x3b7   : > { %3586 = vmatprep.mubr.bf16.mxu1 %v15810_v20  ;;  %vm18804_vm13 = vmmov %vm18802_vm10 }
 0x3b8   : > { %v2798_v4 = vrot.slane %v2796_v36, 1  ;;  %v2806_v34 = vrot.slane %v2804_v11, 1  ;;  %v13872_v36 = vld [vmem:[#allocation13 + $0x60] ss:$8 sps:$4 sm:$0xff]   ;;  %vm18805_vm10 = vmmov %vm18803_vm15 }
 0x3be   : > { %3587 = vmatmul.mubr.bf16.vlgmr.msra.gmra.mrb[92].mxu1 %v15815_v59 }
 0x3bf   : > { %3998 = vmatpush1.bf16.msra.mxu1 %v13854_v60  ;;  %3596 = vmatprep.mubr.bf16.mxu1 %v15820_v24  ;;  %v2794_v60 = vor.u32 %v2792_v35, %v2790_v46  ;;  %v2800_v46 = vshrl.u32 %v15648_v41, 16  ;;  %v13875_v41 = vld [vmem:[#allocation13 + $0x70] ss:$8 sps:$4 sm:$0xff]  }
 0x3c0   : > { %3999 = vmatprep.subr.bf16.mxu1 %v13859_v29  ;;  %v13866_v29 = vld [vmem:[#allocation13 + $0x40] ss:$8 sps:$4 sm:$0xff]  }
 0x3c3   : > { %4000 = vmatpush1.bf16.msra.mxu1 %v13857_v3  ;;  %v15837_v3 = vsel %vm18803_vm15, %v2794_v60, %v2798_v4  ;;  %vm18806_vm15 = vmmov %vm18804_vm13  ;;  %v13880_v60 = vld [vmem:[#allocation13 + $0x84] ss:$8 sps:$4 sm:$0xff]  }
 0x3c4   : > { %4001 = vmatprep.subr.bf16.mxu1 %v13862_v51  ;;  %v15842_v51 = vsel %vm18804_vm13, %v2910_v62, %v2912_v47  ;;  %v2812_v62 = vshll.u32 %v15712_v13, 16  ;;  %vm18807_vm13 = vmmov %vm18805_vm10 }
 0x3c6   : > { %3597 = vmatmul.mubr.bf16.gmra.mrb[96].mxu1 %v15826_v45 }
 0x3c7   : > { %3606 = vmatprep.mubr.bf16.mxu1 %v15831_v32  ;;  %4002 = vmatpush1.bf16.msra.mxu1 %v13860_v58  ;;  %v2914_v58 = vrot.slane %v15712_v13, 1 }
 0x3c8   : > { %4003 = vmatprep.subr.bf16.mxu1 %v13865_v48  ;;  %v2802_v48 = vor.u32 %v2800_v46, %v2798_v4  ;;  %v2808_v4 = vshrl.u32 %v15680_v8, 16  ;;  %v13881_v8 = vld [vmem:[#allocation13 + $0x90] ss:$8 sps:$4 sm:$0xff]  }
 0x3c9   : > { %v15853_v35 = vsel %vm18806_vm15, %v2912_v47, %v2914_v58  ;;  %v2820_v47 = vshll.u32 %v15737_v0, 16 }
 0x3ca   : > { %v2810_v11 = vor.u32 %v2808_v4, %v2806_v34  ;;  %v13889_v4 = vld [vmem:[#allocation13 + $0xb4] ss:$8 sps:$4 sm:$0xff]  }
 0x3cb   : > { %4004 = vmatpush1.bf16.msra.mxu1 %v13863_v39  ;;  %v13877_v39 = vld [vmem:[#allocation13 + $0x74] ss:$8 sps:$4 sm:$0xff]  }
 0x3cc   : > { %4005 = vmatprep.subr.bf16.mxu1 %v13868_v5  ;;  %v15848_v5 = vsel %vm18805_vm10, %v2802_v48, %v2806_v34  ;;  %vm18808_vm10 = vmmov %vm18806_vm15  ;;  %v13886_v34 = vld [vmem:[#allocation13 + $0xa4] ss:$8 sps:$4 sm:$0xff]  }
 0x3cd   : > { %vm18809_vm15 = vmmov %vm18807_vm13 }
 0x3ce   : > { %3607 = vmatmul.mubr.bf16.gmra.mrb[100].mxu1 %v15837_v3 }
 0x3cf   : > { %3616 = vmatprep.mubr.bf16.mxu1 %v15842_v51  ;;  %4006 = vmatpush1.bf16.msra.mxu1 %v13866_v29  ;;  %v2814_v29 = vrot.slane %v2812_v62, 1  ;;  %v2918_v62 = vrot.slane %v15761_v10, 1 }
 0x3d0   : > { %4007 = vmatprep.subr.bf16.mxu1 %v13871_v40  ;;  %v2916_v40 = vrot.slane %v15737_v0, 1 }
 0x3d1   : > { %v15859_v46 = vsel %vm18807_vm13, %v2810_v11, %v2814_v29  ;;  %vm18810_vm13 = vmmov %vm18808_vm10 }
 0x3d2   : > { %v15864_v48 = vsel %vm18808_vm10, %v2914_v58, %v2916_v40  ;;  %v2828_v58 = vshll.u32 %v15761_v10, 16  ;;  %vm18811_vm10 = vmmov %vm18809_vm15 }
 0x3d3   : > { %4008 = vmatpush1.bf16.msra.mxu1 %v13869_v18  ;;  %v13878_v18 = vld [vmem:[#allocation13 + $0x80] ss:$8 sps:$4 sm:$0xff]  }
 0x3d4   : > { %4009 = vmatprep.subr.bf16.mxu1 %v13874_v27  ;;  %v13883_v27 = vld [vmem:[#allocation13 + $0x94] ss:$8 sps:$4 sm:$0xff]  }
 0x3d6   : > { %3617 = vmatmul.mubr.bf16.gmra.mrb[104].mxu1 %v15848_v5 }
 0x3d7   : > { %3626 = vmatprep.mubr.bf16.mxu1 %v15853_v35  ;;  %4010 = vmatpush1.bf16.msra.mxu1 %v13872_v36  ;;  %v2816_v36 = vshrl.u32 %v15712_v13, 16  ;;  %v13887_v13 = vld [vmem:[#allocation13 + $0xb0] ss:$8 sps:$4 sm:$0xff]  }
 0x3d8   : > { %4011 = vmatprep.subr.bf16.mxu1 %v13877_v39  ;;  %v2822_v39 = vrot.slane %v2820_v47, 1  ;;  %v2830_v47 = vrot.slane %v2828_v58, 1  ;;  %v2832_v58 = vshrl.u32 %v15761_v10, 16  ;;  %v13899_v10 = vld [vmem:[#allocation13 + $0xf0] ss:$8 sps:$4 sm:$0xff]  }
 0x3db   : > { %4012 = vmatpush1.bf16.msra.mxu1 %v13875_v41  ;;  %v2818_v41 = vor.u32 %v2816_v36, %v2814_v29  ;;  %v13892_v29 = vld [vmem:[#allocation13 + $0xc4] ss:$8 sps:$4 sm:$0xff]   ;;  %v13890_v36 = vld [vmem:[#allocation13 + $0xc0] ss:$8 sps:$4 sm:$0xff]  }
 0x3dc   : > { %4013 = vmatprep.subr.bf16.mxu1 %v13880_v60  ;;  %v13884_v60 = vld [vmem:[#allocation13 + $0xa0] ss:$8 sps:$4 sm:$0xff]  }
 0x3dd   : > { %v15870_v11 = vsel %vm18809_vm15, %v2818_v41, %v2822_v39  ;;  %v13895_v41 = vld [vmem:[#allocation13 + $0xd4] ss:$8 sps:$4 sm:$0xff]   ;;  %vm18812_vm15 = vmmov %vm18810_vm13 }
 0x3de   : > { %3627 = vmatmul.mubr.bf16.gmra.mrb[108].mxu1 %v15859_v46 }
 0x3df   : > { %3636 = vmatprep.mubr.bf16.mxu1 %v15864_v48  ;;  %4014 = vmatpush1.bf16.msra.mxu1 %v13878_v18  ;;  %v15875_v18 = vsel %vm18810_vm13, %v2916_v40, %v2918_v62  ;;  %v2836_v40 = vshll.u32 %v15783_v61, 16  ;;  %vm18813_vm13 = vmmov %vm18811_vm10 }
 0x3e0   : > { %4015 = vmatprep.subr.bf16.mxu1 %v13883_v27  ;;  %v2824_v27 = vshrl.u32 %v15737_v0, 16  ;;  %v2894_v0 = vpack.c.bf16 %v15526_v52, %v15526_v52 }
 0x3e3   : > { %4016 = vmatpush1.bf16.msra.mxu1 %v13881_v8  ;;  %v2920_v8 = vrot.slane %v15783_v61, 1 }
 0x3e4   : > { %4017 = vmatprep.subr.bf16.mxu1 %v13886_v34  ;;  %v2826_v34 = vor.u32 %v2824_v27, %v2822_v39  ;;  %v13893_v39 = vld [vmem:[#allocation13 + $0xd0] ss:$8 sps:$4 sm:$0xff]   ;;  %v2922_v27 = vrot.slane %v2894_v0, 1 }
 0x3e6   : > { %3637 = vmatmul.mubr.bf16.gmra.mrb[112].mxu1 %v15870_v11  ;;  %v15881_v55 = vsel %vm18811_vm10, %v2826_v34, %v2830_v47  ;;  %v2834_v34 = vor.u32 %v2832_v58, %v2830_v47  ;;  %vm18814_vm10 = vmmov %vm18812_vm15  ;;  %v13904_v47 = vld [vmem:[#allocation13 + $0x104] ss:$8 sps:$4 sm:$0xff]   ;;  %v13913_v58 = vld [vmem:[#allocation13 + $0x134] ss:$8 sps:$4 sm:$0xff]  }
 0x3e7   : > { %3646 = vmatprep.mubr.bf16.mxu1 %v15875_v18  ;;  %4018 = vmatpush1.bf16.msra.mxu1 %v13884_v60  ;;  %v15886_v60 = vsel %vm18812_vm15, %v2918_v62, %v2920_v8  ;;  %v13896_v62 = vld [vmem:[#allocation13 + $0xe0] ss:$8 sps:$4 sm:$0xff]   ;;  %vm18815_vm15 = vmmov %vm18813_vm13 }
 0x3e8   : > { %4019 = vmatprep.subr.bf16.mxu1 %v13889_v4  ;;  %v13898_v4 = vld [vmem:[#allocation13 + $0xe4] ss:$8 sps:$4 sm:$0xff]  }
 0x3eb   : > { %4020 = vmatpush1.bf16.msra.mxu1 %v13887_v13  ;;  %v2838_v13 = vrot.slane %v2836_v40, 1 }
 0x3ec   : > { %4021 = vmatprep.subr.bf16.mxu1 %v13892_v29  ;;  %v2771_v29 = vpack.c.bf16 %v15528_v26, %v15528_v26  ;;  %v2840_v26 = vshrl.u32 %v15783_v61, 16  ;;  %v13908_v61 = vld [vmem:[#allocation13 + $0x120] ss:$8 sps:$4 sm:$0xff]  }
 0x3ed   : > { %v15895_v52 = vsel %vm18813_vm13, %v2834_v34, %v2838_v13  ;;  %v13920_v34 = vld [vmem:[#allocation13 + $0x160] ss:$8 sps:$4 sm:$0xff]  }
 0x3ee   : > { %3647 = vmatmul.mubr.bf16.gmra.mrb[116].mxu1 %v15881_v55  ;;  %v2844_v44 = vshll.u32 %v2771_v29, 16  ;;  %v13916_v29 = vld [vmem:[#allocation13 + $0x144] ss:$8 sps:$4 sm:$0xff]  }
 0x3ef   : > { %3656 = vmatprep.mubr.bf16.mxu1 %v15886_v60  ;;  %4022 = vmatpush1.bf16.msra.mxu1 %v13890_v36  ;;  %v15899_v36 = vsel %vm18814_vm10, %v2920_v8, %v2922_v27  ;;  %v13902_v8 = vld [vmem:[#allocation13 + $0x100] ss:$8 sps:$4 sm:$0xff]   ;;  %v13922_v27 = vld [vmem:[#allocation13 + $0x164] ss:$8 sps:$4 sm:$0xff]   ;;  %vm18837_vm10 = vnez %v18764_v19  ;;  %v14197_v19 = vld [vmem:[%s18606_s7 + $0x2b8] sm:$0xff]  }
 0x3f0   : > { %4023 = vmatprep.subr.bf16.mxu1 %v13895_v41  ;;  %v2842_v41 = vor.u32 %v2840_v26, %v2838_v13  ;;  %v2846_v40 = vrot.slane %v2844_v44, 1  ;;  %v13905_v44 = vld [vmem:[#allocation13 + $0x110] ss:$8 sps:$4 sm:$0xff]  }
 0x3f1   : > { %v13911_v13 = vld [vmem:[#allocation13 + $0x130] ss:$8 sps:$4 sm:$0xff]  }
 0x3f2   : > { %v15904_v0 = vsel %vm18815_vm15, %v2842_v41, %v2846_v40  ;;  %v13923_v26 = vld [vmem:[#allocation13 + $0x170] ss:$8 sps:$4 sm:$0xff]   ;;  %v13931_v41 = vld [vmem:[#allocation13 + $0x194] ss:$8 sps:$4 sm:$0xff]  }
 0x3f3   : > { %4024 = vmatpush1.bf16.msra.mxu1 %v13893_v39  ;;  %v15907_v39 = vld [vmem:[#allocation3 + $0x8] sm:$0xff]  ;;  %v13929_v40 = vld [vmem:[#allocation13 + $0x190] ss:$8 sps:$4 sm:$0xff]  }
 0x3f4   : > { %4025 = vmatprep.subr.bf16.mxu1 %v13898_v4  ;;  %v13907_v4 = vld [vmem:[#allocation13 + $0x114] ss:$8 sps:$4 sm:$0xff]  }
 0x3f6   : > { %3657 = vmatmul.mubr.bf16.gmra.mrb[120].mxu1 %v15895_v52 }
 0x3f7   : > { %3666 = vmatprep.mubr.bf16.mxu1 %v15899_v36  ;;  %4026 = vmatpush1.bf16.msra.mxu1 %v13896_v62  ;;  %v13925_v62 = vld [vmem:[#allocation13 + $0x174] ss:$8 sps:$4 sm:$0xff]  }
 0x3f8   : > { %4027 = vmatprep.subr.bf16.mxu1 %v13901_v33  ;;  %v13910_v33 = vld [vmem:[#allocation13 + $0x124] ss:$8 sps:$4 sm:$0xff]  }
 0x3fb   : > { %4028 = vmatpush1.bf16.msra.mxu1 %v13899_v10  ;;  %v13928_v10 = vld [vmem:[#allocation13 + $0x184] ss:$8 sps:$4 sm:$0xff]  }
 0x3fc   : > { %4120 = vmatprep.subr.bf16.mxu1 %v13904_v47  ;;  %v13926_v47 = vld [vmem:[#allocation13 + $0x180] ss:$8 sps:$4 sm:$0xff]  }
 0x3fe   : > { %3667 = vmatmul.mubr.bf16.gmra.mrb[124].mxu1 %v15904_v0 }
 0x3ff   : > { %4029 = vmatprep.mubr.bf16.mxu1 %v15907_v39 }
 0x406   : > { %4030 = vmatmul.mubr.bf16.vlgmr.msra.gmra.mrb[92].mxu1 %v15907_v39 }
 0x407   : > { %4121 = vmatpush1.bf16.msra.mxu1 %v13902_v8  ;;  %14435 = vmatprep.mubr.msk.bf16.mxu1 %vm15570_vm0, %v15574_v2  ;;  %v13919_v2 = vld [vmem:[#allocation13 + $0x154] ss:$8 sps:$4 sm:$0xff]   ;;  %v13934_v8 = vld [vmem:[#allocation13 + $0x1a4] ss:$8 sps:$4 sm:$0xff]  }
 0x408   : > { %4122 = vmatprep.subr.bf16.mxu1 %v13907_v4  ;;  %v13932_v4 = vld [vmem:[#allocation13 + $0x1a0] ss:$8 sps:$4 sm:$0xff]  }
 0x40b   : > { %4123 = vmatpush1.bf16.msra.mxu1 %v13905_v44  ;;  %v13937_v44 = vld [vmem:[#allocation13 + $0x1b4] ss:$8 sps:$4 sm:$0xff]  }
 0x40c   : > { %4124 = vmatprep.subr.bf16.mxu1 %v13910_v33  ;;  %v13935_v33 = vld [vmem:[#allocation13 + $0x1b0] ss:$8 sps:$4 sm:$0xff]  }
 0x40e   : > { %4040 = vmatmul.mubr.bf16.gmra.mrb[96].mxu1 %v15596_v56  ;;  %v13917_v56 = vld [vmem:[#allocation13 + $0x150] ss:$8 sps:$4 sm:$0xff]  }
 0x40f   : > { %14438 = vmatprep.mubr.msk.bf16.mxu1 %vm15606_vm1, %v15610_v37  ;;  %4125 = vmatpush1.bf16.msra.mxu1 %v13908_v61  ;;  %v13940_v61 = vld [vmem:[#allocation13 + $0x1c4] ss:$8 sps:$4 sm:$0xff]  }
 0x410   : > { %4126 = vmatprep.subr.bf16.mxu1 %v13913_v58  ;;  %v13938_v58 = vld [vmem:[#allocation13 + $0x1c0] ss:$8 sps:$4 sm:$0xff]  }
 0x413   : > { %4127 = vmatpush1.bf16.msra.mxu1 %v13911_v13  ;;  %v13943_v13 = vld [vmem:[#allocation13 + $0x1d4] ss:$8 sps:$4 sm:$0xff]  }
 0x414   : > { %4128 = vmatprep.subr.bf16.mxu1 %v13916_v29  ;;  %v13941_v29 = vld [vmem:[#allocation13 + $0x1d0] ss:$8 sps:$4 sm:$0xff]  }
 0x416   : > { %4050 = vmatmul.mubr.bf16.gmra.mrb[100].mxu1 %v15627_v43 }
 0x417   : > { %14441 = vmatprep.mubr.msk.bf16.mxu1 %vm15637_vm14, %v15642_v28  ;;  %4129 = vmatpush1.bf16.msra.mxu1 %v13914_v21  ;;  %v13946_v21 = vld [vmem:[#allocation13 + $0x1e4] ss:$8 sps:$4 sm:$0xff]  }
 0x418   : > { %4130 = vmatprep.subr.bf16.mxu1 %v13919_v2  ;;  %v13944_v2 = vld [vmem:[#allocation13 + $0x1e0] ss:$8 sps:$4 sm:$0xff]  }
 0x41b   : > { %4131 = vmatpush1.bf16.msra.mxu1 %v13917_v56  ;;  %v13949_v56 = vld [vmem:[#allocation13 + $0x1f4] ss:$8 sps:$4 sm:$0xff]  }
 0x41c   : > { %4132 = vmatprep.subr.bf16.mxu1 %v13922_v27  ;;  %v13947_v27 = vld [vmem:[#allocation13 + $0x1f0] ss:$8 sps:$4 sm:$0xff]  }
 0x41e   : > { %4060 = vmatmul.mubr.bf16.gmra.mrb[104].mxu1 %v15659_v42 }
 0x41f   : > { %14444 = vmatprep.mubr.msk.bf16.mxu1 %vm15669_vm9, %v15674_v25  ;;  %4133 = vmatpush1.bf16.msra.mxu1 %v13920_v34  ;;  %v13952_v34 = vld [vmem:[#allocation13 + $0x404] ss:$8 sps:$4 sm:$0xff]  }
 0x420   : > { %4134 = vmatprep.subr.bf16.mxu1 %v13925_v62  ;;  %v13950_v62 = vld [vmem:[#allocation13 + $0x400] ss:$8 sps:$4 sm:$0xff]  }
 0x423   : > { %4135 = vmatpush1.bf16.msra.mxu1 %v13923_v26  ;;  %v13955_v26 = vld [vmem:[#allocation13 + $0x414] ss:$8 sps:$4 sm:$0xff]  }
 0x424   : > { %4136 = vmatprep.subr.bf16.mxu1 %v13928_v10  ;;  %v13953_v10 = vld [vmem:[#allocation13 + $0x410] ss:$8 sps:$4 sm:$0xff]  }
 0x426   : > { %4070 = vmatmul.mubr.bf16.gmra.mrb[108].mxu1 %v15691_v14 }
 0x427   : > { %14447 = vmatprep.mubr.msk.bf16.mxu1 %vm15701_vm8, %v15706_v23  ;;  %4137 = vmatpush1.bf16.msra.mxu1 %v13926_v47  ;;  %v13958_v47 = vld [vmem:[#allocation13 + $0x424] ss:$8 sps:$4 sm:$0xff]  }
 0x428   : > { %4138 = vmatprep.subr.bf16.mxu1 %v13931_v41  ;;  %v13956_v41 = vld [vmem:[#allocation13 + $0x420] ss:$8 sps:$4 sm:$0xff]  }
 0x42b   : > { %4139 = vmatpush1.bf16.msra.mxu1 %v13929_v40  ;;  %v13961_v40 = vld [vmem:[#allocation13 + $0x434] ss:$8 sps:$4 sm:$0xff]  }
 0x42c   : > { %4140 = vmatprep.subr.bf16.mxu1 %v13934_v8  ;;  %v13959_v8 = vld [vmem:[#allocation13 + $0x430] ss:$8 sps:$4 sm:$0xff]  }
 0x42e   : > { %4080 = vmatmul.mubr.bf16.gmra.mrb[112].mxu1 %v15718_v49 }
 0x42f   : > { %14450 = vmatprep.mubr.msk.bf16.mxu1 %vm15727_vm3, %v15732_v17  ;;  %4141 = vmatpush1.bf16.msra.mxu1 %v13932_v4  ;;  %v13964_v4 = vld [vmem:[#allocation13 + $0x444] ss:$8 sps:$4 sm:$0xff]  }
 0x430   : > { %4142 = vmatprep.subr.bf16.mxu1 %v13937_v44  ;;  %v13962_v44 = vld [vmem:[#allocation13 + $0x440] ss:$8 sps:$4 sm:$0xff]  }
 0x433   : > { %4143 = vmatpush1.bf16.msra.mxu1 %v13935_v33  ;;  %v13967_v33 = vld [vmem:[#allocation13 + $0x454] ss:$8 sps:$4 sm:$0xff]  }
 0x434   : > { %4144 = vmatprep.subr.bf16.mxu1 %v13940_v61  ;;  %v13970_v61 = vld [vmem:[#allocation13 + $0x464] ss:$8 sps:$4 sm:$0xff]  }
 0x436   : > { %4090 = vmatmul.mubr.bf16.gmra.mrb[116].mxu1 %v15743_v30 }
 0x437   : > { %14453 = vmatprep.mubr.msk.bf16.mxu1 %vm15752_vm5, %v15756_v12  ;;  %4145 = vmatpush1.bf16.msra.mxu1 %v13938_v58  ;;  %v13973_v58 = vld [vmem:[#allocation13 + $0x474] ss:$8 sps:$4 sm:$0xff]  }
 0x438   : > { %4146 = vmatprep.subr.bf16.mxu1 %v13943_v13  ;;  %v13971_v13 = vld [vmem:[#allocation13 + $0x470] ss:$8 sps:$4 sm:$0xff]  }
 0x43b   : > { %4147 = vmatpush1.bf16.msra.mxu1 %v13941_v29  ;;  %v13976_v29 = vld [vmem:[#allocation13 + $0x484] ss:$8 sps:$4 sm:$0xff]  }
 0x43c   : > { %4148 = vmatprep.subr.bf16.mxu1 %v13946_v21  ;;  %v13974_v21 = vld [vmem:[#allocation13 + $0x480] ss:$8 sps:$4 sm:$0xff]  }
 0x43e   : > { %4100 = vmatmul.mubr.bf16.gmra.mrb[120].mxu1 %v15766_v1 }
 0x43f   : > { %14456 = vmatprep.mubr.msk.bf16.mxu1 %vm15774_vm7, %v15778_v9  ;;  %4149 = vmatpush1.bf16.msra.mxu1 %v13944_v2  ;;  %v13979_v2 = vld [vmem:[#allocation13 + $0x494] ss:$8 sps:$4 sm:$0xff]  }
 0x440   : > { %4150 = vmatprep.subr.bf16.mxu1 %v13949_v56  ;;  %v13977_v56 = vld [vmem:[#allocation13 + $0x490] ss:$8 sps:$4 sm:$0xff]  }
 0x443   : > { %4151 = vmatpush1.bf16.msra.mxu1 %v13947_v27  ;;  %v13982_v27 = vld [vmem:[#allocation13 + $0x4a4] ss:$8 sps:$4 sm:$0xff]  }
 0x444   : > { %4664 = vmatprep.subr.bf16.mxu1 %v13952_v34  ;;  %v13980_v34 = vld [vmem:[#allocation13 + $0x4a0] ss:$8 sps:$4 sm:$0xff]  }
 0x446   : > { %4110 = vmatmul.mubr.bf16.gmra.mrb[124].mxu1 %v15786_v15 }
 0x447   : > { %4152 = vmatprep.mubr.bf16.mxu1 %v15907_v39 }
 0x44e   : > { %4153 = vmatmul.mubr.bf16.vlgmr.msra.gmra.mrb[92].mxu1 %v15907_v39 }
 0x44f   : > { %4665 = vmatpush1.bf16.msra.mxu1 %v13950_v62  ;;  %4162 = vmatprep.mubr.bf16.mxu1 %v15810_v20  ;;  %v13965_v20 = vld [vmem:[#allocation13 + $0x450] ss:$8 sps:$4 sm:$0xff]   ;;  %v13985_v62 = vld [vmem:[#allocation13 + $0x4b4] ss:$8 sps:$4 sm:$0xff]  }
 0x450   : > { %4666 = vmatprep.subr.bf16.mxu1 %v13955_v26  ;;  %v13983_v26 = vld [vmem:[#allocation13 + $0x4b0] ss:$8 sps:$4 sm:$0xff]  }
 0x453   : > { %4667 = vmatpush1.bf16.msra.mxu1 %v13953_v10  ;;  %v13988_v10 = vld [vmem:[#allocation13 + $0x4c4] ss:$8 sps:$4 sm:$0xff]  }
 0x454   : > { %4668 = vmatprep.subr.bf16.mxu1 %v13958_v47  ;;  %v13986_v47 = vld [vmem:[#allocation13 + $0x4c0] ss:$8 sps:$4 sm:$0xff]  }
 0x456   : > { %4163 = vmatmul.mubr.bf16.gmra.mrb[96].mxu1 %v15815_v59  ;;  %v13968_v59 = vld [vmem:[#allocation13 + $0x460] ss:$8 sps:$4 sm:$0xff]  }
 0x457   : > { %4172 = vmatprep.mubr.bf16.mxu1 %v15820_v24  ;;  %4669 = vmatpush1.bf16.msra.mxu1 %v13956_v41  ;;  %v13991_v41 = vld [vmem:[#allocation13 + $0x4d4] ss:$8 sps:$4 sm:$0xff]  }
 0x458   : > { %4670 = vmatprep.subr.bf16.mxu1 %v13961_v40  ;;  %v13989_v40 = vld [vmem:[#allocation13 + $0x4d0] ss:$8 sps:$4 sm:$0xff]  }
 0x45b   : > { %4671 = vmatpush1.bf16.msra.mxu1 %v13959_v8  ;;  %v13994_v8 = vld [vmem:[#allocation13 + $0x4e4] ss:$8 sps:$4 sm:$0xff]  }
 0x45c   : > { %4672 = vmatprep.subr.bf16.mxu1 %v13964_v4  ;;  %v13992_v4 = vld [vmem:[#allocation13 + $0x4e0] ss:$8 sps:$4 sm:$0xff]  }
 0x45e   : > { %4173 = vmatmul.mubr.bf16.gmra.mrb[100].mxu1 %v15826_v45 }
 0x45f   : > { %4182 = vmatprep.mubr.bf16.mxu1 %v15831_v32  ;;  %4673 = vmatpush1.bf16.msra.mxu1 %v13962_v44  ;;  %v13997_v44 = vld [vmem:[#allocation13 + $0x4f4] ss:$8 sps:$4 sm:$0xff]  }
 0x460   : > { %4674 = vmatprep.subr.bf16.mxu1 %v13967_v33  ;;  %v13995_v33 = vld [vmem:[#allocation13 + $0x4f0] ss:$8 sps:$4 sm:$0xff]  }
 0x463   : > { %4675 = vmatpush1.bf16.msra.mxu1 %v13965_v20  ;;  %v14000_v20 = vld [vmem:[#allocation13 + $0x504] ss:$8 sps:$4 sm:$0xff]  }
 0x464   : > { %4676 = vmatprep.subr.bf16.mxu1 %v13970_v61  ;;  %v13998_v61 = vld [vmem:[#allocation13 + $0x500] ss:$8 sps:$4 sm:$0xff]  }
 0x466   : > { %4183 = vmatmul.mubr.bf16.gmra.mrb[104].mxu1 %v15837_v3 }
 0x467   : > { %4192 = vmatprep.mubr.bf16.mxu1 %v15842_v51  ;;  %4677 = vmatpush1.bf16.msra.mxu1 %v13968_v59  ;;  %v14003_v59 = vld [vmem:[#allocation13 + $0x514] ss:$8 sps:$4 sm:$0xff]  }
 0x468   : > { %4678 = vmatprep.subr.bf16.mxu1 %v13973_v58  ;;  %v14001_v58 = vld [vmem:[#allocation13 + $0x510] ss:$8 sps:$4 sm:$0xff]  }
 0x46b   : > { %4679 = vmatpush1.bf16.msra.mxu1 %v13971_v13  ;;  %v14006_v13 = vld [vmem:[#allocation13 + $0x524] ss:$8 sps:$4 sm:$0xff]  }
 0x46c   : > { %4680 = vmatprep.subr.bf16.mxu1 %v13976_v29  ;;  %v14004_v29 = vld [vmem:[#allocation13 + $0x520] ss:$8 sps:$4 sm:$0xff]  }
 0x46e   : > { %4193 = vmatmul.mubr.bf16.gmra.mrb[108].mxu1 %v15848_v5 }
 0x46f   : > { %4202 = vmatprep.mubr.bf16.mxu1 %v15853_v35  ;;  %4681 = vmatpush1.bf16.msra.mxu1 %v13974_v21  ;;  %v14009_v21 = vld [vmem:[#allocation13 + $0x534] ss:$8 sps:$4 sm:$0xff]  }
 0x470   : > { %4682 = vmatprep.subr.bf16.mxu1 %v13979_v2  ;;  %v14015_v2 = vld [vmem:[#allocation13 + $0x554] ss:$8 sps:$4 sm:$0xff]  }
 0x473   : > { %4683 = vmatpush1.bf16.msra.mxu1 %v13977_v56  ;;  %v14013_v56 = vld [vmem:[#allocation13 + $0x550] ss:$8 sps:$4 sm:$0xff]  }
 0x474   : > { %4684 = vmatprep.subr.bf16.mxu1 %v13982_v27  ;;  %v14018_v27 = vld [vmem:[#allocation13 + $0x564] ss:$8 sps:$4 sm:$0xff]  }
 0x476   : > { %4203 = vmatmul.mubr.bf16.gmra.mrb[112].mxu1 %v15859_v46 }
 0x477   : > { %4212 = vmatprep.mubr.bf16.mxu1 %v15864_v48  ;;  %4685 = vmatpush1.bf16.msra.mxu1 %v13980_v34  ;;  %v14016_v34 = vld [vmem:[#allocation13 + $0x560] ss:$8 sps:$4 sm:$0xff]  }
 0x478   : > { %4686 = vmatprep.subr.bf16.mxu1 %v13985_v62  ;;  %v14021_v62 = vld [vmem:[#allocation13 + $0x574] ss:$8 sps:$4 sm:$0xff]  }
 0x47b   : > { %4687 = vmatpush1.bf16.msra.mxu1 %v13983_v26  ;;  %v14019_v26 = vld [vmem:[#allocation13 + $0x570] ss:$8 sps:$4 sm:$0xff]  }
 0x47c   : > { %4688 = vmatprep.subr.bf16.mxu1 %v13988_v10  ;;  %v14024_v10 = vld [vmem:[#allocation13 + $0x584] ss:$8 sps:$4 sm:$0xff]  }
 0x47e   : > { %4213 = vmatmul.mubr.bf16.gmra.mrb[116].mxu1 %v15870_v11 }
 0x47f   : > { %4222 = vmatprep.mubr.bf16.mxu1 %v15875_v18  ;;  %4689 = vmatpush1.bf16.msra.mxu1 %v13986_v47  ;;  %v14022_v47 = vld [vmem:[#allocation13 + $0x580] ss:$8 sps:$4 sm:$0xff]  }
 0x480   : > { %4690 = vmatprep.subr.bf16.mxu1 %v13991_v41  ;;  %v14027_v41 = vld [vmem:[#allocation13 + $0x594] ss:$8 sps:$4 sm:$0xff]  }
 0x483   : > { %4691 = vmatpush1.bf16.msra.mxu1 %v13989_v40  ;;  %v14025_v40 = vld [vmem:[#allocation13 + $0x590] ss:$8 sps:$4 sm:$0xff]  }
 0x484   : > { %4692 = vmatprep.subr.bf16.mxu1 %v13994_v8  ;;  %v14030_v8 = vld [vmem:[#allocation13 + $0x5a4] ss:$8 sps:$4 sm:$0xff]  }
 0x486   : > { %4223 = vmatmul.mubr.bf16.gmra.mrb[120].mxu1 %v15881_v55 }
 0x487   : > { %4232 = vmatprep.mubr.bf16.mxu1 %v15886_v60  ;;  %4693 = vmatpush1.bf16.msra.mxu1 %v13992_v4  ;;  %v14028_v4 = vld [vmem:[#allocation13 + $0x5a0] ss:$8 sps:$4 sm:$0xff]  }
 0x488   : > { %4694 = vmatprep.subr.bf16.mxu1 %v13997_v44  ;;  %v14033_v44 = vld [vmem:[#allocation13 + $0x5b4] ss:$8 sps:$4 sm:$0xff]  }
 0x48b   : > { %4695 = vmatpush1.bf16.msra.mxu1 %v13995_v33  ;;  %v14031_v33 = vld [vmem:[#allocation13 + $0x5b0] ss:$8 sps:$4 sm:$0xff]  }
 0x48c   : > { %4787 = vmatprep.subr.bf16.mxu1 %v14000_v20  ;;  %v14036_v20 = vld [vmem:[#allocation13 + $0x5c4] ss:$8 sps:$4 sm:$0xff]  }
 0x48e   : > { %4233 = vmatmul.mubr.bf16.gmra.mrb[124].mxu1 %v15895_v52 }
 0x48f   : > { %14459 = vmatprep.mubr.msk.bf16.mxu1 %vm15606_vm1, %v15610_v37  ;;  %v14012_v37 = vld [vmem:[#allocation13 + $0x544] ss:$8 sps:$4 sm:$0xff]  }
 0x496   : > { %4697 = vmatmul.mubr.bf16.vlgmr.msra.gmra.mrb[92].mxu1 %v15627_v43  ;;  %v14010_v43 = vld [vmem:[#allocation13 + $0x540] ss:$8 sps:$4 sm:$0xff]  }
 0x497   : > { %4788 = vmatpush1.bf16.msra.mxu1 %v13998_v61  ;;  %14462 = vmatprep.mubr.msk.bf16.mxu1 %vm15637_vm14, %v15642_v28  ;;  %v14034_v61 = vld [vmem:[#allocation13 + $0x5c0] ss:$8 sps:$4 sm:$0xff]  }
 0x498   : > { %4789 = vmatprep.subr.bf16.mxu1 %v14003_v59  ;;  %v14039_v59 = vld [vmem:[#allocation13 + $0x5d4] ss:$8 sps:$4 sm:$0xff]  }
 0x49b   : > { %4790 = vmatpush1.bf16.msra.mxu1 %v14001_v58  ;;  %v14037_v58 = vld [vmem:[#allocation13 + $0x5d0] ss:$8 sps:$4 sm:$0xff]  }
 0x49c   : > { %4791 = vmatprep.subr.bf16.mxu1 %v14006_v13  ;;  %v14042_v13 = vld [vmem:[#allocation13 + $0x5e4] ss:$8 sps:$4 sm:$0xff]  }
 0x49e   : > { %4707 = vmatmul.mubr.bf16.gmra.mrb[96].mxu1 %v15659_v42 }
 0x49f   : > { %14465 = vmatprep.mubr.msk.bf16.mxu1 %vm15669_vm9, %v15674_v25  ;;  %4792 = vmatpush1.bf16.msra.mxu1 %v14004_v29  ;;  %v14040_v29 = vld [vmem:[#allocation13 + $0x5e0] ss:$8 sps:$4 sm:$0xff]  }
 0x4a0   : > { %4793 = vmatprep.subr.bf16.mxu1 %v14009_v21  ;;  %v14045_v21 = vld [vmem:[#allocation13 + $0x5f4] ss:$8 sps:$4 sm:$0xff]  }
 0x4a3   : > { %4794 = vmatpush1.bf16.msra.mxu1 %v14007_v50  ;;  %v14043_v50 = vld [vmem:[#allocation13 + $0x5f0] ss:$8 sps:$4 sm:$0xff]  }
 0x4a4   : > { %4795 = vmatprep.subr.bf16.mxu1 %v14012_v37  ;;  %v14048_v37 = vld [vmem:[#allocation13 + $0x604] ss:$8 sps:$4 sm:$0xff]  }
 0x4a6   : > { %4717 = vmatmul.mubr.bf16.gmra.mrb[100].mxu1 %v15691_v14 }
 0x4a7   : > { %14468 = vmatprep.mubr.msk.bf16.mxu1 %vm15701_vm8, %v15706_v23  ;;  %4796 = vmatpush1.bf16.msra.mxu1 %v14010_v43  ;;  %v14046_v43 = vld [vmem:[#allocation13 + $0x600] ss:$8 sps:$4 sm:$0xff]  }
 0x4a8   : > { %4797 = vmatprep.subr.bf16.mxu1 %v14015_v2  ;;  %v14051_v2 = vld [vmem:[#allocation13 + $0x614] ss:$8 sps:$4 sm:$0xff]  }
 0x4ab   : > { %4798 = vmatpush1.bf16.msra.mxu1 %v14013_v56  ;;  %v14049_v56 = vld [vmem:[#allocation13 + $0x610] ss:$8 sps:$4 sm:$0xff]  }
 0x4ac   : > { %4799 = vmatprep.subr.bf16.mxu1 %v14018_v27  ;;  %v14054_v27 = vld [vmem:[#allocation13 + $0x624] ss:$8 sps:$4 sm:$0xff]  }
 0x4ae   : > { %4727 = vmatmul.mubr.bf16.gmra.mrb[104].mxu1 %v15718_v49 }
 0x4af   : > { %14471 = vmatprep.mubr.msk.bf16.mxu1 %vm15727_vm3, %v15732_v17  ;;  %4800 = vmatpush1.bf16.msra.mxu1 %v14016_v34  ;;  %v14052_v34 = vld [vmem:[#allocation13 + $0x620] ss:$8 sps:$4 sm:$0xff]  }
 0x4b0   : > { %4801 = vmatprep.subr.bf16.mxu1 %v14021_v62  ;;  %v14057_v62 = vld [vmem:[#allocation13 + $0x634] ss:$8 sps:$4 sm:$0xff]  }
 0x4b3   : > { %4802 = vmatpush1.bf16.msra.mxu1 %v14019_v26  ;;  %v14060_v26 = vld [vmem:[#allocation13 + $0x644] ss:$8 sps:$4 sm:$0xff]  }
 0x4b4   : > { %4803 = vmatprep.subr.bf16.mxu1 %v14024_v10  ;;  %v14063_v10 = vld [vmem:[#allocation13 + $0x654] ss:$8 sps:$4 sm:$0xff]  }
 0x4b6   : > { %4737 = vmatmul.mubr.bf16.gmra.mrb[108].mxu1 %v15743_v30 }
 0x4b7   : > { %14474 = vmatprep.mubr.msk.bf16.mxu1 %vm15752_vm5, %v15756_v12  ;;  %4804 = vmatpush1.bf16.msra.mxu1 %v14022_v47  ;;  %v14061_v47 = vld [vmem:[#allocation13 + $0x650] ss:$8 sps:$4 sm:$0xff]  }
 0x4b8   : > { %4805 = vmatprep.subr.bf16.mxu1 %v14027_v41  ;;  %v14066_v41 = vld [vmem:[#allocation13 + $0x664] ss:$8 sps:$4 sm:$0xff]  }
 0x4bb   : > { %4806 = vmatpush1.bf16.msra.mxu1 %v14025_v40  ;;  %v14064_v40 = vld [vmem:[#allocation13 + $0x660] ss:$8 sps:$4 sm:$0xff]  }
 0x4bc   : > { %4807 = vmatprep.subr.bf16.mxu1 %v14030_v8  ;;  %v14069_v8 = vld [vmem:[#allocation13 + $0x674] ss:$8 sps:$4 sm:$0xff]  }
 0x4be   : > { %4747 = vmatmul.mubr.bf16.gmra.mrb[112].mxu1 %v15766_v1 }
 0x4bf   : > { %14477 = vmatprep.mubr.msk.bf16.mxu1 %vm15774_vm7, %v15778_v9  ;;  %4808 = vmatpush1.bf16.msra.mxu1 %v14028_v4  ;;  %v14067_v4 = vld [vmem:[#allocation13 + $0x670] ss:$8 sps:$4 sm:$0xff]  }
 0x4c0   : > { %4809 = vmatprep.subr.bf16.mxu1 %v14033_v44  ;;  %v14072_v44 = vld [vmem:[#allocation13 + $0x684] ss:$8 sps:$4 sm:$0xff]  }
 0x4c3   : > { %4810 = vmatpush1.bf16.msra.mxu1 %v14031_v33  ;;  %v14070_v33 = vld [vmem:[#allocation13 + $0x680] ss:$8 sps:$4 sm:$0xff]  }
 0x4c4   : > { %4811 = vmatprep.subr.bf16.mxu1 %v14036_v20  ;;  %v14075_v20 = vld [vmem:[#allocation13 + $0x694] ss:$8 sps:$4 sm:$0xff]  }
 0x4c6   : > { %4757 = vmatmul.mubr.bf16.gmra.mrb[116].mxu1 %v15786_v15 }
 0x4c7   : > { %14480 = vmatprep.mubr.msk.bf16.mxu1 %vm15792_vm12, %v15796_v31  ;;  %4812 = vmatpush1.bf16.msra.mxu1 %v14034_v61  ;;  %v14073_v61 = vld [vmem:[#allocation13 + $0x690] ss:$8 sps:$4 sm:$0xff]  }
 0x4c8   : > { %4813 = vmatprep.subr.bf16.mxu1 %v14039_v59  ;;  %v14078_v59 = vld [vmem:[#allocation13 + $0x6a4] ss:$8 sps:$4 sm:$0xff]  }
 0x4cb   : > { %4814 = vmatpush1.bf16.msra.mxu1 %v14037_v58  ;;  %v14076_v58 = vld [vmem:[#allocation13 + $0x6a0] ss:$8 sps:$4 sm:$0xff]  }
 0x4cc   : > { %4815 = vmatprep.subr.bf16.mxu1 %v14042_v13  ;;  %v14081_v13 = vld [vmem:[#allocation13 + $0x6b4] ss:$8 sps:$4 sm:$0xff]  }
 0x4ce   : > { %4767 = vmatmul.mubr.bf16.gmra.mrb[120].mxu1 %v15805_v57 }
 0x4cf   : > { %4776 = vmatprep.mubr.bf16.mxu1 %v15907_v39  ;;  %4816 = vmatpush1.bf16.msra.mxu1 %v14040_v29  ;;  %v14079_v29 = vld [vmem:[#allocation13 + $0x6b0] ss:$8 sps:$4 sm:$0xff]  }
 0x4d0   : > { %4817 = vmatprep.subr.bf16.mxu1 %v14045_v21  ;;  %v14084_v21 = vld [vmem:[#allocation13 + $0x6c4] ss:$8 sps:$4 sm:$0xff]  }
 0x4d3   : > { %4818 = vmatpush1.bf16.msra.mxu1 %v14043_v50  ;;  %v14082_v50 = vld [vmem:[#allocation13 + $0x6c0] ss:$8 sps:$4 sm:$0xff]  }
 0x4d4   : > { %5367 = vmatprep.subr.bf16.mxu1 %v14048_v37  ;;  %v14087_v37 = vld [vmem:[#allocation13 + $0x6d4] ss:$8 sps:$4 sm:$0xff]  }
 0x4d6   : > { %4777 = vmatmul.mubr.bf16.gmra.mrb[124].mxu1 %v15907_v39 }
 0x4d7   : > { %4819 = vmatprep.mubr.bf16.mxu1 %v15820_v24  ;;  %v14055_v24 = vld [vmem:[#allocation13 + $0x630] ss:$8 sps:$4 sm:$0xff]  }
 0x4de   : > { %4820 = vmatmul.mubr.bf16.vlgmr.msra.gmra.mrb[92].mxu1 %v15826_v45  ;;  %v14058_v45 = vld [vmem:[#allocation13 + $0x640] ss:$8 sps:$4 sm:$0xff]  }
 0x4df   : > { %5368 = vmatpush1.bf16.msra.mxu1 %v14046_v43  ;;  %4829 = vmatprep.mubr.bf16.mxu1 %v15831_v32  ;;  %v14085_v43 = vld [vmem:[#allocation13 + $0x6d0] ss:$8 sps:$4 sm:$0xff]  }
 0x4e0   : > { %5369 = vmatprep.subr.bf16.mxu1 %v14051_v2  ;;  %v14090_v2 = vld [vmem:[#allocation13 + $0x6e4] ss:$8 sps:$4 sm:$0xff]  }
 0x4e3   : > { %5370 = vmatpush1.bf16.msra.mxu1 %v14049_v56  ;;  %v14088_v56 = vld [vmem:[#allocation13 + $0x6e0] ss:$8 sps:$4 sm:$0xff]  }
 0x4e4   : > { %5371 = vmatprep.subr.bf16.mxu1 %v14054_v27  ;;  %v14093_v27 = vld [vmem:[#allocation13 + $0x6f4] ss:$8 sps:$4 sm:$0xff]  }
 0x4e6   : > { %4830 = vmatmul.mubr.bf16.gmra.mrb[96].mxu1 %v15837_v3 }
 0x4e7   : > { %4839 = vmatprep.mubr.bf16.mxu1 %v15842_v51  ;;  %5372 = vmatpush1.bf16.msra.mxu1 %v14052_v34  ;;  %v14091_v34 = vld [vmem:[#allocation13 + $0x6f0] ss:$8 sps:$4 sm:$0xff]  }
 0x4e8   : > { %5373 = vmatprep.subr.bf16.mxu1 %v14057_v62  ;;  %v14096_v62 = vld [vmem:[#allocation13 + $0x704] ss:$8 sps:$4 sm:$0xff]  }
 0x4eb   : > { %5374 = vmatpush1.bf16.msra.mxu1 %v14055_v24  ;;  %v14094_v24 = vld [vmem:[#allocation13 + $0x700] ss:$8 sps:$4 sm:$0xff]  }
 0x4ec   : > { %5375 = vmatprep.subr.bf16.mxu1 %v14060_v26  ;;  %v14099_v26 = vld [vmem:[#allocation13 + $0x714] ss:$8 sps:$4 sm:$0xff]  }
 0x4ee   : > { %4840 = vmatmul.mubr.bf16.gmra.mrb[100].mxu1 %v15848_v5 }
 0x4ef   : > { %4849 = vmatprep.mubr.bf16.mxu1 %v15853_v35  ;;  %5376 = vmatpush1.bf16.msra.mxu1 %v14058_v45  ;;  %v14097_v45 = vld [vmem:[#allocation13 + $0x710] ss:$8 sps:$4 sm:$0xff]  }
 0x4f0   : > { %5377 = vmatprep.subr.bf16.mxu1 %v14063_v10  ;;  %v14102_v10 = vld [vmem:[#allocation13 + $0x724] ss:$8 sps:$4 sm:$0xff]  }
 0x4f3   : > { %5378 = vmatpush1.bf16.msra.mxu1 %v14061_v47  ;;  %v14100_v47 = vld [vmem:[#allocation13 + $0x720] ss:$8 sps:$4 sm:$0xff]  }
 0x4f4   : > { %5379 = vmatprep.subr.bf16.mxu1 %v14066_v41  ;;  %v14105_v41 = vld [vmem:[#allocation13 + $0x734] ss:$8 sps:$4 sm:$0xff]  }
 0x4f6   : > { %4850 = vmatmul.mubr.bf16.gmra.mrb[104].mxu1 %v15859_v46 }
 0x4f7   : > { %4859 = vmatprep.mubr.bf16.mxu1 %v15864_v48  ;;  %5380 = vmatpush1.bf16.msra.mxu1 %v14064_v40  ;;  %v14146_v40 = vld [vmem:[%s18606_s7 + $0x250] sm:$0xff]  }
 0x4f8   : > { %5381 = vmatprep.subr.bf16.mxu1 %v14069_v8  ;;  %v14106_v8 = vld [vmem:[#allocation13 + $0x740] ss:$8 sps:$4 sm:$0xff]  }
 0x4fb   : > { %5382 = vmatpush1.bf16.msra.mxu1 %v14067_v4  ;;  %v14111_v4 = vld [vmem:[#allocation13 + $0x754] ss:$8 sps:$4 sm:$0xff]  }
 0x4fc   : > { %5383 = vmatprep.subr.bf16.mxu1 %v14072_v44  ;;  %v14148_v44 = vld [vmem:[%s18606_s7 + $0x258] sm:$0xff]  }
 0x4fe   : > { %4860 = vmatmul.mubr.bf16.gmra.mrb[108].mxu1 %v15870_v11 }
 0x4ff   : > { %4869 = vmatprep.mubr.bf16.mxu1 %v15875_v18  ;;  %5384 = vmatpush1.bf16.msra.mxu1 %v14070_v33  ;;  %v14109_v33 = vld [vmem:[#allocation13 + $0x750] ss:$8 sps:$4 sm:$0xff]  }
 0x500   : > { %5385 = vmatprep.subr.bf16.mxu1 %v14075_v20  ;;  %v14114_v20 = vld [vmem:[#allocation13 + $0x764] ss:$8 sps:$4 sm:$0xff]  }
 0x503   : > { %5386 = vmatpush1.bf16.msra.mxu1 %v14073_v61  ;;  %v14149_v61 = vld [vmem:[%s18606_s7 + $0x218] sm:$0xff]  }
 0x504   : > { %5387 = vmatprep.subr.bf16.mxu1 %v14078_v59  ;;  %v14112_v59 = vld [vmem:[#allocation13 + $0x760] ss:$8 sps:$4 sm:$0xff]  }
 0x506   : > { %4870 = vmatmul.mubr.bf16.gmra.mrb[112].mxu1 %v15881_v55 }
 0x507   : > { %4879 = vmatprep.mubr.bf16.mxu1 %v15886_v60  ;;  %5388 = vmatpush1.bf16.msra.mxu1 %v14076_v58  ;;  %v14117_v58 = vld [vmem:[#allocation13 + $0x774] ss:$8 sps:$4 sm:$0xff]  }
 0x508   : > { %5389 = vmatprep.subr.bf16.mxu1 %v14081_v13  ;;  %v14115_v13 = vld [vmem:[#allocation13 + $0x770] ss:$8 sps:$4 sm:$0xff]  }
 0x50b   : > { %5390 = vmatpush1.bf16.msra.mxu1 %v14079_v29  ;;  %v14120_v29 = vld [vmem:[#allocation13 + $0x784] ss:$8 sps:$4 sm:$0xff]  }
 0x50c   : > { %5391 = vmatprep.subr.bf16.mxu1 %v14084_v21  ;;  %v14118_v21 = vld [vmem:[#allocation13 + $0x780] ss:$8 sps:$4 sm:$0xff]  }
 0x50e   : > { %4880 = vmatmul.mubr.bf16.gmra.mrb[116].mxu1 %v15895_v52 }
 0x50f   : > { %4889 = vmatprep.mubr.bf16.mxu1 %v15899_v36  ;;  %5392 = vmatpush1.bf16.msra.mxu1 %v14082_v50  ;;  %v14123_v50 = vld [vmem:[#allocation13 + $0x794] ss:$8 sps:$4 sm:$0xff]  }
 0x510   : > { %5393 = vmatprep.subr.bf16.mxu1 %v14087_v37  ;;  %v14126_v37 = vld [vmem:[#allocation13 + $0x7a4] ss:$8 sps:$4 sm:$0xff]  }
 0x513   : > { %5394 = vmatpush1.bf16.msra.mxu1 %v14085_v43  ;;  %v14129_v43 = vld [vmem:[#allocation13 + $0x7b4] ss:$8 sps:$4 sm:$0xff]  }
 0x514   : > { %5395 = vmatprep.subr.bf16.mxu1 %v14090_v2  ;;  %v14132_v2 = vld [vmem:[#allocation13 + $0x7c4] ss:$8 sps:$4 sm:$0xff]  }
 0x516   : > { %4890 = vmatmul.mubr.bf16.gmra.mrb[120].mxu1 %v15904_v0 }
 0x517   : > { %4899 = vmatprep.mubr.bf16.mxu1 %v15907_v39  ;;  %5396 = vmatpush1.bf16.msra.mxu1 %v14088_v56  ;;  %v14135_v56 = vld [vmem:[#allocation13 + $0x7d4] ss:$8 sps:$4 sm:$0xff]  }
 0x518   : > { %5397 = vmatprep.subr.bf16.mxu1 %v14093_v27  ;;  %v14133_v27 = vld [vmem:[#allocation13 + $0x7d0] ss:$8 sps:$4 sm:$0xff]  }
 0x51b   : > { %5398 = vmatpush1.bf16.msra.mxu1 %v14091_v34  ;;  %v14136_v34 = vld [vmem:[#allocation13 + $0x7e0] ss:$8 sps:$4 sm:$0xff]  }
 0x51c   : > { %5490 = vmatprep.subr.bf16.mxu1 %v14096_v62  ;;  %v14139_v62 = vld [vmem:[#allocation13 + $0x7f0] ss:$8 sps:$4 sm:$0xff]  }
 0x51e   : > { %4900 = vmatmul.mubr.bf16.gmra.mrb[124].mxu1 %v15907_v39 }
 0x51f   : > { %14483 = vmatprep.mubr.msk.bf16.mxu1 %vm15637_vm14, %v15642_v28  ;;  %v14143_v28 = vld [vmem:[%s18606_s7 + $0x200] sm:$0xff]  }
 0x520   : > { %12170 = vmatpush3.bf16.msra.mxu0 %v14143_v28  ;;  %v14186_v28 = vld [vmem:[%s18606_s7 + $0x540] sm:$0xff]  }
 0x526   : > { %5400 = vmatmul.mubr.bf16.vlgmr.msra.gmra.mrb[92].mxu1 %v15659_v42  ;;  %v14144_v42 = vld [vmem:[%s18606_s7 + $0x248] sm:$0xff]  }
 0x527   : > { %5491 = vmatpush1.bf16.msra.mxu1 %v14094_v24  ;;  %14486 = vmatprep.mubr.msk.bf16.mxu1 %vm15669_vm9, %v15674_v25  ;;  %v14108_v25 = vld [vmem:[#allocation13 + $0x744] ss:$8 sps:$4 sm:$0xff]   ;;  %v14165_v24 = vld [vmem:[%s18606_s7 + $0x238] sm:$0xff]  }
 0x528   : > { %5492 = vmatprep.subr.bf16.mxu1 %v14099_v26  ;;  %12171 = vmatprep.subr.bf16.mxu0 %v14144_v42  ;;  %v14169_v26 = vld [vmem:[%s18606_s7 + $0x428] sm:$0xff]   ;;  %v5653_v42 = vsub.s32 0, %v15136_v16 }
 0x52b   : > { %5493 = vmatpush1.bf16.msra.mxu1 %v14097_v45  ;;  %v14172_v45 = vld [vmem:[%s18606_s7 + $0x470] sm:$0xff]  }
 0x52c   : > { %5494 = vmatprep.subr.bf16.mxu1 %v14102_v10  ;;  %v14173_v10 = vld [vmem:[%s18606_s7 + $0x430] sm:$0xff]  }
 0x52e   : > { %5410 = vmatmul.mubr.bf16.gmra.mrb[96].mxu1 %v15691_v14  ;;  %v14145_v14 = vld [vmem:[%s18606_s7 + $0x208] sm:$0xff]  }
 0x52f   : > { %14489 = vmatprep.mubr.msk.bf16.mxu1 %vm15701_vm8, %v15706_v23  ;;  %5495 = vmatpush1.bf16.msra.mxu1 %v14100_v47  ;;  %v14147_v23 = vld [vmem:[%s18606_s7 + $0x210] sm:$0xff]   ;;  %v14174_v47 = vld [vmem:[%s18606_s7 + $0x478] sm:$0xff]  }
 0x530   : > { %5496 = vmatprep.subr.bf16.mxu1 %v14105_v41  ;;  %12172 = vmatpush3.bf16.msra.mxu0 %v14145_v14  ;;  %v14175_v41 = vld [vmem:[%s18606_s7 + $0x438] sm:$0xff]  }
 0x531   : > { %12173 = vmatprep.subr.bf16.mxu0 %v14146_v40 }
 0x533   : > { %5497 = vmatpush1.bf16.msra.mxu1 %v14103_v54  ;;  %v5649_v54 = vld [vmem:[#allocation14] sm:$0x3] }
 0x534   : > { %5498 = vmatprep.subr.bf16.mxu1 %v14108_v25  ;;  %12174 = vmatpush3.bf16.msra.mxu0 %v14147_v23  ;;  %v5657_v25 = vsub.s32 1, %v15136_v16  ;;  %v16167_v14 = vrot.slane %v5649_v54, %v5653_v42  ;;  %v5842_v16 = vld [vmem:[#allocation2 + $0x18] sm:$0x80] }
 0x535   : > { %12175 = vmatprep.subr.bf16.mxu0 %v14148_v44 }
 0x536   : > { %5420 = vmatmul.mubr.bf16.gmra.mrb[100].mxu1 %v15718_v49  ;;  %v14150_v49 = vld [vmem:[%s18606_s7 + $0x260] sm:$0xff]   ;;  %v16169_v40 = vrot.slane %v5649_v54, %v5657_v25 }
 0x537   : > { %14492 = vmatprep.mubr.msk.bf16.mxu1 %vm15727_vm3, %v15732_v17  ;;  %5499 = vmatpush1.bf16.msra.mxu1 %v14106_v8  ;;  %v14151_v17 = vld [vmem:[%s18606_s7 + $0x220] sm:$0xff]  }
 0x538   : > { %5500 = vmatprep.subr.bf16.mxu1 %v14111_v4  ;;  %12176 = vmatpush3.bf16.msra.mxu0 %v14149_v61 }
 0x539   : > { %12177 = vmatprep.subr.bf16.mxu0 %v14150_v49 }
 0x53b   : > { %5501 = vmatpush1.bf16.msra.mxu1 %v14109_v33 }
 0x53c   : > { %5502 = vmatprep.subr.bf16.mxu1 %v14114_v20  ;;  %12178 = vmatpush3.bf16.msra.mxu0 %v14151_v17 }
 0x53e   : > { %5430 = vmatmul.mubr.bf16.gmra.mrb[104].mxu1 %v15743_v30  ;;  %v14121_v30 = vld [vmem:[#allocation13 + $0x790] ss:$8 sps:$4 sm:$0xff]  }
 0x53f   : > { %14495 = vmatprep.mubr.msk.bf16.mxu1 %vm15752_vm5, %v15756_v12  ;;  %5503 = vmatpush1.bf16.msra.mxu1 %v14112_v59  ;;  %v14124_v12 = vld [vmem:[#allocation13 + $0x7a0] ss:$8 sps:$4 sm:$0xff]   ;;  %v5841_v59 = vld [vmem:[#allocation2 + $0x10] sm:$0x80] }
 0x540   : > { %5504 = vmatprep.subr.bf16.mxu1 %v14117_v58 }
 0x543   : > { %5505 = vmatpush1.bf16.msra.mxu1 %v14115_v13 }
 0x544   : > { %5506 = vmatprep.subr.bf16.mxu1 %v14120_v29 }
 0x546   : > { %5440 = vmatmul.mubr.bf16.gmra.mrb[108].mxu1 %v15766_v1  ;;  %v14127_v1 = vld [vmem:[#allocation13 + $0x7b0] ss:$8 sps:$4 sm:$0xff]  }
 0x547   : > { %14498 = vmatprep.mubr.msk.bf16.mxu1 %vm15774_vm7, %v15778_v9  ;;  %5507 = vmatpush1.bf16.msra.mxu1 %v14118_v21  ;;  %v14130_v9 = vld [vmem:[#allocation13 + $0x7c0] ss:$8 sps:$4 sm:$0xff]  }
 0x548   : > { %5508 = vmatprep.subr.bf16.mxu1 %v14123_v50 }
 0x54b   : > { %5509 = vmatpush1.bf16.msra.mxu1 %v14121_v30 }
 0x54c   : > { %5510 = vmatprep.subr.bf16.mxu1 %v14126_v37 }
 0x54e   : > { %5450 = vmatmul.mubr.bf16.gmra.mrb[112].mxu1 %v15786_v15  ;;  %v14138_v15 = vld [vmem:[#allocation13 + $0x7e4] ss:$8 sps:$4 sm:$0xff]  }
 0x54f   : > { %14501 = vmatprep.mubr.msk.bf16.mxu1 %vm15792_vm12, %v15796_v31  ;;  %5511 = vmatpush1.bf16.msra.mxu1 %v14124_v12  ;;  %v14141_v31 = vld [vmem:[#allocation13 + $0x7f4] ss:$8 sps:$4 sm:$0xff]  }
 0x550   : > { %5512 = vmatprep.subr.bf16.mxu1 %v14129_v43 }
 0x553   : > { %5513 = vmatpush1.bf16.msra.mxu1 %v14127_v1 }
 0x554   : > { %5514 = vmatprep.subr.bf16.mxu1 %v14132_v2 }
 0x556   : > { %5460 = vmatmul.mubr.bf16.gmra.mrb[116].mxu1 %v15805_v57  ;;  %v14155_v57 = vld [vmem:[%s18606_s7 + $0x400] sm:$0xff]  }
 0x557   : > { %5515 = vmatpush1.bf16.msra.mxu1 %v14130_v9  ;;  %5469 = vmatprep.mubr.bf16.mxu1 %v15907_v39 }
 0x558   : > { %5516 = vmatprep.subr.bf16.mxu1 %v14135_v56 }
 0x55b   : > { %5517 = vmatpush1.bf16.msra.mxu1 %v14133_v27 }
 0x55c   : > { %5518 = vmatprep.subr.bf16.mxu1 %v14138_v15 }
 0x55e   : > { %5470 = vmatmul.mubr.bf16.gmra.mrb[120].mxu1 %v15907_v39 }
 0x55f   : > { %5479 = vmatprep.mubr.bf16.mxu1 %v15907_v39  ;;  %5519 = vmatpush1.bf16.msra.mxu1 %v14136_v34 }
 0x560   : > { %5520 = vmatprep.subr.bf16.mxu1 %v14141_v31 }
 0x563   : > { %5521 = vmatpush1.bf16.msra.mxu1 %v14139_v62 }
 0x566   : > { %5480 = vmatmul.mubr.bf16.gmra.mrb[124].mxu1 %v15907_v39 }
 0x567   : > { %5522 = vmatprep.mubr.bf16.mxu1 %v15831_v32  ;;  %v14156_v32 = vld [vmem:[%s18606_s7 + $0x448] sm:$0xff]  }
 0x56e   : > { %5523 = vmatmul.mubr.bf16.vlgmr.msra.gmra.mrb[92].mxu1 %v15837_v3  ;;  %v14158_v3 = vld [vmem:[%s18606_s7 + $0x408] sm:$0xff]  }
 0x56f   : > { %5532 = vmatprep.mubr.bf16.mxu1 %v15842_v51  ;;  %v14152_v51 = vld [vmem:[%s18606_s7 + $0x268] sm:$0xff]  }
 0x570   : > { %12179 = vmatprep.subr.bf16.mxu0 %v14152_v51 }
 0x576   : > { %5533 = vmatmul.mubr.bf16.gmra.mrb[96].mxu1 %v15848_v5  ;;  %v14153_v5 = vld [vmem:[%s18606_s7 + $0x228] sm:$0xff]  }
 0x577   : > { %5542 = vmatprep.mubr.bf16.mxu1 %v15853_v35  ;;  %v14160_v35 = vld [vmem:[%s18606_s7 + $0x450] sm:$0xff]   ;;  %12180 = vmatpush3.bf16.msra.mxu0 %v14153_v5 }
 0x57e   : > { %5543 = vmatmul.mubr.bf16.gmra.mrb[100].mxu1 %v15859_v46  ;;  %v14161_v46 = vld [vmem:[%s18606_s7 + $0x410] sm:$0xff]  }
 0x57f   : > { %5552 = vmatprep.mubr.bf16.mxu1 %v15864_v48  ;;  %v14162_v48 = vld [vmem:[%s18606_s7 + $0x458] sm:$0xff]  }
 0x586   : > { %5553 = vmatmul.mubr.bf16.gmra.mrb[104].mxu1 %v15870_v11  ;;  %v14163_v11 = vld [vmem:[%s18606_s7 + $0x418] sm:$0xff]  }
 0x587   : > { %5562 = vmatprep.mubr.bf16.mxu1 %v15875_v18  ;;  %v14157_v18 = vld [vmem:[%s18606_s7 + $0x270] sm:$0xff]  }
 0x588   : > { %12181 = vmatprep.subr.bf16.mxu0 %v14157_v18 }
 0x58e   : > { %5563 = vmatmul.mubr.bf16.gmra.mrb[108].mxu1 %v15881_v55  ;;  %v14154_v55 = vld [vmem:[%s18606_s7 + $0x440] sm:$0xff]  }
 0x58f   : > { %5572 = vmatprep.mubr.bf16.mxu1 %v15886_v60  ;;  %12729 = vmatprep.subr.bf16.mxu1 %v14154_v55  ;;  %v14159_v60 = vld [vmem:[%s18606_s7 + $0x230] sm:$0xff]  }
 0x590   : > { %12730 = vmatpush3.bf16.msra.mxu1 %v14155_v57  ;;  %12182 = vmatpush3.bf16.msra.mxu0 %v14159_v60 }
 0x591   : > { %12731 = vmatprep.subr.bf16.mxu1 %v14156_v32 }
 0x594   : > { %12732 = vmatpush3.bf16.msra.mxu1 %v14158_v3 }
 0x595   : > { %12733 = vmatprep.subr.bf16.mxu1 %v14160_v35 }
 0x596   : > { %5573 = vmatmul.mubr.bf16.gmra.mrb[112].mxu1 %v15895_v52  ;;  %v14166_v52 = vld [vmem:[%s18606_s7 + $0x460] sm:$0xff]  }
 0x597   : > { %5582 = vmatprep.mubr.bf16.mxu1 %v15899_v36  ;;  %v14167_v36 = vld [vmem:[%s18606_s7 + $0x420] sm:$0xff]  }
 0x598   : > { %12734 = vmatpush3.bf16.msra.mxu1 %v14161_v46 }
 0x599   : > { %12735 = vmatprep.subr.bf16.mxu1 %v14162_v48 }
 0x59c   : > { %12736 = vmatpush3.bf16.msra.mxu1 %v14163_v11 }
 0x59d   : > { %12737 = vmatprep.subr.bf16.mxu1 %v14166_v52 }
 0x59e   : > { %5583 = vmatmul.mubr.bf16.gmra.mrb[116].mxu1 %v15904_v0  ;;  %v14164_v0 = vld [vmem:[%s18606_s7 + $0x278] sm:$0xff]  }
 0x59f   : > { %5592 = vmatprep.mubr.bf16.mxu1 %v15907_v39  ;;  %12183 = vmatprep.subr.bf16.mxu0 %v14164_v0 }
 0x5a0   : > { %12738 = vmatpush3.bf16.msra.mxu1 %v14167_v36  ;;  %12184 = vmatpush3.bf16.msra.mxu0 %v14165_v24 }
 0x5a1   : > { %12239 = vmatprep.subr.bf16.mxu0 %v14170_v6 }
 0x5a6   : > { %5593 = vmatmul.mubr.bf16.gmra.mrb[120].mxu1 %v15907_v39 }
 0x5a7   : > { %5602 = vmatprep.mubr.bf16.mxu1 %v15907_v39 }
 0x5ae   : > { %5603 = vmatmul.mubr.bf16.gmra.mrb[124].mxu1 %v15907_v39  ;;  %v14168_v39 = vld [vmem:[%s18606_s7 + $0x468] sm:$0xff]  }
 0x5af   : > { %12739 = vmatprep.subr.bf16.mxu1 %v14168_v39 }
 0x5b0   : > { %12740 = vmatpush3.bf16.msra.mxu1 %v14169_v26 }
 0x5b1   : > { %12741 = vmatprep.subr.bf16.mxu1 %v14172_v45 }
 0x5b4   : > { %12742 = vmatpush3.bf16.msra.mxu1 %v14173_v10 }
 0x5b5   : > { %12743 = vmatprep.subr.bf16.mxu1 %v14174_v47 }
 0x5b8   : > { %12744 = vmatpush3.bf16.msra.mxu1 %v14175_v41 }
 0x5b9   : > { %12869 = vmatprep.subr.bf16.mxu1 %v14186_v28 }
 0x641   : > { %v5524_v8 = vpop.f32.mrb[92].mxu1 }
 0x642   : > { %v5661_v4 = vadd.f32 %v16167_v14, %v5524_v8  ;;  %v5526_v23 = vpop.f32.mrb[93].mxu1 }
 0x643   : > { %v5662_v44 = vadd.f32 %v16169_v40, %v5526_v23  ;;  %v5528_v33 = vpop.f32.mrb[94].mxu1 }
 0x644   : > { %v5697_v20 = vmax.f32 %v5661_v4, 0.0  ;;  %v5663_v61 = vadd.f32 %v16167_v14, %v5528_v33  ;;  %v5530_v49 = vpop.f32.mrb[95].mxu1 }
 0x645   : > { %v5698_v58 = vmax.f32 %v5662_v44, 0.0  ;;  %v5664_v17 = vadd.f32 %v16169_v40, %v5530_v49 }
 0x646   : > { %5773 = vst [vmem:[#allocation2 + $0x20] sm:$0xff] %v5697_v20  ;;  %v5699_v13 = vmax.f32 %v5663_v61, 0.0  ;;  %v5879_v21 = vpack.c.bf16 %v5697_v20, %v5841_v59 }
 0x647   : > { %5774 = vst [vmem:[#allocation2 + $0x28] sm:$0xff] %v5698_v58  ;;  %v5700_v29 = vmax.f32 %v5664_v17, 0.0  ;;  %v5880_v37 = vpack.c.bf16 %v5698_v58, %v5842_v16 }
 0x648   : > { %v5735_v30 = vsel %vm15169_vm2, %v5699_v13, 0.0  ;;  %v5900_v27 = vshrl.u32 %v5879_v21, 16  ;;  %v5903_v15 = vshll.u32 %v5879_v21, 16  ;;  %v14171_v13 = vld [vmem:[%s18606_s7 + $0x280] sm:$0xff]  }
 0x649   : > { %5775 = vst [vmem:[#allocation2 + $0x30] sm:$0xff] %v5735_v30  ;;  %v5736_v12 = vsel %vm15169_vm2, %v5700_v29, 0.0  ;;  %v5534_v43 = vpop.f32.mrb[96].mxu1  ;;  %v5917_v55 = vshrl.u32 %v5880_v37, 16  ;;  %v5920_v3 = vshll.u32 %v5880_v37, 16  ;;  %v14176_v37 = vld [vmem:[%s18606_s7 + $0x2c8] sm:$0xff]  }
 0x64a   : > { %5776 = vst [vmem:[#allocation2 + $0x38] sm:$0xff] %v5736_v12  ;;  %v5665_v1 = vadd.f32 %v16167_v14, %v5534_v43  ;;  %v5536_v2 = vpop.f32.mrb[97].mxu1  ;;  %v5902_v48 = vrot.slane %v5900_v27, 3  ;;  %v5905_v11 = vrot.slane %v5903_v15, 4  ;;  %vm18818_vm2 = vsmask.f32 4352 }
 0x64b   : > { %v5666_v9 = vadd.f32 %v16169_v40, %v5536_v2  ;;  %v5538_v56 = vpop.f32.mrb[98].mxu1  ;;  %v5919_v52 = vrot.slane %v5917_v55, 3  ;;  %v5922_v26 = vrot.slane %v5920_v3, 4  ;;  %vm18825_vm9 = vmmov %vm18818_vm2 }
 0x64c   : > { %v5701_v34 = vmax.f32 %v5665_v1, 0.0  ;;  %v5667_v31 = vadd.f32 %v16167_v14, %v5538_v56  ;;  %v5540_v62 = vpop.f32.mrb[99].mxu1  ;;  %v5906_v33 = vor.u32 %v5905_v11, %v5902_v48  ;;  %vm18830_vm0 = vmmov %vm18818_vm2 }
 0x64d   : > { %v5702_v57 = vmax.f32 %v5666_v9, 0.0  ;;  %v5668_v32 = vadd.f32 %v16169_v40, %v5540_v62  ;;  %v5923_v59 = vor.u32 %v5922_v26, %v5919_v52  ;;  %v14179_v26 = vld [vmem:[%s18606_s7 + $0x290] sm:$0xff]   ;;  %vm18833_vm14 = vmmov %vm18830_vm0 }
 0x64e   : > { %5777 = vst [vmem:[#allocation2 + $0x40] sm:$0xff] %v5701_v34  ;;  %v5703_v51 = vmax.f32 %v5667_v31, 0.0  ;;  %v5881_v5 = vpack.c.bf16 %v5701_v34, %v5735_v30  ;;  %vm18835_vm13 = vmmov %vm18830_vm0 }
 0x64f   : > { %5778 = vst [vmem:[#allocation2 + $0x48] sm:$0xff] %v5702_v57  ;;  %v5704_v35 = vmax.f32 %v5668_v32, 0.0  ;;  %v5882_v46 = vpack.c.bf16 %v5702_v57, %v5736_v12  ;;  %v14177_v57 = vld [vmem:[%s18606_s7 + $0x288] sm:$0xff]   ;;  %v14192_v12 = vld [vmem:[%s18606_s7 + $0x550] sm:$0xff]   ;;  %vm18838_vm15 = vmmov %vm18830_vm0 }
 0x650   : > { %v5739_v60 = vsel %vm15181_vm4, %v5703_v51, 0.0  ;;  %v5908_v36 = vshrl.u32 %v5881_v5, 16  ;;  %v5911_v0 = vshll.u32 %v5881_v5, 16 }
 0x651   : > { %5779 = vst [vmem:[#allocation2 + $0x50] sm:$0xff] %v5739_v60  ;;  %v5740_v39 = vsel %vm15181_vm4, %v5704_v35, 0.0  ;;  %v5544_v24 = vpop.f32.mrb[100].mxu1  ;;  %v5925_v45 = vshrl.u32 %v5882_v46, 16  ;;  %v5928_v10 = vshll.u32 %v5882_v46, 16  ;;  %vm18820_vm4 = vmmov %vm18818_vm2  ;;  %v14178_v35 = vld [vmem:[%s18606_s7 + $0x2d0] sm:$0xff]  }
 0x652   : > { %5780 = vst [vmem:[#allocation2 + $0x58] sm:$0xff] %v5740_v39  ;;  %v5669_v47 = vadd.f32 %v16167_v14, %v5544_v24  ;;  %v5546_v41 = vpop.f32.mrb[101].mxu1  ;;  %v5910_v6 = vrot.slane %v5908_v36, 3  ;;  %v5913_v28 = vrot.slane %v5911_v0, 4 }
 0x653   : > { %v5670_v42 = vadd.f32 %v16169_v40, %v5546_v41  ;;  %v5548_v54 = vpop.f32.mrb[102].mxu1  ;;  %v5927_v25 = vrot.slane %v5925_v45, 3  ;;  %v5930_v8 = vrot.slane %v5928_v10, 4  ;;  %v14187_v45 = vld [vmem:[%s18606_s7 + $0x500] sm:$0xff]  }
 0x654   : > { %v5705_v4 = vmax.f32 %v5669_v47, 0.0  ;;  %v5671_v23 = vadd.f32 %v16167_v14, %v5548_v54  ;;  %v5550_v44 = vpop.f32.mrb[103].mxu1  ;;  %v5914_v20 = vor.u32 %v5913_v28, %v5910_v6  ;;  %v14180_v6 = vld [vmem:[%s18606_s7 + $0x2d8] sm:$0xff]   ;;  %v14188_v28 = vld [vmem:[%s18606_s7 + $0x548] sm:$0xff]  }
 0x655   : > { %v5706_v61 = vmax.f32 %v5670_v42, 0.0  ;;  %v5672_v49 = vadd.f32 %v16169_v40, %v5550_v44  ;;  %v5931_v58 = vor.u32 %v5930_v8, %v5927_v25 }
 0x656   : > { %5781 = vst [vmem:[#allocation2 + $0x60] sm:$0xff] %v5705_v4  ;;  %v5707_v17 = vmax.f32 %v5671_v23, 0.0  ;;  %v16192_v16 = vsel %vm18818_vm2, %v5906_v33, %v5914_v20  ;;  %v5883_v29 = vpack.c.bf16 %v5705_v4, %v5739_v60 }
 0x657   : > { %18819 = vst [vmem:[#allocation21_spill] sm:$0xff] %v16192_v16  ;;  %5782 = vst [vmem:[#allocation2 + $0x68] sm:$0xff] %v5706_v61  ;;  %v5708_v21 = vmax.f32 %v5672_v49, 0.0  ;;  %v16198_v50 = vsel %vm18820_vm4, %v5923_v59, %v5931_v58  ;;  %v5884_v30 = vpack.c.bf16 %v5706_v61, %v5740_v39 }
 0x658   : > { %18821 = vst [vmem:[#allocation23_spill] sm:$0xff] %v16198_v50  ;;  %v5743_v43 = vsel %vm15205_vm6, %v5707_v17, 0.0  ;;  %7336 = vmatprep.mubr.bf16.mxu0 %v16198_v50  ;;  %v5934_v1 = vshrl.u32 %v5883_v29, 16  ;;  %v5937_v2 = vshll.u32 %v5883_v29, 16  ;;  %v14190_v17 = vld [vmem:[%s18606_s7 + $0x508] sm:$0xff]  }
 0x659   : > { %5783 = vst [vmem:[#allocation2 + $0x70] sm:$0xff] %v5743_v43  ;;  %v16208_v9 = vsel %vm15205_vm6, %v5708_v21, 0.0  ;;  %v5554_v56 = vpop.f32.mrb[104].mxu1  ;;  %7337 = vmatmul.mubr.bf16.vlgmr.msra.gmra.mrb[88].mxu0 %v16192_v16  ;;  %v5943_v27 = vshrl.u32 %v5884_v30, 16  ;;  %v5946_v15 = vshll.u32 %v5884_v30, 16  ;;  %vm18823_vm6 = vmmov %vm18818_vm2 }
 0x65a   : > { %5784 = vst [vmem:[#allocation2 + $0x78] sm:$0xff] %v16208_v9  ;;  %v5673_v34 = vadd.f32 %v16167_v14, %v5554_v56  ;;  %v5556_v31 = vpop.f32.mrb[105].mxu1  ;;  %12240 = vmatpush3.bf16.msra.mxu0 %v14171_v13  ;;  %v5936_v62 = vrot.slane %v5934_v1, 3  ;;  %v5939_v55 = vrot.slane %v5937_v2, 4 }
 0x65b   : > { %v5674_v32 = vadd.f32 %v16169_v40, %v5556_v31  ;;  %v5558_v3 = vpop.f32.mrb[106].mxu1  ;;  %v5945_v51 = vrot.slane %v5943_v27, 3  ;;  %v5948_v5 = vrot.slane %v5946_v15, 4  ;;  %12241 = vmatprep.subr.bf16.mxu0 %v14176_v37  ;;  %v14182_v37 = vld [vmem:[%s18606_s7 + $0x2e0] sm:$0xff]  }
 0x65c   : > { %v5709_v46 = vmax.f32 %v5673_v34, 0.0  ;;  %v5675_v48 = vadd.f32 %v16167_v14, %v5558_v3  ;;  %v5560_v11 = vpop.f32.mrb[107].mxu1  ;;  %v5940_v18 = vor.u32 %v5939_v55, %v5936_v62 }
 0x65d   : > { %v5710_v60 = vmax.f32 %v5674_v32, 0.0  ;;  %v5676_v52 = vadd.f32 %v16169_v40, %v5560_v11  ;;  %v5949_v36 = vor.u32 %v5948_v5, %v5945_v51  ;;  %v14193_v32 = vld [vmem:[%s18606_s7 + $0x510] sm:$0xff]  }
 0x65e   : > { %5785 = vst [vmem:[#allocation2 + $0x80] sm:$0xff] %v5709_v46  ;;  %v5711_v0 = vmax.f32 %v5675_v48, 0.0  ;;  %v16223_v39 = vsel %vm18823_vm6, %v5914_v20, %v5940_v18  ;;  %12242 = vmatpush3.bf16.msra.mxu0 %v14177_v57  ;;  %v5885_v24 = vpack.c.bf16 %v5709_v46, %v5743_v43  ;;  %v14183_v57 = vld [vmem:[%s18606_s7 + $0x2a0] sm:$0xff]   ;;  %v14194_v46 = vld [vmem:[%s18606_s7 + $0x558] sm:$0xff]   ;;  %v18831_v48 = vld [vmem:[#allocation22_spill] sm:$0xff] }
 0x65f   : > { %18824 = vst [vmem:[#allocation24_spill] sm:$0xff] %v16223_v39  ;;  %5786 = vst [vmem:[#allocation2 + $0x88] sm:$0xff] %v5710_v60  ;;  %v5712_v10 = vmax.f32 %v5676_v52, 0.0  ;;  %v16232_v47 = vsel %vm18825_vm9, %v5931_v58, %v5949_v36  ;;  %v5886_v41 = vpack.c.bf16 %v5710_v60, %v16208_v9  ;;  %12243 = vmatprep.subr.bf16.mxu0 %v14178_v35  ;;  %v14181_v58 = vld [vmem:[%s18606_s7 + $0x298] sm:$0xff]   ;;  %v14184_v35 = vld [vmem:[%s18606_s7 + $0x2e8] sm:$0xff]   ;;  %vm18832_vm1 = vnez %v18831_v48 }
 0x660   : > { %18826 = vst [vmem:[#allocation31_spill] sm:$0xff] %v16232_v47  ;;  %v5747_v54 = vsel %vm15259_vm11, %v5711_v0, 0.0  ;;  %7344 = vmatprep.mubr.bf16.mxu0 %v16232_v47  ;;  %9145 = vmatprep.mubr.bf16.mxu1 %v16232_v47  ;;  %v5952_v25 = vshrl.u32 %v5885_v24, 16  ;;  %v5955_v8 = vshll.u32 %v5885_v24, 16  ;;  %vm18844_vm6 = vmmov %vm18830_vm0  ;;  %v16551_v47 = vld [vmem:[#allocation2 + $0x38] sm:$0xff] }
 0x661   : > { %5787 = vst [vmem:[#allocation2 + $0x90] sm:$0xff] %v5747_v54  ;;  %v5748_v4 = vsel %vm15259_vm11, %v5712_v10, 0.0  ;;  %v5564_v23 = vpop.f32.mrb[108].mxu1  ;;  %7345 = vmatmul.mubr.bf16.gmra.mrb[92].mxu0 %v16223_v39  ;;  %9146 = vmatmul.mubr.bf16.vlgmr.msra.gmra.mrb[128].mxu1 %v16223_v39  ;;  %v5961_v44 = vshrl.u32 %v5886_v41, 16  ;;  %v5964_v33 = vshll.u32 %v5886_v41, 16  ;;  %vm18828_vm11 = vmmov %vm18818_vm2 }
 0x662   : > { %5788 = vst [vmem:[#allocation2 + $0x98] sm:$0xff] %v5748_v4  ;;  %v5677_v20 = vadd.f32 %v16167_v14, %v5564_v23  ;;  %v5566_v61 = vpop.f32.mrb[109].mxu1  ;;  %v5954_v49 = vrot.slane %v5952_v25, 3  ;;  %v5957_v59 = vrot.slane %v5955_v8, 4  ;;  %12244 = vmatpush3.bf16.msra.mxu0 %v14179_v26  ;;  %12870 = vmatpush3.bf16.msra.mxu1 %v14187_v45  ;;  %v14198_v23 = vld [vmem:[%s18606_s7 + $0x560] sm:$0xff]   ;;  %vm18840_vm2 = vmmov %vm18830_vm0 }
 0x663   : > { %v5678_v13 = vadd.f32 %v16169_v40, %v5566_v61  ;;  %v5568_v29 = vpop.f32.mrb[110].mxu1  ;;  %v5963_v21 = vrot.slane %v5961_v44, 3  ;;  %v5966_v30 = vrot.slane %v5964_v33, 4  ;;  %12245 = vmatprep.subr.bf16.mxu0 %v14180_v6  ;;  %12871 = vmatprep.subr.bf16.mxu1 %v14188_v28  ;;  %v14185_v6 = vld [vmem:[%s18606_s7 + $0x2a8] sm:$0xff]   ;;  %v14195_v28 = vld [vmem:[%s18606_s7 + $0x518] sm:$0xff]   ;;  %vm18846_vm9 = vmmov %vm18830_vm0 }
 0x664   : > { %v5713_v43 = vmax.f32 %v5677_v20, 0.0  ;;  %v5679_v1 = vadd.f32 %v16167_v14, %v5568_v29  ;;  %v5570_v2 = vpop.f32.mrb[111].mxu1  ;;  %v5958_v56 = vor.u32 %v5957_v59, %v5954_v49 }
 0x665   : > { %v16264_v27 = vmax.f32 %v5678_v13, 0.0  ;;  %v16267_v15 = vadd.f32 %v16169_v40, %v5570_v2  ;;  %v16269_v34 = vor.u32 %v5966_v30, %v5963_v21  ;;  %v14191_v21 = vld [vmem:[%s18606_s7 + $0x2b0] sm:$0xff]   ;;  %v14199_v30 = vld [vmem:[%s18606_s7 + $0x520] sm:$0xff]   ;;  %v14200_v2 = vld [vmem:[%s18606_s7 + $0x568] sm:$0xff]  }
 0x666   : > { %5789 = vst [vmem:[#allocation2 + $0xa0] sm:$0xff] %v5713_v43  ;;  %v5715_v31 = vmax.f32 %v5679_v1, 0.0  ;;  %v16272_v62 = vsel %vm18828_vm11, %v5940_v18, %v5958_v56  ;;  %v5887_v55 = vpack.c.bf16 %v5713_v43, %v5747_v54  ;;  %12246 = vmatpush3.bf16.msra.mxu0 %v14181_v58  ;;  %12872 = vmatpush3.bf16.msra.mxu1 %v14190_v17  ;;  %v14196_v1 = vld [vmem:[%s18606_s7 + $0x2f8] sm:$0xff]  }
 0x667   : > { %18829 = vst [vmem:[#allocation26_spill] sm:$0xff] %v16272_v62  ;;  %5790 = vst [vmem:[#allocation2 + $0xa8] sm:$0xff] %v16264_v27  ;;  %v18647_v3 = vmax.f32 %v16267_v15, 0.0  ;;  %v16284_v51 = vsel %vm18830_vm0, %v5949_v36, %v16269_v34  ;;  %v5888_v5 = vpack.c.bf16 %v16264_v27, %v5748_v4  ;;  %12247 = vmatprep.subr.bf16.mxu0 %v14182_v37  ;;  %12873 = vmatprep.subr.bf16.mxu1 %v14192_v12  ;;  %v14189_v4 = vld [vmem:[%s18606_s7 + $0x2f0] sm:$0xff]  }
 0x668   : > { %v16295_v11 = vsel %vm18832_vm1, %v5715_v31, 0.0  ;;  %7352 = vmatprep.mubr.bf16.mxu0 %v16284_v51  ;;  %9153 = vmatprep.mubr.bf16.mxu1 %v16284_v51  ;;  %v5970_v18 = vshrl.u32 %v5887_v55, 16  ;;  %v5973_v60 = vshll.u32 %v5887_v55, 16 }
 0x669   : > { %5791 = vst [vmem:[#allocation2 + $0xb0] sm:$0xff] %v16295_v11  ;;  %v16304_v52 = vsel %vm18832_vm1, %v18647_v3, 0.0  ;;  %v5574_v36 = vpop.f32.mrb[112].mxu1  ;;  %7353 = vmatmul.mubr.bf16.gmra.mrb[96].mxu0 %v16272_v62  ;;  %9154 = vmatmul.mubr.bf16.gmra.mrb[132].mxu1 %v16272_v62  ;;  %v5979_v0 = vshrl.u32 %v5888_v5, 16  ;;  %v5982_v24 = vshll.u32 %v5888_v5, 16  ;;  %vm18851_vm1 = vmmov %vm18830_vm0 }
 0x66a   : > { %5792 = vst [vmem:[#allocation2 + $0xb8] sm:$0xff] %v16304_v52  ;;  %v5681_v26 = vadd.f32 %v16167_v14, %v5574_v36  ;;  %v5576_v45 = vpop.f32.mrb[113].mxu1  ;;  %v5972_v10 = vrot.slane %v5970_v18, 3  ;;  %v5975_v41 = vrot.slane %v5973_v60, 4  ;;  %12248 = vmatpush3.bf16.msra.mxu0 %v14183_v57  ;;  %12874 = vmatpush3.bf16.msra.mxu1 %v14193_v32  ;;  %v14201_v60 = vld [vmem:[%s18606_s7 + $0x528] sm:$0xff]  }
 0x66b   : > { %v5682_v42 = vadd.f32 %v16169_v40, %v5576_v45  ;;  %v5578_v54 = vpop.f32.mrb[114].mxu1  ;;  %v5981_v25 = vrot.slane %v5979_v0, 3  ;;  %v5984_v8 = vrot.slane %v5982_v24, 4  ;;  %12249 = vmatprep.subr.bf16.mxu0 %v14184_v35  ;;  %12875 = vmatprep.subr.bf16.mxu1 %v14194_v46  ;;  %v14202_v45 = vld [vmem:[%s18606_s7 + $0x340] sm:$0xff]  }
 0x66c   : > { %v16323_v44 = vmax.f32 %v5681_v26, 0.0  ;;  %v16326_v33 = vadd.f32 %v16167_v14, %v5578_v54  ;;  %v5580_v20 = vpop.f32.mrb[115].mxu1  ;;  %v5976_v61 = vor.u32 %v5975_v41, %v5972_v10  ;;  %v14204_v10 = vld [vmem:[%s18606_s7 + $0x570] sm:$0xff]  }
 0x66d   : > { %v16328_v49 = vmax.f32 %v5682_v42, 0.0  ;;  %v16331_v59 = vadd.f32 %v16169_v40, %v5580_v20  ;;  %v16333_v58 = vor.u32 %v5984_v8, %v5981_v25 }
 0x66e   : > { %5793 = vst [vmem:[#allocation2 + $0xc0] sm:$0xff] %v16323_v44  ;;  %v18644_v17 = vmax.f32 %v16326_v33, 0.0  ;;  %v16338_v13 = vsel %vm18833_vm14, %v5958_v56, %v5976_v61  ;;  %v5889_v29 = vpack.c.bf16 %v16323_v44, %v16295_v11  ;;  %12250 = vmatpush3.bf16.msra.mxu0 %v14185_v6  ;;  %12876 = vmatpush3.bf16.msra.mxu1 %v14195_v28 }
 0x66f   : > { %18834 = vst [vmem:[#allocation22_spill] sm:$0xff] %v16338_v13  ;;  %5794 = vst [vmem:[#allocation2 + $0xc8] sm:$0xff] %v16328_v49  ;;  %v18645_v37 = vmax.f32 %v16331_v59, 0.0  ;;  %v16353_v12 = vsel %vm18835_vm13, %v16269_v34, %v16333_v58  ;;  %v5890_v43 = vpack.c.bf16 %v16328_v49, %v16304_v52  ;;  %12251 = vmatprep.subr.bf16.mxu0 %v14189_v4  ;;  %12877 = vmatprep.subr.bf16.mxu1 %v14198_v23 }
 0x670   : > { %18836 = vst [vmem:[#allocation32_spill] sm:$0xff] %v16353_v12  ;;  %v16367_v56 = vsel %vm18837_vm10, %v18644_v17, 0.0  ;;  %7360 = vmatprep.mubr.bf16.mxu0 %v16353_v12  ;;  %9161 = vmatprep.mubr.bf16.mxu1 %v16353_v12  ;;  %v5988_v34 = vshrl.u32 %v5889_v29, 16  ;;  %v5991_v31 = vshll.u32 %v5889_v29, 16  ;;  %v14205_v29 = vld [vmem:[%s18606_s7 + $0x530] sm:$0xff]   ;;  %vm18855_vm13 = vmmov %vm18830_vm0 }
 0x671   : > { %5795 = vst [vmem:[#allocation2 + $0xd0] sm:$0xff] %v16367_v56  ;;  %v16376_v55 = vsel %vm18837_vm10, %v18645_v37, 0.0  ;;  %v5584_v57 = vpop.f32.mrb[116].mxu1  ;;  %7361 = vmatmul.mubr.bf16.gmra.mrb[100].mxu0 %v16338_v13  ;;  %9162 = vmatmul.mubr.bf16.gmra.mrb[136].mxu1 %v16338_v13  ;;  %v5997_v32 = vshrl.u32 %v5890_v43, 16  ;;  %v6000_v5 = vshll.u32 %v5890_v43, 16  ;;  %v14206_v43 = vld [vmem:[%s18606_s7 + $0x578] sm:$0xff]   ;;  %vm18857_vm10 = vmmov %vm18830_vm0 }
 0x672   : > { %5796 = vst [vmem:[#allocation2 + $0xd8] sm:$0xff] %v16376_v55  ;;  %v5685_v35 = vadd.f32 %v16167_v14, %v5584_v57  ;;  %v5586_v46 = vpop.f32.mrb[117].mxu1  ;;  %v5990_v48 = vrot.slane %v5988_v34, 3  ;;  %v5993_v18 = vrot.slane %v5991_v31, 4  ;;  %12252 = vmatpush3.bf16.msra.mxu0 %v14191_v21  ;;  %12878 = vmatpush3.bf16.msra.mxu1 %v14199_v30 }
 0x673   : > { %v5686_v36 = vadd.f32 %v16169_v40, %v5586_v46  ;;  %v5588_v0 = vpop.f32.mrb[118].mxu1  ;;  %v5999_v24 = vrot.slane %v5997_v32, 3  ;;  %v6002_v26 = vrot.slane %v6000_v5, 4  ;;  %12253 = vmatprep.subr.bf16.mxu0 %v14196_v1  ;;  %12879 = vmatprep.subr.bf16.mxu1 %v14200_v2  ;;  %v16428_v1 = vpack.c.bf16 %v16304_v52, %v16264_v27  ;;  %v18842_v2 = vld [vmem:[#allocation25_spill] sm:$0xff] }
 0x674   : > { %v16395_v41 = vmax.f32 %v5685_v35, 0.0  ;;  %v16398_v6 = vadd.f32 %v16167_v14, %v5588_v0  ;;  %v5590_v28 = vpop.f32.mrb[119].mxu1  ;;  %v5994_v42 = vor.u32 %v5993_v18, %v5990_v48  ;;  %vm18843_vm4 = vnez %v18842_v2 }
 0x675   : > { %v16400_v54 = vmax.f32 %v5686_v36, 0.0  ;;  %v16403_v25 = vadd.f32 %v16169_v40, %v5590_v28  ;;  %v6003_v8 = vor.u32 %v6002_v26, %v5999_v24  ;;  %v14218_v26 = vld [vmem:[%s18606_s7 + $0x640] sm:$0xff]  }
 0x676   : > { %5797 = vst [vmem:[#allocation2 + $0xe0] sm:$0xff] %v16395_v41  ;;  %v18642_v4 = vmax.f32 %v16398_v6, 0.0  ;;  %v16408_v23 = vsel %vm18838_vm15, %v5976_v61, %v5994_v42  ;;  %v5891_v20 = vpack.c.bf16 %v16395_v41, %v16367_v56  ;;  %12254 = vmatpush3.bf16.msra.mxu0 %v14197_v19  ;;  %12880 = vmatpush3.bf16.msra.mxu1 %v14201_v60  ;;  %v14207_v19 = vld [vmem:[%s18606_s7 + $0x538] sm:$0xff]   ;;  %vm18859_vm15 = vsmask.f32 7424 }
 0x677   : > { %18839 = vst [vmem:[#allocation33_spill] sm:$0xff] %v16408_v23  ;;  %5798 = vst [vmem:[#allocation2 + $0xe8] sm:$0xff] %v16400_v54  ;;  %v18643_v21 = vmax.f32 %v16403_v25, 0.0  ;;  %v16419_v30 = vsel %vm18840_vm2, %v16333_v58, %v6003_v8  ;;  %v5892_v61 = vpack.c.bf16 %v16400_v54, %v16376_v55  ;;  %12309 = vmatprep.subr.bf16.mxu0 %v14202_v45  ;;  %12881 = vmatprep.subr.bf16.mxu1 %v14204_v10 }
 0x678   : > { %18841 = vst [vmem:[#allocation34_spill] sm:$0xff] %v16419_v30  ;;  %v16434_v34 = vsel %vm18843_vm4, %v18642_v4, 0.0  ;;  %7368 = vmatprep.mubr.bf16.mxu0 %v16419_v30  ;;  %9169 = vmatprep.mubr.bf16.mxu1 %v16419_v30  ;;  %v6006_v58 = vshrl.u32 %v5891_v20, 16  ;;  %v6009_v31 = vshll.u32 %v5891_v20, 16  ;;  %vm18862_vm2 = vmmov %vm18859_vm15 }
 0x679   : > { %5799 = vst [vmem:[#allocation2 + $0xf0] sm:$0xff] %v16434_v34  ;;  %v16443_v52 = vsel %vm18843_vm4, %v18643_v21, 0.0  ;;  %v5594_v57 = vpop.f32.mrb[120].mxu1  ;;  %7369 = vmatmul.mubr.bf16.gmra.mrb[104].mxu0 %v16408_v23  ;;  %9170 = vmatmul.mubr.bf16.gmra.mrb[140].mxu1 %v16408_v23  ;;  %v6015_v32 = vshrl.u32 %v5892_v61, 16  ;;  %v6018_v5 = vshll.u32 %v5892_v61, 16  ;;  %v16506_v21 = vpack.c.bf16 %v16376_v55, %v16328_v49  ;;  %vm18863_vm4 = vmmov %vm18862_vm2 }
 0x67a   : > { %5800 = vst [vmem:[#allocation2 + $0xf8] sm:$0xff] %v16443_v52  ;;  %v5689_v35 = vadd.f32 %v16167_v14, %v5594_v57  ;;  %v5596_v46 = vpop.f32.mrb[121].mxu1  ;;  %v6008_v48 = vrot.slane %v6006_v58, 3  ;;  %v6011_v18 = vrot.slane %v6009_v31, 4  ;;  %12882 = vmatpush3.bf16.msra.mxu1 %v14205_v29  ;;  %v16473_v57 = vld [vmem:[#allocation2 + $0xa0] sm:$0xff] }
 0x67b   : > { %v5690_v60 = vadd.f32 %v16169_v40, %v5596_v46  ;;  %v5598_v36 = vpop.f32.mrb[122].mxu1  ;;  %v6017_v0 = vrot.slane %v6015_v32, 3  ;;  %v6020_v24 = vrot.slane %v6018_v5, 4  ;;  %12883 = vmatprep.subr.bf16.mxu1 %v14206_v43 }
 0x67c   : > { %v16456_v45 = vmax.f32 %v5689_v35, 0.0  ;;  %v16459_v10 = vadd.f32 %v16167_v14, %v5598_v36  ;;  %v5600_v28 = vpop.f32.mrb[123].mxu1  ;;  %v6012_v20 = vor.u32 %v6011_v18, %v6008_v48 }
 0x67d   : > { %v16461_v29 = vmax.f32 %v5690_v60, 0.0  ;;  %v16464_v61 = vadd.f32 %v16169_v40, %v5600_v28  ;;  %v6021_v2 = vor.u32 %v6020_v24, %v6017_v0  ;;  %v6231_v0 = vpack.c.bf16 %v16295_v11, %v16473_v57 }
 0x67e   : > { %5801 = vst [vmem:[#allocation2 + $0x100] sm:$0xff] %v16456_v45  ;;  %v18640_v43 = vmax.f32 %v16459_v10, 0.0  ;;  %v16469_v58 = vsel %vm18844_vm6, %v5994_v42, %v6012_v20  ;;  %v5893_v31 = vpack.c.bf16 %v16456_v45, %v16434_v34  ;;  %12884 = vmatpush3.bf16.msra.mxu1 %v14207_v19  ;;  %v18848_v42 = vld [vmem:[#allocation27_spill] sm:$0xff]  ;;  %vm18864_vm6 = vmmov %vm18830_vm0 }
 0x67f   : > { %18845 = vst [vmem:[#allocation25_spill] sm:$0xff] %v16469_v58  ;;  %5802 = vst [vmem:[#allocation2 + $0x108] sm:$0xff] %v16461_v29  ;;  %v18641_v32 = vmax.f32 %v16464_v61, 0.0  ;;  %v16478_v5 = vsel %vm18846_vm9, %v6003_v8, %v6021_v2  ;;  %v5894_v35 = vpack.c.bf16 %v16461_v29, %v16443_v52  ;;  %13009 = vmatprep.subr.bf16.mxu1 %v14218_v26  ;;  %vm18849_vm11 = vnez %v18848_v42 }
 0x680   : > { %18847 = vst [vmem:[#allocation35_spill] sm:$0xff] %v16478_v5  ;;  %v16486_v46 = vsel %vm18849_vm11, %v18640_v43, 0.0  ;;  %7376 = vmatprep.mubr.bf16.mxu0 %v16478_v5  ;;  %9177 = vmatprep.mubr.bf16.mxu1 %v16478_v5  ;;  %v6024_v48 = vshrl.u32 %v5893_v31, 16  ;;  %v6027_v18 = vshll.u32 %v5893_v31, 16  ;;  %vm18866_vm9 = vmmov %vm18830_vm0 }
 0x681   : > { %5803 = vst [vmem:[#allocation2 + $0x110] sm:$0xff] %v16486_v46  ;;  %v16495_v8 = vsel %vm18849_vm11, %v18641_v32, 0.0  ;;  %v5604_v19 = vpop.f32.mrb[124].mxu1  ;;  %7377 = vmatmul.mubr.bf16.gmra.mrb[108].mxu0 %v16469_v58  ;;  %9178 = vmatmul.mubr.bf16.gmra.mrb[144].mxu1 %v16469_v58  ;;  %v6033_v60 = vshrl.u32 %v5894_v35, 16  ;;  %v6036_v36 = vshll.u32 %v5894_v35, 16  ;;  %vm18869_vm11 = vmmov %vm18862_vm2 }
 0x682   : > { %5804 = vst [vmem:[#allocation2 + $0x118] sm:$0xff] %v16495_v8  ;;  %v5693_v24 = vadd.f32 %v16167_v14, %v5604_v19  ;;  %v5606_v26 = vpop.f32.mrb[125].mxu1  ;;  %v6026_v28 = vrot.slane %v6024_v48, 3  ;;  %v6029_v31 = vrot.slane %v6027_v18, 4 }
 0x683   : > { %v5694_v42 = vadd.f32 %v16169_v40, %v5606_v26  ;;  %v5608_v43 = vpop.f32.mrb[126].mxu1  ;;  %v6035_v32 = vrot.slane %v6033_v60, 3  ;;  %v6038_v4 = vrot.slane %v6036_v36, 4  ;;  %v6303_v26 = vshll.u32 %v6231_v0, 16 }
 0x684   : > { %v16508_v35 = vmax.f32 %v5693_v24, 0.0  ;;  %v16511_v11 = vadd.f32 %v16167_v14, %v5608_v43  ;;  %v5610_v17 = vpop.f32.mrb[127].mxu1  ;;  %v6030_v37 = vor.u32 %v6029_v31, %v6026_v28 }
 0x685   : > { %v16513_v19 = vmax.f32 %v5694_v42, 0.0  ;;  %v16516_v48 = vadd.f32 %v16169_v40, %v5610_v17  ;;  %v6039_v18 = vor.u32 %v6038_v4, %v6035_v32  ;;  %v18853_v17 = vld [vmem:[#allocation28_spill] sm:$0xff]  ;;  %v16547_v31 = vrot.slane %v6303_v26, 1 }
 0x686   : > { %5805 = vst [vmem:[#allocation2 + $0x120] sm:$0xff] %v16508_v35  ;;  %v18646_v60 = vmax.f32 %v16511_v11, 0.0  ;;  %v16521_v55 = vsel %vm18830_vm0, %v6012_v20, %v6030_v37  ;;  %v5895_v14 = vpack.c.bf16 %v16508_v35, %v16486_v46  ;;  %vm18854_vm14 = vnez %v18853_v17  ;;  %vm18870_vm0 = vmmov %vm18862_vm2 }
 0x687   : > { %18850 = vst [vmem:[#allocation27_spill] sm:$0xff] %v16521_v55  ;;  %5806 = vst [vmem:[#allocation2 + $0x128] sm:$0xff] %v16513_v19  ;;  %v18650_v43 = vmax.f32 %v16516_v48, 0.0  ;;  %v16528_v36 = vsel %vm18851_vm1, %v6021_v2, %v6039_v18  ;;  %v5896_v40 = vpack.c.bf16 %v16513_v19, %v16495_v8  ;;  %v6315_v17 = vshrl.u32 %v6231_v0, 16 }
 0x688   : > { %18852 = vst [vmem:[#allocation36_spill] sm:$0xff] %v16528_v36  ;;  %v16536_v4 = vsel %vm18854_vm14, %v18646_v60, 0.0  ;;  %7384 = vmatprep.mubr.bf16.mxu0 %v16528_v36  ;;  %9185 = vmatprep.mubr.bf16.mxu1 %v16528_v36  ;;  %v6042_v20 = vshrl.u32 %v5895_v14, 16  ;;  %v6045_v32 = vshll.u32 %v5895_v14, 16  ;;  %v6233_v14 = vpack.c.bf16 %v16367_v56, %v16323_v44  ;;  %v6120_v56 = vld [vmem:[#allocation2 + $0x58] sm:$0xff]  ;;  %vm18873_vm1 = vmmov %vm18870_vm0 }
 0x689   : > { %5807 = vst [vmem:[#allocation2 + $0x130] sm:$0xff] %v16536_v4  ;;  %v5768_v2 = vsel %vm18854_vm14, %v18650_v43, 0.0  ;;  %7385 = vmatmul.mubr.bf16.gmra.mrb[112].mxu0 %v16521_v55  ;;  %9186 = vmatmul.mubr.bf16.gmra.mrb[148].mxu1 %v16521_v55  ;;  %v6051_v24 = vshrl.u32 %v5896_v40, 16  ;;  %v6054_v28 = vshll.u32 %v5896_v40, 16  ;;  %v16555_v43 = vpack.c.bf16 %v16443_v52, %v16400_v54  ;;  %vm18875_vm14 = vmmov %vm18870_vm0 }
 0x68a   : > { %5808 = vst [vmem:[#allocation2 + $0x138] sm:$0xff] %v5768_v2  ;;  %v6044_v42 = vrot.slane %v6042_v20, 3  ;;  %v6047_v60 = vrot.slane %v6045_v32, 4  ;;  %v6319_v40 = vshll.u32 %v6233_v14, 16  ;;  %v6317_v50 = vor.u32 %v6315_v17, %v16547_v31  ;;  %v6186_v32 = vld [vmem:[#allocation2 + $0x28] sm:$0xfe] }
 0x68b   : > { %v6053_v3 = vrot.slane %v6051_v24, 3  ;;  %v6056_v39 = vrot.slane %v6054_v28, 4  ;;  %v6235_v20 = vpack.c.bf16 %v16434_v34, %v16395_v41  ;;  %v16567_v24 = vpack.c.bf16 %v16551_v47, %v6186_v32  ;;  %v6118_v41 = vld [vmem:[#allocation2 + $0x48] sm:$0xff]  ;;  %v6119_v34 = vld [vmem:[#allocation2 + $0x50] sm:$0xff]  ;;  %v6117_v32 = vld [vmem:[#allocation2 + $0x40] sm:$0xff] }
 0x68c   : > { %v16557_v16 = vor.u32 %v6047_v60, %v6044_v42  ;;  %v6321_v0 = vrot.slane %v6319_v40, 1  ;;  %v6331_v60 = vshrl.u32 %v6233_v14, 16  ;;  %v16583_v14 = vpack.c.bf16 %v6120_v56, %v6118_v41 }
 0x68d   : > { %v6057_v26 = vor.u32 %v6056_v39, %v6053_v3  ;;  %v6335_v39 = vshll.u32 %v6235_v20, 16  ;;  %v16574_v3 = vpack.c.bf16 %v16495_v8, %v16461_v29  ;;  %v6258_v55 = vshll.u32 %v16567_v24, 16 }
 0x68e   : > { %v16564_v44 = vsel %vm18855_vm13, %v6030_v37, %v16557_v16  ;;  %v16579_v28 = vsel %vm18859_vm15, %v6317_v50, %v6321_v0  ;;  %18861 = vst [vmem:[#allocation39_spill] sm:$0xff] %v16583_v14  ;;  %v6333_v8 = vor.u32 %v6331_v60, %v6321_v0  ;;  %v16588_v58 = vpack.c.bf16 %v6119_v34, %v6117_v32  ;;  %vm18878_vm13 = vmmov %vm18870_vm0 }
 0x68f   : > { %18856 = vst [vmem:[#allocation28_spill] sm:$0xff] %v16564_v44  ;;  %v16570_v52 = vsel %vm18857_vm10, %v6039_v18, %v6057_v26  ;;  %18860 = vst [vmem:[#allocation38_spill] sm:$0xff] %v16579_v28  ;;  %v6337_v17 = vrot.slane %v6335_v39, 1  ;;  %v6347_v56 = vshrl.u32 %v6235_v20, 16  ;;  %v6115_v39 = vld [vmem:[#allocation2 + $0x30] sm:$0xff]  ;;  %v6260_v30 = vrot.slane %v6258_v55, 1 }
 0x690   : > { %18858 = vst [vmem:[#allocation37_spill] sm:$0xff] %v16570_v52  ;;  %7392 = vmatprep.mubr.bf16.mxu0 %v16570_v52  ;;  %9193 = vmatprep.mubr.bf16.mxu1 %v16570_v52  ;;  %v5877_v37 = vld [vmem:[#allocation2 + $0x130] sm:$0x7f]  ;;  %v6237_v52 = vpack.c.bf16 %v16486_v46, %v16456_v45  ;;  %v16595_v45 = vpack.c.bf16 %v5768_v2, %v16513_v19  ;;  %v6185_v20 = vld [vmem:[#allocation2 + $0x20] sm:$0xfe]  ;;  %vm18881_vm10 = vmmov %vm18870_vm0  ;;  %vm18883_vm15 = vcmask 1046528  }
 0x691   : > { %7393 = vmatmul.mubr.bf16.gmra.mrb[116].mxu0 %v16564_v44  ;;  %9194 = vmatmul.mubr.bf16.gmra.mrb[152].mxu1 %v16564_v44  ;;  %v5878_v18 = vld [vmem:[#allocation2 + $0x138] sm:$0x7f]  ;;  %v5897_v42 = vpack.c.bf16 %v5877_v37, %v5877_v37  ;;  %v16591_v5 = vsel %vm18862_vm2, %v6333_v8, %v6337_v17  ;;  %v6349_v34 = vor.u32 %v6347_v56, %v6337_v17  ;;  %v6114_v56 = vld [vmem:[#allocation2 + $0x28] sm:$0xff]  ;;  %vm18885_vm2 = vmmov %vm18870_vm0 }
 0x692   : > { %v5898_v40 = vpack.c.bf16 %v5878_v18, %v5878_v18  ;;  %v6351_v41 = vshll.u32 %v6237_v52, 16  ;;  %v6263_v18 = vshll.u32 %v16583_v14, 16  ;;  %v6223_v13 = vpack.c.bf16 %v6115_v39, %v6185_v20 }
 0x693   : > { %v6060_v36 = vshrl.u32 %v5897_v42, 16  ;;  %v6063_v50 = vshll.u32 %v5897_v42, 16  ;;  %v16597_v42 = vld [vmem:[#allocation2 + $0x68] sm:$0xff]  ;;  %v16623_v55 = vpack.c.bf16 %v16551_v47, %v6114_v56  ;;  %v6200_v47 = vld [vmem:[#allocation2 + $0x98] sm:$0xff]  ;;  %v6113_v56 = vld [vmem:[#allocation2 + $0x20] sm:$0xff] }
 0x694   : > { %v6069_v44 = vshrl.u32 %v5898_v40, 16  ;;  %v6072_v37 = vshll.u32 %v5898_v40, 16  ;;  %v6353_v32 = vrot.slane %v6351_v41, 1  ;;  %v16601_v40 = vpack.c.bf16 %v16536_v4, %v16508_v35  ;;  %v6195_v41 = vld [vmem:[#allocation2 + $0x70] sm:$0xff] }
 0x695   : > { %v6062_v0 = vrot.slane %v6060_v36, 3  ;;  %v6065_v60 = vrot.slane %v6063_v50, 4  ;;  %v16608_v2 = vpack.c.bf16 %v16208_v9, %v16597_v42  ;;  %v6265_v35 = vrot.slane %v6263_v18, 1  ;;  %18868 = vst [vmem:[#allocation42_spill] sm:$0xff] %v16623_v55 }
 0x696   : > { %v6071_v46 = vrot.slane %v6069_v44, 3  ;;  %v6074_v23 = vrot.slane %v6072_v37, 4  ;;  %v16604_v50 = vsel %vm18863_vm4, %v6349_v34, %v6353_v32  ;;  %v6363_v44 = vshrl.u32 %v6237_v52, 16  ;;  %vm18887_vm4 = vmmov %vm18870_vm0 }
 0x697   : > { %v6066_v8 = vor.u32 %v6065_v60, %v6062_v0  ;;  %v6367_v17 = vshll.u32 %v16601_v40, 16  ;;  %v6251_v4 = vshll.u32 %v16588_v58, 16  ;;  %v6246_v0 = vshll.u32 %v6223_v13, 16  ;;  %v16630_v60 = vld [vmem:[#allocation3 + $0x8] sm:$0xff] }
 0x698   : > { %v6075_v36 = vor.u32 %v6074_v23, %v6071_v46  ;;  %v6256_v23 = vshrl.u32 %v16567_v24, 16  ;;  %v6365_v52 = vor.u32 %v6363_v44, %v6353_v32  ;;  %v6193_v46 = vld [vmem:[#allocation2 + $0x60] sm:$0xff] }
 0x699   : > { %v16620_v9 = vsel %vm18866_vm9, %v16557_v16, %v6066_v8  ;;  %v6279_v16 = vshll.u32 %v16608_v2, 16  ;;  %v6253_v34 = vrot.slane %v6251_v4, 1  ;;  %v6248_v8 = vrot.slane %v6246_v0, 1  ;;  %vm18891_vm9 = vmmov %vm18870_vm0 }
 0x69a   : > { %v16612_v37 = vsel %vm18864_vm6, %v6057_v26, %v6075_v36  ;;  %18867 = vst [vmem:[#allocation41_spill] sm:$0xff] %v16620_v9  ;;  %v16625_v26 = vrot.slane %v6367_v17, 1  ;;  %v6261_v24 = vor.u32 %v6260_v30, %v6256_v23  ;;  %v6244_v30 = vshrl.u32 %v6223_v13, 16  ;;  %v6198_v36 = vld [vmem:[#allocation2 + $0x88] sm:$0xff]  ;;  %v14203_v23 = vld [vmem:[%s18606_s7 + $0x300] sm:$0xff]   ;;  %vm18889_vm6 = vmmov %vm18870_vm0 }
 0x69b   : > { %18865 = vst [vmem:[#allocation40_spill] sm:$0xff] %v16612_v37  ;;  %7400 = vmatprep.mubr.bf16.mxu0 %v16612_v37  ;;  %9201 = vmatprep.mubr.bf16.mxu1 %v16612_v37  ;;  %v16641_v20 = vpack.c.bf16 %v6195_v41, %v6193_v46  ;;  %v16643_v44 = vpack.c.bf16 %v6200_v47, %v6198_v36  ;;  %v14208_v13 = vld [vmem:[%s18606_s7 + $0x348] sm:$0xff]   ;;  %v6199_v46 = vld [vmem:[#allocation2 + $0x90] sm:$0xff] }
 0x69c   : > { %7401 = vmatmul.mubr.bf16.gmra.mrb[120].mxu0 %v16620_v9  ;;  %9202 = vmatmul.mubr.bf16.gmra.mrb[156].mxu1 %v16620_v9  ;;  %v16636_v18 = vsel %vm18869_vm11, %v6365_v52, %v16625_v26  ;;  %v16639_v32 = vsel %vm18870_vm0, %v6261_v24, %v6265_v35  ;;  %v6249_v17 = vor.u32 %v6248_v8, %v6244_v30  ;;  %v6275_v52 = vshrl.u32 %v16583_v14, 16  ;;  %v6465_v30 = vld [vmem:[#allocation2 + $0x130] sm:$0xff]  ;;  %v6197_v8 = vld [vmem:[#allocation2 + $0x80] sm:$0xff]  ;;  %vm18894_vm11 = vmmov %vm18870_vm0 }
 0x69d   : > { %7441 = vmatprep.mubr.bf16.mxu0 %v16623_v55  ;;  %9209 = vmatprep.mubr.bf16.mxu1 %v16630_v60  ;;  %18871 = vst [vmem:[#allocation43_spill] sm:$0xff] %v16639_v32  ;;  %v6281_v55 = vrot.slane %v6279_v16, 1  ;;  %v16649_v4 = vpack.c.bf16 %v6115_v39, %v6113_v56  ;;  %v6271_v0 = vshll.u32 %v16641_v20, 16  ;;  %v6295_v47 = vshll.u32 %v16643_v44, 16  ;;  %v6461_v16 = vld [vmem:[#allocation2 + $0x110] sm:$0xff] }
 0x69e   : > { %v16655_v41 = vsel %vm18873_vm1, %v6249_v17, %v6253_v34  ;;  %v6277_v24 = vor.u32 %v6275_v52, %v6265_v35  ;;  %v14209_v35 = vld [vmem:[%s18606_s7 + $0x308] sm:$0xff]   ;;  %v14210_v36 = vld [vmem:[%s18606_s7 + $0x350] sm:$0xff]   ;;  %v16672_v17 = vld [vmem:[#allocation2 + $0x100] sm:$0xff]  ;;  %v6267_v56 = vshrl.u32 %v16588_v58, 16  ;;  %v16675_v52 = vpack.c.bf16 %v6199_v46, %v6197_v8 }
 0x69f   : > { %18872 = vst [vmem:[#allocation44_spill] sm:$0xff] %v16649_v4  ;;  %18874 = vst [vmem:[#allocation45_spill] sm:$0xff] %v16655_v41  ;;  %v6297_v9 = vrot.slane %v6295_v47, 1  ;;  %v14219_v46 = vld [vmem:[%s18606_s7 + $0x600] sm:$0xff]   ;;  %v14212_v47 = vld [vmem:[%s18606_s7 + $0x358] sm:$0xff]  }
 0x6a0   : > { %v16663_v39 = vsel %vm18875_vm14, %v6277_v24, %v6281_v55  ;;  %v16677_v24 = vld [vmem:[#allocation2 + $0x120] sm:$0xff]  ;;  %v6269_v12 = vor.u32 %v6267_v56, %v6253_v34  ;;  %vm18901_vm1 = vmmov %vm18870_vm0 }
 0x6a1   : > { %18876 = vst [vmem:[#allocation46_spill] sm:$0xff] %v16663_v39  ;;  %v6485_v37 = vpack.c.bf16 %v6465_v30, %v16677_v24  ;;  %v14213_v30 = vld [vmem:[%s18606_s7 + $0x318] sm:$0xff]   ;;  %vm18906_vm14 = vmmov %vm18870_vm0 }
 0x6a3   : > { %v16692_v8 = vrot.slane %v6485_v37, 1  ;;  %v6307_v37 = vshrl.u32 %v16643_v44, 16 }
 0x6a4   : > { %7442 = vmatmul.mubr.bf16.vlgmr.msra.gmra.mrb[124].mxu0 %v16649_v4  ;;  %9210 = vmatmul.mubr.bf16.gmra.mrb[160].mxu1 %v16630_v60  ;;  %v6483_v4 = vpack.c.bf16 %v6461_v16, %v16672_v17 }
 0x6a5   : > { %12310 = vmatpush3.bf16.msra.mxu0 %v14203_v23  ;;  %7449 = vmatprep.mubr.bf16.mxu0 %v16583_v14  ;;  %v6273_v23 = vrot.slane %v6271_v0, 1  ;;  %v16680_v14 = vld [vmem:[#allocation2 + $0x78] sm:$0xff]  ;;  %v14211_v0 = vld [vmem:[%s18606_s7 + $0x310] sm:$0xff]   ;;  %18877 = vst [vmem:[#allocation47_spill] sm:$0xff] %v16692_v8 }
 0x6a6   : > { %9355 = vmatprep.mubr.bf16.mxu1 %v16663_v39  ;;  %12311 = vmatprep.subr.bf16.mxu0 %v14208_v13  ;;  %v6291_v13 = vshrl.u32 %v16608_v2, 16  ;;  %v16690_v16 = vrot.slane %v6483_v4, 1  ;;  %v16699_v34 = vpack.c.bf16 %v16680_v14, %v16597_v42  ;;  %v14220_v4 = vld [vmem:[%s18606_s7 + $0x648] sm:$0xff]  }
 0x6a7   : > { %v16695_v2 = vsel %vm18878_vm13, %v6269_v12, %v6273_v23  ;;  %vm18909_vm13 = vmmov %vm18870_vm0 }
 0x6a8   : > { %v6293_v62 = vor.u32 %v6291_v13, %v6281_v55  ;;  %18879 = vst [vmem:[#allocation48_spill] sm:$0xff] %v16695_v2  ;;  %18880 = vst [vmem:[#allocation49_spill] sm:$0xff] %v16699_v34  ;;  %v6287_v55 = vshll.u32 %v16675_v52, 16  ;;  %v16716_v42 = vsel %vm18883_vm15, %v16690_v16, %v16692_v8  ;;  %v14214_v13 = vld [vmem:[%s18606_s7 + $0x360] sm:$0xff]  }
 0x6a9   : > { %12312 = vmatpush3.bf16.msra.mxu0 %v14209_v35  ;;  %18884 = vst [vmem:[#allocation51_spill] sm:$0xff] %v16716_v42  ;;  %v6311_v35 = vshll.u32 %v16428_v1, 16  ;;  %v14215_v42 = vld [vmem:[%s18606_s7 + $0x320] sm:$0xff]  }
 0x6aa   : > { %12313 = vmatprep.subr.bf16.mxu0 %v14210_v36  ;;  %v16711_v12 = vsel %vm18881_vm10, %v6293_v62, %v6297_v9  ;;  %v14222_v62 = vld [vmem:[%s18606_s7 + $0x608] sm:$0xff]   ;;  %v6283_v36 = vshrl.u32 %v16641_v20, 16  ;;  %v6289_v56 = vrot.slane %v6287_v55, 1  ;;  %v14225_v55 = vld [vmem:[%s18606_s7 + $0x610] sm:$0xff]   ;;  %vm18926_vm10 = vmmov %vm18883_vm15 }
 0x6ab   : > { %18882 = vst [vmem:[#allocation50_spill] sm:$0xff] %v16711_v12  ;;  %vm18928_vm15 = vmmov %vm18926_vm10 }
 0x6ac   : > { %7450 = vmatmul.mubr.bf16.gmra.mrb[128].mxu0 %v16588_v58  ;;  %9356 = vmatmul.mubr.bf16.vlgmr.msra.gmra.mrb[164].mxu1 %v16695_v2  ;;  %v6285_v8 = vor.u32 %v6283_v36, %v6273_v23  ;;  %v14226_v23 = vld [vmem:[%s18606_s7 + $0x658] sm:$0xff]  }
 0x6ad   : > { %7457 = vmatprep.mubr.bf16.mxu0 %v16699_v34  ;;  %9363 = vmatprep.mubr.bf16.mxu1 %v16711_v12  ;;  %v6309_v34 = vor.u32 %v6307_v37, %v6297_v9  ;;  %v14216_v9 = vld [vmem:[%s18606_s7 + $0x368] sm:$0xff]  }
 0x6ae   : > { %12314 = vmatpush3.bf16.msra.mxu0 %v14211_v0  ;;  %13010 = vmatpush3.bf16.msra.mxu1 %v14219_v46  ;;  %v14224_v0 = vld [vmem:[%s18606_s7 + $0x650] sm:$0xff]   ;;  %v6313_v46 = vrot.slane %v6311_v35, 1  ;;  %v14217_v37 = vld [vmem:[%s18606_s7 + $0x328] sm:$0xff]   ;;  %v14227_v35 = vld [vmem:[%s18606_s7 + $0x618] sm:$0xff]  }
 0x6af   : > { %12315 = vmatprep.subr.bf16.mxu0 %v14212_v47  ;;  %13011 = vmatprep.subr.bf16.mxu1 %v14220_v4  ;;  %v16742_v47 = vsel %vm18885_vm2, %v6285_v8, %v6289_v56  ;;  %v6327_v8 = vshll.u32 %v16506_v21, 16  ;;  %vm18930_vm2 = vmmov %vm18926_vm10 }
 0x6b0   : > { %18886 = vst [vmem:[#allocation52_spill] sm:$0xff] %v16742_v47  ;;  %v16753_v4 = vsel %vm18887_vm4, %v6309_v34, %v6313_v46  ;;  %v14221_v34 = vld [vmem:[%s18606_s7 + $0x370] sm:$0xff]   ;;  %vm18934_vm4 = vmmov %vm18930_vm2 }
 0x6b1   : > { %18888 = vst [vmem:[#allocation53_spill] sm:$0xff] %v16753_v4  ;;  %v6329_v36 = vrot.slane %v6327_v8, 1  ;;  %v18893_v8 = vmax.f32 %v16267_v15, 0.0  ;;  %v14236_v15 = vld [vmem:[%s18606_s7 + $0x670] sm:$0xff]  }
 0x6b2   : > { %12316 = vmatpush3.bf16.msra.mxu0 %v14213_v30  ;;  %13012 = vmatpush3.bf16.msra.mxu1 %v14222_v62  ;;  %v6299_v30 = vshrl.u32 %v16675_v52, 16  ;;  %v6323_v62 = vshrl.u32 %v16428_v1, 16  ;;  %v14228_v1 = vld [vmem:[%s18606_s7 + $0x378] sm:$0xff]  }
 0x6b3   : > { %12317 = vmatprep.subr.bf16.mxu0 %v14214_v13  ;;  %13013 = vmatprep.subr.bf16.mxu1 %v14224_v0 }
 0x6b4   : > { %7458 = vmatmul.mubr.bf16.gmra.mrb[132].mxu0 %v16641_v20  ;;  %9364 = vmatmul.mubr.bf16.gmra.mrb[168].mxu1 %v16742_v47  ;;  %v6301_v13 = vor.u32 %v6299_v30, %v6289_v56  ;;  %v6325_v0 = vor.u32 %v6323_v62, %v6313_v46  ;;  %v14232_v56 = vld [vmem:[%s18606_s7 + $0x668] sm:$0xff]  }
 0x6b5   : > { %7465 = vmatprep.mubr.bf16.mxu0 %v16643_v44  ;;  %9371 = vmatprep.mubr.bf16.mxu1 %v16753_v4  ;;  %v14233_v30 = vld [vmem:[%s18606_s7 + $0x628] sm:$0xff]  }
 0x6b6   : > { %12318 = vmatpush3.bf16.msra.mxu0 %v14215_v42  ;;  %13014 = vmatpush3.bf16.msra.mxu1 %v14225_v55  ;;  %v14230_v42 = vld [vmem:[%s18606_s7 + $0x660] sm:$0xff]   ;;  %v14223_v55 = vld [vmem:[%s18606_s7 + $0x330] sm:$0xff]   ;;  %v16791_v46 = vsel %vm18891_vm9, %v6325_v0, %v6329_v36  ;;  %vm18940_vm9 = vmmov %vm18930_vm2 }
 0x6b7   : > { %12319 = vmatprep.subr.bf16.mxu0 %v14216_v9  ;;  %13015 = vmatprep.subr.bf16.mxu1 %v14226_v23  ;;  %v14231_v9 = vld [vmem:[%s18606_s7 + $0x620] sm:$0xff]   ;;  %v16780_v23 = vsel %vm18889_vm6, %v6301_v13, %v16547_v31  ;;  %18892 = vst [vmem:[#allocation55_spill] sm:$0xff] %v16791_v46  ;;  %v6343_v31 = vshll.u32 %v16555_v43, 16  ;;  %vm18936_vm6 = vmmov %vm18930_vm2 }
 0x6b8   : > { %18890 = vst [vmem:[#allocation54_spill] sm:$0xff] %v16780_v23 }
 0x6b9   : > { %v6345_v62 = vrot.slane %v6343_v31, 1  ;;  %v6133_v31 = vld [vmem:[#allocation2 + $0xc0] sm:$0xff] }
 0x6ba   : > { %12320 = vmatpush3.bf16.msra.mxu0 %v14217_v37  ;;  %13016 = vmatpush3.bf16.msra.mxu1 %v14227_v35  ;;  %v16797_v37 = vpack.c.bf16 %v18893_v8, %v16264_v27  ;;  %v14229_v35 = vld [vmem:[%s18606_s7 + $0x338] sm:$0xff]   ;;  %v14234_v27 = vld [vmem:[%s18606_s7 + $0x3c0] sm:$0xff]  }
 0x6bb   : > { %12321 = vmatprep.subr.bf16.mxu0 %v14221_v34  ;;  %13017 = vmatprep.subr.bf16.mxu1 %v14230_v42  ;;  %v6131_v34 = vld [vmem:[#allocation2 + $0xb0] sm:$0xff]  ;;  %v6339_v42 = vshrl.u32 %v16506_v21, 16  ;;  %v14250_v8 = vld [vmem:[%s18606_s7 + $0x740] sm:$0xff]  }
 0x6bc   : > { %7466 = vmatmul.mubr.bf16.gmra.mrb[136].mxu0 %v16675_v52  ;;  %9372 = vmatmul.mubr.bf16.gmra.mrb[172].mxu1 %v16780_v23  ;;  %v16817_v13 = vpack.c.bf16 %v6131_v34, %v16473_v57  ;;  %v6359_v57 = vshll.u32 %v16574_v3, 16 }
 0x6bd   : > { %14504 = vmatprep.mubr.msk.bf16.mxu0 %vm15701_vm8, %v16797_v37  ;;  %9379 = vmatprep.mubr.bf16.mxu1 %v16791_v46  ;;  %v6341_v0 = vor.u32 %v6339_v42, %v6329_v36  ;;  %v18896_v36 = vmax.f32 %v16331_v59, 0.0 }
 0x6be   : > { %12322 = vmatpush3.bf16.msra.mxu0 %v14223_v55  ;;  %13018 = vmatpush3.bf16.msra.mxu1 %v14231_v9  ;;  %v14237_v55 = vld [vmem:[%s18606_s7 + $0x630] sm:$0xff]   ;;  %v14238_v9 = vld [vmem:[%s18606_s7 + $0x678] sm:$0xff]   ;;  %v6361_v59 = vrot.slane %v6359_v57, 1 }
 0x6bf   : > { %12323 = vmatprep.subr.bf16.mxu0 %v14228_v1  ;;  %13019 = vmatprep.subr.bf16.mxu1 %v14232_v56  ;;  %v16828_v21 = vsel %vm18894_vm11, %v6341_v0, %v6345_v62  ;;  %v16834_v1 = vpack.c.bf16 %v18896_v36, %v16328_v49  ;;  %v14239_v56 = vld [vmem:[%s18606_s7 + $0x638] sm:$0xff]   ;;  %v6355_v49 = vshrl.u32 %v16555_v43, 16  ;;  %v18899_v43 = vmax.f32 %v16403_v25, 0.0  ;;  %vm18942_vm11 = vmmov %vm18930_vm2 }
 0x6c0   : > { %18895 = vst [vmem:[#allocation56_spill] sm:$0xff] %v16828_v21  ;;  %v6371_v0 = vshrl.u32 %v16574_v3, 16  ;;  %v18900_v36 = vmax.f32 %v16398_v6, 0.0  ;;  %v18902_v3 = vmax.f32 %v16464_v61, 0.0  ;;  %v6387_v6 = vshrl.u32 %v16595_v45, 16 }
 0x6c1   : > { %v16862_v42 = vpack.c.bf16 %v18899_v43, %v16400_v54  ;;  %v18907_v61 = vmax.f32 %v16516_v48, 0.0 }
 0x6c2   : > { %12324 = vmatpush3.bf16.msra.mxu0 %v14229_v35  ;;  %13020 = vmatpush3.bf16.msra.mxu1 %v14233_v30  ;;  %v6357_v35 = vor.u32 %v6355_v49, %v6345_v62  ;;  %v18897_v30 = vmax.f32 %v16326_v33, 0.0  ;;  %v6222_v33 = vld [vmem:[#allocation2 + $0x148] sm:$0x1]  ;;  %v6137_v62 = vld [vmem:[#allocation2 + $0xe0] sm:$0xff]  ;;  %v6373_v57 = vor.u32 %v6371_v0, %v6361_v59  ;;  %v18910_v0 = vmax.f32 %v16511_v11, 0.0 }
 0x6c3   : > { %12379 = vmatprep.subr.bf16.mxu0 %v14234_v27  ;;  %13021 = vmatprep.subr.bf16.mxu1 %v14236_v15  ;;  %v6375_v15 = vshll.u32 %v16595_v45, 16  ;;  %v16905_v45 = vpack.c.bf16 %v18907_v61, %v16513_v19  ;;  %v14235_v19 = vld [vmem:[%s18606_s7 + $0x380] sm:$0xff]   ;;  %v14240_v11 = vld [vmem:[%s18606_s7 + $0x3c8] sm:$0xff]   ;;  %v18914_v61 = vld [vmem:[#allocation22_spill] sm:$0xff] }
 0x6c4   : > { %7474 = vmatmul.mubr.bf16.gmra.mrb[140].mxu0 %v16817_v13  ;;  %9380 = vmatmul.mubr.bf16.gmra.mrb[176].mxu1 %v16579_v28  ;;  %v16849_v34 = vpack.c.bf16 %v18897_v30, %v6133_v31  ;;  %v16856_v27 = vsel %vm18870_vm0, %v6357_v35, %v6361_v59  ;;  %v6221_v31 = vld [vmem:[#allocation2 + $0x140] sm:$0x1]  ;;  %v16919_v48 = vpack.c.bf16 %v18910_v0, %v16677_v24  ;;  %v14243_v24 = vld [vmem:[%s18606_s7 + $0x390] sm:$0xff]   ;;  %vm18946_vm0 = vmmov %vm18930_vm2 }
 0x6c5   : > { %14507 = vmatprep.mubr.msk.bf16.mxu0 %vm15727_vm3, %v16834_v1  ;;  %9387 = vmatprep.mubr.bf16.mxu1 %v16828_v21  ;;  %18898 = vst [vmem:[#allocation57_spill] sm:$0xff] %v16856_v27  ;;  %v6241_v49 = vpack.c.bf16 %v6221_v31, %v6221_v31  ;;  %18908 = vst [vmem:[#allocation60_spill] sm:$0xff] %v16905_v45  ;;  %v14245_v31 = vld [vmem:[%s18606_s7 + $0x398] sm:$0xff]   ;;  %v14253_v0 = vld [vmem:[%s18606_s7 + $0x3f0] sm:$0xff]  }
 0x6c6   : > { %13022 = vmatpush3.bf16.msra.mxu1 %v14237_v55  ;;  %v6377_v55 = vrot.slane %v6375_v15, 1  ;;  %v18904_v15 = vmax.f32 %v16459_v10, 0.0  ;;  %v6379_v10 = vshrl.u32 %v16601_v40, 16  ;;  %18911 = vst [vmem:[#allocation61_spill] sm:$0xff] %v16919_v48  ;;  %v14241_v40 = vld [vmem:[%s18606_s7 + $0x388] sm:$0xff]  }
 0x6c7   : > { %13023 = vmatprep.subr.bf16.mxu1 %v14238_v9  ;;  %v6242_v9 = vpack.c.bf16 %v6222_v33, %v6222_v33  ;;  %v6383_v30 = vshll.u32 %v6241_v49, 16  ;;  %v14256_v49 = vld [vmem:[%s18606_s7 + $0x750] sm:$0xff]  }
 0x6c8   : > { %v16878_v54 = vsel %vm18901_vm1, %v6373_v57, %v6377_v55  ;;  %v6389_v59 = vor.u32 %v6387_v6, %v6377_v55  ;;  %v16893_v43 = vpack.c.bf16 %v18904_v15, %v16672_v17  ;;  %v6381_v17 = vor.u32 %v6379_v10, %v16625_v26  ;;  %v14242_v26 = vld [vmem:[%s18606_s7 + $0x3d0] sm:$0xff]   ;;  %v14251_v55 = vld [vmem:[%s18606_s7 + $0x700] sm:$0xff]   ;;  %v14252_v57 = vld [vmem:[%s18606_s7 + $0x748] sm:$0xff]  }
 0x6c9   : > { %v6391_v25 = vshll.u32 %v6242_v9, 16  ;;  %v6385_v33 = vrot.slane %v6383_v30, 1  ;;  %v14244_v9 = vld [vmem:[%s18606_s7 + $0x3d8] sm:$0xff]   ;;  %v14246_v6 = vld [vmem:[%s18606_s7 + $0x3e0] sm:$0xff]   ;;  %v14248_v30 = vld [vmem:[%s18606_s7 + $0x3e8] sm:$0xff]  }
 0x6ca   : > { %13024 = vmatpush3.bf16.msra.mxu1 %v14239_v56  ;;  %v16871_v56 = vpack.c.bf16 %v18900_v36, %v6137_v62  ;;  %18905 = vst [vmem:[#allocation59_spill] sm:$0xff] %v16893_v43  ;;  %v18912_v36 = vld [vmem:[#allocation26_spill] sm:$0xff]  ;;  %v14258_v15 = vld [vmem:[%s18606_s7 + $0x758] sm:$0xff]   ;;  %vm18948_vm1 = vmmov %vm18946_vm0 }
 0x6cb   : > { %13149 = vmatprep.subr.bf16.mxu1 %v14250_v8  ;;  %v16883_v8 = vpack.c.bf16 %v18902_v3, %v16461_v29  ;;  %v6393_v35 = vrot.slane %v6391_v25, 1  ;;  %v16914_v62 = vsel %vm18909_vm13, %v6381_v17, %v6385_v33  ;;  %v18913_v25 = vld [vmem:[#allocation32_spill] sm:$0xff]  ;;  %v14254_v3 = vld [vmem:[%s18606_s7 + $0x708] sm:$0xff]   ;;  %v18915_v10 = vld [vmem:[#allocation34_spill] sm:$0xff] }
 0x6cc   : > { %14510 = vmatmul.mubr.msk.bf16.gmra.mrb[144].mxu0 %vm15727_vm3, %v16849_v34  ;;  %9388 = vmatmul.mubr.bf16.gmra.mrb[180].mxu1 %v16591_v5  ;;  %v14249_v17 = vld [vmem:[%s18606_s7 + $0x3a8] sm:$0xff]   ;;  %v14259_v33 = vld [vmem:[%s18606_s7 + $0x718] sm:$0xff]   ;;  %vm18954_vm13 = vmmov %vm18946_vm0 }
 0x6cd   : > { %14513 = vmatprep.mubr.msk.bf16.mxu0 %vm15752_vm5, %v16862_v42  ;;  %9395 = vmatprep.mubr.bf16.mxu1 %v16856_v27  ;;  %18903 = vst [vmem:[#allocation58_spill] sm:$0xff] %v16883_v8  ;;  %v16900_v29 = vsel %vm18906_vm14, %v6389_v59, %v6393_v35  ;;  %v14247_v59 = vld [vmem:[%s18606_s7 + $0x3a0] sm:$0xff]   ;;  %v14257_v35 = vld [vmem:[%s18606_s7 + $0x710] sm:$0xff]   ;;  %vm18952_vm14 = vmmov %vm18946_vm0 }
 0x6d4   : > { %14516 = vmatmul.mubr.msk.bf16.gmra.mrb[148].mxu0 %vm15752_vm5, %v16871_v56  ;;  %9396 = vmatmul.mubr.bf16.gmra.mrb[184].mxu1 %v16604_v50 }
 0x6d5   : > { %14519 = vmatprep.mubr.msk.bf16.mxu0 %vm15774_vm7, %v16883_v8  ;;  %9403 = vmatprep.mubr.bf16.mxu1 %v16878_v54 }
 0x6dc   : > { %14522 = vmatmul.mubr.msk.bf16.gmra.mrb[152].mxu0 %vm15774_vm7, %v16893_v43  ;;  %9404 = vmatmul.mubr.bf16.gmra.mrb[188].mxu1 %v16636_v18 }
 0x6dd   : > { %14525 = vmatprep.mubr.msk.bf16.mxu0 %vm15792_vm12, %v16905_v45  ;;  %9411 = vmatprep.mubr.bf16.mxu1 %v16900_v29  ;;  %v6510_v45 = vrot.slane %v16588_v58, 1 }
 0x6e4   : > { %14528 = vmatmul.mubr.msk.bf16.gmra.mrb[156].mxu0 %vm15792_vm12, %v16919_v48  ;;  %9412 = vmatmul.mubr.bf16.gmra.mrb[192].mxu1 %v16914_v62 }
 0x6e5   : > { %7546 = vmatprep.mubr.bf16.mxu0 %v16639_v32  ;;  %9419 = vmatprep.mubr.bf16.mxu1 %v16630_v60 }
 0x6ec   : > { %7547 = vmatmul.mubr.bf16.vlgmr.msra.gmra.mrb[160].mxu0 %v16655_v41  ;;  %9420 = vmatmul.mubr.bf16.gmra.mrb[196].mxu1 %v16630_v60 }
 0x6ed   : > { %12380 = vmatpush3.bf16.msra.mxu0 %v14235_v19  ;;  %7554 = vmatprep.mubr.bf16.mxu0 %v16663_v39  ;;  %v14262_v19 = vld [vmem:[%s18606_s7 + $0x760] sm:$0xff]   ;;  %v6441_v39 = vld [vmem:[#allocation2 + $0x70] sm:$0xff] }
 0x6ee   : > { %10168 = vmatprep.mubr.bf16.mxu1 %v16284_v51  ;;  %12381 = vmatprep.subr.bf16.mxu0 %v14240_v11  ;;  %v14255_v11 = vld [vmem:[%s18606_s7 + $0x3b0] sm:$0xff]  }
 0x6f1   : > { %12382 = vmatpush3.bf16.msra.mxu0 %v14241_v40  ;;  %v14263_v40 = vld [vmem:[%s18606_s7 + $0x720] sm:$0xff]  }
 0x6f2   : > { %12383 = vmatprep.subr.bf16.mxu0 %v14242_v26  ;;  %v14260_v26 = vld [vmem:[%s18606_s7 + $0x3f8] sm:$0xff]  }
 0x6f4   : > { %7555 = vmatmul.mubr.bf16.gmra.mrb[164].mxu0 %v16695_v2  ;;  %10169 = vmatmul.mubr.bf16.vlgmr.msra.gmra.mrb[200].mxu1 %v18912_v36 }
 0x6f5   : > { %7562 = vmatprep.mubr.bf16.mxu0 %v16711_v12  ;;  %10176 = vmatprep.mubr.bf16.mxu1 %v18913_v25 }
 0x6f6   : > { %12384 = vmatpush3.bf16.msra.mxu0 %v14243_v24  ;;  %13150 = vmatpush3.bf16.msra.mxu1 %v14251_v55  ;;  %v14264_v24 = vld [vmem:[%s18606_s7 + $0x768] sm:$0xff]  }
 0x6f7   : > { %12385 = vmatprep.subr.bf16.mxu0 %v14244_v9  ;;  %13151 = vmatprep.subr.bf16.mxu1 %v14252_v57  ;;  %v18916_v55 = vld [vmem:[#allocation33_spill] sm:$0xff]  ;;  %v18917_v9 = vld [vmem:[#allocation35_spill] sm:$0xff] }
 0x6f8   : > { %v14261_v57 = vld [vmem:[%s18606_s7 + $0x3b8] sm:$0xff]  }
 0x6fa   : > { %12386 = vmatpush3.bf16.msra.mxu0 %v14245_v31  ;;  %13152 = vmatpush3.bf16.msra.mxu1 %v14254_v3  ;;  %v14265_v31 = vld [vmem:[%s18606_s7 + $0x728] sm:$0xff]   ;;  %v14266_v3 = vld [vmem:[%s18606_s7 + $0x40] sm:$0xff]  }
 0x6fb   : > { %12387 = vmatprep.subr.bf16.mxu0 %v14246_v6  ;;  %13153 = vmatprep.subr.bf16.mxu1 %v14256_v49  ;;  %v14268_v6 = vld [vmem:[%s18606_s7 + $0x770] sm:$0xff]  }
 0x6fc   : > { %7563 = vmatmul.mubr.bf16.gmra.mrb[168].mxu0 %v16742_v47  ;;  %10177 = vmatmul.mubr.bf16.gmra.mrb[204].mxu1 %v18914_v61  ;;  %v14269_v49 = vld [vmem:[%s18606_s7 + $0x730] sm:$0xff]  }
 0x6fd   : > { %7570 = vmatprep.mubr.bf16.mxu0 %v16753_v4  ;;  %10184 = vmatprep.mubr.bf16.mxu1 %v18915_v10 }
 0x6fe   : > { %12388 = vmatpush3.bf16.msra.mxu0 %v14247_v59  ;;  %13154 = vmatpush3.bf16.msra.mxu1 %v14257_v35  ;;  %v14270_v59 = vld [vmem:[%s18606_s7 + $0x778] sm:$0xff]   ;;  %v18918_v35 = vld [vmem:[#allocation25_spill] sm:$0xff] }
 0x6ff   : > { %12389 = vmatprep.subr.bf16.mxu0 %v14248_v30  ;;  %13155 = vmatprep.subr.bf16.mxu1 %v14258_v15  ;;  %v18919_v30 = vld [vmem:[#allocation36_spill] sm:$0xff]  ;;  %v14271_v15 = vld [vmem:[%s18606_s7 + $0x738] sm:$0xff]  }
 0x702   : > { %12390 = vmatpush3.bf16.msra.mxu0 %v14249_v17  ;;  %13156 = vmatpush3.bf16.msra.mxu1 %v14259_v33  ;;  %v18920_v17 = vld [vmem:[#allocation27_spill] sm:$0xff]  ;;  %v18921_v33 = vld [vmem:[#allocation37_spill] sm:$0xff] }
 0x703   : > { %12391 = vmatprep.subr.bf16.mxu0 %v14253_v0  ;;  %13157 = vmatprep.subr.bf16.mxu1 %v14262_v19  ;;  %v18922_v0 = vld [vmem:[#allocation28_spill] sm:$0xff] }
 0x704   : > { %7571 = vmatmul.mubr.bf16.gmra.mrb[172].mxu0 %v16780_v23  ;;  %10185 = vmatmul.mubr.bf16.gmra.mrb[208].mxu1 %v18916_v55  ;;  %v18923_v19 = vld [vmem:[#allocation40_spill] sm:$0xff] }
 0x705   : > { %7578 = vmatprep.mubr.bf16.mxu0 %v16791_v46  ;;  %10192 = vmatprep.mubr.bf16.mxu1 %v18917_v9 }
 0x706   : > { %12392 = vmatpush3.bf16.msra.mxu0 %v14255_v11  ;;  %13158 = vmatpush3.bf16.msra.mxu1 %v14263_v40  ;;  %v6434_v11 = vld [vmem:[#allocation2 + $0x38] sm:$0xff]  ;;  %v18924_v40 = vld [vmem:[#allocation41_spill] sm:$0xff] }
 0x707   : > { %12393 = vmatprep.subr.bf16.mxu0 %v14260_v26  ;;  %13159 = vmatprep.subr.bf16.mxu1 %v14264_v24  ;;  %v6432_v26 = vld [vmem:[#allocation2 + $0x28] sm:$0xfc] }
 0x708   : > { %v6470_v24 = vpack.c.bf16 %v6434_v11, %v6432_v26 }
 0x70a   : > { %12394 = vmatpush3.bf16.msra.mxu0 %v14261_v57  ;;  %13160 = vmatpush3.bf16.msra.mxu1 %v14265_v31  ;;  %v18925_v57 = vld [vmem:[#allocation39_spill] sm:$0xff] }
 0x70b   : > { %12449 = vmatprep.subr.bf16.mxu0 %v14266_v3  ;;  %13161 = vmatprep.subr.bf16.mxu1 %v14268_v6  ;;  %v6513_v31 = vrot.slane %v18925_v57, 1  ;;  %v6512_v3 = vrot.slane %v6470_v24, 1  ;;  %v6433_v6 = vld [vmem:[#allocation2 + $0x30] sm:$0xff] }
 0x70c   : > { %7579 = vmatmul.mubr.bf16.gmra.mrb[176].mxu0 %v16579_v28  ;;  %10193 = vmatmul.mubr.bf16.gmra.mrb[212].mxu1 %v18918_v35 }
 0x70d   : > { %7586 = vmatprep.mubr.bf16.mxu0 %v16828_v21  ;;  %10200 = vmatprep.mubr.bf16.mxu1 %v18919_v30 }
 0x70e   : > { %13162 = vmatpush3.bf16.msra.mxu1 %v14269_v49  ;;  %v6440_v49 = vld [vmem:[#allocation2 + $0x68] sm:$0xff] }
 0x70f   : > { %13163 = vmatprep.subr.bf16.mxu1 %v14270_v59  ;;  %v17056_v59 = vsel %vm18926_vm10, %v6512_v3, %v6513_v31  ;;  %vm18958_vm10 = vmmov %vm18946_vm0 }
 0x710   : > { %18927 = vst [vmem:[#allocation26_spill] sm:$0xff] %v17056_v59 }
 0x712   : > { %13164 = vmatpush3.bf16.msra.mxu1 %v14271_v15 }
 0x714   : > { %7587 = vmatmul.mubr.bf16.gmra.mrb[180].mxu0 %v16591_v5  ;;  %10201 = vmatmul.mubr.bf16.gmra.mrb[216].mxu1 %v18920_v17 }
 0x715   : > { %7594 = vmatprep.mubr.bf16.mxu0 %v16856_v27  ;;  %10208 = vmatprep.mubr.bf16.mxu1 %v18921_v33 }
 0x71c   : > { %7595 = vmatmul.mubr.bf16.gmra.mrb[184].mxu0 %v16604_v50  ;;  %10209 = vmatmul.mubr.bf16.gmra.mrb[220].mxu1 %v18922_v0 }
 0x71d   : > { %7602 = vmatprep.mubr.bf16.mxu0 %v16878_v54  ;;  %10216 = vmatprep.mubr.bf16.mxu1 %v18923_v19  ;;  %v6431_v19 = vld [vmem:[#allocation2 + $0x20] sm:$0xfc] }
 0x71e   : > { %v6469_v11 = vpack.c.bf16 %v6433_v6, %v6431_v19  ;;  %v6444_v19 = vld [vmem:[#allocation2 + $0x88] sm:$0xff] }
 0x720   : > { %v6509_v41 = vrot.slane %v6469_v11, 1 }
 0x722   : > { %v17073_v6 = vsel %vm18928_vm15, %v6509_v41, %v6510_v45  ;;  %v14273_v41 = vld [vmem:[%s18606_s7 + $0x8] sm:$0xff]   ;;  %vm18960_vm15 = vmmov %vm18946_vm0 }
 0x723   : > { %18929 = vst [vmem:[#allocation32_spill] sm:$0xff] %v17073_v6 }
 0x724   : > { %7603 = vmatmul.mubr.bf16.gmra.mrb[188].mxu0 %v16636_v18  ;;  %10217 = vmatmul.mubr.bf16.gmra.mrb[224].mxu1 %v18924_v40  ;;  %v6474_v40 = vpack.c.bf16 %v16680_v14, %v6440_v49  ;;  %v14267_v14 = vld [vmem:[%s18606_s7] sm:$0xff]   ;;  %v6446_v49 = vld [vmem:[#allocation2 + $0x98] sm:$0xff] }
 0x725   : > { %7610 = vmatprep.mubr.bf16.mxu0 %v16900_v29  ;;  %10224 = vmatprep.mubr.bf16.mxu1 %v16630_v60 }
 0x726   : > { %v6517_v3 = vrot.slane %v6474_v40, 1 }
 0x72c   : > { %7611 = vmatmul.mubr.bf16.gmra.mrb[192].mxu0 %v16914_v62  ;;  %10225 = vmatmul.mubr.bf16.gmra.mrb[228].mxu1 %v16630_v60  ;;  %v12185_v15 = vpop.f32.mrb[88].mxu0 }
 0x72d   : > { %7651 = vmatprep.mubr.bf16.mxu0 %v17056_v59  ;;  %v12186_v48 = vpop.f32.mrb[89].mxu0  ;;  %10232 = vmatprep.mubr.bf16.mxu1 %v16630_v60  ;;  %v6439_v59 = vld [vmem:[#allocation2 + $0x60] sm:$0xff] }
 0x72e   : > { %v17061_v26 = vadd.f32 %v12186_v48, %v12185_v15  ;;  %v12188_v24 = vpop.f32.mrb[90].mxu0  ;;  %v14272_v48 = vld [vmem:[%s18606_s7 + $0x48] sm:$0xff]   ;;  %v6473_v15 = vpack.c.bf16 %v6441_v39, %v6439_v59 }
 0x72f   : > { %v12189_v22 = vpop.f32.mrb[91].mxu0 }
 0x730   : > { %v17064_v2 = vadd.f32 %v12189_v22, %v12188_v24  ;;  %v17078_v22 = vsel %vm18930_vm2, %v6513_v31, %v6517_v3  ;;  %v6476_v24 = vpack.c.bf16 %v6446_v49, %v6444_v19  ;;  %vm18964_vm2 = vmmov %vm18946_vm0 }
 0x731   : > { %18931 = vst [vmem:[#allocation22_spill] sm:$0xff] %v17078_v22 }
 0x732   : > { %v6521_v8 = vrot.slane %v6476_v24, 1 }
 0x734   : > { %7652 = vmatmul.mubr.bf16.vlgmr.msra.gmra.mrb[196].mxu0 %v17073_v6  ;;  %10233 = vmatmul.mubr.bf16.gmra.mrb[232].mxu1 %v16630_v60  ;;  %v12191_v40 = vpop.f32.mrb[92].mxu0  ;;  %v12745_v11 = vpop.f32.mrb[128].mxu1  ;;  %v17108_v24 = vsel %vm18936_vm6, %v6517_v3, %v6521_v8  ;;  %v14277_v3 = vld [vmem:[%s18606_s7 + $0x18] sm:$0xff]   ;;  %vm18971_vm6 = vmmov %vm18946_vm0 }
 0x735   : > { %12450 = vmatpush3.bf16.msra.mxu0 %v14267_v14  ;;  %7659 = vmatprep.mubr.bf16.mxu0 %v17078_v22  ;;  %v12192_v32 = vpop.f32.mrb[93].mxu0  ;;  %v12746_v43 = vpop.f32.mrb[129].mxu1  ;;  %v14274_v14 = vld [vmem:[%s18606_s7 + $0x50] sm:$0xff]   ;;  %v6515_v22 = vrot.slane %v6473_v15, 1  ;;  %v14276_v15 = vld [vmem:[%s18606_s7 + $0x58] sm:$0xff]   ;;  %18937 = vst [vmem:[#allocation25_spill] sm:$0xff] %v17108_v24 }
 0x736   : > { %10378 = vmatprep.mubr.bf16.mxu1 %v16711_v12  ;;  %v17085_v39 = vadd.f32 %v12192_v32, %v12191_v40  ;;  %v17087_v60 = vadd.f32 %v12746_v43, %v12745_v11  ;;  %v12194_v31 = vpop.f32.mrb[94].mxu0  ;;  %v12748_v59 = vpop.f32.mrb[130].mxu1  ;;  %12451 = vmatprep.subr.bf16.mxu0 %v14272_v48  ;;  %v6445_v12 = vld [vmem:[#allocation2 + $0x90] sm:$0xff]  ;;  %v6450_v32 = vld [vmem:[#allocation2 + $0xb8] sm:$0xff]  ;;  %v6443_v43 = vld [vmem:[#allocation2 + $0x80] sm:$0xff] }
 0x737   : > { %v12195_v49 = vpop.f32.mrb[95].mxu0  ;;  %v12749_v19 = vpop.f32.mrb[131].mxu1  ;;  %v14275_v48 = vld [vmem:[%s18606_s7 + $0x10] sm:$0xff]   ;;  %v17100_v40 = vsel %vm18934_vm4, %v6510_v45, %v6515_v22  ;;  %v6475_v11 = vpack.c.bf16 %v6445_v12, %v6443_v43  ;;  %vm18966_vm4 = vmmov %vm18946_vm0 }
 0x738   : > { %18932 = vst [vmem:[#allocation34_spill] sm:$0xff] %v17087_v60  ;;  %v17092_v6 = vadd.f32 %v12195_v49, %v12194_v31  ;;  %v17094_v7 = vadd.f32 %v12749_v19, %v12748_v59  ;;  %18935 = vst [vmem:[#allocation35_spill] sm:$0xff] %v17100_v40  ;;  %v6448_v60 = vld [vmem:[#allocation2 + $0xa8] sm:$0xff] }
 0x739   : > { %12452 = vmatpush3.bf16.msra.mxu0 %v14273_v41  ;;  %v6478_v59 = vpack.c.bf16 %v6450_v32, %v6448_v60  ;;  %v6519_v60 = vrot.slane %v6475_v11, 1  ;;  %v14278_v32 = vld [vmem:[%s18606_s7 + $0x60] sm:$0xff]  }
 0x73a   : > { %18933 = vst [vmem:[#allocation33_spill] sm:$0xff] %v17094_v7  ;;  %12453 = vmatprep.subr.bf16.mxu0 %v14274_v14 }
 0x73b   : > { %v17130_v11 = vsel %vm18940_vm9, %v6515_v22, %v6519_v60  ;;  %vm18976_vm9 = vmmov %vm18946_vm0 }
 0x73c   : > { %7660 = vmatmul.mubr.bf16.gmra.mrb[200].mxu0 %v17100_v40  ;;  %10379 = vmatmul.mubr.bf16.vlgmr.msra.gmra.mrb[236].mxu1 %v16742_v47  ;;  %v12197_v41 = vpop.f32.mrb[96].mxu0  ;;  %v12751_v31 = vpop.f32.mrb[132].mxu1  ;;  %18941 = vst [vmem:[#allocation37_spill] sm:$0xff] %v17130_v11  ;;  %v6460_v47 = vld [vmem:[#allocation2 + $0x108] sm:$0xff] }
 0x73d   : > { %7667 = vmatprep.mubr.bf16.mxu0 %v17108_v24  ;;  %10386 = vmatprep.mubr.bf16.mxu1 %v16753_v4  ;;  %v12198_v12 = vpop.f32.mrb[97].mxu0  ;;  %v12752_v45 = vpop.f32.mrb[133].mxu1  ;;  %v6452_v4 = vld [vmem:[#allocation2 + $0xc8] sm:$0xff] }
 0x73e   : > { %v17112_v14 = vadd.f32 %v12198_v12, %v12197_v41  ;;  %v17114_v49 = vadd.f32 %v12752_v45, %v12751_v31  ;;  %v12200_v19 = vpop.f32.mrb[98].mxu0  ;;  %v12754_v43 = vpop.f32.mrb[134].mxu1  ;;  %12454 = vmatpush3.bf16.msra.mxu0 %v14275_v48  ;;  %v6525_v31 = vrot.slane %v6478_v59, 1  ;;  %v6449_v12 = vld [vmem:[#allocation2 + $0xb0] sm:$0xff]  ;;  %v6454_v45 = vld [vmem:[#allocation2 + $0xd8] sm:$0xff]  ;;  %v6447_v48 = vld [vmem:[#allocation2 + $0xa0] sm:$0xff] }
 0x73f   : > { %v12201_v7 = vpop.f32.mrb[99].mxu0  ;;  %v12755_v40 = vpop.f32.mrb[135].mxu1  ;;  %12455 = vmatprep.subr.bf16.mxu0 %v14276_v15  ;;  %v6477_v15 = vpack.c.bf16 %v6449_v12, %v6447_v48 }
 0x740   : > { %18938 = vst [vmem:[#allocation36_spill] sm:$0xff] %v17114_v49  ;;  %v17122_v24 = vadd.f32 %v12201_v7, %v12200_v19  ;;  %v17124_v41 = vadd.f32 %v12755_v40, %v12754_v43  ;;  %v14279_v49 = vld [vmem:[%s18606_s7 + $0x20] sm:$0xff]   ;;  %v14280_v7 = vld [vmem:[%s18606_s7 + $0x68] sm:$0xff]   ;;  %v17138_v40 = vsel %vm18942_vm11, %v6521_v8, %v6525_v31  ;;  %v6480_v43 = vpack.c.bf16 %v6454_v45, %v6452_v4  ;;  %v14282_v45 = vld [vmem:[%s18606_s7 + $0x70] sm:$0xff]  }
 0x741   : > { %18943 = vst [vmem:[#allocation28_spill] sm:$0xff] %v17138_v40  ;;  %v14281_v8 = vld [vmem:[%s18606_s7 + $0x28] sm:$0xff]   ;;  %v6523_v4 = vrot.slane %v6477_v15, 1 }
 0x742   : > { %18939 = vst [vmem:[#allocation27_spill] sm:$0xff] %v17124_v41  ;;  %12456 = vmatpush3.bf16.msra.mxu0 %v14277_v3 }
 0x743   : > { %12457 = vmatprep.subr.bf16.mxu0 %v14278_v32  ;;  %v17160_v15 = vsel %vm18946_vm0, %v6519_v60, %v6523_v4 }
 0x744   : > { %7668 = vmatmul.mubr.bf16.gmra.mrb[204].mxu0 %v17130_v11  ;;  %10387 = vmatmul.mubr.bf16.gmra.mrb[240].mxu1 %v16780_v23  ;;  %v12203_v59 = vpop.f32.mrb[100].mxu0  ;;  %v12757_v19 = vpop.f32.mrb[136].mxu1  ;;  %18947 = vst [vmem:[#allocation39_spill] sm:$0xff] %v17160_v15 }
 0x745   : > { %7675 = vmatprep.mubr.bf16.mxu0 %v17138_v40  ;;  %10394 = vmatprep.mubr.bf16.mxu1 %v16791_v46  ;;  %v12204_v22 = vpop.f32.mrb[101].mxu0  ;;  %v12758_v3 = vpop.f32.mrb[137].mxu1  ;;  %v6456_v46 = vld [vmem:[#allocation2 + $0xe8] sm:$0xff] }
 0x746   : > { %v17142_v32 = vadd.f32 %v12204_v22, %v12203_v59  ;;  %v17144_v12 = vadd.f32 %v12758_v3, %v12757_v19  ;;  %v12206_v48 = vpop.f32.mrb[102].mxu0  ;;  %v12760_v41 = vpop.f32.mrb[138].mxu1  ;;  %12458 = vmatpush3.bf16.msra.mxu0 %v14279_v49  ;;  %v6529_v19 = vrot.slane %v6480_v43, 1  ;;  %v6453_v22 = vld [vmem:[#allocation2 + $0xd0] sm:$0xff]  ;;  %v6458_v3 = vld [vmem:[#allocation2 + $0xf8] sm:$0xff]  ;;  %v6451_v49 = vld [vmem:[#allocation2 + $0xc0] sm:$0xff] }
 0x747   : > { %v12207_v11 = vpop.f32.mrb[103].mxu0  ;;  %v12761_v23 = vpop.f32.mrb[139].mxu1  ;;  %12459 = vmatprep.subr.bf16.mxu0 %v14280_v7  ;;  %v6479_v7 = vpack.c.bf16 %v6453_v22, %v6451_v49 }
 0x748   : > { %18944 = vst [vmem:[#allocation40_spill] sm:$0xff] %v17144_v12  ;;  %v17152_v40 = vadd.f32 %v12207_v11, %v12206_v48  ;;  %v17154_v59 = vadd.f32 %v12761_v23, %v12760_v41  ;;  %v14283_v12 = vld [vmem:[%s18606_s7 + $0x30] sm:$0xff]   ;;  %v14284_v23 = vld [vmem:[%s18606_s7 + $0x78] sm:$0xff]   ;;  %v17168_v41 = vsel %vm18948_vm1, %v6525_v31, %v6529_v19  ;;  %v6482_v48 = vpack.c.bf16 %v6458_v3, %v6456_v46  ;;  %v14286_v3 = vld [vmem:[%s18606_s7 + $0xc0] sm:$0xff]  }
 0x749   : > { %18949 = vst [vmem:[#allocation62_spill] sm:$0xff] %v17168_v41  ;;  %v14285_v31 = vld [vmem:[%s18606_s7 + $0x38] sm:$0xff]   ;;  %v6527_v46 = vrot.slane %v6479_v7, 1 }
 0x74a   : > { %18945 = vst [vmem:[#allocation41_spill] sm:$0xff] %v17154_v59  ;;  %12460 = vmatpush3.bf16.msra.mxu0 %v14281_v8 }
 0x74b   : > { %12461 = vmatprep.subr.bf16.mxu0 %v14282_v45 }
 0x74c   : > { %7676 = vmatmul.mubr.bf16.gmra.mrb[208].mxu0 %v17160_v15  ;;  %10395 = vmatmul.mubr.bf16.gmra.mrb[244].mxu1 %v16579_v28  ;;  %v12209_v11 = vpop.f32.mrb[104].mxu0  ;;  %v12763_v43 = vpop.f32.mrb[140].mxu1 }
 0x74d   : > { %7683 = vmatprep.mubr.bf16.mxu0 %v17168_v41  ;;  %10402 = vmatprep.mubr.bf16.mxu1 %v16828_v21  ;;  %v12210_v60 = vpop.f32.mrb[105].mxu0  ;;  %v12764_v8 = vpop.f32.mrb[141].mxu1 }
 0x74e   : > { %v17172_v45 = vadd.f32 %v12210_v60, %v12209_v11  ;;  %v17174_v22 = vadd.f32 %v12764_v8, %v12763_v43  ;;  %v12212_v49 = vpop.f32.mrb[106].mxu0  ;;  %v12766_v59 = vpop.f32.mrb[142].mxu1  ;;  %12462 = vmatpush3.bf16.msra.mxu0 %v14283_v12  ;;  %v6533_v43 = vrot.slane %v6482_v48, 1  ;;  %v6457_v60 = vld [vmem:[#allocation2 + $0xf0] sm:$0xff]  ;;  %v6462_v8 = vld [vmem:[#allocation2 + $0x118] sm:$0xff]  ;;  %v6455_v12 = vld [vmem:[#allocation2 + $0xe0] sm:$0xff] }
 0x74f   : > { %v12213_v15 = vpop.f32.mrb[107].mxu0  ;;  %v12767_v28 = vpop.f32.mrb[143].mxu1  ;;  %12463 = vmatprep.subr.bf16.mxu0 %v14284_v23  ;;  %v6481_v21 = vpack.c.bf16 %v6457_v60, %v6455_v12  ;;  %v6484_v7 = vpack.c.bf16 %v6462_v8, %v6460_v47  ;;  %v6466_v8 = vld [vmem:[#allocation2 + $0x138] sm:$0xff] }
 0x750   : > { %18950 = vst [vmem:[#allocation63_spill] sm:$0xff] %v17174_v22  ;;  %v17182_v41 = vadd.f32 %v12213_v15, %v12212_v49  ;;  %v17184_v11 = vadd.f32 %v12767_v28, %v12766_v59  ;;  %v17187_v22 = vsel %vm18952_vm14, %v6523_v4, %v6527_v46  ;;  %v17192_v15 = vsel %vm18954_vm13, %v6529_v19, %v6533_v43 }
 0x751   : > { %18953 = vst [vmem:[#allocation65_spill] sm:$0xff] %v17187_v22  ;;  %18955 = vst [vmem:[#allocation66_spill] sm:$0xff] %v17192_v15  ;;  %v6537_v47 = vrot.slane %v6484_v7, 1 }
 0x752   : > { %18951 = vst [vmem:[#allocation64_spill] sm:$0xff] %v17184_v11  ;;  %12464 = vmatpush3.bf16.msra.mxu0 %v14285_v31  ;;  %v6531_v11 = vrot.slane %v6481_v21, 1 }
 0x753   : > { %12519 = vmatprep.subr.bf16.mxu0 %v14286_v3 }
 0x754   : > { %7684 = vmatmul.mubr.bf16.gmra.mrb[212].mxu0 %v17187_v22  ;;  %10403 = vmatmul.mubr.bf16.gmra.mrb[248].mxu1 %v16591_v5  ;;  %v12215_v28 = vpop.f32.mrb[108].mxu0  ;;  %v12769_v59 = vpop.f32.mrb[144].mxu1 }
 0x755   : > { %7691 = vmatprep.mubr.bf16.mxu0 %v17192_v15  ;;  %10410 = vmatprep.mubr.bf16.mxu1 %v16856_v27  ;;  %v12216_v23 = vpop.f32.mrb[109].mxu0  ;;  %v12770_v4 = vpop.f32.mrb[145].mxu1  ;;  %v17205_v15 = vsel %vm18958_vm10, %v6527_v46, %v6531_v11  ;;  %v6464_v27 = vld [vmem:[#allocation2 + $0x128] sm:$0xff] }
 0x756   : > { %v17196_v48 = vadd.f32 %v12216_v23, %v12215_v28  ;;  %v17198_v49 = vadd.f32 %v12770_v4, %v12769_v59  ;;  %v12218_v31 = vpop.f32.mrb[110].mxu0  ;;  %v12772_v3 = vpop.f32.mrb[146].mxu1  ;;  %18959 = vst [vmem:[#allocation69_spill] sm:$0xff] %v17205_v15  ;;  %v17210_v28 = vsel %vm18960_vm15, %v6533_v43, %v6537_v47  ;;  %v6486_v21 = vpack.c.bf16 %v6466_v8, %v6464_v27  ;;  %v6468_v27 = vld [vmem:[#allocation2 + $0x148] sm:$0x3] }
 0x757   : > { %v12219_v60 = vpop.f32.mrb[111].mxu0  ;;  %v12773_v12 = vpop.f32.mrb[147].mxu1  ;;  %18961 = vst [vmem:[#allocation70_spill] sm:$0xff] %v17210_v28  ;;  %v17224_v8 = vsel %vm18964_vm2, %v6531_v11, %v16690_v16 }
 0x758   : > { %18956 = vst [vmem:[#allocation67_spill] sm:$0xff] %v17198_v49  ;;  %v17200_v19 = vadd.f32 %v12219_v60, %v12218_v31  ;;  %v17202_v22 = vadd.f32 %v12773_v12, %v12772_v3  ;;  %18965 = vst [vmem:[#allocation73_spill] sm:$0xff] %v17224_v8 }
 0x75a   : > { %18957 = vst [vmem:[#allocation68_spill] sm:$0xff] %v17202_v22 }
 0x75c   : > { %7692 = vmatmul.mubr.bf16.gmra.mrb[216].mxu0 %v17205_v15  ;;  %10411 = vmatmul.mubr.bf16.gmra.mrb[252].mxu1 %v16604_v50  ;;  %v12221_v59 = vpop.f32.mrb[112].mxu0  ;;  %v12775_v23 = vpop.f32.mrb[148].mxu1  ;;  %v6541_v15 = vrot.slane %v6486_v21, 1 }
 0x75d   : > { %7699 = vmatprep.mubr.bf16.mxu0 %v17210_v28  ;;  %10418 = vmatprep.mubr.bf16.mxu1 %v16878_v54  ;;  %v12222_v7 = vpop.f32.mrb[113].mxu0  ;;  %v12776_v4 = vpop.f32.mrb[149].mxu1 }
 0x75e   : > { %v17214_v31 = vadd.f32 %v12222_v7, %v12221_v59  ;;  %v17216_v46 = vadd.f32 %v12776_v4, %v12775_v23  ;;  %v12224_v3 = vpop.f32.mrb[114].mxu0  ;;  %v12778_v60 = vpop.f32.mrb[150].mxu1  ;;  %v17229_v59 = vsel %vm18966_vm4, %v6537_v47, %v6541_v15  ;;  %v6488_v4 = vpack.c.bf16 %v6468_v27, %v6468_v27  ;;  %v6467_v27 = vld [vmem:[#allocation2 + $0x140] sm:$0x3] }
 0x75f   : > { %v12225_v12 = vpop.f32.mrb[115].mxu0  ;;  %v12779_v22 = vpop.f32.mrb[151].mxu1  ;;  %18967 = vst [vmem:[#allocation74_spill] sm:$0xff] %v17229_v59  ;;  %v6487_v28 = vpack.c.bf16 %v6467_v27, %v6467_v27 }
 0x760   : > { %18962 = vst [vmem:[#allocation71_spill] sm:$0xff] %v17216_v46  ;;  %v17218_v49 = vadd.f32 %v12225_v12, %v12224_v3  ;;  %v17220_v43 = vadd.f32 %v12779_v22, %v12778_v60 }
 0x762   : > { %18963 = vst [vmem:[#allocation72_spill] sm:$0xff] %v17220_v43 }
 0x764   : > { %7700 = vmatmul.mubr.bf16.gmra.mrb[220].mxu0 %v17224_v8  ;;  %10419 = vmatmul.mubr.bf16.gmra.mrb[0].mxu1 %v16636_v18  ;;  %v12227_v23 = vpop.f32.mrb[116].mxu0  ;;  %v12781_v7 = vpop.f32.mrb[152].mxu1  ;;  %v6545_v8 = vrot.slane %v6488_v4, 1 }
 0x765   : > { %7707 = vmatprep.mubr.bf16.mxu0 %v17229_v59  ;;  %10426 = vmatprep.mubr.bf16.mxu1 %v16900_v29  ;;  %v12228_v22 = vpop.f32.mrb[117].mxu0  ;;  %v12782_v21 = vpop.f32.mrb[153].mxu1  ;;  %v18970_v59 = vld [vmem:[#allocation51_spill] sm:$0xff] }
 0x766   : > { %v17233_v3 = vadd.f32 %v12228_v22, %v12227_v23  ;;  %v17235_v16 = vadd.f32 %v12782_v21, %v12781_v7  ;;  %v12230_v11 = vpop.f32.mrb[118].mxu0  ;;  %v12784_v60 = vpop.f32.mrb[154].mxu1  ;;  %v17244_v29 = vsel %vm18971_vm6, %v6541_v15, %v6545_v8  ;;  %v17247_v23 = vld [vmem:[#allocation3 + $0x8] sm:$0xff] }
 0x767   : > { %v12231_v12 = vpop.f32.mrb[119].mxu0  ;;  %v12785_v43 = vpop.f32.mrb[155].mxu1  ;;  %18972 = vst [vmem:[#allocation77_spill] sm:$0xff] %v17244_v29 }
 0x768   : > { %18968 = vst [vmem:[#allocation75_spill] sm:$0xff] %v17235_v16  ;;  %v17237_v46 = vadd.f32 %v12231_v12, %v12230_v11  ;;  %v17239_v47 = vadd.f32 %v12785_v43, %v12784_v60  ;;  %v6543_v43 = vrot.slane %v6487_v28, 1  ;;  %v18975_v16 = vld [vmem:[#allocation47_spill] sm:$0xff] }
 0x76a   : > { %18969 = vst [vmem:[#allocation76_spill] sm:$0xff] %v17239_v47 }
 0x76c   : > { %7708 = vmatmul.mubr.bf16.gmra.mrb[224].mxu0 %v18970_v59  ;;  %10427 = vmatmul.mubr.bf16.gmra.mrb[4].mxu1 %v16914_v62 }
 0x76d   : > { %7715 = vmatprep.mubr.bf16.mxu0 %v17244_v29  ;;  %10434 = vmatprep.mubr.bf16.mxu1 %v17247_v23  ;;  %v17260_v29 = vsel %vm18976_vm9, %v18975_v16, %v6543_v43 }
 0x76e   : > { %18977 = vst [vmem:[#allocation47_spill] sm:$0xff] %v17260_v29 }
 0x76f   : > { %v12233_v7 = vpop.f32.mrb[120].mxu0  ;;  %v12787_v22 = vpop.f32.mrb[156].mxu1 }
 0x770   : > { %v12234_v21 = vpop.f32.mrb[121].mxu0  ;;  %v12788_v4 = vpop.f32.mrb[157].mxu1 }
 0x771   : > { %v17250_v11 = vadd.f32 %v12234_v21, %v12233_v7  ;;  %v17252_v60 = vadd.f32 %v12788_v4, %v12787_v22  ;;  %v12236_v12 = vpop.f32.mrb[122].mxu0  ;;  %v12790_v62 = vpop.f32.mrb[158].mxu1 }
 0x772   : > { %v12237_v27 = vpop.f32.mrb[123].mxu0  ;;  %v12791_v15 = vpop.f32.mrb[159].mxu1 }
 0x773   : > { %18973 = vst [vmem:[#allocation78_spill] sm:$0xff] %v17252_v60  ;;  %v17254_v8 = vadd.f32 %v12237_v27, %v12236_v12  ;;  %v17256_v47 = vadd.f32 %v12791_v15, %v12790_v62  ;;  %v14287_v62 = vld [vmem:[%s18606_s7 + $0x80] sm:$0xff]  }
 0x774   : > { %7716 = vmatmul.mubr.bf16.gmra.mrb[228].mxu0 %v17260_v29  ;;  %10435 = vmatmul.mubr.bf16.gmra.mrb[8].mxu1 %v17247_v23 }
 0x775   : > { %18974 = vst [vmem:[#allocation79_spill] sm:$0xff] %v17256_v47  ;;  %8140 = vmatprep.mubr.bf16.mxu0 %v17247_v23  ;;  %10442 = vmatprep.mubr.bf16.mxu1 %v17247_v23  ;;  %v14288_v47 = vld [vmem:[%s18606_s7 + $0xc8] sm:$0xff]  }
 0x777   : > { %v12255_v28 = vpop.f32.mrb[124].mxu0  ;;  %v12793_v7 = vpop.f32.mrb[160].mxu1 }
 0x778   : > { %v12256_v22 = vpop.f32.mrb[125].mxu0  ;;  %v12794_v21 = vpop.f32.mrb[161].mxu1 }
 0x779   : > { %v12257_v4 = vadd.f32 %v12256_v22, %v12255_v28  ;;  %v12258_v12 = vpop.f32.mrb[126].mxu0  ;;  %v17269_v16 = vadd.f32 %v12794_v21, %v12793_v7  ;;  %v12796_v43 = vpop.f32.mrb[162].mxu1  ;;  %v18980_v7 = vld [vmem:[#allocation23_spill] sm:$0xff]  ;;  %v14289_v22 = vld [vmem:[%s18606_s7 + $0x88] sm:$0xff]  }
 0x77a   : > { %v12259_v27 = vpop.f32.mrb[127].mxu0  ;;  %v12797_v15 = vpop.f32.mrb[163].mxu1 }
 0x77b   : > { %18978 = vst [vmem:[#allocation80_spill] sm:$0xff] %v17269_v16  ;;  %v17275_v60 = vadd.f32 %v12257_v4, %v17061_v26  ;;  %v12260_v29 = vadd.f32 %v12259_v27, %v12258_v12  ;;  %v17277_v59 = vadd.f32 %v12797_v15, %v12796_v43  ;;  %v14290_v26 = vld [vmem:[%s18606_s7 + $0xd0] sm:$0xff]  }
 0x77c   : > { %8141 = vmatmul.mubr.bf16.vlgmr.msra.gmra.mrb[232].mxu0 %v17247_v23  ;;  %10443 = vmatmul.mubr.bf16.gmra.mrb[12].mxu1 %v17247_v23 }
 0x77d   : > { %18979 = vst [vmem:[#allocation81_spill] sm:$0xff] %v17277_v59  ;;  %v17282_v28 = vadd.f32 %v12260_v29, %v17064_v2  ;;  %12520 = vmatpush3.bf16.msra.mxu0 %v14287_v62  ;;  %8148 = vmatprep.mubr.bf16.mxu0 %v18980_v7  ;;  %v14291_v62 = vld [vmem:[%s18606_s7 + $0x90] sm:$0xff]   ;;  %v14292_v59 = vld [vmem:[%s18606_s7 + $0xd8] sm:$0xff]  }
 0x77e   : > { %12521 = vmatprep.subr.bf16.mxu0 %v14288_v47 }
 0x77f   : > { %v12261_v21 = vpop.f32.mrb[128].mxu0  ;;  %v12885_v4 = vpop.f32.mrb[164].mxu1 }
 0x780   : > { %v12262_v12 = vpop.f32.mrb[129].mxu0  ;;  %v12886_v43 = vpop.f32.mrb[165].mxu1 }
 0x781   : > { %v12263_v27 = vadd.f32 %v12262_v12, %v12261_v21  ;;  %v17291_v15 = vadd.f32 %v12886_v43, %v12885_v4  ;;  %v12264_v2 = vpop.f32.mrb[130].mxu0  ;;  %v12888_v29 = vpop.f32.mrb[166].mxu1  ;;  %12522 = vmatpush3.bf16.msra.mxu0 %v14289_v22  ;;  %v18983_v12 = vld [vmem:[#allocation21_spill] sm:$0xff]  ;;  %v18984_v43 = vld [vmem:[#allocation31_spill] sm:$0xff] }
 0x782   : > { %v12265_v7 = vpop.f32.mrb[131].mxu0  ;;  %v12889_v47 = vpop.f32.mrb[167].mxu1  ;;  %12523 = vmatprep.subr.bf16.mxu0 %v14290_v26  ;;  %v14293_v26 = vld [vmem:[%s18606_s7 + $0x98] sm:$0xff]  }
 0x783   : > { %18981 = vst [vmem:[#allocation23_spill] sm:$0xff] %v17291_v15  ;;  %v17300_v16 = vadd.f32 %v12263_v27, %v17085_v39  ;;  %v12266_v21 = vadd.f32 %v12265_v7, %v12264_v2  ;;  %v17302_v4 = vadd.f32 %v12889_v47, %v12888_v29  ;;  %v14294_v39 = vld [vmem:[%s18606_s7 + $0xe0] sm:$0xff]  }
 0x784   : > { %8149 = vmatmul.mubr.bf16.gmra.mrb[236].mxu0 %v18983_v12 }
 0x785   : > { %18982 = vst [vmem:[#allocation82_spill] sm:$0xff] %v17302_v4  ;;  %v17306_v22 = vadd.f32 %v12266_v21, %v17092_v6  ;;  %8156 = vmatprep.mubr.bf16.mxu0 %v18984_v43  ;;  %12524 = vmatpush3.bf16.msra.mxu0 %v14291_v62  ;;  %v14295_v62 = vld [vmem:[%s18606_s7 + $0xa0] sm:$0xff]   ;;  %v14296_v4 = vld [vmem:[%s18606_s7 + $0xe8] sm:$0xff]  }
 0x786   : > { %12525 = vmatprep.subr.bf16.mxu0 %v14292_v59 }
 0x787   : > { %v12267_v27 = vpop.f32.mrb[132].mxu0  ;;  %v12891_v2 = vpop.f32.mrb[168].mxu1 }
 0x788   : > { %v12268_v29 = vpop.f32.mrb[133].mxu0  ;;  %v12892_v7 = vpop.f32.mrb[169].mxu1 }
 0x789   : > { %v12269_v47 = vadd.f32 %v12268_v29, %v12267_v27  ;;  %v17315_v12 = vadd.f32 %v12892_v7, %v12891_v2  ;;  %v12270_v6 = vpop.f32.mrb[134].mxu0  ;;  %v12894_v21 = vpop.f32.mrb[170].mxu1  ;;  %12526 = vmatpush3.bf16.msra.mxu0 %v14293_v26  ;;  %v18987_v29 = vld [vmem:[#allocation24_spill] sm:$0xff] }
 0x78a   : > { %v12271_v43 = vpop.f32.mrb[135].mxu0  ;;  %v12895_v59 = vpop.f32.mrb[171].mxu1  ;;  %12527 = vmatprep.subr.bf16.mxu0 %v14294_v39  ;;  %v14297_v39 = vld [vmem:[%s18606_s7 + $0xa8] sm:$0xff]  }
 0x78b   : > { %18985 = vst [vmem:[#allocation21_spill] sm:$0xff] %v17315_v12  ;;  %v17324_v15 = vadd.f32 %v12269_v47, %v17112_v14  ;;  %v12272_v27 = vadd.f32 %v12271_v43, %v12270_v6  ;;  %v17326_v2 = vadd.f32 %v12895_v59, %v12894_v21  ;;  %v14298_v14 = vld [vmem:[%s18606_s7 + $0xf0] sm:$0xff]  }
 0x78c   : > { %8157 = vmatmul.mubr.bf16.gmra.mrb[240].mxu0 %v18987_v29  ;;  %v14300_v29 = vld [vmem:[%s18606_s7 + $0xf8] sm:$0xff]  }
 0x78d   : > { %18986 = vst [vmem:[#allocation31_spill] sm:$0xff] %v17326_v2  ;;  %v17330_v26 = vadd.f32 %v12272_v27, %v17122_v24  ;;  %8164 = vmatprep.mubr.bf16.mxu0 %v16284_v51  ;;  %12528 = vmatpush3.bf16.msra.mxu0 %v14295_v62  ;;  %v14299_v51 = vld [vmem:[%s18606_s7 + $0xb0] sm:$0xff]  }
 0x78e   : > { %12529 = vmatprep.subr.bf16.mxu0 %v14296_v4 }
 0x78f   : > { %v12273_v7 = vpop.f32.mrb[136].mxu0  ;;  %v12897_v47 = vpop.f32.mrb[172].mxu1 }
 0x790   : > { %v12274_v6 = vpop.f32.mrb[137].mxu0  ;;  %v12898_v21 = vpop.f32.mrb[173].mxu1 }
 0x791   : > { %v12275_v43 = vadd.f32 %v12274_v6, %v12273_v7  ;;  %v17339_v59 = vadd.f32 %v12898_v21, %v12897_v47  ;;  %v12276_v24 = vpop.f32.mrb[138].mxu0  ;;  %v12900_v27 = vpop.f32.mrb[174].mxu1  ;;  %12530 = vmatpush3.bf16.msra.mxu0 %v14297_v39 }
 0x792   : > { %v12277_v62 = vpop.f32.mrb[139].mxu0  ;;  %v12901_v4 = vpop.f32.mrb[175].mxu1  ;;  %12531 = vmatprep.subr.bf16.mxu0 %v14298_v14  ;;  %v14301_v14 = vld [vmem:[%s18606_s7 + $0xb8] sm:$0xff]  }
 0x793   : > { %18988 = vst [vmem:[#allocation24_spill] sm:$0xff] %v17339_v59  ;;  %v17348_v2 = vadd.f32 %v12275_v43, %v17142_v32  ;;  %v12278_v7 = vadd.f32 %v12277_v62, %v12276_v24  ;;  %v17350_v47 = vadd.f32 %v12901_v4, %v12900_v27  ;;  %v14302_v32 = vld [vmem:[%s18606_s7 + $0x140] sm:$0xff]  }
 0x794   : > { %8165 = vmatmul.mubr.bf16.gmra.mrb[244].mxu0 %v18912_v36 }
 0x795   : > { %18989 = vst [vmem:[#allocation83_spill] sm:$0xff] %v17350_v47  ;;  %v17354_v39 = vadd.f32 %v12278_v7, %v17152_v40  ;;  %8172 = vmatprep.mubr.bf16.mxu0 %v18913_v25  ;;  %12532 = vmatpush3.bf16.msra.mxu0 %v14299_v51 }
 0x796   : > { %12533 = vmatprep.subr.bf16.mxu0 %v14300_v29 }
 0x797   : > { %v12279_v6 = vpop.f32.mrb[140].mxu0  ;;  %v12903_v21 = vpop.f32.mrb[176].mxu1 }
 0x798   : > { %v12280_v43 = vpop.f32.mrb[141].mxu0  ;;  %v12904_v24 = vpop.f32.mrb[177].mxu1 }
 0x799   : > { %v12281_v36 = vadd.f32 %v12280_v43, %v12279_v6  ;;  %v17363_v27 = vadd.f32 %v12904_v24, %v12903_v21  ;;  %v12282_v40 = vpop.f32.mrb[142].mxu0  ;;  %v12906_v62 = vpop.f32.mrb[178].mxu1  ;;  %12534 = vmatpush3.bf16.msra.mxu0 %v14301_v14 }
 0x79a   : > { %v12283_v25 = vpop.f32.mrb[143].mxu0  ;;  %v12907_v51 = vpop.f32.mrb[179].mxu1  ;;  %12589 = vmatprep.subr.bf16.mxu0 %v14302_v32 }
 0x79b   : > { %18990 = vst [vmem:[#allocation84_spill] sm:$0xff] %v17363_v27  ;;  %v17366_v4 = vadd.f32 %v12281_v36, %v17172_v45  ;;  %v12284_v29 = vadd.f32 %v12283_v25, %v12282_v40  ;;  %v17368_v7 = vadd.f32 %v12907_v51, %v12906_v62 }
 0x79c   : > { %8173 = vmatmul.mubr.bf16.gmra.mrb[248].mxu0 %v18914_v61 }
 0x79d   : > { %18991 = vst [vmem:[#allocation85_spill] sm:$0xff] %v17368_v7  ;;  %v17372_v47 = vadd.f32 %v12284_v29, %v17182_v41  ;;  %8180 = vmatprep.mubr.bf16.mxu0 %v18915_v10 }
 0x79f   : > { %v12285_v6 = vpop.f32.mrb[144].mxu0  ;;  %v12909_v21 = vpop.f32.mrb[180].mxu1 }
 0x7a0   : > { %v12286_v43 = vpop.f32.mrb[145].mxu0  ;;  %v12910_v14 = vpop.f32.mrb[181].mxu1 }
 0x7a1   : > { %v12287_v24 = vadd.f32 %v12286_v43, %v12285_v6  ;;  %v17375_v27 = vadd.f32 %v12910_v14, %v12909_v21  ;;  %v12288_v32 = vpop.f32.mrb[146].mxu0  ;;  %v12912_v45 = vpop.f32.mrb[182].mxu1 }
 0x7a2   : > { %v12289_v36 = vpop.f32.mrb[147].mxu0  ;;  %v12913_v40 = vpop.f32.mrb[183].mxu1 }
 0x7a3   : > { %18992 = vst [vmem:[#allocation86_spill] sm:$0xff] %v17375_v27  ;;  %v17378_v62 = vadd.f32 %v12287_v24, %v17196_v48  ;;  %v12290_v61 = vadd.f32 %v12289_v36, %v12288_v32  ;;  %v17380_v25 = vadd.f32 %v12913_v40, %v12912_v45 }
 0x7a4   : > { %8181 = vmatmul.mubr.bf16.gmra.mrb[252].mxu0 %v18916_v55 }
 0x7a5   : > { %18993 = vst [vmem:[#allocation87_spill] sm:$0xff] %v17380_v25  ;;  %v17384_v10 = vadd.f32 %v12290_v61, %v17200_v19  ;;  %8188 = vmatprep.mubr.bf16.mxu0 %v18917_v9 }
 0x7a7   : > { %v12291_v41 = vpop.f32.mrb[148].mxu0  ;;  %v12915_v51 = vpop.f32.mrb[184].mxu1 }
 0x7a8   : > { %v12292_v29 = vpop.f32.mrb[149].mxu0  ;;  %v12916_v6 = vpop.f32.mrb[185].mxu1 }
 0x7a9   : > { %v12293_v21 = vadd.f32 %v12292_v29, %v12291_v41  ;;  %v17387_v43 = vadd.f32 %v12916_v6, %v12915_v51  ;;  %v12294_v14 = vpop.f32.mrb[150].mxu0  ;;  %v12918_v48 = vpop.f32.mrb[186].mxu1 }
 0x7aa   : > { %v12295_v24 = vpop.f32.mrb[151].mxu0  ;;  %v12919_v32 = vpop.f32.mrb[187].mxu1 }
 0x7ab   : > { %18994 = vst [vmem:[#allocation88_spill] sm:$0xff] %v17387_v43  ;;  %v17390_v45 = vadd.f32 %v12293_v21, %v17214_v31  ;;  %v12296_v55 = vadd.f32 %v12295_v24, %v12294_v14  ;;  %v17392_v36 = vadd.f32 %v12919_v32, %v12918_v48 }
 0x7ac   : > { %8189 = vmatmul.mubr.bf16.gmra.mrb[0].mxu0 %v18918_v35 }
 0x7ad   : > { %18995 = vst [vmem:[#allocation89_spill] sm:$0xff] %v17392_v36  ;;  %v17396_v9 = vadd.f32 %v12296_v55, %v17218_v49  ;;  %8196 = vmatprep.mubr.bf16.mxu0 %v18919_v30 }
 0x7af   : > { %v12297_v19 = vpop.f32.mrb[152].mxu0  ;;  %v12921_v40 = vpop.f32.mrb[188].mxu1 }
 0x7b0   : > { %v12298_v61 = vpop.f32.mrb[153].mxu0  ;;  %v12922_v41 = vpop.f32.mrb[189].mxu1 }
 0x7b1   : > { %v12299_v51 = vadd.f32 %v12298_v61, %v12297_v19  ;;  %v17399_v29 = vadd.f32 %v12922_v41, %v12921_v40  ;;  %v12300_v6 = vpop.f32.mrb[154].mxu0  ;;  %v12924_v31 = vpop.f32.mrb[190].mxu1 }
 0x7b2   : > { %v12301_v21 = vpop.f32.mrb[155].mxu0  ;;  %v12925_v14 = vpop.f32.mrb[191].mxu1 }
 0x7b3   : > { %18996 = vst [vmem:[#allocation90_spill] sm:$0xff] %v17399_v29  ;;  %v17402_v48 = vadd.f32 %v12299_v51, %v17233_v3  ;;  %v12302_v35 = vadd.f32 %v12301_v21, %v12300_v6  ;;  %v17404_v24 = vadd.f32 %v12925_v14, %v12924_v31 }
 0x7b4   : > { %8197 = vmatmul.mubr.bf16.gmra.mrb[4].mxu0 %v18920_v17 }
 0x7b5   : > { %18997 = vst [vmem:[#allocation91_spill] sm:$0xff] %v17404_v24  ;;  %v17408_v30 = vadd.f32 %v12302_v35, %v17237_v46  ;;  %8204 = vmatprep.mubr.bf16.mxu0 %v18921_v33 }
 0x7b7   : > { %v12303_v49 = vpop.f32.mrb[156].mxu0  ;;  %v12927_v32 = vpop.f32.mrb[192].mxu1 }
 0x7b8   : > { %v12304_v55 = vpop.f32.mrb[157].mxu0  ;;  %v12928_v19 = vpop.f32.mrb[193].mxu1 }
 0x7b9   : > { %v12305_v40 = vadd.f32 %v12304_v55, %v12303_v49  ;;  %v17411_v61 = vadd.f32 %v12928_v19, %v12927_v32  ;;  %v12306_v41 = vpop.f32.mrb[158].mxu0  ;;  %v12930_v3 = vpop.f32.mrb[194].mxu1 }
 0x7ba   : > { %v12307_v51 = vpop.f32.mrb[159].mxu0  ;;  %v12931_v6 = vpop.f32.mrb[195].mxu1 }
 0x7bb   : > { %18998 = vst [vmem:[#allocation92_spill] sm:$0xff] %v17411_v61  ;;  %v17414_v31 = vadd.f32 %v12305_v40, %v17250_v11  ;;  %v12308_v17 = vadd.f32 %v12307_v51, %v12306_v41  ;;  %v17416_v21 = vadd.f32 %v12931_v6, %v12930_v3  ;;  %v14303_v11 = vld [vmem:[%s18606_s7 + $0x100] sm:$0xff]  }
 0x7bc   : > { %8205 = vmatmul.mubr.bf16.gmra.mrb[8].mxu0 %v18922_v0 }
 0x7bd   : > { %18999 = vst [vmem:[#allocation93_spill] sm:$0xff] %v17416_v21  ;;  %v17420_v33 = vadd.f32 %v12308_v17, %v17254_v8  ;;  %8245 = vmatprep.mubr.bf16.mxu0 %v17247_v23  ;;  %v14304_v8 = vld [vmem:[%s18606_s7 + $0x148] sm:$0xff]  }
 0x7bf   : > { %v12325_v46 = vpop.f32.mrb[160].mxu0  ;;  %v12933_v14 = vpop.f32.mrb[196].mxu1 }
 0x7c0   : > { %v12326_v35 = vpop.f32.mrb[161].mxu0  ;;  %v12934_v49 = vpop.f32.mrb[197].mxu1 }
 0x7c1   : > { %v12327_v32 = vadd.f32 %v12326_v35, %v12325_v46  ;;  %v12328_v55 = vpop.f32.mrb[162].mxu0  ;;  %v17426_v19 = vadd.f32 %v12934_v49, %v12933_v14  ;;  %v12936_v40 = vpop.f32.mrb[198].mxu1  ;;  %v19002_v46 = vld [vmem:[#allocation42_spill] sm:$0xff]  ;;  %v14305_v14 = vld [vmem:[%s18606_s7 + $0x108] sm:$0xff]  }
 0x7c2   : > { %v12329_v41 = vpop.f32.mrb[163].mxu0  ;;  %v12937_v0 = vpop.f32.mrb[199].mxu1 }
 0x7c3   : > { %19000 = vst [vmem:[#allocation94_spill] sm:$0xff] %v17426_v19  ;;  %v17432_v3 = vadd.f32 %v12327_v32, %v17275_v60  ;;  %v12330_v51 = vadd.f32 %v12329_v41, %v12328_v55  ;;  %v17434_v6 = vadd.f32 %v12937_v0, %v12936_v40  ;;  %v14306_v60 = vld [vmem:[%s18606_s7 + $0x150] sm:$0xff]  }
 0x7c4   : > { %8246 = vmatmul.mubr.bf16.vlgmr.msra.gmra.mrb[12].mxu0 %v17247_v23  ;;  %v14307_v0 = vld [vmem:[%s18606_s7 + $0x110] sm:$0xff]  }
 0x7c5   : > { %19001 = vst [vmem:[#allocation95_spill] sm:$0xff] %v17434_v6  ;;  %v17438_v17 = vadd.f32 %v12330_v51, %v17282_v28  ;;  %12590 = vmatpush3.bf16.msra.mxu0 %v14303_v11  ;;  %8253 = vmatprep.mubr.bf16.mxu0 %v19002_v46  ;;  %v14308_v46 = vld [vmem:[%s18606_s7 + $0x158] sm:$0xff]  }
 0x7c6   : > { %12591 = vmatprep.subr.bf16.mxu0 %v14304_v8 }
 0x7c7   : > { %v12331_v35 = vpop.f32.mrb[164].mxu0  ;;  %v13025_v49 = vpop.f32.mrb[200].mxu1 }
 0x7c8   : > { %v12332_v32 = vpop.f32.mrb[165].mxu0  ;;  %v13026_v55 = vpop.f32.mrb[201].mxu1 }
 0x7c9   : > { %v12333_v40 = vadd.f32 %v12332_v32, %v12331_v35  ;;  %v17447_v41 = vadd.f32 %v13026_v55, %v13025_v49  ;;  %v12334_v28 = vpop.f32.mrb[166].mxu0  ;;  %v13028_v11 = vpop.f32.mrb[202].mxu1  ;;  %12592 = vmatpush3.bf16.msra.mxu0 %v14305_v14  ;;  %v19005_v32 = vld [vmem:[#allocation44_spill] sm:$0xff] }
 0x7ca   : > { %v12335_v51 = vpop.f32.mrb[167].mxu0  ;;  %v13029_v8 = vpop.f32.mrb[203].mxu1  ;;  %12593 = vmatprep.subr.bf16.mxu0 %v14306_v60  ;;  %v14309_v60 = vld [vmem:[%s18606_s7 + $0x118] sm:$0xff]  }
 0x7cb   : > { %19003 = vst [vmem:[#allocation42_spill] sm:$0xff] %v17447_v41  ;;  %v17456_v6 = vadd.f32 %v12333_v40, %v17300_v16  ;;  %v12336_v35 = vadd.f32 %v12335_v51, %v12334_v28  ;;  %v17458_v49 = vadd.f32 %v13029_v8, %v13028_v11  ;;  %v14310_v16 = vld [vmem:[%s18606_s7 + $0x160] sm:$0xff]  }
 0x7cc   : > { %8254 = vmatmul.mubr.bf16.gmra.mrb[16].mxu0 %v19005_v32 }
 0x7cd   : > { %19004 = vst [vmem:[#allocation96_spill] sm:$0xff] %v17458_v49  ;;  %v17462_v14 = vadd.f32 %v12336_v35, %v17306_v22  ;;  %8261 = vmatprep.mubr.bf16.mxu0 %v18925_v57  ;;  %12594 = vmatpush3.bf16.msra.mxu0 %v14307_v0  ;;  %v14311_v0 = vld [vmem:[%s18606_s7 + $0x120] sm:$0xff]   ;;  %v14312_v49 = vld [vmem:[%s18606_s7 + $0x168] sm:$0xff]  }
 0x7ce   : > { %12595 = vmatprep.subr.bf16.mxu0 %v14308_v46 }
 0x7cf   : > { %v12337_v55 = vpop.f32.mrb[168].mxu0  ;;  %v13031_v40 = vpop.f32.mrb[204].mxu1 }
 0x7d0   : > { %v12338_v28 = vpop.f32.mrb[169].mxu0  ;;  %v13032_v11 = vpop.f32.mrb[205].mxu1 }
 0x7d1   : > { %v12339_v51 = vadd.f32 %v12338_v28, %v12337_v55  ;;  %v17471_v8 = vadd.f32 %v13032_v11, %v13031_v40  ;;  %v12340_v22 = vpop.f32.mrb[170].mxu0  ;;  %v13034_v35 = vpop.f32.mrb[206].mxu1  ;;  %12596 = vmatpush3.bf16.msra.mxu0 %v14309_v60  ;;  %v19008_v28 = vld [vmem:[#allocation49_spill] sm:$0xff] }
 0x7d2   : > { %v12341_v32 = vpop.f32.mrb[171].mxu0  ;;  %v13035_v46 = vpop.f32.mrb[207].mxu1  ;;  %12597 = vmatprep.subr.bf16.mxu0 %v14310_v16  ;;  %v14313_v16 = vld [vmem:[%s18606_s7 + $0x128] sm:$0xff]  }
 0x7d3   : > { %19006 = vst [vmem:[#allocation44_spill] sm:$0xff] %v17471_v8  ;;  %v17480_v41 = vadd.f32 %v12339_v51, %v17324_v15  ;;  %v12342_v55 = vadd.f32 %v12341_v32, %v12340_v22  ;;  %v17482_v40 = vadd.f32 %v13035_v46, %v13034_v35  ;;  %v14314_v15 = vld [vmem:[%s18606_s7 + $0x170] sm:$0xff]   ;;  %v14316_v8 = vld [vmem:[%s18606_s7 + $0x178] sm:$0xff]  }
 0x7d4   : > { %8262 = vmatmul.mubr.bf16.gmra.mrb[20].mxu0 %v16588_v58 }
 0x7d5   : > { %19007 = vst [vmem:[#allocation97_spill] sm:$0xff] %v17482_v40  ;;  %v17486_v60 = vadd.f32 %v12342_v55, %v17330_v26  ;;  %8269 = vmatprep.mubr.bf16.mxu0 %v19008_v28  ;;  %12598 = vmatpush3.bf16.msra.mxu0 %v14311_v0  ;;  %v14315_v0 = vld [vmem:[%s18606_s7 + $0x130] sm:$0xff]  }
 0x7d6   : > { %12599 = vmatprep.subr.bf16.mxu0 %v14312_v49 }
 0x7d7   : > { %v12343_v11 = vpop.f32.mrb[172].mxu0  ;;  %v13037_v51 = vpop.f32.mrb[208].mxu1 }
 0x7d8   : > { %v12344_v22 = vpop.f32.mrb[173].mxu0  ;;  %v13038_v35 = vpop.f32.mrb[209].mxu1 }
 0x7d9   : > { %v12345_v32 = vadd.f32 %v12344_v22, %v12343_v11  ;;  %v17495_v46 = vadd.f32 %v13038_v35, %v13037_v51  ;;  %v12346_v26 = vpop.f32.mrb[174].mxu0  ;;  %v13040_v55 = vpop.f32.mrb[210].mxu1  ;;  %12600 = vmatpush3.bf16.msra.mxu0 %v14313_v16 }
 0x7da   : > { %v12347_v40 = vpop.f32.mrb[175].mxu0  ;;  %v13041_v49 = vpop.f32.mrb[211].mxu1  ;;  %12601 = vmatprep.subr.bf16.mxu0 %v14314_v15  ;;  %v14317_v15 = vld [vmem:[%s18606_s7 + $0x138] sm:$0xff]  }
 0x7db   : > { %19009 = vst [vmem:[#allocation49_spill] sm:$0xff] %v17495_v46  ;;  %v17504_v19 = vadd.f32 %v12345_v32, %v17348_v2  ;;  %v12348_v11 = vadd.f32 %v12347_v40, %v12346_v26  ;;  %v17506_v51 = vadd.f32 %v13041_v49, %v13040_v55  ;;  %v14318_v2 = vld [vmem:[%s18606_s7 + $0x1c0] sm:$0xff]  }
 0x7dc   : > { %8270 = vmatmul.mubr.bf16.gmra.mrb[24].mxu0 %v16641_v20 }
 0x7dd   : > { %19010 = vst [vmem:[#allocation98_spill] sm:$0xff] %v17506_v51  ;;  %v17510_v16 = vadd.f32 %v12348_v11, %v17354_v39  ;;  %8277 = vmatprep.mubr.bf16.mxu0 %v16643_v44  ;;  %12602 = vmatpush3.bf16.msra.mxu0 %v14315_v0 }
 0x7de   : > { %12603 = vmatprep.subr.bf16.mxu0 %v14316_v8 }
 0x7df   : > { %v12349_v40 = vpop.f32.mrb[176].mxu0  ;;  %v13043_v22 = vpop.f32.mrb[212].mxu1 }
 0x7e0   : > { %v12350_v35 = vpop.f32.mrb[177].mxu0  ;;  %v13044_v32 = vpop.f32.mrb[213].mxu1 }
 0x7e1   : > { %v12351_v26 = vadd.f32 %v12350_v35, %v12349_v40  ;;  %v17519_v55 = vadd.f32 %v13044_v32, %v13043_v22  ;;  %v12352_v39 = vpop.f32.mrb[178].mxu0  ;;  %v13046_v49 = vpop.f32.mrb[214].mxu1  ;;  %12604 = vmatpush3.bf16.msra.mxu0 %v14317_v15 }
 0x7e2   : > { %v12353_v0 = vpop.f32.mrb[179].mxu0  ;;  %v13047_v11 = vpop.f32.mrb[215].mxu1  ;;  %12659 = vmatprep.subr.bf16.mxu0 %v14318_v2 }
 0x7e3   : > { %19011 = vst [vmem:[#allocation99_spill] sm:$0xff] %v17519_v55  ;;  %v17522_v51 = vadd.f32 %v12351_v26, %v17366_v4  ;;  %v12354_v8 = vadd.f32 %v12353_v0, %v12352_v39  ;;  %v17524_v46 = vadd.f32 %v13047_v11, %v13046_v49  ;;  %v19023_v55 = vld [vmem:[#allocation59_spill] sm:$0xff] }
 0x7e4   : > { %8278 = vmatmul.mubr.bf16.gmra.mrb[28].mxu0 %v16675_v52 }
 0x7e5   : > { %19012 = vst [vmem:[#allocation100_spill] sm:$0xff] %v17524_v46  ;;  %v17528_v21 = vadd.f32 %v12354_v8, %v17372_v47  ;;  %14531 = vmatprep.mubr.msk.bf16.mxu0 %vm15701_vm8, %v16797_v37 }
 0x7e7   : > { %v12355_v40 = vpop.f32.mrb[180].mxu0  ;;  %v13049_v15 = vpop.f32.mrb[216].mxu1 }
 0x7e8   : > { %v12356_v22 = vpop.f32.mrb[181].mxu0  ;;  %v13050_v35 = vpop.f32.mrb[217].mxu1 }
 0x7e9   : > { %v12357_v2 = vadd.f32 %v12356_v22, %v12355_v40  ;;  %v17533_v32 = vadd.f32 %v13050_v35, %v13049_v15  ;;  %v12358_v4 = vpop.f32.mrb[182].mxu0  ;;  %v13052_v26 = vpop.f32.mrb[218].mxu1 }
 0x7ea   : > { %v12359_v39 = vpop.f32.mrb[183].mxu0  ;;  %v13053_v49 = vpop.f32.mrb[219].mxu1 }
 0x7eb   : > { %19013 = vst [vmem:[#allocation101_spill] sm:$0xff] %v17533_v32  ;;  %v17536_v0 = vadd.f32 %v12357_v2, %v17378_v62  ;;  %v12360_v47 = vadd.f32 %v12359_v39, %v12358_v4  ;;  %v17538_v11 = vadd.f32 %v13053_v49, %v13052_v26 }
 0x7ec   : > { %8286 = vmatmul.mubr.bf16.gmra.mrb[32].mxu0 %v16817_v13 }
 0x7ed   : > { %19014 = vst [vmem:[#allocation102_spill] sm:$0xff] %v17538_v11  ;;  %v17542_v8 = vadd.f32 %v12360_v47, %v17384_v10  ;;  %14534 = vmatprep.mubr.msk.bf16.mxu0 %vm15727_vm3, %v16834_v1 }
 0x7ef   : > { %v12361_v40 = vpop.f32.mrb[184].mxu0  ;;  %v13055_v15 = vpop.f32.mrb[220].mxu1 }
 0x7f0   : > { %v12362_v22 = vpop.f32.mrb[185].mxu0  ;;  %v13056_v35 = vpop.f32.mrb[221].mxu1 }
 0x7f1   : > { %v12363_v32 = vadd.f32 %v12362_v22, %v12361_v40  ;;  %v17547_v46 = vadd.f32 %v13056_v35, %v13055_v15  ;;  %v12364_v62 = vpop.f32.mrb[186].mxu0  ;;  %v13058_v2 = vpop.f32.mrb[222].mxu1 }
 0x7f2   : > { %v12365_v4 = vpop.f32.mrb[187].mxu0  ;;  %v13059_v26 = vpop.f32.mrb[223].mxu1 }
 0x7f3   : > { %19015 = vst [vmem:[#allocation103_spill] sm:$0xff] %v17547_v46  ;;  %v17550_v39 = vadd.f32 %v12363_v32, %v17390_v45  ;;  %v12366_v10 = vadd.f32 %v12365_v4, %v12364_v62  ;;  %v17552_v49 = vadd.f32 %v13059_v26, %v13058_v2 }
 0x7f4   : > { %14537 = vmatmul.mubr.msk.bf16.gmra.mrb[36].mxu0 %vm15727_vm3, %v16849_v34 }
 0x7f5   : > { %19016 = vst [vmem:[#allocation104_spill] sm:$0xff] %v17552_v49  ;;  %v17558_v47 = vadd.f32 %v12366_v10, %v17396_v9  ;;  %14540 = vmatprep.mubr.msk.bf16.mxu0 %vm15752_vm5, %v16862_v42 }
 0x7f7   : > { %v12367_v40 = vpop.f32.mrb[188].mxu0  ;;  %v13061_v15 = vpop.f32.mrb[224].mxu1 }
 0x7f8   : > { %v12368_v22 = vpop.f32.mrb[189].mxu0  ;;  %v13062_v35 = vpop.f32.mrb[225].mxu1 }
 0x7f9   : > { %v12369_v45 = vadd.f32 %v12368_v22, %v12367_v40  ;;  %v17563_v32 = vadd.f32 %v13062_v35, %v13061_v15  ;;  %v12370_v62 = vpop.f32.mrb[190].mxu0  ;;  %v13064_v2 = vpop.f32.mrb[226].mxu1  ;;  %v19019_v40 = vld [vmem:[#allocation58_spill] sm:$0xff] }
 0x7fa   : > { %v12371_v4 = vpop.f32.mrb[191].mxu0  ;;  %v13065_v26 = vpop.f32.mrb[227].mxu1 }
 0x7fb   : > { %19017 = vst [vmem:[#allocation105_spill] sm:$0xff] %v17563_v32  ;;  %v17566_v49 = vadd.f32 %v12369_v45, %v17402_v48  ;;  %v12372_v9 = vadd.f32 %v12371_v4, %v12370_v62  ;;  %v17568_v10 = vadd.f32 %v13065_v26, %v13064_v2 }
 0x7fc   : > { %14543 = vmatmul.mubr.msk.bf16.gmra.mrb[40].mxu0 %vm15752_vm5, %v16871_v56 }
 0x7fd   : > { %19018 = vst [vmem:[#allocation106_spill] sm:$0xff] %v17568_v10  ;;  %v17574_v46 = vadd.f32 %v12372_v9, %v17408_v30  ;;  %14546 = vmatprep.mubr.msk.bf16.mxu0 %vm15774_vm7, %v19019_v40 }
 0x7ff   : > { %v12373_v22 = vpop.f32.mrb[192].mxu0  ;;  %v13067_v35 = vpop.f32.mrb[228].mxu1 }
 0x800   : > { %v12374_v32 = vpop.f32.mrb[193].mxu0  ;;  %v13068_v11 = vpop.f32.mrb[229].mxu1 }
 0x801   : > { %v12375_v48 = vadd.f32 %v12374_v32, %v12373_v22  ;;  %v12376_v45 = vpop.f32.mrb[194].mxu0  ;;  %v17579_v62 = vadd.f32 %v13068_v11, %v13067_v35  ;;  %v13070_v2 = vpop.f32.mrb[230].mxu1 }
 0x802   : > { %v12377_v4 = vpop.f32.mrb[195].mxu0  ;;  %v13071_v26 = vpop.f32.mrb[231].mxu1 }
 0x803   : > { %19021 = vst [vmem:[#allocation58_spill] sm:$0xff] %v17579_v62  ;;  %v17582_v10 = vadd.f32 %v12375_v48, %v17414_v31  ;;  %v12378_v30 = vadd.f32 %v12377_v4, %v12376_v45  ;;  %v17584_v9 = vadd.f32 %v13071_v26, %v13070_v2  ;;  %v14319_v31 = vld [vmem:[%s18606_s7 + $0x180] sm:$0xff]  }
 0x804   : > { %14549 = vmatmul.mubr.msk.bf16.gmra.mrb[44].mxu0 %vm15774_vm7, %v19023_v55 }
 0x805   : > { %19022 = vst [vmem:[#allocation29_spill] sm:$0xff] %v17584_v9  ;;  %v17590_v61 = vadd.f32 %v12378_v30, %v17420_v33  ;;  %8350 = vmatprep.mubr.bf16.mxu0 %v17247_v23  ;;  %v14320_v33 = vld [vmem:[%s18606_s7 + $0x1c8] sm:$0xff]  }
 0x807   : > { %v12395_v11 = vpop.f32.mrb[196].mxu0  ;;  %v13073_v32 = vpop.f32.mrb[232].mxu1 }
 0x808   : > { %v12396_v22 = vpop.f32.mrb[197].mxu0  ;;  %v13074_v35 = vpop.f32.mrb[233].mxu1 }
 0x809   : > { %v12397_v62 = vadd.f32 %v12396_v22, %v12395_v11  ;;  %v12398_v24 = vpop.f32.mrb[198].mxu0  ;;  %v17596_v48 = vadd.f32 %v13074_v35, %v13073_v32  ;;  %v13076_v45 = vpop.f32.mrb[234].mxu1  ;;  %v19026_v32 = vld [vmem:[#allocation43_spill] sm:$0xff]  ;;  %v14321_v22 = vld [vmem:[%s18606_s7 + $0x188] sm:$0xff]  }
 0x80a   : > { %v12399_v2 = vpop.f32.mrb[199].mxu0  ;;  %v13077_v4 = vpop.f32.mrb[235].mxu1 }
 0x80b   : > { %19024 = vst [vmem:[#allocation59_spill] sm:$0xff] %v17596_v48  ;;  %v17602_v26 = vadd.f32 %v12397_v62, %v17432_v3  ;;  %v12400_v30 = vadd.f32 %v12399_v2, %v12398_v24  ;;  %v17604_v9 = vadd.f32 %v13077_v4, %v13076_v45  ;;  %v14322_v3 = vld [vmem:[%s18606_s7 + $0x1d0] sm:$0xff]   ;;  %v14328_v48 = vld [vmem:[%s18606_s7 + $0x1e8] sm:$0xff]  }
 0x80c   : > { %8351 = vmatmul.mubr.bf16.vlgmr.msra.gmra.mrb[48].mxu0 %v17247_v23  ;;  %v14323_v4 = vld [vmem:[%s18606_s7 + $0x190] sm:$0xff]  }
 0x80d   : > { %19025 = vst [vmem:[#allocation107_spill] sm:$0xff] %v17604_v9  ;;  %v17608_v11 = vadd.f32 %v12400_v30, %v17438_v17  ;;  %12660 = vmatpush3.bf16.msra.mxu0 %v14319_v31  ;;  %8358 = vmatprep.mubr.bf16.mxu0 %v19026_v32  ;;  %v14324_v32 = vld [vmem:[%s18606_s7 + $0x1d8] sm:$0xff]  }
 0x80e   : > { %12661 = vmatprep.subr.bf16.mxu0 %v14320_v33 }
 0x80f   : > { %v12401_v24 = vpop.f32.mrb[200].mxu0  ;;  %v13165_v62 = vpop.f32.mrb[236].mxu1 }
 0x810   : > { %v12402_v35 = vpop.f32.mrb[201].mxu0  ;;  %v13166_v45 = vpop.f32.mrb[237].mxu1 }
 0x811   : > { %v12403_v23 = vadd.f32 %v12402_v35, %v12401_v24  ;;  %v17617_v2 = vadd.f32 %v13166_v45, %v13165_v62  ;;  %v12404_v17 = vpop.f32.mrb[202].mxu0  ;;  %v13168_v31 = vpop.f32.mrb[238].mxu1  ;;  %12662 = vmatpush3.bf16.msra.mxu0 %v14321_v22  ;;  %v19029_v35 = vld [vmem:[#allocation45_spill] sm:$0xff]  ;;  %v19030_v45 = vld [vmem:[#allocation46_spill] sm:$0xff] }
 0x812   : > { %v12405_v30 = vpop.f32.mrb[203].mxu0  ;;  %v13169_v33 = vpop.f32.mrb[239].mxu1  ;;  %12663 = vmatprep.subr.bf16.mxu0 %v14322_v3  ;;  %v14325_v3 = vld [vmem:[%s18606_s7 + $0x198] sm:$0xff]  }
 0x813   : > { %19027 = vst [vmem:[#allocation43_spill] sm:$0xff] %v17617_v2  ;;  %v17626_v9 = vadd.f32 %v12403_v23, %v17456_v6  ;;  %v12406_v24 = vadd.f32 %v12405_v30, %v12404_v17  ;;  %v17628_v62 = vadd.f32 %v13169_v33, %v13168_v31  ;;  %v14326_v6 = vld [vmem:[%s18606_s7 + $0x1e0] sm:$0xff]   ;;  %v19041_v2 = vld [vmem:[#allocation54_spill] sm:$0xff] }
 0x814   : > { %8359 = vmatmul.mubr.bf16.gmra.mrb[52].mxu0 %v19029_v35 }
 0x815   : > { %19028 = vst [vmem:[#allocation108_spill] sm:$0xff] %v17628_v62  ;;  %v17632_v22 = vadd.f32 %v12406_v24, %v17462_v14  ;;  %8366 = vmatprep.mubr.bf16.mxu0 %v19030_v45  ;;  %12664 = vmatpush3.bf16.msra.mxu0 %v14323_v4  ;;  %v14327_v4 = vld [vmem:[%s18606_s7 + $0x1a0] sm:$0xff]  }
 0x816   : > { %12665 = vmatprep.subr.bf16.mxu0 %v14324_v32 }
 0x817   : > { %v12407_v23 = vpop.f32.mrb[204].mxu0  ;;  %v13171_v17 = vpop.f32.mrb[240].mxu1 }
 0x818   : > { %v12408_v31 = vpop.f32.mrb[205].mxu0  ;;  %v13172_v30 = vpop.f32.mrb[241].mxu1 }
 0x819   : > { %v12409_v33 = vadd.f32 %v12408_v31, %v12407_v23  ;;  %v17641_v35 = vadd.f32 %v13172_v30, %v13171_v17  ;;  %v12410_v14 = vpop.f32.mrb[206].mxu0  ;;  %v13174_v24 = vpop.f32.mrb[242].mxu1  ;;  %12666 = vmatpush3.bf16.msra.mxu0 %v14325_v3  ;;  %v19033_v31 = vld [vmem:[#allocation48_spill] sm:$0xff]  ;;  %v19034_v30 = vld [vmem:[#allocation50_spill] sm:$0xff] }
 0x81a   : > { %v12411_v45 = vpop.f32.mrb[207].mxu0  ;;  %v13175_v32 = vpop.f32.mrb[243].mxu1  ;;  %12667 = vmatprep.subr.bf16.mxu0 %v14326_v6  ;;  %v14329_v6 = vld [vmem:[%s18606_s7 + $0x1a8] sm:$0xff]  }
 0x81b   : > { %19031 = vst [vmem:[#allocation45_spill] sm:$0xff] %v17641_v35  ;;  %v17650_v62 = vadd.f32 %v12409_v33, %v17480_v41  ;;  %v12412_v23 = vadd.f32 %v12411_v45, %v12410_v14  ;;  %v17652_v17 = vadd.f32 %v13175_v32, %v13174_v24  ;;  %v14330_v41 = vld [vmem:[%s18606_s7 + $0x1f0] sm:$0xff]  }
 0x81c   : > { %8367 = vmatmul.mubr.bf16.gmra.mrb[56].mxu0 %v19033_v31 }
 0x81d   : > { %19032 = vst [vmem:[#allocation46_spill] sm:$0xff] %v17652_v17  ;;  %v17656_v3 = vadd.f32 %v12412_v23, %v17486_v60  ;;  %8374 = vmatprep.mubr.bf16.mxu0 %v19034_v30  ;;  %12668 = vmatpush3.bf16.msra.mxu0 %v14327_v4  ;;  %v14331_v4 = vld [vmem:[%s18606_s7 + $0x1b0] sm:$0xff]   ;;  %v14332_v17 = vld [vmem:[%s18606_s7 + $0x1f8] sm:$0xff]  }
 0x81e   : > { %12669 = vmatprep.subr.bf16.mxu0 %v14328_v48 }
 0x81f   : > { %v12413_v33 = vpop.f32.mrb[208].mxu0  ;;  %v13177_v14 = vpop.f32.mrb[244].mxu1 }
 0x820   : > { %v12414_v24 = vpop.f32.mrb[209].mxu0  ;;  %v13178_v45 = vpop.f32.mrb[245].mxu1 }
 0x821   : > { %v12415_v32 = vadd.f32 %v12414_v24, %v12413_v33  ;;  %v17665_v31 = vadd.f32 %v13178_v45, %v13177_v14  ;;  %v12416_v60 = vpop.f32.mrb[210].mxu0  ;;  %v13180_v23 = vpop.f32.mrb[246].mxu1  ;;  %12670 = vmatpush3.bf16.msra.mxu0 %v14329_v6  ;;  %v19037_v24 = vld [vmem:[#allocation52_spill] sm:$0xff]  ;;  %v19038_v45 = vld [vmem:[#allocation53_spill] sm:$0xff] }
 0x822   : > { %v12417_v30 = vpop.f32.mrb[211].mxu0  ;;  %v13181_v48 = vpop.f32.mrb[247].mxu1  ;;  %12671 = vmatprep.subr.bf16.mxu0 %v14330_v41  ;;  %v14333_v41 = vld [vmem:[%s18606_s7 + $0x1b8] sm:$0xff]  }
 0x823   : > { %19035 = vst [vmem:[#allocation48_spill] sm:$0xff] %v17665_v31  ;;  %v17674_v35 = vadd.f32 %v12415_v32, %v17504_v19  ;;  %v12418_v33 = vadd.f32 %v12417_v30, %v12416_v60  ;;  %v17676_v14 = vadd.f32 %v13181_v48, %v13180_v23  ;;  %v14334_v19 = vld [vmem:[%s18606_s7 + $0x4c0] sm:$0xff]  }
 0x824   : > { %8375 = vmatmul.mubr.bf16.gmra.mrb[60].mxu0 %v19037_v24 }
 0x825   : > { %19036 = vst [vmem:[#allocation50_spill] sm:$0xff] %v17676_v14  ;;  %v17680_v6 = vadd.f32 %v12418_v33, %v17510_v16  ;;  %8382 = vmatprep.mubr.bf16.mxu0 %v19038_v45  ;;  %12672 = vmatpush3.bf16.msra.mxu0 %v14331_v4 }
 0x826   : > { %12673 = vmatprep.subr.bf16.mxu0 %v14332_v17 }
 0x827   : > { %v12419_v32 = vpop.f32.mrb[212].mxu0  ;;  %v13183_v60 = vpop.f32.mrb[248].mxu1 }
 0x828   : > { %v12420_v23 = vpop.f32.mrb[213].mxu0  ;;  %v13184_v30 = vpop.f32.mrb[249].mxu1 }
 0x829   : > { %v12421_v48 = vadd.f32 %v12420_v23, %v12419_v32  ;;  %v17689_v24 = vadd.f32 %v13184_v30, %v13183_v60  ;;  %v12422_v16 = vpop.f32.mrb[214].mxu0  ;;  %v13186_v33 = vpop.f32.mrb[250].mxu1  ;;  %12674 = vmatpush3.bf16.msra.mxu0 %v14333_v41  ;;  %v19042_v32 = vld [vmem:[#allocation55_spill] sm:$0xff] }
 0x82a   : > { %v12423_v4 = vpop.f32.mrb[215].mxu0  ;;  %v13187_v45 = vpop.f32.mrb[251].mxu1  ;;  %12799 = vmatprep.subr.bf16.mxu0 %v14334_v19 }
 0x82b   : > { %19039 = vst [vmem:[#allocation52_spill] sm:$0xff] %v17689_v24  ;;  %v17692_v14 = vadd.f32 %v12421_v48, %v17522_v51  ;;  %v12424_v17 = vadd.f32 %v12423_v4, %v12422_v16  ;;  %v17694_v31 = vadd.f32 %v13187_v45, %v13186_v33 }
 0x82c   : > { %8383 = vmatmul.mubr.bf16.gmra.mrb[64].mxu0 %v19041_v2 }
 0x82d   : > { %19040 = vst [vmem:[#allocation53_spill] sm:$0xff] %v17694_v31  ;;  %v17698_v29 = vadd.f32 %v12424_v17, %v17528_v21  ;;  %8390 = vmatprep.mubr.bf16.mxu0 %v19042_v32  ;;  %v19045_v21 = vld [vmem:[#allocation38_spill] sm:$0xff]  ;;  %v19046_v17 = vld [vmem:[#allocation56_spill] sm:$0xff] }
 0x82f   : > { %v12425_v60 = vpop.f32.mrb[216].mxu0  ;;  %v13189_v23 = vpop.f32.mrb[252].mxu1 }
 0x830   : > { %v12426_v30 = vpop.f32.mrb[217].mxu0  ;;  %v13190_v41 = vpop.f32.mrb[253].mxu1 }
 0x831   : > { %v12427_v24 = vadd.f32 %v12426_v30, %v12425_v60  ;;  %v17701_v36 = vadd.f32 %v13190_v41, %v13189_v23  ;;  %v12428_v19 = vpop.f32.mrb[218].mxu0  ;;  %v13192_v51 = vpop.f32.mrb[254].mxu1 }
 0x832   : > { %v12429_v48 = vpop.f32.mrb[219].mxu0  ;;  %v13193_v16 = vpop.f32.mrb[255].mxu1 }
 0x833   : > { %19043 = vst [vmem:[#allocation54_spill] sm:$0xff] %v17701_v36  ;;  %v17704_v33 = vadd.f32 %v12427_v24, %v17536_v0  ;;  %v12430_v2 = vadd.f32 %v12429_v48, %v12428_v19  ;;  %v17706_v4 = vadd.f32 %v13193_v16, %v13192_v51 }
 0x834   : > { %8391 = vmatmul.mubr.bf16.gmra.mrb[68].mxu0 %v19045_v21 }
 0x835   : > { %19044 = vst [vmem:[#allocation55_spill] sm:$0xff] %v17706_v4  ;;  %v17710_v45 = vadd.f32 %v12430_v2, %v17542_v8  ;;  %8398 = vmatprep.mubr.bf16.mxu0 %v19046_v17  ;;  %v19049_v2 = vld [vmem:[#allocation57_spill] sm:$0xff] }
 0x837   : > { %v12431_v32 = vpop.f32.mrb[220].mxu0  ;;  %v13195_v60 = vpop.f32.mrb[0].mxu1 }
 0x838   : > { %v12432_v23 = vpop.f32.mrb[221].mxu0  ;;  %v13196_v30 = vpop.f32.mrb[1].mxu1 }
 0x839   : > { %v12433_v41 = vadd.f32 %v12432_v23, %v12431_v32  ;;  %v17713_v36 = vadd.f32 %v13196_v30, %v13195_v60  ;;  %v12434_v31 = vpop.f32.mrb[222].mxu0  ;;  %v13198_v0 = vpop.f32.mrb[2].mxu1 }
 0x83a   : > { %v12435_v24 = vpop.f32.mrb[223].mxu0  ;;  %v13199_v19 = vpop.f32.mrb[3].mxu1 }
 0x83b   : > { %19047 = vst [vmem:[#allocation38_spill] sm:$0xff] %v17713_v36  ;;  %v17716_v51 = vadd.f32 %v12433_v41, %v17550_v39  ;;  %v12436_v48 = vadd.f32 %v12435_v24, %v12434_v31  ;;  %v17718_v16 = vadd.f32 %v13199_v19, %v13198_v0 }
 0x83c   : > { %8399 = vmatmul.mubr.bf16.gmra.mrb[72].mxu0 %v16591_v5 }
 0x83d   : > { %19048 = vst [vmem:[#allocation56_spill] sm:$0xff] %v17718_v16  ;;  %v17722_v8 = vadd.f32 %v12436_v48, %v17558_v47  ;;  %8406 = vmatprep.mubr.bf16.mxu0 %v19049_v2 }
 0x83f   : > { %v12437_v21 = vpop.f32.mrb[224].mxu0  ;;  %v13201_v17 = vpop.f32.mrb[4].mxu1 }
 0x840   : > { %v12438_v32 = vpop.f32.mrb[225].mxu0  ;;  %v13202_v60 = vpop.f32.mrb[5].mxu1 }
 0x841   : > { %v12439_v23 = vadd.f32 %v12438_v32, %v12437_v21  ;;  %v17725_v30 = vadd.f32 %v13202_v60, %v13201_v17  ;;  %v12440_v36 = vpop.f32.mrb[226].mxu0  ;;  %v13204_v39 = vpop.f32.mrb[6].mxu1 }
 0x842   : > { %v12441_v41 = vpop.f32.mrb[227].mxu0  ;;  %v13205_v31 = vpop.f32.mrb[7].mxu1 }
 0x843   : > { %19050 = vst [vmem:[#allocation57_spill] sm:$0xff] %v17725_v30  ;;  %v17728_v0 = vadd.f32 %v12439_v23, %v17566_v49  ;;  %v12442_v5 = vadd.f32 %v12441_v41, %v12440_v36  ;;  %v17730_v24 = vadd.f32 %v13205_v31, %v13204_v39  ;;  %v17741_v36 = vld [vmem:[#allocation3 + $0x8] sm:$0xff]  ;;  %v14335_v39 = vld [vmem:[%s18606_s7 + $0x480] sm:$0xff]  }
 0x844   : > { %8407 = vmatmul.mubr.bf16.gmra.mrb[76].mxu0 %v16604_v50 }
 0x845   : > { %19051 = vst [vmem:[#allocation109_spill] sm:$0xff] %v17730_v24  ;;  %v17734_v47 = vadd.f32 %v12442_v5, %v17574_v46  ;;  %8414 = vmatprep.mubr.bf16.mxu0 %v16878_v54  ;;  %v14337_v5 = vld [vmem:[%s18606_s7 + $0x488] sm:$0xff]   ;;  %v19059_v24 = vld [vmem:[#allocation39_spill] sm:$0xff] }
 0x847   : > { %v12443_v19 = vpop.f32.mrb[228].mxu0 }
 0x848   : > { %v12444_v48 = vpop.f32.mrb[229].mxu0 }
 0x849   : > { %v12445_v2 = vadd.f32 %v12444_v48, %v12443_v19  ;;  %v12446_v21 = vpop.f32.mrb[230].mxu0  ;;  %v14338_v48 = vld [vmem:[%s18606_s7 + $0x4d0] sm:$0xff]  }
 0x84a   : > { %v12447_v17 = vpop.f32.mrb[231].mxu0 }
 0x84b   : > { %v12448_v32 = vadd.f32 %v12447_v17, %v12446_v21  ;;  %v17738_v60 = vadd.f32 %v12445_v2, %v17582_v10 }
 0x84c   : > { %8415 = vmatmul.mubr.bf16.gmra.mrb[80].mxu0 %v16636_v18  ;;  %v14336_v18 = vld [vmem:[%s18606_s7 + $0x4c8] sm:$0xff]  }
 0x84d   : > { %8455 = vmatprep.mubr.bf16.mxu0 %v17741_v36  ;;  %v17745_v50 = vadd.f32 %v12448_v32, %v17590_v61  ;;  %v19052_v61 = vld [vmem:[#allocation26_spill] sm:$0xff] }
 0x84e   : > { %v14339_v32 = vld [vmem:[%s18606_s7 + $0x490] sm:$0xff]  }
 0x84f   : > { %v12465_v46 = vpop.f32.mrb[232].mxu0 }
 0x850   : > { %v12466_v54 = vpop.f32.mrb[233].mxu0 }
 0x851   : > { %v12467_v49 = vadd.f32 %v12466_v54, %v12465_v46  ;;  %v12468_v23 = vpop.f32.mrb[234].mxu0 }
 0x852   : > { %v12469_v41 = vpop.f32.mrb[235].mxu0 }
 0x853   : > { %v12470_v10 = vadd.f32 %v12469_v41, %v12468_v23  ;;  %v17754_v31 = vadd.f32 %v12467_v49, %v17602_v26  ;;  %v19053_v23 = vld [vmem:[#allocation32_spill] sm:$0xff]  ;;  %v14341_v41 = vld [vmem:[%s18606_s7 + $0x498] sm:$0xff]  }
 0x854   : > { %8456 = vmatmul.mubr.bf16.vlgmr.msra.gmra.mrb[84].mxu0 %v17741_v36 }
 0x855   : > { %12800 = vmatpush3.bf16.msra.mxu0 %v14335_v39  ;;  %8463 = vmatprep.mubr.bf16.mxu0 %v19052_v61  ;;  %v17762_v19 = vadd.f32 %v12470_v10, %v17608_v11  ;;  %v14340_v11 = vld [vmem:[%s18606_s7 + $0x4d8] sm:$0xff]   ;;  %v19054_v39 = vld [vmem:[#allocation22_spill] sm:$0xff]  ;;  %v14342_v10 = vld [vmem:[%s18606_s7 + $0x4e0] sm:$0xff]  }
 0x856   : > { %12801 = vmatprep.subr.bf16.mxu0 %v14336_v18 }
 0x857   : > { %v12471_v2 = vpop.f32.mrb[236].mxu0 }
 0x858   : > { %v12472_v26 = vpop.f32.mrb[237].mxu0 }
 0x859   : > { %v12473_v21 = vadd.f32 %v12472_v26, %v12471_v2  ;;  %v12474_v17 = vpop.f32.mrb[238].mxu0  ;;  %12802 = vmatpush3.bf16.msra.mxu0 %v14337_v5  ;;  %v14343_v2 = vld [vmem:[%s18606_s7 + $0x4a0] sm:$0xff]  }
 0x85a   : > { %v12475_v46 = vpop.f32.mrb[239].mxu0  ;;  %12803 = vmatprep.subr.bf16.mxu0 %v14338_v48 }
 0x85b   : > { %v12476_v54 = vadd.f32 %v12475_v46, %v12474_v17  ;;  %v17774_v49 = vadd.f32 %v12473_v21, %v17626_v9  ;;  %v19056_v46 = vld [vmem:[#allocation25_spill] sm:$0xff] }
 0x85c   : > { %8464 = vmatmul.mubr.bf16.gmra.mrb[88].mxu0 %v19053_v23  ;;  %v14346_v23 = vld [vmem:[%s18606_s7 + $0x4f0] sm:$0xff]  }
 0x85d   : > { %8471 = vmatprep.mubr.bf16.mxu0 %v19054_v39  ;;  %12804 = vmatpush3.bf16.msra.mxu0 %v14339_v32  ;;  %v17782_v18 = vadd.f32 %v12476_v54, %v17632_v22  ;;  %v14344_v22 = vld [vmem:[%s18606_s7 + $0x4e8] sm:$0xff]   ;;  %v19055_v32 = vld [vmem:[#allocation35_spill] sm:$0xff] }
 0x85e   : > { %12805 = vmatprep.subr.bf16.mxu0 %v14340_v11  ;;  %v14345_v11 = vld [vmem:[%s18606_s7 + $0x4a8] sm:$0xff]  }
 0x85f   : > { %v12477_v61 = vpop.f32.mrb[240].mxu0 }
 0x860   : > { %v12478_v9 = vpop.f32.mrb[241].mxu0 }
 0x861   : > { %v12479_v5 = vadd.f32 %v12478_v9, %v12477_v61  ;;  %v12480_v48 = vpop.f32.mrb[242].mxu0  ;;  %12806 = vmatpush3.bf16.msra.mxu0 %v14341_v41  ;;  %v14347_v9 = vld [vmem:[%s18606_s7 + $0x4b0] sm:$0xff]  }
 0x862   : > { %v12481_v26 = vpop.f32.mrb[243].mxu0  ;;  %12807 = vmatprep.subr.bf16.mxu0 %v14342_v10 }
 0x863   : > { %v12482_v21 = vadd.f32 %v12481_v26, %v12480_v48  ;;  %v17794_v17 = vadd.f32 %v12479_v5, %v17650_v62  ;;  %v19057_v26 = vld [vmem:[#allocation37_spill] sm:$0xff] }
 0x864   : > { %8472 = vmatmul.mubr.bf16.gmra.mrb[92].mxu0 %v19055_v32 }
 0x865   : > { %8479 = vmatprep.mubr.bf16.mxu0 %v19056_v46  ;;  %12808 = vmatpush3.bf16.msra.mxu0 %v14343_v2  ;;  %v17802_v54 = vadd.f32 %v12482_v21, %v17656_v3  ;;  %v14348_v3 = vld [vmem:[%s18606_s7 + $0x4f8] sm:$0xff]  }
 0x866   : > { %12809 = vmatprep.subr.bf16.mxu0 %v14344_v22  ;;  %v19058_v22 = vld [vmem:[#allocation28_spill] sm:$0xff]  ;;  %v14349_v21 = vld [vmem:[%s18606_s7 + $0x4b8] sm:$0xff]  }
 0x867   : > { %v12483_v41 = vpop.f32.mrb[244].mxu0 }
 0x868   : > { %v12484_v62 = vpop.f32.mrb[245].mxu0 }
 0x869   : > { %v12485_v10 = vadd.f32 %v12484_v62, %v12483_v41  ;;  %v12486_v61 = vpop.f32.mrb[246].mxu0  ;;  %12810 = vmatpush3.bf16.msra.mxu0 %v14345_v11 }
 0x86a   : > { %v12487_v5 = vpop.f32.mrb[247].mxu0  ;;  %12811 = vmatprep.subr.bf16.mxu0 %v14346_v23  ;;  %v14350_v23 = vld [vmem:[%s18606_s7 + $0x5c0] sm:$0xff]  }
 0x86b   : > { %v12488_v48 = vadd.f32 %v12487_v5, %v12486_v61  ;;  %v17814_v2 = vadd.f32 %v12485_v10, %v17674_v35 }
 0x86c   : > { %8480 = vmatmul.mubr.bf16.gmra.mrb[96].mxu0 %v19057_v26 }
 0x86d   : > { %8487 = vmatprep.mubr.bf16.mxu0 %v19058_v22  ;;  %12812 = vmatpush3.bf16.msra.mxu0 %v14347_v9  ;;  %v17822_v11 = vadd.f32 %v12488_v48, %v17680_v6  ;;  %v19060_v6 = vld [vmem:[#allocation62_spill] sm:$0xff] }
 0x86e   : > { %12813 = vmatprep.subr.bf16.mxu0 %v14348_v3 }
 0x86f   : > { %v12489_v41 = vpop.f32.mrb[248].mxu0 }
 0x870   : > { %v12490_v35 = vpop.f32.mrb[249].mxu0 }
 0x871   : > { %v12491_v62 = vadd.f32 %v12490_v35, %v12489_v41  ;;  %v12492_v10 = vpop.f32.mrb[250].mxu0  ;;  %12814 = vmatpush3.bf16.msra.mxu0 %v14349_v21 }
 0x872   : > { %v12493_v61 = vpop.f32.mrb[251].mxu0  ;;  %12939 = vmatprep.subr.bf16.mxu0 %v14350_v23  ;;  %v19061_v23 = vld [vmem:[#allocation65_spill] sm:$0xff] }
 0x873   : > { %v12494_v9 = vadd.f32 %v12493_v61, %v12492_v10  ;;  %v17828_v5 = vadd.f32 %v12491_v62, %v17692_v14  ;;  %v19062_v14 = vld [vmem:[#allocation66_spill] sm:$0xff] }
 0x874   : > { %8488 = vmatmul.mubr.bf16.gmra.mrb[100].mxu0 %v19059_v24 }
 0x875   : > { %8495 = vmatprep.mubr.bf16.mxu0 %v19060_v6  ;;  %v17833_v3 = vadd.f32 %v12494_v9, %v17698_v29 }
 0x877   : > { %v12495_v48 = vpop.f32.mrb[252].mxu0 }
 0x878   : > { %v12496_v30 = vpop.f32.mrb[253].mxu0 }
 0x879   : > { %v12497_v16 = vadd.f32 %v12496_v30, %v12495_v48  ;;  %v12498_v4 = vpop.f32.mrb[254].mxu0 }
 0x87a   : > { %v12499_v41 = vpop.f32.mrb[255].mxu0 }
 0x87b   : > { %v12500_v35 = vadd.f32 %v12499_v41, %v12498_v4  ;;  %v17836_v21 = vadd.f32 %v12497_v16, %v17704_v33  ;;  %v19063_v4 = vld [vmem:[#allocation69_spill] sm:$0xff]  ;;  %v19064_v33 = vld [vmem:[#allocation70_spill] sm:$0xff] }
 0x87c   : > { %8496 = vmatmul.mubr.bf16.gmra.mrb[104].mxu0 %v19061_v23 }
 0x87d   : > { %8503 = vmatprep.mubr.bf16.mxu0 %v19062_v14  ;;  %v17841_v62 = vadd.f32 %v12500_v35, %v17710_v45 }
 0x87f   : > { %v12501_v10 = vpop.f32.mrb[0].mxu0 }
 0x880   : > { %v12502_v61 = vpop.f32.mrb[1].mxu0 }
 0x881   : > { %v12503_v29 = vadd.f32 %v12502_v61, %v12501_v10  ;;  %v12504_v9 = vpop.f32.mrb[2].mxu0 }
 0x882   : > { %v12505_v43 = vpop.f32.mrb[3].mxu0 }
 0x883   : > { %v12506_v25 = vadd.f32 %v12505_v43, %v12504_v9  ;;  %v17844_v30 = vadd.f32 %v12503_v29, %v17716_v51  ;;  %v19065_v43 = vld [vmem:[#allocation73_spill] sm:$0xff]  ;;  %v19066_v51 = vld [vmem:[#allocation74_spill] sm:$0xff] }
 0x884   : > { %8504 = vmatmul.mubr.bf16.gmra.mrb[108].mxu0 %v19063_v4 }
 0x885   : > { %8511 = vmatprep.mubr.bf16.mxu0 %v19064_v33  ;;  %v17849_v16 = vadd.f32 %v12506_v25, %v17722_v8 }
 0x887   : > { %v12507_v48 = vpop.f32.mrb[4].mxu0 }
 0x888   : > { %v12508_v41 = vpop.f32.mrb[5].mxu0 }
 0x889   : > { %v12509_v45 = vadd.f32 %v12508_v41, %v12507_v48  ;;  %v12510_v35 = vpop.f32.mrb[6].mxu0 }
 0x88a   : > { %v12511_v27 = vpop.f32.mrb[7].mxu0 }
 0x88b   : > { %v12512_v7 = vadd.f32 %v12511_v27, %v12510_v35  ;;  %v17852_v10 = vadd.f32 %v12509_v45, %v17728_v0  ;;  %v19067_v27 = vld [vmem:[#allocation51_spill] sm:$0xff] }
 0x88c   : > { %8512 = vmatmul.mubr.bf16.gmra.mrb[112].mxu0 %v19065_v43 }
 0x88d   : > { %8519 = vmatprep.mubr.bf16.mxu0 %v19066_v51  ;;  %v17857_v61 = vadd.f32 %v12512_v7, %v17734_v47 }
 0x88f   : > { %v12513_v29 = vpop.f32.mrb[8].mxu0 }
 0x890   : > { %v12514_v9 = vpop.f32.mrb[9].mxu0 }
 0x891   : > { %v12515_v25 = vadd.f32 %v12514_v9, %v12513_v29  ;;  %v12516_v8 = vpop.f32.mrb[10].mxu0  ;;  %v14351_v29 = vld [vmem:[%s18606_s7 + $0x580] sm:$0xff]  }
 0x892   : > { %v12517_v59 = vpop.f32.mrb[11].mxu0 }
 0x893   : > { %v17860_v48 = vadd.f32 %v12515_v25, %v17738_v60  ;;  %v12518_v41 = vadd.f32 %v12517_v59, %v12516_v8  ;;  %v14352_v59 = vld [vmem:[%s18606_s7 + $0x5c8] sm:$0xff]   ;;  %v14354_v8 = vld [vmem:[%s18606_s7 + $0x5d0] sm:$0xff]  }
 0x894   : > { %8520 = vmatmul.mubr.bf16.gmra.mrb[116].mxu0 %v19067_v27  ;;  %v14353_v25 = vld [vmem:[%s18606_s7 + $0x588] sm:$0xff]  }
 0x895   : > { %v17864_v0 = vadd.f32 %v12518_v41, %v17745_v50  ;;  %9250 = vmatprep.mubr.bf16.mxu0 %v18925_v57 }
 0x897   : > { %v12535_v45 = vpop.f32.mrb[12].mxu0 }
 0x898   : > { %v12536_v35 = vpop.f32.mrb[13].mxu0 }
 0x899   : > { %v12537_v7 = vadd.f32 %v12536_v35, %v12535_v45  ;;  %v12538_v47 = vpop.f32.mrb[14].mxu0 }
 0x89a   : > { %v12539_v9 = vpop.f32.mrb[15].mxu0 }
 0x89b   : > { %v17874_v60 = vadd.f32 %v12537_v7, %v17754_v31  ;;  %v12540_v50 = vadd.f32 %v12539_v9, %v12538_v47  ;;  %v14356_v7 = vld [vmem:[%s18606_s7 + $0x5d8] sm:$0xff]  }
 0x89c   : > { %9251 = vmatmul.mubr.bf16.vlgmr.msra.gmra.mrb[120].mxu0 %v16588_v58  ;;  %v14355_v58 = vld [vmem:[%s18606_s7 + $0x590] sm:$0xff]  }
 0x89d   : > { %v17878_v57 = vadd.f32 %v12540_v50, %v17762_v19  ;;  %12940 = vmatpush3.bf16.msra.mxu0 %v14351_v29  ;;  %9258 = vmatprep.mubr.bf16.mxu0 %v19008_v28  ;;  %v14358_v50 = vld [vmem:[%s18606_s7 + $0x5e0] sm:$0xff]  }
 0x89e   : > { %12941 = vmatprep.subr.bf16.mxu0 %v14352_v59  ;;  %v14357_v59 = vld [vmem:[%s18606_s7 + $0x598] sm:$0xff]  }
 0x89f   : > { %v12541_v31 = vpop.f32.mrb[16].mxu0 }
 0x8a0   : > { %v12542_v41 = vpop.f32.mrb[17].mxu0 }
 0x8a1   : > { %v12543_v45 = vadd.f32 %v12542_v41, %v12541_v31  ;;  %v12544_v35 = vpop.f32.mrb[18].mxu0  ;;  %12942 = vmatpush3.bf16.msra.mxu0 %v14353_v25 }
 0x8a2   : > { %v12545_v19 = vpop.f32.mrb[19].mxu0  ;;  %12943 = vmatprep.subr.bf16.mxu0 %v14354_v8 }
 0x8a3   : > { %v17894_v47 = vadd.f32 %v12543_v45, %v17774_v49  ;;  %v12546_v29 = vadd.f32 %v12545_v19, %v12544_v35  ;;  %v14360_v45 = vld [vmem:[%s18606_s7 + $0x5e8] sm:$0xff]  }
 0x8a4   : > { %9259 = vmatmul.mubr.bf16.gmra.mrb[124].mxu0 %v16641_v20 }
 0x8a5   : > { %v17898_v9 = vadd.f32 %v12546_v29, %v17782_v18  ;;  %9266 = vmatprep.mubr.bf16.mxu0 %v16643_v44  ;;  %12944 = vmatpush3.bf16.msra.mxu0 %v14355_v58  ;;  %v14359_v18 = vld [vmem:[%s18606_s7 + $0x5a0] sm:$0xff]  }
 0x8a6   : > { %12945 = vmatprep.subr.bf16.mxu0 %v14356_v7  ;;  %v14361_v7 = vld [vmem:[%s18606_s7 + $0x5a8] sm:$0xff]  }
 0x8a7   : > { %v12547_v49 = vpop.f32.mrb[20].mxu0 }
 0x8a8   : > { %v12548_v25 = vpop.f32.mrb[21].mxu0 }
 0x8a9   : > { %v12549_v8 = vadd.f32 %v12548_v25, %v12547_v49  ;;  %v12550_v31 = vpop.f32.mrb[22].mxu0  ;;  %12946 = vmatpush3.bf16.msra.mxu0 %v14357_v59 }
 0x8aa   : > { %v12551_v41 = vpop.f32.mrb[23].mxu0  ;;  %12947 = vmatprep.subr.bf16.mxu0 %v14358_v50 }
 0x8ab   : > { %v17914_v35 = vadd.f32 %v12549_v8, %v17794_v17  ;;  %v12552_v58 = vadd.f32 %v12551_v41, %v12550_v31  ;;  %v14362_v17 = vld [vmem:[%s18606_s7 + $0x5f0] sm:$0xff]   ;;  %v14364_v8 = vld [vmem:[%s18606_s7 + $0x5f8] sm:$0xff]  }
 0x8ac   : > { %9267 = vmatmul.mubr.bf16.gmra.mrb[128].mxu0 %v16675_v52 }
 0x8ad   : > { %v17918_v19 = vadd.f32 %v12552_v58, %v17802_v54  ;;  %14552 = vmatprep.mubr.msk.bf16.mxu0 %vm15701_vm8, %v16797_v37  ;;  %12948 = vmatpush3.bf16.msra.mxu0 %v14359_v18  ;;  %v14363_v54 = vld [vmem:[%s18606_s7 + $0x5b0] sm:$0xff]  }
 0x8ae   : > { %12949 = vmatprep.subr.bf16.mxu0 %v14360_v45  ;;  %v14365_v45 = vld [vmem:[%s18606_s7 + $0x5b8] sm:$0xff]  }
 0x8af   : > { %v12553_v29 = vpop.f32.mrb[24].mxu0 }
 0x8b0   : > { %v12554_v59 = vpop.f32.mrb[25].mxu0 }
 0x8b1   : > { %v12555_v50 = vadd.f32 %v12554_v59, %v12553_v29  ;;  %v12556_v49 = vpop.f32.mrb[26].mxu0  ;;  %12950 = vmatpush3.bf16.msra.mxu0 %v14361_v7 }
 0x8b2   : > { %v12557_v25 = vpop.f32.mrb[27].mxu0  ;;  %12951 = vmatprep.subr.bf16.mxu0 %v14362_v17 }
 0x8b3   : > { %v17936_v31 = vadd.f32 %v12555_v50, %v17814_v2  ;;  %v12558_v18 = vadd.f32 %v12557_v25, %v12556_v49  ;;  %v14366_v2 = vld [vmem:[%s18606_s7 + $0x6c0] sm:$0xff]  }
 0x8b4   : > { %9275 = vmatmul.mubr.bf16.gmra.mrb[132].mxu0 %v16817_v13 }
 0x8b5   : > { %v17940_v41 = vadd.f32 %v12558_v18, %v17822_v11  ;;  %14555 = vmatprep.mubr.msk.bf16.mxu0 %vm15727_vm3, %v16834_v1  ;;  %12952 = vmatpush3.bf16.msra.mxu0 %v14363_v54 }
 0x8b6   : > { %12953 = vmatprep.subr.bf16.mxu0 %v14364_v8 }
 0x8b7   : > { %v12559_v58 = vpop.f32.mrb[28].mxu0 }
 0x8b8   : > { %v12560_v7 = vpop.f32.mrb[29].mxu0 }
 0x8b9   : > { %v12561_v17 = vadd.f32 %v12560_v7, %v12559_v58  ;;  %v12562_v29 = vpop.f32.mrb[30].mxu0  ;;  %12954 = vmatpush3.bf16.msra.mxu0 %v14365_v45 }
 0x8ba   : > { %v12563_v11 = vpop.f32.mrb[31].mxu0  ;;  %13079 = vmatprep.subr.bf16.mxu0 %v14366_v2 }
 0x8bb   : > { %v17952_v59 = vadd.f32 %v12561_v17, %v17828_v5  ;;  %v12564_v50 = vadd.f32 %v12563_v11, %v12562_v29 }
 0x8bc   : > { %14558 = vmatmul.mubr.msk.bf16.gmra.mrb[136].mxu0 %vm15727_vm3, %v16849_v34 }
 0x8bd   : > { %v17958_v49 = vadd.f32 %v12564_v50, %v17833_v3  ;;  %14561 = vmatprep.mubr.msk.bf16.mxu0 %vm15752_vm5, %v16862_v42 }
 0x8bf   : > { %v12565_v54 = vpop.f32.mrb[32].mxu0 }
 0x8c0   : > { %v12566_v25 = vpop.f32.mrb[33].mxu0 }
 0x8c1   : > { %v12567_v8 = vadd.f32 %v12566_v25, %v12565_v54  ;;  %v12568_v18 = vpop.f32.mrb[34].mxu0  ;;  %v19068_v54 = vld [vmem:[#allocation60_spill] sm:$0xff] }
 0x8c2   : > { %v12569_v45 = vpop.f32.mrb[35].mxu0 }
 0x8c3   : > { %v17964_v5 = vadd.f32 %v12567_v8, %v17836_v21  ;;  %v12570_v2 = vadd.f32 %v12569_v45, %v12568_v18 }
 0x8c4   : > { %14564 = vmatmul.mubr.msk.bf16.gmra.mrb[140].mxu0 %vm15752_vm5, %v16871_v56 }
 0x8c5   : > { %v17970_v3 = vadd.f32 %v12570_v2, %v17841_v62  ;;  %14567 = vmatprep.mubr.msk.bf16.mxu0 %vm15774_vm7, %v19019_v40 }
 0x8c7   : > { %v12571_v58 = vpop.f32.mrb[36].mxu0 }
 0x8c8   : > { %v12572_v7 = vpop.f32.mrb[37].mxu0 }
 0x8c9   : > { %v12573_v17 = vadd.f32 %v12572_v7, %v12571_v58  ;;  %v12574_v29 = vpop.f32.mrb[38].mxu0 }
 0x8ca   : > { %v12575_v11 = vpop.f32.mrb[39].mxu0 }
 0x8cb   : > { %v17976_v21 = vadd.f32 %v12573_v17, %v17844_v30  ;;  %v12576_v50 = vadd.f32 %v12575_v11, %v12574_v29  ;;  %v19070_v17 = vld [vmem:[#allocation61_spill] sm:$0xff] }
 0x8cc   : > { %14570 = vmatmul.mubr.msk.bf16.gmra.mrb[144].mxu0 %vm15774_vm7, %v19023_v55 }
 0x8cd   : > { %v17982_v62 = vadd.f32 %v12576_v50, %v17849_v16  ;;  %14573 = vmatprep.mubr.msk.bf16.mxu0 %vm15792_vm12, %v19068_v54 }
 0x8cf   : > { %v12577_v8 = vpop.f32.mrb[40].mxu0 }
 0x8d0   : > { %v12578_v18 = vpop.f32.mrb[41].mxu0 }
 0x8d1   : > { %v12579_v45 = vadd.f32 %v12578_v18, %v12577_v8  ;;  %v12580_v2 = vpop.f32.mrb[42].mxu0 }
 0x8d2   : > { %v12581_v58 = vpop.f32.mrb[43].mxu0 }
 0x8d3   : > { %v17988_v30 = vadd.f32 %v12579_v45, %v17852_v10  ;;  %v12582_v7 = vadd.f32 %v12581_v58, %v12580_v2 }
 0x8d4   : > { %14576 = vmatmul.mubr.msk.bf16.gmra.mrb[148].mxu0 %vm15792_vm12, %v19070_v17 }
 0x8d5   : > { %v17994_v16 = vadd.f32 %v12582_v7, %v17857_v61  ;;  %9314 = vmatprep.mubr.bf16.mxu0 %v17741_v36 }
 0x8d7   : > { %v12583_v29 = vpop.f32.mrb[44].mxu0 }
 0x8d8   : > { %v12584_v11 = vpop.f32.mrb[45].mxu0 }
 0x8d9   : > { %v12585_v50 = vadd.f32 %v12584_v11, %v12583_v29  ;;  %v12586_v12 = vpop.f32.mrb[46].mxu0  ;;  %v14367_v29 = vld [vmem:[%s18606_s7 + $0x680] sm:$0xff]  }
 0x8da   : > { %v12587_v8 = vpop.f32.mrb[47].mxu0 }
 0x8db   : > { %v17998_v18 = vadd.f32 %v12585_v50, %v17860_v48  ;;  %v12588_v10 = vadd.f32 %v12587_v8, %v12586_v12  ;;  %v14368_v12 = vld [vmem:[%s18606_s7 + $0x6c8] sm:$0xff]   ;;  %v14370_v8 = vld [vmem:[%s18606_s7 + $0x6d0] sm:$0xff]  }
 0x8dc   : > { %9315 = vmatmul.mubr.bf16.gmra.mrb[152].mxu0 %v17741_v36  ;;  %v14369_v50 = vld [vmem:[%s18606_s7 + $0x688] sm:$0xff]  }
 0x8dd   : > { %v18002_v45 = vadd.f32 %v12588_v10, %v17864_v0  ;;  %9460 = vmatprep.mubr.bf16.mxu0 %v19054_v39 }
 0x8df   : > { %v12605_v61 = vpop.f32.mrb[48].mxu0 }
 0x8e0   : > { %v12606_v2 = vpop.f32.mrb[49].mxu0 }
 0x8e1   : > { %v12607_v58 = vadd.f32 %v12606_v2, %v12605_v61  ;;  %v12608_v7 = vpop.f32.mrb[50].mxu0 }
 0x8e2   : > { %v12609_v11 = vpop.f32.mrb[51].mxu0 }
 0x8e3   : > { %v18012_v48 = vadd.f32 %v12607_v58, %v17874_v60  ;;  %v12610_v0 = vadd.f32 %v12609_v11, %v12608_v7  ;;  %v14372_v58 = vld [vmem:[%s18606_s7 + $0x6d8] sm:$0xff]  }
 0x8e4   : > { %9461 = vmatmul.mubr.bf16.vlgmr.msra.gmra.mrb[156].mxu0 %v19055_v32  ;;  %v14371_v32 = vld [vmem:[%s18606_s7 + $0x690] sm:$0xff]  }
 0x8e5   : > { %v18016_v39 = vadd.f32 %v12610_v0, %v17878_v57  ;;  %13080 = vmatpush3.bf16.msra.mxu0 %v14367_v29  ;;  %9468 = vmatprep.mubr.bf16.mxu0 %v19056_v46  ;;  %v14374_v0 = vld [vmem:[%s18606_s7 + $0x6e0] sm:$0xff]  }
 0x8e6   : > { %13081 = vmatprep.subr.bf16.mxu0 %v14368_v12  ;;  %v14373_v12 = vld [vmem:[%s18606_s7 + $0x698] sm:$0xff]  }
 0x8e7   : > { %v12611_v60 = vpop.f32.mrb[52].mxu0 }
 0x8e8   : > { %v12612_v10 = vpop.f32.mrb[53].mxu0 }
 0x8e9   : > { %v12613_v61 = vadd.f32 %v12612_v10, %v12611_v60  ;;  %v12614_v2 = vpop.f32.mrb[54].mxu0  ;;  %13082 = vmatpush3.bf16.msra.mxu0 %v14369_v50 }
 0x8ea   : > { %v12615_v57 = vpop.f32.mrb[55].mxu0  ;;  %13083 = vmatprep.subr.bf16.mxu0 %v14370_v8 }
 0x8eb   : > { %v18032_v7 = vadd.f32 %v12613_v61, %v17894_v47  ;;  %v12616_v29 = vadd.f32 %v12615_v57, %v12614_v2  ;;  %v14376_v61 = vld [vmem:[%s18606_s7 + $0x6e8] sm:$0xff]  }
 0x8ec   : > { %9469 = vmatmul.mubr.bf16.gmra.mrb[160].mxu0 %v19057_v26 }
 0x8ed   : > { %v18036_v11 = vadd.f32 %v12616_v29, %v17898_v9  ;;  %9476 = vmatprep.mubr.bf16.mxu0 %v19058_v22  ;;  %13084 = vmatpush3.bf16.msra.mxu0 %v14371_v32  ;;  %v14375_v9 = vld [vmem:[%s18606_s7 + $0x6a0] sm:$0xff]   ;;  %v14378_v29 = vld [vmem:[%s18606_s7 + $0x6f0] sm:$0xff]  }
 0x8ee   : > { %13085 = vmatprep.subr.bf16.mxu0 %v14372_v58  ;;  %v14377_v58 = vld [vmem:[%s18606_s7 + $0x6a8] sm:$0xff]  }
 0x8ef   : > { %v12617_v47 = vpop.f32.mrb[56].mxu0 }
 0x8f0   : > { %v12618_v50 = vpop.f32.mrb[57].mxu0 }
 0x8f1   : > { %v12619_v8 = vadd.f32 %v12618_v50, %v12617_v47  ;;  %v12620_v60 = vpop.f32.mrb[58].mxu0  ;;  %13086 = vmatpush3.bf16.msra.mxu0 %v14373_v12 }
 0x8f2   : > { %v12621_v10 = vpop.f32.mrb[59].mxu0  ;;  %13087 = vmatprep.subr.bf16.mxu0 %v14374_v0 }
 0x8f3   : > { %v18052_v2 = vadd.f32 %v12619_v8, %v17914_v35  ;;  %v12622_v32 = vadd.f32 %v12621_v10, %v12620_v60  ;;  %v14380_v8 = vld [vmem:[%s18606_s7 + $0x6f8] sm:$0xff]  }
 0x8f4   : > { %9477 = vmatmul.mubr.bf16.gmra.mrb[164].mxu0 %v19059_v24 }
 0x8f5   : > { %v18056_v57 = vadd.f32 %v12622_v32, %v17918_v19  ;;  %9484 = vmatprep.mubr.bf16.mxu0 %v19060_v6  ;;  %13088 = vmatpush3.bf16.msra.mxu0 %v14375_v9  ;;  %v14379_v19 = vld [vmem:[%s18606_s7 + $0x6b0] sm:$0xff]   ;;  %v14382_v32 = vld [vmem:[%s18606_s7 + $0x7c0] sm:$0xff]  }
 0x8f6   : > { %13089 = vmatprep.subr.bf16.mxu0 %v14376_v61  ;;  %v14381_v61 = vld [vmem:[%s18606_s7 + $0x6b8] sm:$0xff]  }
 0x8f7   : > { %v12623_v35 = vpop.f32.mrb[60].mxu0 }
 0x8f8   : > { %v12624_v12 = vpop.f32.mrb[61].mxu0 }
 0x8f9   : > { %v12625_v0 = vadd.f32 %v12624_v12, %v12623_v35  ;;  %v12626_v47 = vpop.f32.mrb[62].mxu0  ;;  %13090 = vmatpush3.bf16.msra.mxu0 %v14377_v58 }
 0x8fa   : > { %v12627_v50 = vpop.f32.mrb[63].mxu0  ;;  %13091 = vmatprep.subr.bf16.mxu0 %v14378_v29 }
 0x8fb   : > { %v18072_v60 = vadd.f32 %v12625_v0, %v17936_v31  ;;  %v12628_v9 = vadd.f32 %v12627_v50, %v12626_v47 }
 0x8fc   : > { %9485 = vmatmul.mubr.bf16.gmra.mrb[168].mxu0 %v19061_v23 }
 0x8fd   : > { %v18076_v10 = vadd.f32 %v12628_v9, %v17940_v41  ;;  %9492 = vmatprep.mubr.bf16.mxu0 %v19062_v14  ;;  %13092 = vmatpush3.bf16.msra.mxu0 %v14379_v19 }
 0x8fe   : > { %13093 = vmatprep.subr.bf16.mxu0 %v14380_v8 }
 0x8ff   : > { %v12629_v31 = vpop.f32.mrb[64].mxu0 }
 0x900   : > { %v12630_v58 = vpop.f32.mrb[65].mxu0 }
 0x901   : > { %v12631_v29 = vadd.f32 %v12630_v58, %v12629_v31  ;;  %v12632_v35 = vpop.f32.mrb[66].mxu0  ;;  %13094 = vmatpush3.bf16.msra.mxu0 %v14381_v61 }
 0x902   : > { %v12633_v12 = vpop.f32.mrb[67].mxu0  ;;  %13219 = vmatprep.subr.bf16.mxu0 %v14382_v32 }
 0x903   : > { %v18086_v41 = vadd.f32 %v12631_v29, %v17952_v59  ;;  %v12634_v0 = vadd.f32 %v12633_v12, %v12632_v35 }
 0x904   : > { %9493 = vmatmul.mubr.bf16.gmra.mrb[172].mxu0 %v19063_v4 }
 0x905   : > { %v18090_v47 = vadd.f32 %v12634_v0, %v17958_v49  ;;  %9500 = vmatprep.mubr.bf16.mxu0 %v19064_v33 }
 0x907   : > { %v12635_v19 = vpop.f32.mrb[68].mxu0 }
 0x908   : > { %v12636_v50 = vpop.f32.mrb[69].mxu0 }
 0x909   : > { %v12637_v8 = vadd.f32 %v12636_v50, %v12635_v19  ;;  %v12638_v9 = vpop.f32.mrb[70].mxu0  ;;  %v19071_v50 = vld [vmem:[#allocation77_spill] sm:$0xff] }
 0x90a   : > { %v12639_v31 = vpop.f32.mrb[71].mxu0 }
 0x90b   : > { %v18094_v61 = vadd.f32 %v12637_v8, %v17964_v5  ;;  %v12640_v32 = vadd.f32 %v12639_v31, %v12638_v9 }
 0x90c   : > { %9501 = vmatmul.mubr.bf16.gmra.mrb[176].mxu0 %v19065_v43 }
 0x90d   : > { %v18098_v59 = vadd.f32 %v12640_v32, %v17970_v3  ;;  %9508 = vmatprep.mubr.bf16.mxu0 %v19066_v51  ;;  %v19072_v51 = vld [vmem:[#allocation47_spill] sm:$0xff] }
 0x90f   : > { %v12641_v49 = vpop.f32.mrb[72].mxu0 }
 0x910   : > { %v12642_v58 = vpop.f32.mrb[73].mxu0 }
 0x911   : > { %v12643_v29 = vadd.f32 %v12642_v58, %v12641_v49  ;;  %v12644_v35 = vpop.f32.mrb[74].mxu0 }
 0x912   : > { %v12645_v12 = vpop.f32.mrb[75].mxu0 }
 0x913   : > { %v18102_v0 = vadd.f32 %v12643_v29, %v17976_v21  ;;  %v12646_v19 = vadd.f32 %v12645_v12, %v12644_v35 }
 0x914   : > { %9509 = vmatmul.mubr.bf16.gmra.mrb[180].mxu0 %v19067_v27 }
 0x915   : > { %v18106_v5 = vadd.f32 %v12646_v19, %v17982_v62  ;;  %9516 = vmatprep.mubr.bf16.mxu0 %v19071_v50 }
 0x917   : > { %v12647_v3 = vpop.f32.mrb[76].mxu0 }
 0x918   : > { %v12648_v8 = vpop.f32.mrb[77].mxu0 }
 0x919   : > { %v12649_v9 = vadd.f32 %v12648_v8, %v12647_v3  ;;  %v12650_v31 = vpop.f32.mrb[78].mxu0 }
 0x91a   : > { %v12651_v32 = vpop.f32.mrb[79].mxu0 }
 0x91b   : > { %v18110_v49 = vadd.f32 %v12649_v9, %v17988_v30  ;;  %v12652_v58 = vadd.f32 %v12651_v32, %v12650_v31 }
 0x91c   : > { %9517 = vmatmul.mubr.bf16.gmra.mrb[184].mxu0 %v19072_v51 }
 0x91d   : > { %v18114_v21 = vadd.f32 %v12652_v58, %v17994_v16  ;;  %9524 = vmatprep.mubr.bf16.mxu0 %v17741_v36  ;;  %v14383_v58 = vld [vmem:[%s18606_s7 + $0x780] sm:$0xff]  }
 0x91f   : > { %v12653_v62 = vpop.f32.mrb[80].mxu0 }
 0x920   : > { %v12654_v29 = vpop.f32.mrb[81].mxu0 }
 0x921   : > { %v12655_v35 = vadd.f32 %v12654_v29, %v12653_v62  ;;  %v12656_v12 = vpop.f32.mrb[82].mxu0 }
 0x922   : > { %v12657_v19 = vpop.f32.mrb[83].mxu0 }
 0x923   : > { %v18118_v3 = vadd.f32 %v12655_v35, %v17998_v18  ;;  %v12658_v8 = vadd.f32 %v12657_v19, %v12656_v12  ;;  %v14384_v18 = vld [vmem:[%s18606_s7 + $0x7c8] sm:$0xff]   ;;  %v14386_v12 = vld [vmem:[%s18606_s7 + $0x7d0] sm:$0xff]  }
 0x924   : > { %9525 = vmatmul.mubr.bf16.gmra.mrb[188].mxu0 %v17741_v36  ;;  %v14385_v35 = vld [vmem:[%s18606_s7 + $0x788] sm:$0xff]  }
 0x925   : > { %v18122_v30 = vadd.f32 %v12658_v8, %v18002_v45  ;;  %10273 = vmatprep.mubr.bf16.mxu0 %v19008_v28 }
 0x927   : > { %v12675_v16 = vpop.f32.mrb[84].mxu0 }
 0x928   : > { %v12676_v9 = vpop.f32.mrb[85].mxu0 }
 0x929   : > { %v12677_v31 = vadd.f32 %v12676_v9, %v12675_v16  ;;  %v12678_v32 = vpop.f32.mrb[86].mxu0 }
 0x92a   : > { %v12679_v62 = vpop.f32.mrb[87].mxu0 }
 0x92b   : > { %v18132_v29 = vadd.f32 %v12677_v31, %v18012_v48  ;;  %v12680_v45 = vadd.f32 %v12679_v62, %v12678_v32 }
 0x92c   : > { %10274 = vmatmul.mubr.bf16.vlgmr.msra.gmra.mrb[192].mxu0 %v16641_v20  ;;  %v14387_v20 = vld [vmem:[%s18606_s7 + $0x790] sm:$0xff]  }
 0x92d   : > { %v18136_v28 = vadd.f32 %v12680_v45, %v18016_v39  ;;  %13220 = vmatpush3.bf16.msra.mxu0 %v14383_v58  ;;  %10281 = vmatprep.mubr.bf16.mxu0 %v16643_v44  ;;  %v14388_v44 = vld [vmem:[%s18606_s7 + $0x7d8] sm:$0xff]  }
 0x92e   : > { %13221 = vmatprep.subr.bf16.mxu0 %v14384_v18  ;;  %v14389_v58 = vld [vmem:[%s18606_s7 + $0x798] sm:$0xff]  }
 0x92f   : > { %v12681_v48 = vpop.f32.mrb[88].mxu0 }
 0x930   : > { %v12682_v19 = vpop.f32.mrb[89].mxu0 }
 0x931   : > { %v12683_v8 = vadd.f32 %v12682_v19, %v12681_v48  ;;  %v12684_v16 = vpop.f32.mrb[90].mxu0  ;;  %13222 = vmatpush3.bf16.msra.mxu0 %v14385_v35  ;;  %v14393_v19 = vld [vmem:[%s18606_s7 + $0x7a8] sm:$0xff]  }
 0x932   : > { %v12685_v39 = vpop.f32.mrb[91].mxu0  ;;  %13223 = vmatprep.subr.bf16.mxu0 %v14386_v12 }
 0x933   : > { %v18152_v9 = vadd.f32 %v12683_v8, %v18032_v7  ;;  %v12686_v31 = vadd.f32 %v12685_v39, %v12684_v16  ;;  %v14390_v7 = vld [vmem:[%s18606_s7 + $0x7e0] sm:$0xff]   ;;  %v14396_v39 = vld [vmem:[%s18606_s7 + $0x7f8] sm:$0xff]  }
 0x934   : > { %10282 = vmatmul.mubr.bf16.gmra.mrb[196].mxu0 %v16675_v52 }
 0x935   : > { %v18156_v32 = vadd.f32 %v12686_v31, %v18036_v11  ;;  %14579 = vmatprep.mubr.msk.bf16.mxu0 %vm15701_vm8, %v16797_v37  ;;  %13224 = vmatpush3.bf16.msra.mxu0 %v14387_v20  ;;  %v14392_v11 = vld [vmem:[%s18606_s7 + $0x7e8] sm:$0xff]  }
 0x936   : > { %13225 = vmatprep.subr.bf16.mxu0 %v14388_v44 }
 0x937   : > { %v12687_v62 = vpop.f32.mrb[92].mxu0 }
 0x938   : > { %v12688_v18 = vpop.f32.mrb[93].mxu0 }
 0x939   : > { %v12689_v52 = vadd.f32 %v12688_v18, %v12687_v62  ;;  %v12690_v45 = vpop.f32.mrb[94].mxu0  ;;  %13226 = vmatpush3.bf16.msra.mxu0 %v14389_v58 }
 0x93a   : > { %v12691_v37 = vpop.f32.mrb[95].mxu0  ;;  %13227 = vmatprep.subr.bf16.mxu0 %v14390_v7  ;;  %v14397_v7 = vld [vmem:[%s18606_s7 + $0x7b8] sm:$0xff]  }
 0x93b   : > { %v18174_v35 = vadd.f32 %v12689_v52, %v18052_v2  ;;  %v12692_v12 = vadd.f32 %v12691_v37, %v12690_v45  ;;  %v14394_v2 = vld [vmem:[%s18606_s7 + $0x7f0] sm:$0xff]  }
 0x93c   : > { %10290 = vmatmul.mubr.bf16.gmra.mrb[200].mxu0 %v16817_v13 }
 0x93d   : > { %v18178_v48 = vadd.f32 %v12692_v12, %v18056_v57  ;;  %14582 = vmatprep.mubr.msk.bf16.mxu0 %vm15727_vm3, %v16834_v1  ;;  %13228 = vmatpush3.bf16.msra.mxu0 %v14391_v38  ;;  %v14395_v57 = vld [vmem:[%s18606_s7 + $0x7b0] sm:$0xff]  }
 0x93e   : > { %13229 = vmatprep.subr.bf16.mxu0 %v14392_v11 }
 0x93f   : > { %v12693_v8 = vpop.f32.mrb[96].mxu0 }
 0x940   : > { %v12694_v16 = vpop.f32.mrb[97].mxu0 }
 0x941   : > { %v12695_v13 = vadd.f32 %v12694_v16, %v12693_v8  ;;  %v12696_v20 = vpop.f32.mrb[98].mxu0  ;;  %13230 = vmatpush3.bf16.msra.mxu0 %v14393_v19 }
 0x942   : > { %v12697_v1 = vpop.f32.mrb[99].mxu0  ;;  %13231 = vmatprep.subr.bf16.mxu0 %v14394_v2 }
 0x943   : > { %v18196_v44 = vadd.f32 %v12695_v13, %v18072_v60  ;;  %v12698_v31 = vadd.f32 %v12697_v1, %v12696_v20 }
 0x944   : > { %14585 = vmatmul.mubr.msk.bf16.gmra.mrb[204].mxu0 %vm15727_vm3, %v16849_v34  ;;  %vm10689_vm3 = vcmask 519168  }
 0x945   : > { %v18202_v58 = vadd.f32 %v12698_v31, %v18076_v10  ;;  %14588 = vmatprep.mubr.msk.bf16.mxu0 %vm15752_vm5, %v16862_v42  ;;  %13232 = vmatpush3.bf16.msra.mxu0 %v14395_v57 }
 0x946   : > { %13233 = vmatprep.subr.bf16.mxu0 %v14396_v39 }
 0x947   : > { %v12699_v60 = vpop.f32.mrb[100].mxu0 }
 0x948   : > { %v12700_v62 = vpop.f32.mrb[101].mxu0 }
 0x949   : > { %v12701_v18 = vadd.f32 %v12700_v62, %v12699_v60  ;;  %v12702_v52 = vpop.f32.mrb[102].mxu0  ;;  %13234 = vmatpush3.bf16.msra.mxu0 %v14397_v7 }
 0x94a   : > { %v12703_v63 = vpop.f32.mrb[103].mxu0 }
 0x94b   : > { %v18211_v34 = vadd.f32 %v12701_v18, %v18086_v41  ;;  %v12704_v10 = vadd.f32 %v12703_v63, %v12702_v52 }
 0x94c   : > { %14591 = vmatmul.mubr.msk.bf16.gmra.mrb[208].mxu0 %vm15752_vm5, %v16871_v56 }
 0x94d   : > { %v18217_v42 = vadd.f32 %v12704_v10, %v18090_v47  ;;  %14594 = vmatprep.mubr.msk.bf16.mxu0 %vm15774_vm7, %v19019_v40  ;;  %v19073_v10 = vld [vmem:[#allocation34_spill] sm:$0xff] }
 0x94f   : > { %v12705_v45 = vpop.f32.mrb[104].mxu0 }
 0x950   : > { %v12706_v38 = vpop.f32.mrb[105].mxu0 }
 0x951   : > { %v12707_v37 = vadd.f32 %v12706_v38, %v12705_v45  ;;  %v12708_v11 = vpop.f32.mrb[106].mxu0 }
 0x952   : > { %v12709_v12 = vpop.f32.mrb[107].mxu0 }
 0x953   : > { %v18223_v41 = vadd.f32 %v12707_v37, %v18094_v61  ;;  %v12710_v19 = vadd.f32 %v12709_v12, %v12708_v11  ;;  %v19076_v12 = vld [vmem:[#allocation82_spill] sm:$0xff] }
 0x954   : > { %14597 = vmatmul.mubr.msk.bf16.gmra.mrb[212].mxu0 %vm15774_vm7, %v19023_v55 }
 0x955   : > { %v18229_v53 = vadd.f32 %v12710_v19, %v18098_v59  ;;  %14600 = vmatprep.mubr.msk.bf16.mxu0 %vm15792_vm12, %v19068_v54 }
 0x957   : > { %v12711_v56 = vpop.f32.mrb[108].mxu0 }
 0x958   : > { %v12712_v40 = vpop.f32.mrb[109].mxu0 }
 0x959   : > { %v12713_v47 = vadd.f32 %v12712_v40, %v12711_v56  ;;  %v12714_v2 = vpop.f32.mrb[110].mxu0 }
 0x95a   : > { %v12715_v8 = vpop.f32.mrb[111].mxu0 }
 0x95b   : > { %v18235_v61 = vadd.f32 %v12713_v47, %v18102_v0  ;;  %v12716_v16 = vadd.f32 %v12715_v8, %v12714_v2  ;;  %v19077_v2 = vld [vmem:[#allocation36_spill] sm:$0xff] }
 0x95c   : > { %14603 = vmatmul.mubr.msk.bf16.gmra.mrb[216].mxu0 %vm15792_vm12, %v19070_v17 }
 0x95d   : > { %v18241_v55 = vadd.f32 %v12716_v16, %v18106_v5  ;;  %10329 = vmatprep.mubr.bf16.mxu0 %v17741_v36 }
 0x95f   : > { %v12717_v15 = vpop.f32.mrb[112].mxu0 }
 0x960   : > { %v12718_v54 = vpop.f32.mrb[113].mxu0 }
 0x961   : > { %v12719_v59 = vadd.f32 %v12718_v54, %v12717_v15  ;;  %v12720_v13 = vpop.f32.mrb[114].mxu0 }
 0x962   : > { %v12721_v20 = vpop.f32.mrb[115].mxu0 }
 0x963   : > { %v18245_v57 = vadd.f32 %v12719_v59, %v18110_v49  ;;  %v12722_v0 = vadd.f32 %v12721_v20, %v12720_v13  ;;  %v19080_v13 = vld [vmem:[#allocation31_spill] sm:$0xff] }
 0x964   : > { %10330 = vmatmul.mubr.bf16.gmra.mrb[220].mxu0 %v17741_v36 }
 0x965   : > { %v18249_v1 = vadd.f32 %v12722_v0, %v18114_v21  ;;  %10337 = vmatprep.mubr.bf16.mxu0 %v17741_v36 }
 0x967   : > { %v12723_v25 = vpop.f32.mrb[116].mxu0 }
 0x968   : > { %v12724_v17 = vpop.f32.mrb[117].mxu0 }
 0x969   : > { %v12725_v5 = vadd.f32 %v12724_v17, %v12723_v25  ;;  %v12726_v39 = vpop.f32.mrb[118].mxu0 }
 0x96a   : > { %v12727_v31 = vpop.f32.mrb[119].mxu0 }
 0x96b   : > { %v18253_v7 = vadd.f32 %v12725_v5, %v18118_v3  ;;  %v12728_v60 = vadd.f32 %v12727_v31, %v12726_v39  ;;  %v19074_v3 = vld [vmem:[#allocation33_spill] sm:$0xff]  ;;  %v19081_v39 = vld [vmem:[#allocation40_spill] sm:$0xff] }
 0x96c   : > { %10338 = vmatmul.mubr.bf16.gmra.mrb[224].mxu0 %v17741_v36  ;;  %v19075_v36 = vld [vmem:[#allocation23_spill] sm:$0xff] }
 0x96d   : > { %v18257_v49 = vadd.f32 %v12728_v60, %v18122_v30  ;;  %10483 = vmatprep.mubr.bf16.mxu0 %v19056_v46 }
 0x96f   : > { %v12815_v21 = vpop.f32.mrb[120].mxu0 }
 0x970   : > { %v12816_v62 = vpop.f32.mrb[121].mxu0 }
 0x971   : > { %v12817_v18 = vadd.f32 %v12816_v62, %v12815_v21  ;;  %v12818_v52 = vpop.f32.mrb[122].mxu0 }
 0x972   : > { %v12819_v63 = vpop.f32.mrb[123].mxu0 }
 0x973   : > { %v9253_v45 = vadd.f32 %v12817_v18, %v19073_v10  ;;  %v12820_v38 = vadd.f32 %v12819_v63, %v12818_v52  ;;  %v19084_v52 = vld [vmem:[#allocation83_spill] sm:$0xff] }
 0x974   : > { %10484 = vmatmul.mubr.bf16.vlgmr.msra.gmra.mrb[228].mxu0 %v19057_v26  ;;  %v19078_v26 = vld [vmem:[#allocation27_spill] sm:$0xff] }
 0x975   : > { %v9256_v37 = vadd.f32 %v12820_v38, %v19074_v3  ;;  %10491 = vmatprep.mubr.bf16.mxu0 %v19058_v22  ;;  %v18265_v11 = vadd.f32 %v19075_v36, %v9253_v45  ;;  %v19079_v22 = vld [vmem:[#allocation21_spill] sm:$0xff] }
 0x977   : > { %v12821_v30 = vpop.f32.mrb[124].mxu0  ;;  %v18268_v46 = vadd.f32 %v19076_v12, %v9256_v37  ;;  %v19085_v37 = vld [vmem:[#allocation63_spill] sm:$0xff] }
 0x978   : > { %v12822_v19 = vpop.f32.mrb[125].mxu0 }
 0x979   : > { %v12823_v56 = vadd.f32 %v12822_v19, %v12821_v30  ;;  %v12824_v40 = vpop.f32.mrb[126].mxu0 }
 0x97a   : > { %v12825_v47 = vpop.f32.mrb[127].mxu0 }
 0x97b   : > { %v9261_v8 = vadd.f32 %v12823_v56, %v19077_v2  ;;  %v12826_v16 = vadd.f32 %v12825_v47, %v12824_v40  ;;  %v19088_v40 = vld [vmem:[#allocation85_spill] sm:$0xff] }
 0x97c   : > { %10492 = vmatmul.mubr.bf16.gmra.mrb[232].mxu0 %v19059_v24  ;;  %v19082_v24 = vld [vmem:[#allocation41_spill] sm:$0xff] }
 0x97d   : > { %v9264_v15 = vadd.f32 %v12826_v16, %v19078_v26  ;;  %10499 = vmatprep.mubr.bf16.mxu0 %v19060_v6  ;;  %v18275_v54 = vadd.f32 %v19079_v22, %v9261_v8  ;;  %v19083_v6 = vld [vmem:[#allocation24_spill] sm:$0xff] }
 0x97f   : > { %v12827_v59 = vpop.f32.mrb[128].mxu0  ;;  %v18278_v20 = vadd.f32 %v19080_v13, %v9264_v15  ;;  %v19089_v15 = vld [vmem:[#allocation67_spill] sm:$0xff] }
 0x980   : > { %v12828_v0 = vpop.f32.mrb[129].mxu0 }
 0x981   : > { %v12829_v25 = vadd.f32 %v12828_v0, %v12827_v59  ;;  %v12830_v17 = vpop.f32.mrb[130].mxu0  ;;  %v19091_v0 = vld [vmem:[#allocation74_spill] sm:$0xff] }
 0x982   : > { %v12831_v5 = vpop.f32.mrb[131].mxu0 }
 0x983   : > { %v9269_v31 = vadd.f32 %v12829_v25, %v19081_v39  ;;  %v12832_v60 = vadd.f32 %v12831_v5, %v12830_v17  ;;  %v19093_v5 = vld [vmem:[#allocation87_spill] sm:$0xff] }
 0x984   : > { %10500 = vmatmul.mubr.bf16.gmra.mrb[236].mxu0 %v19061_v23  ;;  %v19086_v23 = vld [vmem:[#allocation64_spill] sm:$0xff] }
 0x985   : > { %v9272_v21 = vadd.f32 %v12832_v60, %v19082_v24  ;;  %10507 = vmatprep.mubr.bf16.mxu0 %v19062_v14  ;;  %v18285_v62 = vadd.f32 %v19083_v6, %v9269_v31  ;;  %v19087_v14 = vld [vmem:[#allocation84_spill] sm:$0xff]  ;;  %v19094_v6 = vld [vmem:[#allocation71_spill] sm:$0xff] }
 0x987   : > { %v12833_v18 = vpop.f32.mrb[132].mxu0  ;;  %v18288_v63 = vadd.f32 %v19084_v52, %v9272_v21 }
 0x988   : > { %v12834_v10 = vpop.f32.mrb[133].mxu0 }
 0x989   : > { %v12835_v45 = vadd.f32 %v12834_v10, %v12833_v18  ;;  %v12836_v38 = vpop.f32.mrb[134].mxu0 }
 0x98a   : > { %v12837_v3 = vpop.f32.mrb[135].mxu0 }
 0x98b   : > { %v9277_v36 = vadd.f32 %v12835_v45, %v19085_v37  ;;  %v12838_v30 = vadd.f32 %v12837_v3, %v12836_v38  ;;  %v19096_v45 = vld [vmem:[#allocation88_spill] sm:$0xff]  ;;  %v19097_v37 = vld [vmem:[#allocation89_spill] sm:$0xff] }
 0x98c   : > { %10508 = vmatmul.mubr.bf16.gmra.mrb[240].mxu0 %v19063_v4  ;;  %v19090_v4 = vld [vmem:[#allocation68_spill] sm:$0xff] }
 0x98d   : > { %v9280_v12 = vadd.f32 %v12838_v30, %v19086_v23  ;;  %10515 = vmatprep.mubr.bf16.mxu0 %v19064_v33  ;;  %v18295_v19 = vadd.f32 %v19087_v14, %v9277_v36  ;;  %v19092_v33 = vld [vmem:[#allocation86_spill] sm:$0xff] }
 0x98f   : > { %v12839_v56 = vpop.f32.mrb[136].mxu0  ;;  %v18298_v47 = vadd.f32 %v19088_v40, %v9280_v12 }
 0x990   : > { %v12840_v2 = vpop.f32.mrb[137].mxu0 }
 0x991   : > { %v12841_v8 = vadd.f32 %v12840_v2, %v12839_v56  ;;  %v12842_v16 = vpop.f32.mrb[138].mxu0  ;;  %v19098_v56 = vld [vmem:[#allocation75_spill] sm:$0xff] }
 0x992   : > { %v12843_v26 = vpop.f32.mrb[139].mxu0 }
 0x993   : > { %v9285_v22 = vadd.f32 %v12841_v8, %v19089_v15  ;;  %v12844_v59 = vadd.f32 %v12843_v26, %v12842_v16  ;;  %v14405_v16 = vld [vmem:[#allocation3 + $0x8] sm:$0xff] }
 0x994   : > { %10516 = vmatmul.mubr.bf16.gmra.mrb[244].mxu0 %v19065_v43  ;;  %v19095_v43 = vld [vmem:[#allocation72_spill] sm:$0xff] }
 0x995   : > { %v9288_v13 = vadd.f32 %v12844_v59, %v19090_v4  ;;  %10523 = vmatprep.mubr.bf16.mxu0 %v19091_v0  ;;  %v18305_v25 = vadd.f32 %v19092_v33, %v9285_v22  ;;  %v19101_v22 = vld [vmem:[#allocation91_spill] sm:$0xff] }
 0x997   : > { %v12845_v17 = vpop.f32.mrb[140].mxu0  ;;  %v18308_v39 = vadd.f32 %v19093_v5, %v9288_v13 }
 0x998   : > { %v12846_v31 = vpop.f32.mrb[141].mxu0 }
 0x999   : > { %v12847_v60 = vadd.f32 %v12846_v31, %v12845_v17  ;;  %v12848_v24 = vpop.f32.mrb[142].mxu0  ;;  %v19102_v17 = vld [vmem:[#allocation78_spill] sm:$0xff] }
 0x99a   : > { %v12849_v21 = vpop.f32.mrb[143].mxu0 }
 0x99b   : > { %v9293_v18 = vadd.f32 %v12847_v60, %v19094_v6  ;;  %v12850_v52 = vadd.f32 %v12849_v21, %v12848_v24  ;;  %v19104_v24 = vld [vmem:[#allocation92_spill] sm:$0xff] }
 0x99c   : > { %10524 = vmatmul.mubr.bf16.gmra.mrb[248].mxu0 %v19067_v27  ;;  %v19099_v27 = vld [vmem:[#allocation76_spill] sm:$0xff] }
 0x99d   : > { %v9296_v10 = vadd.f32 %v12850_v52, %v19095_v43  ;;  %10531 = vmatprep.mubr.bf16.mxu0 %v19071_v50  ;;  %v18315_v38 = vadd.f32 %v19096_v45, %v9293_v18  ;;  %v19100_v50 = vld [vmem:[#allocation90_spill] sm:$0xff]  ;;  %v19105_v18 = vld [vmem:[#allocation93_spill] sm:$0xff] }
 0x99f   : > { %v12851_v3 = vpop.f32.mrb[144].mxu0  ;;  %v18318_v36 = vadd.f32 %v19097_v37, %v9296_v10  ;;  %v19106_v37 = vld [vmem:[#allocation80_spill] sm:$0xff] }
 0x9a0   : > { %v12852_v30 = vpop.f32.mrb[145].mxu0 }
 0x9a1   : > { %v12853_v23 = vadd.f32 %v12852_v30, %v12851_v3  ;;  %v12854_v12 = vpop.f32.mrb[146].mxu0 }
 0x9a2   : > { %v12855_v14 = vpop.f32.mrb[147].mxu0 }
 0x9a3   : > { %v9301_v40 = vadd.f32 %v12853_v23, %v19098_v56  ;;  %v12856_v2 = vadd.f32 %v12855_v14, %v12854_v12  ;;  %v19107_v12 = vld [vmem:[#allocation81_spill] sm:$0xff]  ;;  %v19108_v56 = vld [vmem:[#allocation94_spill] sm:$0xff] }
 0x9a4   : > { %10532 = vmatmul.mubr.bf16.gmra.mrb[252].mxu0 %v19072_v51  ;;  %v19103_v51 = vld [vmem:[#allocation79_spill] sm:$0xff] }
 0x9a5   : > { %v9304_v8 = vadd.f32 %v12856_v2, %v19099_v27  ;;  %10539 = vmatprep.mubr.bf16.mxu0 %v14405_v16  ;;  %v18324_v26 = vadd.f32 %v19100_v50, %v9301_v40  ;;  %v19109_v27 = vld [vmem:[#allocation95_spill] sm:$0xff] }
 0x9a7   : > { %v12857_v15 = vpop.f32.mrb[148].mxu0  ;;  %v18327_v59 = vadd.f32 %v19101_v22, %v9304_v8 }
 0x9a8   : > { %v12858_v4 = vpop.f32.mrb[149].mxu0 }
 0x9a9   : > { %v12859_v13 = vadd.f32 %v12858_v4, %v12857_v15  ;;  %v12860_v0 = vpop.f32.mrb[150].mxu0 }
 0x9aa   : > { %v12861_v33 = vpop.f32.mrb[151].mxu0 }
 0x9ab   : > { %v9309_v5 = vadd.f32 %v12859_v13, %v19102_v17  ;;  %v12862_v31 = vadd.f32 %v12861_v33, %v12860_v0  ;;  %v13207_v33 = vpop.f32.mrb[8].mxu1 }
 0x9ac   : > { %10540 = vmatmul.mubr.bf16.gmra.mrb[0].mxu0 %v14405_v16 }
 0x9ad   : > { %v9312_v60 = vadd.f32 %v12862_v31, %v19103_v51  ;;  %10547 = vmatprep.mubr.bf16.mxu0 %v14405_v16  ;;  %v18332_v21 = vadd.f32 %v19104_v24, %v9309_v5  ;;  %v13208_v5 = vpop.f32.mrb[9].mxu1 }
 0x9ae   : > { %v18350_v31 = vadd.f32 %v13208_v5, %v13207_v33  ;;  %v13210_v51 = vpop.f32.mrb[10].mxu1 }
 0x9af   : > { %v12863_v6 = vpop.f32.mrb[152].mxu0  ;;  %v18335_v52 = vadd.f32 %v19105_v18, %v9312_v60 }
 0x9b0   : > { %v12864_v43 = vpop.f32.mrb[153].mxu0 }
 0x9b1   : > { %v12865_v10 = vadd.f32 %v12864_v43, %v12863_v6  ;;  %v12866_v45 = vpop.f32.mrb[154].mxu0  ;;  %v13211_v6 = vpop.f32.mrb[11].mxu1 }
 0x9b2   : > { %v12867_v3 = vpop.f32.mrb[155].mxu0  ;;  %v18355_v43 = vadd.f32 %v13211_v6, %v13210_v51 }
 0x9b3   : > { %v9317_v30 = vadd.f32 %v12865_v10, %v19106_v37  ;;  %v12868_v23 = vadd.f32 %v12867_v3, %v12866_v45  ;;  %v13213_v37 = vpop.f32.mrb[12].mxu1 }
 0x9b4   : > { %10548 = vmatmul.mubr.bf16.gmra.mrb[4].mxu0 %v14405_v16 }
 0x9b5   : > { %v9320_v14 = vadd.f32 %v12868_v23, %v19107_v12  ;;  %v18340_v40 = vadd.f32 %v19108_v56, %v9317_v30  ;;  %v13214_v23 = vpop.f32.mrb[13].mxu1 }
 0x9b6   : > { %v13216_v12 = vpop.f32.mrb[14].mxu1 }
 0x9b7   : > { %v12955_v2 = vpop.f32.mrb[156].mxu0  ;;  %v18343_v8 = vadd.f32 %v19109_v27, %v9320_v14 }
 0x9b8   : > { %v12956_v50 = vpop.f32.mrb[157].mxu0 }
 0x9b9   : > { %v12957_v15 = vadd.f32 %v12956_v50, %v12955_v2  ;;  %v12958_v22 = vpop.f32.mrb[158].mxu0  ;;  %v13217_v2 = vpop.f32.mrb[15].mxu1 }
 0x9ba   : > { %v12959_v4 = vpop.f32.mrb[159].mxu0  ;;  %v18367_v50 = vadd.f32 %v13217_v2, %v13216_v12 }
 0x9bb   : > { %v9463_v13 = vadd.f32 %v12957_v15, %v18265_v11  ;;  %v12960_v0 = vadd.f32 %v12959_v4, %v12958_v22 }
 0x9bd   : > { %v18347_v17 = vadd.f32 %v9463_v13, %v18132_v29  ;;  %v9466_v16 = vadd.f32 %v12960_v0, %v18268_v46 }
 0x9bf   : > { %v18353_v60 = vadd.f32 %v9466_v16, %v18136_v28  ;;  %v12961_v24 = vpop.f32.mrb[160].mxu0  ;;  %v18362_v28 = vadd.f32 %v13214_v23, %v13213_v37 }
 0x9c0   : > { %v12962_v18 = vpop.f32.mrb[161].mxu0 }
 0x9c1   : > { %v12963_v11 = vadd.f32 %v12962_v18, %v12961_v24  ;;  %v12964_v10 = vpop.f32.mrb[162].mxu0 }
 0x9c2   : > { %v12965_v45 = vpop.f32.mrb[163].mxu0 }
 0x9c3   : > { %v9471_v29 = vadd.f32 %v12963_v11, %v18275_v54  ;;  %v12966_v3 = vadd.f32 %v12965_v45, %v12964_v10 }
 0x9c5   : > { %v18359_v46 = vadd.f32 %v9471_v29, %v18152_v9  ;;  %v9474_v30 = vadd.f32 %v12966_v3, %v18278_v20 }
 0x9c7   : > { %v18365_v14 = vadd.f32 %v9474_v30, %v18156_v32  ;;  %v12967_v56 = vpop.f32.mrb[164].mxu0 }
 0x9c8   : > { %v12968_v27 = vpop.f32.mrb[165].mxu0 }
 0x9c9   : > { %v12969_v54 = vadd.f32 %v12968_v27, %v12967_v56  ;;  %v12970_v15 = vpop.f32.mrb[166].mxu0 }
 0x9ca   : > { %v12971_v22 = vpop.f32.mrb[167].mxu0 }
 0x9cb   : > { %v9479_v9 = vadd.f32 %v12969_v54, %v18285_v62  ;;  %v12972_v4 = vadd.f32 %v12971_v22, %v12970_v15 }
 0x9cd   : > { %v18371_v20 = vadd.f32 %v9479_v9, %v18174_v35  ;;  %v9482_v13 = vadd.f32 %v12972_v4, %v18288_v63 }
 0x9cf   : > { %v18375_v0 = vadd.f32 %v9482_v13, %v18178_v48  ;;  %v12973_v32 = vpop.f32.mrb[168].mxu0 }
 0x9d0   : > { %v12974_v33 = vpop.f32.mrb[169].mxu0 }
 0x9d1   : > { %v12975_v16 = vadd.f32 %v12974_v33, %v12973_v32  ;;  %v12976_v5 = vpop.f32.mrb[170].mxu0 }
 0x9d2   : > { %v12977_v51 = vpop.f32.mrb[171].mxu0 }
 0x9d3   : > { %v9487_v24 = vadd.f32 %v12975_v16, %v18295_v19  ;;  %v12978_v6 = vadd.f32 %v12977_v51, %v12976_v5 }
 0x9d5   : > { %v18379_v18 = vadd.f32 %v9487_v24, %v18196_v44  ;;  %v9490_v62 = vadd.f32 %v12978_v6, %v18298_v47 }
 0x9d7   : > { %v18383_v35 = vadd.f32 %v9490_v62, %v18202_v58  ;;  %v12979_v63 = vpop.f32.mrb[172].mxu0 }
 0x9d8   : > { %v12980_v11 = vpop.f32.mrb[173].mxu0 }
 0x9d9   : > { %v12981_v48 = vadd.f32 %v12980_v11, %v12979_v63  ;;  %v12982_v10 = vpop.f32.mrb[174].mxu0 }
 0x9da   : > { %v12983_v45 = vpop.f32.mrb[175].mxu0 }
 0x9db   : > { %v9495_v29 = vadd.f32 %v12981_v48, %v18305_v25  ;;  %v12984_v3 = vadd.f32 %v12983_v45, %v12982_v10 }
 0x9dd   : > { %v18387_v37 = vadd.f32 %v9495_v29, %v18211_v34  ;;  %v9498_v19 = vadd.f32 %v12984_v3, %v18308_v39 }
 0x9df   : > { %v18391_v44 = vadd.f32 %v9498_v19, %v18217_v42  ;;  %v12985_v47 = vpop.f32.mrb[176].mxu0  ;;  %v19110_v19 = vld [vmem:[#allocation42_spill] sm:$0xff] }
 0x9e0   : > { %v12986_v30 = vpop.f32.mrb[177].mxu0 }
 0x9e1   : > { %v12987_v58 = vadd.f32 %v12986_v30, %v12985_v47  ;;  %v12988_v23 = vpop.f32.mrb[178].mxu0 }
 0x9e2   : > { %v12989_v12 = vpop.f32.mrb[179].mxu0 }
 0x9e3   : > { %v9503_v56 = vadd.f32 %v12987_v58, %v18315_v38  ;;  %v12990_v2 = vadd.f32 %v12989_v12, %v12988_v23  ;;  %v19111_v58 = vld [vmem:[#allocation96_spill] sm:$0xff] }
 0x9e5   : > { %v18395_v27 = vadd.f32 %v9503_v56, %v18223_v41  ;;  %v9506_v25 = vadd.f32 %v12990_v2, %v18318_v36  ;;  %v19113_v56 = vld [vmem:[#allocation108_spill] sm:$0xff] }
 0x9e7   : > { %v18399_v34 = vadd.f32 %v9506_v25, %v18229_v53  ;;  %v12991_v39 = vpop.f32.mrb[180].mxu0 }
 0x9e8   : > { %v12992_v54 = vpop.f32.mrb[181].mxu0 }
 0x9e9   : > { %v12993_v42 = vadd.f32 %v12992_v54, %v12991_v39  ;;  %v12994_v15 = vpop.f32.mrb[182].mxu0  ;;  %v19114_v54 = vld [vmem:[#allocation44_spill] sm:$0xff] }
 0x9ea   : > { %v12995_v22 = vpop.f32.mrb[183].mxu0 }
 0x9eb   : > { %v9511_v9 = vadd.f32 %v12993_v42, %v18324_v26  ;;  %v12996_v4 = vadd.f32 %v12995_v22, %v12994_v15  ;;  %v19115_v22 = vld [vmem:[#allocation97_spill] sm:$0xff] }
 0x9ed   : > { %v18403_v13 = vadd.f32 %v9511_v9, %v18235_v61  ;;  %v9514_v38 = vadd.f32 %v12996_v4, %v18327_v59  ;;  %v19116_v4 = vld [vmem:[#allocation45_spill] sm:$0xff] }
 0x9ef   : > { %v18407_v41 = vadd.f32 %v9514_v38, %v18241_v55  ;;  %v12997_v36 = vpop.f32.mrb[184].mxu0 }
 0x9f0   : > { %v12998_v32 = vpop.f32.mrb[185].mxu0 }
 0x9f1   : > { %v12999_v53 = vadd.f32 %v12998_v32, %v12997_v36  ;;  %v13000_v33 = vpop.f32.mrb[186].mxu0  ;;  %v19117_v32 = vld [vmem:[#allocation46_spill] sm:$0xff] }
 0x9f2   : > { %v13001_v16 = vpop.f32.mrb[187].mxu0 }
 0x9f3   : > { %v9519_v5 = vadd.f32 %v12999_v53, %v18332_v21  ;;  %v13002_v51 = vadd.f32 %v13001_v16, %v13000_v33 }
 0x9f5   : > { %v18411_v24 = vadd.f32 %v9519_v5, %v18245_v57  ;;  %v9522_v26 = vadd.f32 %v13002_v51, %v18335_v52 }
 0x9f7   : > { %v18415_v61 = vadd.f32 %v9522_v26, %v18249_v1  ;;  %v13003_v59 = vpop.f32.mrb[188].mxu0  ;;  %v19118_v26 = vld [vmem:[#allocation49_spill] sm:$0xff] }
 0x9f8   : > { %v13004_v6 = vpop.f32.mrb[189].mxu0 }
 0x9f9   : > { %v13005_v55 = vadd.f32 %v13004_v6, %v13003_v59  ;;  %v13006_v62 = vpop.f32.mrb[190].mxu0 }
 0x9fa   : > { %v13007_v63 = vpop.f32.mrb[191].mxu0 }
 0x9fb   : > { %v9527_v11 = vadd.f32 %v13005_v55, %v18340_v40  ;;  %v13008_v48 = vadd.f32 %v13007_v63, %v13006_v62  ;;  %v19112_v40 = vld [vmem:[#allocation43_spill] sm:$0xff]  ;;  %v19119_v55 = vld [vmem:[#allocation98_spill] sm:$0xff]  ;;  %v19120_v63 = vld [vmem:[#allocation48_spill] sm:$0xff] }
 0x9fd   : > { %v18419_v10 = vadd.f32 %v9527_v11, %v18253_v7  ;;  %v9530_v21 = vadd.f32 %v13008_v48, %v18343_v8 }
 0x9ff   : > { %v18423_v57 = vadd.f32 %v9530_v21, %v18257_v49  ;;  %v13095_v52 = vpop.f32.mrb[192].mxu0  ;;  %v19121_v21 = vld [vmem:[#allocation50_spill] sm:$0xff] }
 0xa00   : > { %v13096_v45 = vpop.f32.mrb[193].mxu0 }
 0xa01   : > { %v13097_v1 = vadd.f32 %v13096_v45, %v13095_v52  ;;  %v13098_v29 = vpop.f32.mrb[194].mxu0 }
 0xa02   : > { %v13099_v3 = vpop.f32.mrb[195].mxu0 }
 0xa03   : > { %v10276_v47 = vadd.f32 %v13097_v1, %v19110_v19  ;;  %v13100_v30 = vadd.f32 %v13099_v3, %v13098_v29  ;;  %v19122_v19 = vld [vmem:[#allocation99_spill] sm:$0xff] }
 0xa05   : > { %v10279_v23 = vadd.f32 %v13100_v30, %v19111_v58  ;;  %v18428_v12 = vadd.f32 %v19112_v40, %v10276_v47  ;;  %v19123_v58 = vld [vmem:[#allocation100_spill] sm:$0xff] }
 0xa06   : > { %v19124_v40 = vld [vmem:[#allocation52_spill] sm:$0xff] }
 0xa07   : > { %v13101_v7 = vpop.f32.mrb[196].mxu0  ;;  %v18431_v2 = vadd.f32 %v19113_v56, %v10279_v23 }
 0xa08   : > { %v13102_v8 = vpop.f32.mrb[197].mxu0 }
 0xa09   : > { %v13103_v49 = vadd.f32 %v13102_v8, %v13101_v7  ;;  %v13104_v25 = vpop.f32.mrb[198].mxu0  ;;  %v19125_v8 = vld [vmem:[#allocation53_spill] sm:$0xff] }
 0xa0a   : > { %v13105_v39 = vpop.f32.mrb[199].mxu0 }
 0xa0b   : > { %v10284_v42 = vadd.f32 %v13103_v49, %v19114_v54  ;;  %v13106_v15 = vadd.f32 %v13105_v39, %v13104_v25 }
 0xa0d   : > { %v10287_v9 = vadd.f32 %v13106_v15, %v19115_v22  ;;  %v18436_v38 = vadd.f32 %v19116_v4, %v10284_v42  ;;  %v19126_v15 = vld [vmem:[#allocation101_spill] sm:$0xff]  ;;  %v19127_v4 = vld [vmem:[#allocation102_spill] sm:$0xff] }
 0xa0f   : > { %v13107_v36 = vpop.f32.mrb[200].mxu0  ;;  %v18439_v53 = vadd.f32 %v19117_v32, %v10287_v9  ;;  %v19128_v32 = vld [vmem:[#allocation54_spill] sm:$0xff] }
 0xa10   : > { %v13108_v33 = vpop.f32.mrb[201].mxu0 }
 0xa11   : > { %v13109_v16 = vadd.f32 %v13108_v33, %v13107_v36  ;;  %v13110_v5 = vpop.f32.mrb[202].mxu0 }
 0xa12   : > { %v13111_v51 = vpop.f32.mrb[203].mxu0 }
 0xa13   : > { %v10292_v59 = vadd.f32 %v13109_v16, %v19118_v26  ;;  %v13112_v6 = vadd.f32 %v13111_v51, %v13110_v5  ;;  %v19129_v5 = vld [vmem:[#allocation55_spill] sm:$0xff] }
 0xa15   : > { %v10295_v62 = vadd.f32 %v13112_v6, %v19119_v55  ;;  %v18444_v11 = vadd.f32 %v19120_v63, %v10292_v59 }
 0xa17   : > { %v13113_v48 = vpop.f32.mrb[204].mxu0  ;;  %v18447_v52 = vadd.f32 %v19121_v21, %v10295_v62  ;;  %v19130_v62 = vld [vmem:[#allocation103_spill] sm:$0xff]  ;;  %v19131_v21 = vld [vmem:[#allocation104_spill] sm:$0xff] }
 0xa18   : > { %v13114_v45 = vpop.f32.mrb[205].mxu0 }
 0xa19   : > { %v13115_v1 = vadd.f32 %v13114_v45, %v13113_v48  ;;  %v13116_v29 = vpop.f32.mrb[206].mxu0 }
 0xa1a   : > { %v13117_v3 = vpop.f32.mrb[207].mxu0 }
 0xa1b   : > { %v10300_v47 = vadd.f32 %v13115_v1, %v19122_v19  ;;  %v13118_v30 = vadd.f32 %v13117_v3, %v13116_v29  ;;  %v19132_v1 = vld [vmem:[#allocation38_spill] sm:$0xff]  ;;  %v19133_v19 = vld [vmem:[#allocation56_spill] sm:$0xff] }
 0xa1d   : > { %v10303_v23 = vadd.f32 %v13118_v30, %v19123_v58  ;;  %v18452_v7 = vadd.f32 %v19124_v40, %v10300_v47 }
 0xa1f   : > { %v13119_v56 = vpop.f32.mrb[208].mxu0  ;;  %v18455_v49 = vadd.f32 %v19125_v8, %v10303_v23 }
 0xa20   : > { %v13120_v25 = vpop.f32.mrb[209].mxu0 }
 0xa21   : > { %v13121_v39 = vadd.f32 %v13120_v25, %v13119_v56  ;;  %v13122_v54 = vpop.f32.mrb[210].mxu0  ;;  %v19134_v56 = vld [vmem:[#allocation105_spill] sm:$0xff] }
 0xa22   : > { %v13123_v42 = vpop.f32.mrb[211].mxu0 }
 0xa23   : > { %v10308_v22 = vadd.f32 %v13121_v39, %v19126_v15  ;;  %v13124_v9 = vadd.f32 %v13123_v42, %v13122_v54  ;;  %v19135_v39 = vld [vmem:[#allocation106_spill] sm:$0xff]  ;;  %v19136_v42 = vld [vmem:[#allocation57_spill] sm:$0xff] }
 0xa25   : > { %v10311_v36 = vadd.f32 %v13124_v9, %v19127_v4  ;;  %v18460_v33 = vadd.f32 %v19128_v32, %v10308_v22  ;;  %v19137_v9 = vld [vmem:[#allocation109_spill] sm:$0xff] }
 0xa27   : > { %v13125_v16 = vpop.f32.mrb[212].mxu0  ;;  %v18463_v51 = vadd.f32 %v19129_v5, %v10311_v36 }
 0xa28   : > { %v13126_v26 = vpop.f32.mrb[213].mxu0 }
 0xa29   : > { %v13127_v59 = vadd.f32 %v13126_v26, %v13125_v16  ;;  %v13128_v6 = vpop.f32.mrb[214].mxu0  ;;  %v19138_v26 = vld [vmem:[#allocation58_spill] sm:$0xff] }
 0xa2a   : > { %v13129_v55 = vpop.f32.mrb[215].mxu0 }
 0xa2b   : > { %v10316_v63 = vadd.f32 %v13127_v59, %v19130_v62  ;;  %v13130_v48 = vadd.f32 %v13129_v55, %v13128_v6  ;;  %v19139_v55 = vld [vmem:[#allocation29_spill] sm:$0xff] }
 0xa2d   : > { %v10319_v45 = vadd.f32 %v13130_v48, %v19131_v21  ;;  %v18468_v29 = vadd.f32 %v19132_v1, %v10316_v63 }
 0xa2f   : > { %v13131_v3 = vpop.f32.mrb[216].mxu0  ;;  %v18471_v47 = vadd.f32 %v19133_v19, %v10319_v45 }
 0xa30   : > { %v13132_v30 = vpop.f32.mrb[217].mxu0 }
 0xa31   : > { %v13133_v58 = vadd.f32 %v13132_v30, %v13131_v3  ;;  %v13134_v23 = vpop.f32.mrb[218].mxu0  ;;  %v19140_v30 = vld [vmem:[#allocation59_spill] sm:$0xff] }
 0xa32   : > { %v13135_v40 = vpop.f32.mrb[219].mxu0 }
 0xa33   : > { %v10324_v8 = vadd.f32 %v13133_v58, %v19134_v56  ;;  %v13136_v25 = vadd.f32 %v13135_v40, %v13134_v23  ;;  %v19141_v40 = vld [vmem:[#allocation107_spill] sm:$0xff] }
 0xa35   : > { %v10327_v54 = vadd.f32 %v13136_v25, %v19135_v39  ;;  %v18476_v15 = vadd.f32 %v19136_v42, %v10324_v8 }
 0xa37   : > { %v13137_v22 = vpop.f32.mrb[220].mxu0  ;;  %v18479_v4 = vadd.f32 %v19137_v9, %v10327_v54 }
 0xa38   : > { %v13138_v36 = vpop.f32.mrb[221].mxu0 }
 0xa39   : > { %v13139_v32 = vadd.f32 %v13138_v36, %v13137_v22  ;;  %v13140_v16 = vpop.f32.mrb[222].mxu0  ;;  %v18498_v36 = vld [vmem:[#allocation16] ss:$0 sm:$0xff] }
 0xa3a   : > { %v13141_v5 = vpop.f32.mrb[223].mxu0 }
 0xa3b   : > { %v10332_v59 = vadd.f32 %v13139_v32, %v19138_v26  ;;  %v13142_v6 = vadd.f32 %v13141_v5, %v13140_v16 }
 0xa3d   : > { %v10335_v62 = vadd.f32 %v13142_v6, %v19139_v55  ;;  %v18484_v63 = vadd.f32 %v18350_v31, %v10332_v59 }
 0xa3f   : > { %v18487_v48 = vadd.f32 %v18355_v43, %v10335_v62  ;;  %v13143_v21 = vpop.f32.mrb[224].mxu0 }
 0xa40   : > { %v13144_v45 = vpop.f32.mrb[225].mxu0 }
 0xa41   : > { %v13145_v1 = vadd.f32 %v13144_v45, %v13143_v21  ;;  %v13146_v3 = vpop.f32.mrb[226].mxu0 }
 0xa42   : > { %v13147_v19 = vpop.f32.mrb[227].mxu0 }
 0xa43   : > { %v10340_v58 = vadd.f32 %v13145_v1, %v19140_v30  ;;  %v13148_v23 = vadd.f32 %v13147_v19, %v13146_v3 }
 0xa45   : > { %v10343_v56 = vadd.f32 %v13148_v23, %v19141_v40  ;;  %v18492_v8 = vadd.f32 %v18362_v28, %v10340_v58 }
 0xa47   : > { %v18495_v25 = vadd.f32 %v18367_v50, %v10343_v56  ;;  %v13235_v31 = vpop.f32.mrb[228].mxu0 }
 0xa48   : > { %v13236_v39 = vpop.f32.mrb[229].mxu0 }
 0xa49   : > { %v13237_v43 = vadd.f32 %v13236_v39, %v13235_v31  ;;  %v13238_v54 = vpop.f32.mrb[230].mxu0 }
 0xa4a   : > { %v13239_v42 = vpop.f32.mrb[231].mxu0 }
 0xa4b   : > { %v10486_v22 = vadd.f32 %v13237_v43, %v18428_v12  ;;  %v13240_v9 = vadd.f32 %v13239_v42, %v13238_v54 }
 0xa4d   : > { %v10556_v32 = vadd.f32 %v10486_v22, %v18347_v17  ;;  %v10489_v16 = vadd.f32 %v13240_v9, %v18431_v2 }
 0xa4f   : > { %v10581_v28 = vadd.f32 %v18498_v36, %v10556_v32  ;;  %v10557_v50 = vadd.f32 %v10489_v16, %v18353_v60  ;;  %v13241_v5 = vpop.f32.mrb[232].mxu0 }
 0xa50   : > { %v13242_v26 = vpop.f32.mrb[233].mxu0 }
 0xa51   : > { %v10599_v59 = vmax.f32 %v10581_v28, 0.0  ;;  %v10582_v6 = vadd.f32 %v18498_v36, %v10557_v50  ;;  %v13243_v55 = vadd.f32 %v13242_v26, %v13241_v5  ;;  %v13244_v62 = vpop.f32.mrb[234].mxu0 }
 0xa52   : > { %v13245_v17 = vpop.f32.mrb[235].mxu0 }
 0xa53   : > { %v11858_v12 = vpack.c.bf16 %v10599_v59, %v10599_v59  ;;  %v10600_v2 = vmax.f32 %v10582_v6, 0.0  ;;  %v10494_v60 = vadd.f32 %v13243_v55, %v18436_v38  ;;  %v13246_v21 = vadd.f32 %v13245_v17, %v13244_v62 }
 0xa55   : > { %10690 = vst.msk [vmem:[%s18510_s11] sm:$0xf] %vm10689_vm3, %v11858_v12  ;;  %v11859_v45 = vpack.c.bf16 %v10600_v2, %v10600_v2  ;;  %v10558_v1 = vadd.f32 %v10494_v60, %v18359_v46  ;;  %v10497_v3 = vadd.f32 %v13246_v21, %v18439_v53 }
 0xa57   : > { %10691 = vst.msk [vmem:[%s18510_s11 + $0x4] sm:$0xf] %vm10689_vm3, %v11859_v45  ;;  %v10583_v19 = vadd.f32 %v18498_v36, %v10558_v1  ;;  %v10559_v30 = vadd.f32 %v10497_v3, %v18365_v14  ;;  %v13247_v58 = vpop.f32.mrb[236].mxu0 }
 0xa58   : > { %v13248_v23 = vpop.f32.mrb[237].mxu0 }
 0xa59   : > { %v10601_v40 = vmax.f32 %v10583_v19, 0.0  ;;  %v10584_v38 = vadd.f32 %v18498_v36, %v10559_v30  ;;  %v13249_v56 = vadd.f32 %v13248_v23, %v13247_v58  ;;  %v13250_v31 = vpop.f32.mrb[238].mxu0 }
 0xa5a   : > { %v13251_v39 = vpop.f32.mrb[239].mxu0 }
 0xa5b   : > { %v11860_v43 = vpack.c.bf16 %v10601_v40, %v10601_v40  ;;  %v10602_v46 = vmax.f32 %v10584_v38, 0.0  ;;  %v10502_v54 = vadd.f32 %v13249_v56, %v18444_v11  ;;  %v13252_v53 = vadd.f32 %v13251_v39, %v13250_v31 }
 0xa5d   : > { %10692 = vst.msk [vmem:[%s18510_s11 + $0x8] sm:$0xf] %vm10689_vm3, %v11860_v43  ;;  %v11861_v42 = vpack.c.bf16 %v10602_v46, %v10602_v46  ;;  %v10560_v22 = vadd.f32 %v10502_v54, %v18371_v20  ;;  %v10505_v14 = vadd.f32 %v13252_v53, %v18447_v52 }
 0xa5f   : > { %10693 = vst.msk [vmem:[%s18510_s11 + $0xc] sm:$0xf] %vm10689_vm3, %v11861_v42  ;;  %v10585_v9 = vadd.f32 %v18498_v36, %v10560_v22  ;;  %v10561_v32 = vadd.f32 %v10505_v14, %v18375_v0  ;;  %v13253_v16 = vpop.f32.mrb[240].mxu0 }
 0xa60   : > { %v13254_v28 = vpop.f32.mrb[241].mxu0 }
 0xa61   : > { %v10603_v50 = vmax.f32 %v10585_v9, 0.0  ;;  %v10586_v11 = vadd.f32 %v18498_v36, %v10561_v32  ;;  %v13255_v5 = vadd.f32 %v13254_v28, %v13253_v16  ;;  %v13256_v26 = vpop.f32.mrb[242].mxu0 }
 0xa62   : > { %v13257_v59 = vpop.f32.mrb[243].mxu0 }
 0xa63   : > { %v11862_v6 = vpack.c.bf16 %v10603_v50, %v10603_v50  ;;  %v10604_v20 = vmax.f32 %v10586_v11, 0.0  ;;  %v10510_v55 = vadd.f32 %v13255_v5, %v18452_v7  ;;  %v13258_v52 = vadd.f32 %v13257_v59, %v13256_v26 }
 0xa65   : > { %10694 = vst.msk [vmem:[%s18510_s11 + $0x10] sm:$0xf] %vm10689_vm3, %v11862_v6  ;;  %v11863_v62 = vpack.c.bf16 %v10604_v20, %v10604_v20  ;;  %v10562_v17 = vadd.f32 %v10510_v55, %v18379_v18  ;;  %v10513_v0 = vadd.f32 %v13258_v52, %v18455_v49 }
 0xa67   : > { %10695 = vst.msk [vmem:[%s18510_s11 + $0x14] sm:$0xf] %vm10689_vm3, %v11863_v62  ;;  %v10587_v12 = vadd.f32 %v18498_v36, %v10562_v17  ;;  %v10563_v2 = vadd.f32 %v10513_v0, %v18383_v35  ;;  %v13259_v60 = vpop.f32.mrb[244].mxu0 }
 0xa68   : > { %v13260_v21 = vpop.f32.mrb[245].mxu0 }
 0xa69   : > { %v10605_v45 = vmax.f32 %v10587_v12, 0.0  ;;  %v10588_v7 = vadd.f32 %v18498_v36, %v10563_v2  ;;  %v13261_v1 = vadd.f32 %v13260_v21, %v13259_v60  ;;  %v13262_v3 = vpop.f32.mrb[246].mxu0 }
 0xa6a   : > { %v13263_v19 = vpop.f32.mrb[247].mxu0 }
 0xa6b   : > { %v11864_v30 = vpack.c.bf16 %v10605_v45, %v10605_v45  ;;  %v10606_v18 = vmax.f32 %v10588_v7, 0.0  ;;  %v10518_v58 = vadd.f32 %v13261_v1, %v18460_v33  ;;  %v13264_v49 = vadd.f32 %v13263_v19, %v13262_v3 }
 0xa6d   : > { %10696 = vst.msk [vmem:[%s18510_s11 + $0x18] sm:$0xf] %vm10689_vm3, %v11864_v30  ;;  %v11865_v23 = vpack.c.bf16 %v10606_v18, %v10606_v18  ;;  %v10564_v40 = vadd.f32 %v10518_v58, %v18387_v37  ;;  %v10521_v35 = vadd.f32 %v13264_v49, %v18463_v51 }
 0xa6f   : > { %10697 = vst.msk [vmem:[%s18510_s11 + $0x1c] sm:$0xf] %vm10689_vm3, %v11865_v23  ;;  %v10589_v38 = vadd.f32 %v18498_v36, %v10564_v40  ;;  %v10565_v56 = vadd.f32 %v10521_v35, %v18391_v44  ;;  %v13265_v31 = vpop.f32.mrb[248].mxu0 }
 0xa70   : > { %v13266_v39 = vpop.f32.mrb[249].mxu0 }
 0xa71   : > { %v10607_v43 = vmax.f32 %v10589_v38, 0.0  ;;  %v10590_v33 = vadd.f32 %v18498_v36, %v10565_v56  ;;  %v13267_v46 = vadd.f32 %v13266_v39, %v13265_v31  ;;  %v13268_v54 = vpop.f32.mrb[250].mxu0 }
 0xa72   : > { %v13269_v53 = vpop.f32.mrb[251].mxu0 }
 0xa73   : > { %v11866_v42 = vpack.c.bf16 %v10607_v43, %v10607_v43  ;;  %v10608_v37 = vmax.f32 %v10590_v33, 0.0  ;;  %v10526_v22 = vadd.f32 %v13267_v46, %v18468_v29  ;;  %v13270_v51 = vadd.f32 %v13269_v53, %v13268_v54 }
 0xa75   : > { %10698 = vst.msk [vmem:[%s18510_s11 + $0x20] sm:$0xf] %vm10689_vm3, %v11866_v42  ;;  %v11867_v14 = vpack.c.bf16 %v10608_v37, %v10608_v37  ;;  %v10566_v9 = vadd.f32 %v10526_v22, %v18395_v27  ;;  %v10529_v44 = vadd.f32 %v13270_v51, %v18471_v47 }
 0xa77   : > { %10699 = vst.msk [vmem:[%s18510_s11 + $0x24] sm:$0xf] %vm10689_vm3, %v11867_v14  ;;  %v10591_v32 = vadd.f32 %v18498_v36, %v10566_v9  ;;  %v10567_v16 = vadd.f32 %v10529_v44, %v18399_v34  ;;  %v13271_v28 = vpop.f32.mrb[252].mxu0 }
 0xa78   : > { %v13272_v50 = vpop.f32.mrb[253].mxu0 }
 0xa79   : > { %v10609_v11 = vmax.f32 %v10591_v32, 0.0  ;;  %v10592_v29 = vadd.f32 %v18498_v36, %v10567_v16  ;;  %v13273_v5 = vadd.f32 %v13272_v50, %v13271_v28  ;;  %v13274_v26 = vpop.f32.mrb[254].mxu0 }
 0xa7a   : > { %v13275_v59 = vpop.f32.mrb[255].mxu0 }
 0xa7b   : > { %v11868_v6 = vpack.c.bf16 %v10609_v11, %v10609_v11  ;;  %v10610_v27 = vmax.f32 %v10592_v29, 0.0  ;;  %v10534_v20 = vadd.f32 %v13273_v5, %v18476_v15  ;;  %v13276_v47 = vadd.f32 %v13275_v59, %v13274_v26 }
 0xa7d   : > { %10700 = vst.msk [vmem:[%s18510_s11 + $0x28] sm:$0xf] %vm10689_vm3, %v11868_v6  ;;  %v11869_v55 = vpack.c.bf16 %v10610_v27, %v10610_v27  ;;  %v10568_v52 = vadd.f32 %v10534_v20, %v18403_v13  ;;  %v10537_v34 = vadd.f32 %v13276_v47, %v18479_v4 }
 0xa7f   : > { %10701 = vst.msk [vmem:[%s18510_s11 + $0x2c] sm:$0xf] %vm10689_vm3, %v11869_v55  ;;  %v10593_v62 = vadd.f32 %v18498_v36, %v10568_v52  ;;  %v10569_v17 = vadd.f32 %v10537_v34, %v18407_v41  ;;  %v13277_v0 = vpop.f32.mrb[0].mxu0 }
 0xa80   : > { %v13278_v12 = vpop.f32.mrb[1].mxu0 }
 0xa81   : > { %v10611_v2 = vmax.f32 %v10593_v62, 0.0  ;;  %v10594_v15 = vadd.f32 %v18498_v36, %v10569_v17  ;;  %v13279_v60 = vadd.f32 %v13278_v12, %v13277_v0  ;;  %v13280_v21 = vpop.f32.mrb[2].mxu0 }
 0xa82   : > { %v13281_v45 = vpop.f32.mrb[3].mxu0 }
 0xa83   : > { %v11870_v7 = vpack.c.bf16 %v10611_v2, %v10611_v2  ;;  %v10612_v13 = vmax.f32 %v10594_v15, 0.0  ;;  %v10542_v1 = vadd.f32 %v13279_v60, %v18484_v63  ;;  %v13282_v4 = vadd.f32 %v13281_v45, %v13280_v21 }
 0xa85   : > { %10702 = vst.msk [vmem:[%s18510_s11 + $0x30] sm:$0xf] %vm10689_vm3, %v11870_v7  ;;  %v11871_v3 = vpack.c.bf16 %v10612_v13, %v10612_v13  ;;  %v10570_v19 = vadd.f32 %v10542_v1, %v18411_v24  ;;  %v10545_v41 = vadd.f32 %v13282_v4, %v18487_v48 }
 0xa87   : > { %10703 = vst.msk [vmem:[%s18510_s11 + $0x34] sm:$0xf] %vm10689_vm3, %v11871_v3  ;;  %v10595_v30 = vadd.f32 %v18498_v36, %v10570_v19  ;;  %v10571_v18 = vadd.f32 %v10545_v41, %v18415_v61  ;;  %v13283_v58 = vpop.f32.mrb[4].mxu0 }
 0xa88   : > { %v13284_v49 = vpop.f32.mrb[5].mxu0 }
 0xa89   : > { %v10613_v23 = vmax.f32 %v10595_v30, 0.0  ;;  %v10596_v63 = vadd.f32 %v18498_v36, %v10571_v18  ;;  %v13285_v40 = vadd.f32 %v13284_v49, %v13283_v58  ;;  %v13286_v35 = vpop.f32.mrb[6].mxu0 }
 0xa8a   : > { %v13287_v38 = vpop.f32.mrb[7].mxu0 }
 0xa8b   : > { %v11872_v24 = vpack.c.bf16 %v10613_v23, %v10613_v23  ;;  %v10614_v56 = vmax.f32 %v10596_v63, 0.0  ;;  %v10550_v48 = vadd.f32 %v13285_v40, %v18492_v8  ;;  %v13288_v31 = vadd.f32 %v13287_v38, %v13286_v35 }
 0xa8d   : > { %10704 = vst.msk [vmem:[%s18510_s11 + $0x38] sm:$0xf] %vm10689_vm3, %v11872_v24  ;;  %v11873_v39 = vpack.c.bf16 %v10614_v56, %v10614_v56  ;;  %v10572_v61 = vadd.f32 %v10550_v48, %v18419_v10  ;;  %v10553_v43 = vadd.f32 %v13288_v31, %v18495_v25 }
 0xa8f   : > { %10705 = vst.msk [vmem:[%s18510_s11 + $0x3c] sm:$0xf] %vm10689_vm3, %v11873_v39  ;;  %v10597_v33 = vadd.f32 %v18498_v36, %v10572_v61  ;;  %v10573_v46 = vadd.f32 %v10553_v43, %v18423_v57 }
 0xa91   : > { %v10615_v54 = vmax.f32 %v10597_v33, 0.0  ;;  %v10598_v53 = vadd.f32 %v18498_v36, %v10573_v46 }
 0xa93   : > { %v11874_v42 = vpack.c.bf16 %v10615_v54, %v10615_v54  ;;  %v10616_v37 = vmax.f32 %v10598_v53, 0.0 }
 0xa95   : > { %10706 = vst.msk [vmem:[%s18510_s11 + $0x40] sm:$0xf] %vm10689_vm3, %v11874_v42  ;;  %v11875_v8 = vpack.c.bf16 %v10616_v37, %v10616_v37 }
 0xa97   : > { %10707 = vst.msk [vmem:[%s18510_s11 + $0x44] sm:$0xf] %vm10689_vm3, %v11875_v8 }
 0xa98 PF: > { %s23_s30 = sadd.s32 1, %s14822_s30  }
 0xa99   : > { %p20_p11 = scmp.ge.s32.totalorder %s23_s30, 4  }
 0xa9b   :  { %22 = sbr.rel (!%p20_p11) target bundleno = 4 (0x4), region = 124 }
 0xaa2   :  { %10729 = vsyncpa [#allocation7], 1 }
 0xaa3   :  { %10731 = vsyncpa [#allocation7 + $0x1], 1 }
 0xaa4   :  { %10732 = vsyncpa [#allocation9], 1 }
 0xaa5   :  { %10733 = vsyncpa [#allocation12], 1 }
 0xaa6   :  { %10734 = vsyncpa [#allocation15], 1 }

</bundles_post_ra>
